<compile_context>
chip_gen: v7x
topology: tpu7x:2x2x1
jax: 0.10.0
libtpu: 0.0.40
codegen_flags: <defaults>
</compile_context>

<pallas_src>
import jax
import jax.numpy as jnp
from jax.experimental import pallas as pl
from jax.experimental.pallas import tpu as pltpu


ACT_DTYPE = jnp.bfloat16


def _vmem_limit_bytes():
    # ~3/4 of physical VMEM: ~96 MiB on v5e/v6e (128 MiB phys), ~48 MiB on v7x.
    try:
        cap = pltpu.get_tpu_info().vmem_capacity_bytes
        return int(min(cap * 3 // 4, 96 * 1024 * 1024))
    except Exception:
        return 32 * 1024 * 1024


# ---------------------------------------------------------------------------
# Fused generator kernel: initial conv -> num_rrdb RRDB blocks -> final conv
# ---------------------------------------------------------------------------

def _make_generator_kernel(H, W, C, num_blocks, slope):
    HW = H * W
    K3 = 3 * C
    f32 = jnp.float32

    def lrelu(v):
        return jnp.maximum(v, slope * v)

    def pad_hw(a):
        # Zero-pad an (H, W, C) value by 1 on each side of H and W (registers).
        zr = jnp.zeros((1, W, C), a.dtype)
        a = jnp.concatenate([zr, a, zr], axis=0)
        zc = jnp.zeros((H + 2, 1, C), a.dtype)
        return jnp.concatenate([zc, a, zc], axis=1)

    def stencil9(ap, w_ref):
        # ap: (H+2, W+2, C); w_ref: (3, 3, C). Depthwise 3x3 stencil, f32 acc.
        acc = jnp.zeros((H, W, C), f32)
        for ky in range(3):
            for kx in range(3):
                acc = acc + (ap[ky:ky + H, kx:kx + W, :].astype(f32)
                             * w_ref[ky, kx].astype(f32).reshape(1, 1, C))
        return acc

    def conv3x3_stacked(act, w_slab, bias):
        # act: (H, W, C) bf16.  w_slab: (3C, 3C) bf16 with
        #   w_slab[kx*C + ci, ky*C + co] = w[ky, kx, ci, co]   (HWIO weights).
        # One MXU matmul; ky=0/2 output stripes are row-shifted into place.
        zc = jnp.zeros((H, 1, C), act.dtype)
        left = jnp.concatenate([zc, act[:, :W - 1, :]], axis=1)    # kx = 0
        right = jnp.concatenate([act[:, 1:, :], zc], axis=1)       # kx = 2
        lhs = jnp.concatenate([left, act, right], axis=2).reshape(HW, K3)
        s = jnp.dot(lhs, w_slab, preferred_element_type=f32).reshape(H, W, K3)
        s_top, s_mid, s_bot = s[..., :C], s[..., C:2 * C], s[..., 2 * C:]
        zr = jnp.zeros((1, W, C), f32)
        out = s_mid                                                 # ky = 1
        out = out + jnp.concatenate([zr, s_top[:H - 1]], axis=0)   # ky = 0
        out = out + jnp.concatenate([s_bot[1:], zr], axis=0)       # ky = 2
        return out + bias

    def kernel(x_ref, w0_ref, b0_ref, wt_ref, bt_ref, wf_ref, fb_ref,
               o_ref, act_ref):
        j = pl.program_id(1)

        # ---- prologue (j == 0): initial conv, Cin=1 -> C, no activation ----
        @pl.when(j == 0)
        def _():
            x2d = x_ref[0].astype(f32)                              # (H, W)
            xc = jnp.broadcast_to(x2d[..., None], (H, W, C))
            feat = stencil9(pad_hw(xc), w0_ref) + b0_ref[...].reshape(1, 1, C)
            act_ref[...] = feat.astype(act_ref.dtype)

        # ---- RRDB block j: conv1+lrelu -> conv2+lrelu -> conv3 + residual ----
        x = act_ref[...]                                            # (H, W, C) bf16
        h = lrelu(conv3x3_stacked(x, wt_ref[0, 0],
                                  bt_ref[0, 0].reshape(1, 1, C)))
        h = lrelu(conv3x3_stacked(h.astype(x.dtype), wt_ref[0, 1],
                                  bt_ref[0, 1].reshape(1, 1, C)))
        h = conv3x3_stacked(h.astype(x.dtype), wt_ref[0, 2],
                            bt_ref[0, 2].reshape(1, 1, C))
        act_ref[...] = (x.astype(f32) + h).astype(act_ref.dtype)

        # ---- epilogue (j == last): final conv, C -> 1, lane reduction ----
        @pl.when(j == num_blocks - 1)
        def _():
            a = act_ref[...].astype(f32)
            acc = stencil9(pad_hw(a), wf_ref)                       # (H, W, C)
            o_ref[0] = jnp.sum(acc, axis=-1) + fb_ref[...]          # (H, W)

    return kernel


# ---------------------------------------------------------------------------
# Parameters: init (deterministic synthetic) + one-time kernel-layout repack
# ---------------------------------------------------------------------------

def init_generator_params(key, in_channels=1, num_rrdb=4, width=64):
    def conv_params(k, cin, cout):
        kw, kb = jax.random.split(k)
        fan_in = cin * 9
        w = jax.random.normal(kw, (3, 3, cin, cout), jnp.float32) * (2.0 / fan_in) ** 0.5
        b = jax.random.normal(kb, (cout,), jnp.float32) * 0.01
        return w, b

    keys = jax.random.split(key, 2 + 3 * num_rrdb)
    params = {"initial": conv_params(keys[0], in_channels, width),
              "final": conv_params(keys[1], width, in_channels),
              "rrdb": []}
    for i in range(num_rrdb):
        params["rrdb"].append({
            "conv1": conv_params(keys[2 + 3 * i], width, width),
            "conv2": conv_params(keys[3 + 3 * i], width, width),
            "conv3": conv_params(keys[4 + 3 * i], width, width),
        })
    return params


def prepare_params(params):
    """One-time repack of HWIO conv weights into kernel-ready layouts."""
    w0, b0 = params["initial"]        # (3,3,1,C), (C,)
    wf, bf = params["final"]          # (3,3,C,1), (1,)
    C = w0.shape[-1]

    def stack_block(blk):
        slabs, biases = [], []
        for name in ("conv1", "conv2", "conv3"):
            w, b = blk[name]          # (3,3,C,C) = (ky,kx,ci,co), (C,)
            # slab[kx*C + ci, ky*C + co] = w[ky, kx, ci, co]
            slabs.append(jnp.transpose(w, (1, 2, 0, 3)).reshape(3 * C, 3 * C))
            biases.append(b)
        return jnp.stack(slabs), jnp.stack(biases)

    ws, bs = zip(*(stack_block(blk) for blk in params["rrdb"]))
    return {
        "w_trunk": jnp.stack(ws).astype(ACT_DTYPE),     # (B, 3, 3C, 3C) bf16
        "b_trunk": jnp.stack(bs).astype(jnp.float32),   # (B, 3, C)
        "w0": w0.reshape(3, 3, C).astype(jnp.float32),  # Cin = 1 squeezed
        "b0": b0.reshape(1, C).astype(jnp.float32),
        "wf": wf.reshape(3, 3, C).astype(jnp.float32),  # Cout = 1 squeezed
        "fb": bf.reshape(1, 1).astype(jnp.float32),
    }


# ---------------------------------------------------------------------------
# Forward pass: ONE pallas_call for the whole generator
# ---------------------------------------------------------------------------

def generator_forward(prep, x_nchw, *, slope=0.2):
    """Matches Generator.forward. x_nchw: (N, 1, H, W) float32 (NCHW)."""
    N, cin, H, W = x_nchw.shape
    assert cin == 1, "edge-layer kernels assume in_channels == 1 (module default)"
    B, _, K3, _ = prep["w_trunk"].shape
    C = K3 // 3

    x = x_nchw[:, 0, :, :]                                   # (N, H, W): lane-dense HBM I/O

    band = pl.BlockSpec((1, H, W), lambda n, j: (n, 0, 0))
    out = pl.pallas_call(
        _make_generator_kernel(H, W, C, B, slope),
        out_shape=jax.ShapeDtypeStruct((N, H, W), jnp.float32),
        grid=(N, B),
        in_specs=[
            band,                                                     # x (fetched once per n)
            pl.BlockSpec((3, 3, C), lambda n, j: (0, 0, 0)),          # initial conv weights
            pl.BlockSpec((1, C), lambda n, j: (0, 0)),                # initial conv bias
            pl.BlockSpec((1, 3, K3, K3), lambda n, j: (j, 0, 0, 0)),  # per-block stacked weights
            pl.BlockSpec((1, 3, C), lambda n, j: (j, 0, 0)),          # per-block biases
            pl.BlockSpec((3, 3, C), lambda n, j: (0, 0, 0)),          # final conv weights
            pl.BlockSpec((1, 1), lambda n, j: (0, 0)),                # final conv bias
        ],
        out_specs=band,
        scratch_shapes=[pltpu.VMEM((H, W, C), ACT_DTYPE)],            # resident trunk activation
        compiler_params=pltpu.CompilerParams(
            dimension_semantics=("parallel", "arbitrary"),
            vmem_limit_bytes=_vmem_limit_bytes()),
    )(x, prep["w0"], prep["b0"], prep["w_trunk"], prep["b_trunk"],
      prep["wf"], prep["fb"])

    return out[:, None, :, :]                                 # (N, 1, H, W)


# ---------------------------------------------------------------------------
# Pure-JAX reference (f32 activations; trunk weights bf16-rounded like the MXU)
# ---------------------------------------------------------------------------

def _conv2d_nhwc(x, w, b):
    y = jax.lax.conv_general_dilated(
        x, w, window_strides=(1, 1), padding="SAME",
        dimension_numbers=("NHWC", "HWIO", "NHWC"))
    return y + b.reshape(1, 1, 1, -1)


def reference_forward(params, x_nchw, *, slope=0.2):
    bf = lambda w: w.astype(jnp.bfloat16).astype(jnp.float32)
    h = _conv2d_nhwc(jnp.transpose(x_nchw, (0, 2, 3, 1)).astype(jnp.float32),
                     params["initial"][0], params["initial"][1])
    for blk in params["rrdb"]:
        t = jax.nn.leaky_relu(_conv2d_nhwc(h, bf(blk["conv1"][0]), blk["conv1"][1]), slope)
        t = jax.nn.leaky_relu(_conv2d_nhwc(t, bf(blk["conv2"][0]), blk["conv2"][1]), slope)
        t = _conv2d_nhwc(t, bf(blk["conv3"][0]), blk["conv3"][1])
        h = h + t
    y = _conv2d_nhwc(h, params["final"][0], params["final"][1])
    return jnp.transpose(y, (0, 3, 1, 2))


if __name__ == "__main__":
    key = jax.random.PRNGKey(0)
    k_params, k_x = jax.random.split(key)

    # Small demo config (module default is num_rrdb=23; 4 keeps the demo fast --
    # the fused kernel and grid structure are identical, just a longer block axis).
    NUM_RRDB = 4
    params = init_generator_params(k_params, in_channels=1, num_rrdb=NUM_RRDB)
    prep = prepare_params(params)

    x = jax.random.normal(k_x, (2, 1, 16, 16), jnp.float32)   # NCHW, like PyTorch

    fwd = jax.jit(generator_forward)
    y = fwd(prep, x)
    jax.block_until_ready(y)

    assert y.shape == x.shape, (y.shape, x.shape)
    assert bool(jnp.isfinite(y).all())

    # Correctness vs the pure-JAX f32 reference (bf16 activation drift allowed).
    y_ref = reference_forward(params, x)
    err = float(jnp.max(jnp.abs(y.astype(jnp.float32) - y_ref)))
    scale = float(jnp.max(jnp.abs(y_ref)))
    assert err <= 0.08 * scale + 0.1, ("mismatch vs reference", err, scale)

    print("KERNEL_OK")
</pallas_src>

<mosaic_0001>
module attributes {stable_mosaic.version = 11 : i64} {
  func.func @kernel(%arg0: i32, %arg1: i32, %arg2: memref<1x16x16xf32, #tpu.memory_space<vmem>>, %arg3: memref<3x3x64xf32, #tpu.memory_space<vmem>>, %arg4: memref<1x64xf32, #tpu.memory_space<vmem>>, %arg5: memref<1x3x192x192xbf16, #tpu.memory_space<vmem>>, %arg6: memref<1x3x64xf32, #tpu.memory_space<vmem>>, %arg7: memref<3x3x64xf32, #tpu.memory_space<vmem>>, %arg8: memref<1x1xf32, #tpu.memory_space<vmem>>, %arg9: memref<1x16x16xf32, #tpu.memory_space<vmem>>, %arg10: memref<16x16x64xbf16, #tpu.memory_space<vmem>>) attributes {dimension_semantics = [#tpu.dimension_semantics<parallel>, #tpu.dimension_semantics<arbitrary>], iteration_bounds = array<i64: 2, 4>, scalar_prefetch = 0 : i64, scratch_operands = 1 : i64, tpu.core_type = #tpu.core_type<tc>, window_params = [{transform_indices = @transform_0, window_bounds = array<i64: 1, 16, 16>}, {pipeline_mode = #tpu.pipeline_mode<synchronous>, transform_indices = @transform_1, window_bounds = array<i64: 3, 3, 64>}, {pipeline_mode = #tpu.pipeline_mode<synchronous>, transform_indices = @transform_2, window_bounds = array<i64: 1, 64>}, {transform_indices = @transform_3, window_bounds = array<i64: 1, 3, 192, 192>}, {transform_indices = @transform_4, window_bounds = array<i64: 1, 3, 64>}, {pipeline_mode = #tpu.pipeline_mode<synchronous>, transform_indices = @transform_5, window_bounds = array<i64: 3, 3, 64>}, {pipeline_mode = #tpu.pipeline_mode<synchronous>, transform_indices = @transform_6, window_bounds = array<i64: 1, 1>}, {transform_indices = @transform_7, window_bounds = array<i64: 1, 16, 16>}]} {
    %c0_i32 = arith.constant 0 : i32
    %0 = arith.cmpi eq, %arg1, %c0_i32 : i32
    %1 = arith.extui %0 : i1 to i32
    %c0_i32_0 = arith.constant 0 : i32
    %2 = arith.cmpi ne, %1, %c0_i32_0 : i32
    scf.if %2 {
      %c0_36 = arith.constant 0 : index
      %c0_37 = arith.constant 0 : index
      %c0_38 = arith.constant 0 : index
      %97 = vector.load %arg2[%c0_36, %c0_37, %c0_38] : memref<1x16x16xf32, #tpu.memory_space<vmem>>, vector<1x16x16xf32>
      %98 = vector.shape_cast %97 : vector<1x16x16xf32> to vector<16x16xf32>
      %99 = vector.shape_cast %98 : vector<16x16xf32> to vector<16x16x1xf32>
      %100 = vector.shape_cast %99 : vector<16x16x1xf32> to vector<16x16x1xf32>
      %101 = vector.broadcast %100 : vector<16x16x1xf32> to vector<16x16x64xf32>
      %cst_39 = arith.constant 0.000000e+00 : f32
      %102 = vector.broadcast %cst_39 : f32 to vector<1x16x64xf32>
      %103 = tpu.concatenate %102, %101, %102 in 0 : vector<1x16x64xf32>, vector<16x16x64xf32>, vector<1x16x64xf32> -> vector<18x16x64xf32>
      %cst_40 = arith.constant 0.000000e+00 : f32
      %104 = vector.broadcast %cst_40 : f32 to vector<18x1x64xf32>
      %105 = tpu.concatenate %104, %103, %104 in 1 : vector<18x1x64xf32>, vector<18x16x64xf32>, vector<18x1x64xf32> -> vector<18x18x64xf32>
      %cst_41 = arith.constant 0.000000e+00 : f32
      %106 = vector.broadcast %cst_41 : f32 to vector<16x16x64xf32>
      %107 = vector.extract_strided_slice %105 {offsets = [0, 0, 0], sizes = [16, 16, 64], strides = [1, 1, 1]} : vector<18x18x64xf32> to vector<16x16x64xf32>
      %c0_42 = arith.constant 0 : index
      %c0_43 = arith.constant 0 : index
      %c0_44 = arith.constant 0 : index
      %108 = vector.load %arg3[%c0_42, %c0_43, %c0_44] : memref<3x3x64xf32, #tpu.memory_space<vmem>>, vector<1x1x64xf32>
      %109 = vector.shape_cast %108 : vector<1x1x64xf32> to vector<64xf32>
      %110 = vector.shape_cast %109 : vector<64xf32> to vector<1x1x64xf32>
      %111 = vector.broadcast %110 : vector<1x1x64xf32> to vector<16x16x64xf32>
      %112 = arith.mulf %107, %111 : vector<16x16x64xf32>
      %113 = arith.addf %106, %112 : vector<16x16x64xf32>
      %114 = vector.extract_strided_slice %105 {offsets = [0, 1, 0], sizes = [16, 16, 64], strides = [1, 1, 1]} : vector<18x18x64xf32> to vector<16x16x64xf32>
      %c0_45 = arith.constant 0 : index
      %c1_46 = arith.constant 1 : index
      %c0_47 = arith.constant 0 : index
      %115 = vector.load %arg3[%c0_45, %c1_46, %c0_47] : memref<3x3x64xf32, #tpu.memory_space<vmem>>, vector<1x1x64xf32>
      %116 = vector.shape_cast %115 : vector<1x1x64xf32> to vector<64xf32>
      %117 = vector.shape_cast %116 : vector<64xf32> to vector<1x1x64xf32>
      %118 = vector.broadcast %117 : vector<1x1x64xf32> to vector<16x16x64xf32>
      %119 = arith.mulf %114, %118 : vector<16x16x64xf32>
      %120 = arith.addf %113, %119 : vector<16x16x64xf32>
      %121 = vector.extract_strided_slice %105 {offsets = [0, 2, 0], sizes = [16, 16, 64], strides = [1, 1, 1]} : vector<18x18x64xf32> to vector<16x16x64xf32>
      %c0_48 = arith.constant 0 : index
      %c2_49 = arith.constant 2 : index
      %c0_50 = arith.constant 0 : index
      %122 = vector.load %arg3[%c0_48, %c2_49, %c0_50] : memref<3x3x64xf32, #tpu.memory_space<vmem>>, vector<1x1x64xf32>
      %123 = vector.shape_cast %122 : vector<1x1x64xf32> to vector<64xf32>
      %124 = vector.shape_cast %123 : vector<64xf32> to vector<1x1x64xf32>
      %125 = vector.broadcast %124 : vector<1x1x64xf32> to vector<16x16x64xf32>
      %126 = arith.mulf %121, %125 : vector<16x16x64xf32>
      %127 = arith.addf %120, %126 : vector<16x16x64xf32>
      %128 = vector.extract_strided_slice %105 {offsets = [1, 0, 0], sizes = [16, 16, 64], strides = [1, 1, 1]} : vector<18x18x64xf32> to vector<16x16x64xf32>
      %c1_51 = arith.constant 1 : index
      %c0_52 = arith.constant 0 : index
      %c0_53 = arith.constant 0 : index
      %129 = vector.load %arg3[%c1_51, %c0_52, %c0_53] : memref<3x3x64xf32, #tpu.memory_space<vmem>>, vector<1x1x64xf32>
      %130 = vector.shape_cast %129 : vector<1x1x64xf32> to vector<64xf32>
      %131 = vector.shape_cast %130 : vector<64xf32> to vector<1x1x64xf32>
      %132 = vector.broadcast %131 : vector<1x1x64xf32> to vector<16x16x64xf32>
      %133 = arith.mulf %128, %132 : vector<16x16x64xf32>
      %134 = arith.addf %127, %133 : vector<16x16x64xf32>
      %135 = vector.extract_strided_slice %105 {offsets = [1, 1, 0], sizes = [16, 16, 64], strides = [1, 1, 1]} : vector<18x18x64xf32> to vector<16x16x64xf32>
      %c1_54 = arith.constant 1 : index
      %c1_55 = arith.constant 1 : index
      %c0_56 = arith.constant 0 : index
      %136 = vector.load %arg3[%c1_54, %c1_55, %c0_56] : memref<3x3x64xf32, #tpu.memory_space<vmem>>, vector<1x1x64xf32>
      %137 = vector.shape_cast %136 : vector<1x1x64xf32> to vector<64xf32>
      %138 = vector.shape_cast %137 : vector<64xf32> to vector<1x1x64xf32>
      %139 = vector.broadcast %138 : vector<1x1x64xf32> to vector<16x16x64xf32>
      %140 = arith.mulf %135, %139 : vector<16x16x64xf32>
      %141 = arith.addf %134, %140 : vector<16x16x64xf32>
      %142 = vector.extract_strided_slice %105 {offsets = [1, 2, 0], sizes = [16, 16, 64], strides = [1, 1, 1]} : vector<18x18x64xf32> to vector<16x16x64xf32>
      %c1_57 = arith.constant 1 : index
      %c2_58 = arith.constant 2 : index
      %c0_59 = arith.constant 0 : index
      %143 = vector.load %arg3[%c1_57, %c2_58, %c0_59] : memref<3x3x64xf32, #tpu.memory_space<vmem>>, vector<1x1x64xf32>
      %144 = vector.shape_cast %143 : vector<1x1x64xf32> to vector<64xf32>
      %145 = vector.shape_cast %144 : vector<64xf32> to vector<1x1x64xf32>
      %146 = vector.broadcast %145 : vector<1x1x64xf32> to vector<16x16x64xf32>
      %147 = arith.mulf %142, %146 : vector<16x16x64xf32>
      %148 = arith.addf %141, %147 : vector<16x16x64xf32>
      %149 = vector.extract_strided_slice %105 {offsets = [2, 0, 0], sizes = [16, 16, 64], strides = [1, 1, 1]} : vector<18x18x64xf32> to vector<16x16x64xf32>
      %c2_60 = arith.constant 2 : index
      %c0_61 = arith.constant 0 : index
      %c0_62 = arith.constant 0 : index
      %150 = vector.load %arg3[%c2_60, %c0_61, %c0_62] : memref<3x3x64xf32, #tpu.memory_space<vmem>>, vector<1x1x64xf32>
      %151 = vector.shape_cast %150 : vector<1x1x64xf32> to vector<64xf32>
      %152 = vector.shape_cast %151 : vector<64xf32> to vector<1x1x64xf32>
      %153 = vector.broadcast %152 : vector<1x1x64xf32> to vector<16x16x64xf32>
      %154 = arith.mulf %149, %153 : vector<16x16x64xf32>
      %155 = arith.addf %148, %154 : vector<16x16x64xf32>
      %156 = vector.extract_strided_slice %105 {offsets = [2, 1, 0], sizes = [16, 16, 64], strides = [1, 1, 1]} : vector<18x18x64xf32> to vector<16x16x64xf32>
      %c2_63 = arith.constant 2 : index
      %c1_64 = arith.constant 1 : index
      %c0_65 = arith.constant 0 : index
      %157 = vector.load %arg3[%c2_63, %c1_64, %c0_65] : memref<3x3x64xf32, #tpu.memory_space<vmem>>, vector<1x1x64xf32>
      %158 = vector.shape_cast %157 : vector<1x1x64xf32> to vector<64xf32>
      %159 = vector.shape_cast %158 : vector<64xf32> to vector<1x1x64xf32>
      %160 = vector.broadcast %159 : vector<1x1x64xf32> to vector<16x16x64xf32>
      %161 = arith.mulf %156, %160 : vector<16x16x64xf32>
      %162 = arith.addf %155, %161 : vector<16x16x64xf32>
      %163 = vector.extract_strided_slice %105 {offsets = [2, 2, 0], sizes = [16, 16, 64], strides = [1, 1, 1]} : vector<18x18x64xf32> to vector<16x16x64xf32>
      %c2_66 = arith.constant 2 : index
      %c2_67 = arith.constant 2 : index
      %c0_68 = arith.constant 0 : index
      %164 = vector.load %arg3[%c2_66, %c2_67, %c0_68] : memref<3x3x64xf32, #tpu.memory_space<vmem>>, vector<1x1x64xf32>
      %165 = vector.shape_cast %164 : vector<1x1x64xf32> to vector<64xf32>
      %166 = vector.shape_cast %165 : vector<64xf32> to vector<1x1x64xf32>
      %167 = vector.broadcast %166 : vector<1x1x64xf32> to vector<16x16x64xf32>
      %168 = arith.mulf %163, %167 : vector<16x16x64xf32>
      %169 = arith.addf %162, %168 : vector<16x16x64xf32>
      %c0_69 = arith.constant 0 : index
      %c0_70 = arith.constant 0 : index
      %170 = vector.load %arg4[%c0_69, %c0_70] : memref<1x64xf32, #tpu.memory_space<vmem>>, vector<1x64xf32>
      %171 = vector.shape_cast %170 : vector<1x64xf32> to vector<1x1x64xf32>
      %172 = vector.broadcast %171 : vector<1x1x64xf32> to vector<16x16x64xf32>
      %173 = arith.addf %169, %172 : vector<16x16x64xf32>
      %174 = arith.truncf %173 : vector<16x16x64xf32> to vector<16x16x64xbf16>
      %c0_71 = arith.constant 0 : index
      %c0_72 = arith.constant 0 : index
      %c0_73 = arith.constant 0 : index
      %175 = vector.load %arg10[%c0_71, %c0_72, %c0_73] : memref<16x16x64xbf16, #tpu.memory_space<vmem>>, vector<16x16x64xbf16>
      tpu.vector_store %arg10[%c0_71, %c0_72, %c0_73], %174 {strides = array<i32>} : memref<16x16x64xbf16, #tpu.memory_space<vmem>>, vector<16x16x64xbf16>,
    } else {
    }
    %c0 = arith.constant 0 : index
    %c0_1 = arith.constant 0 : index
    %c0_2 = arith.constant 0 : index
    %3 = vector.load %arg10[%c0, %c0_1, %c0_2] : memref<16x16x64xbf16, #tpu.memory_space<vmem>>, vector<16x16x64xbf16>
    %c0_3 = arith.constant 0 : index
    %c0_4 = arith.constant 0 : index
    %c0_5 = arith.constant 0 : index
    %c0_6 = arith.constant 0 : index
    %4 = vector.load %arg5[%c0_3, %c0_4, %c0_5, %c0_6] : memref<1x3x192x192xbf16, #tpu.memory_space<vmem>>, vector<1x1x192x192xbf16>
    %5 = vector.shape_cast %4 : vector<1x1x192x192xbf16> to vector<192x192xbf16>
    %c0_7 = arith.constant 0 : index
    %c0_8 = arith.constant 0 : index
    %c0_9 = arith.constant 0 : index
    %6 = vector.load %arg6[%c0_7, %c0_8, %c0_9] : memref<1x3x64xf32, #tpu.memory_space<vmem>>, vector<1x1x64xf32>
    %7 = vector.shape_cast %6 : vector<1x1x64xf32> to vector<64xf32>
    %8 = vector.shape_cast %7 : vector<64xf32> to vector<1x1x64xf32>
    %cst = arith.constant 0.000000e+00 : bf16
    %9 = vector.broadcast %cst : bf16 to vector<16x1x64xbf16>
    %10 = vector.extract_strided_slice %3 {offsets = [0, 0, 0], sizes = [16, 15, 64], strides = [1, 1, 1]} : vector<16x16x64xbf16> to vector<16x15x64xbf16>
    %11 = tpu.concatenate %9, %10 in 1 : vector<16x1x64xbf16>, vector<16x15x64xbf16> -> vector<16x16x64xbf16>
    %12 = vector.extract_strided_slice %3 {offsets = [0, 1, 0], sizes = [16, 15, 64], strides = [1, 1, 1]} : vector<16x16x64xbf16> to vector<16x15x64xbf16>
    %13 = tpu.concatenate %12, %9 in 1 : vector<16x15x64xbf16>, vector<16x1x64xbf16> -> vector<16x16x64xbf16>
    %14 = tpu.concatenate %11, %3, %13 in 2 : vector<16x16x64xbf16>, vector<16x16x64xbf16>, vector<16x16x64xbf16> -> vector<16x16x192xbf16>
    %15 = vector.shape_cast %14 : vector<16x16x192xbf16> to vector<256x192xbf16>
    %cst_10 = arith.constant dense<0.000000e+00> : vector<256x192xf32>
    %16 = tpu.matmul %15, %5, %cst_10 {dimension_numbers = #tpu.dot_dimension_numbers<[1], [0], [0], [1], [0, 0, 1, 1], [], []>} : vector<256x192xbf16>, vector<192x192xbf16>, vector<256x192xf32> -> vector<256x192xf32>
    %17 = vector.shape_cast %16 : vector<256x192xf32> to vector<16x16x192xf32>
    %18 = vector.extract_strided_slice %17 {offsets = [0, 0, 0], sizes = [16, 16, 64], strides = [1, 1, 1]} : vector<16x16x192xf32> to vector<16x16x64xf32>
    %19 = vector.extract_strided_slice %17 {offsets = [0, 0, 64], sizes = [16, 16, 64], strides = [1, 1, 1]} : vector<16x16x192xf32> to vector<16x16x64xf32>
    %20 = vector.extract_strided_slice %17 {offsets = [0, 0, 128], sizes = [16, 16, 64], strides = [1, 1, 1]} : vector<16x16x192xf32> to vector<16x16x64xf32>
    %cst_11 = arith.constant 0.000000e+00 : f32
    %21 = vector.broadcast %cst_11 : f32 to vector<1x16x64xf32>
    %22 = vector.extract_strided_slice %18 {offsets = [0, 0, 0], sizes = [15, 16, 64], strides = [1, 1, 1]} : vector<16x16x64xf32> to vector<15x16x64xf32>
    %23 = tpu.concatenate %21, %22 in 0 : vector<1x16x64xf32>, vector<15x16x64xf32> -> vector<16x16x64xf32>
    %24 = arith.addf %19, %23 : vector<16x16x64xf32>
    %25 = vector.extract_strided_slice %20 {offsets = [1, 0, 0], sizes = [15, 16, 64], strides = [1, 1, 1]} : vector<16x16x64xf32> to vector<15x16x64xf32>
    %26 = tpu.concatenate %25, %21 in 0 : vector<15x16x64xf32>, vector<1x16x64xf32> -> vector<16x16x64xf32>
    %27 = arith.addf %24, %26 : vector<16x16x64xf32>
    %28 = vector.broadcast %8 : vector<1x1x64xf32> to vector<16x16x64xf32>
    %29 = arith.addf %27, %28 : vector<16x16x64xf32>
    %cst_12 = arith.constant 2.000000e-01 : f32
    %30 = vector.broadcast %cst_12 : f32 to vector<16x16x64xf32>
    %31 = arith.mulf %30, %29 : vector<16x16x64xf32>
    %32 = arith.maximumf %29, %31 : vector<16x16x64xf32>
    %33 = arith.truncf %32 : vector<16x16x64xf32> to vector<16x16x64xbf16>
    %c0_13 = arith.constant 0 : index
    %c1 = arith.constant 1 : index
    %c0_14 = arith.constant 0 : index
    %c0_15 = arith.constant 0 : index
    %34 = vector.load %arg5[%c0_13, %c1, %c0_14, %c0_15] : memref<1x3x192x192xbf16, #tpu.memory_space<vmem>>, vector<1x1x192x192xbf16>
    %35 = vector.shape_cast %34 : vector<1x1x192x192xbf16> to vector<192x192xbf16>
    %c0_16 = arith.constant 0 : index
    %c1_17 = arith.constant 1 : index
    %c0_18 = arith.constant 0 : index
    %36 = vector.load %arg6[%c0_16, %c1_17, %c0_18] : memref<1x3x64xf32, #tpu.memory_space<vmem>>, vector<1x1x64xf32>
    %37 = vector.shape_cast %36 : vector<1x1x64xf32> to vector<64xf32>
    %38 = vector.shape_cast %37 : vector<64xf32> to vector<1x1x64xf32>
    %cst_19 = arith.constant 0.000000e+00 : bf16
    %39 = vector.broadcast %cst_19 : bf16 to vector<16x1x64xbf16>
    %40 = vector.extract_strided_slice %33 {offsets = [0, 0, 0], sizes = [16, 15, 64], strides = [1, 1, 1]} : vector<16x16x64xbf16> to vector<16x15x64xbf16>
    %41 = tpu.concatenate %39, %40 in 1 : vector<16x1x64xbf16>, vector<16x15x64xbf16> -> vector<16x16x64xbf16>
    %42 = vector.extract_strided_slice %33 {offsets = [0, 1, 0], sizes = [16, 15, 64], strides = [1, 1, 1]} : vector<16x16x64xbf16> to vector<16x15x64xbf16>
    %43 = tpu.concatenate %42, %39 in 1 : vector<16x15x64xbf16>, vector<16x1x64xbf16> -> vector<16x16x64xbf16>
    %44 = tpu.concatenate %41, %33, %43 in 2 : vector<16x16x64xbf16>, vector<16x16x64xbf16>, vector<16x16x64xbf16> -> vector<16x16x192xbf16>
    %45 = vector.shape_cast %44 : vector<16x16x192xbf16> to vector<256x192xbf16>
    %cst_20 = arith.constant dense<0.000000e+00> : vector<256x192xf32>
    %46 = tpu.matmul %45, %35, %cst_20 {dimension_numbers = #tpu.dot_dimension_numbers<[1], [0], [0], [1], [0, 0, 1, 1], [], []>} : vector<256x192xbf16>, vector<192x192xbf16>, vector<256x192xf32> -> vector<256x192xf32>
    %47 = vector.shape_cast %46 : vector<256x192xf32> to vector<16x16x192xf32>
    %48 = vector.extract_strided_slice %47 {offsets = [0, 0, 0], sizes = [16, 16, 64], strides = [1, 1, 1]} : vector<16x16x192xf32> to vector<16x16x64xf32>
    %49 = vector.extract_strided_slice %47 {offsets = [0, 0, 64], sizes = [16, 16, 64], strides = [1, 1, 1]} : vector<16x16x192xf32> to vector<16x16x64xf32>
    %50 = vector.extract_strided_slice %47 {offsets = [0, 0, 128], sizes = [16, 16, 64], strides = [1, 1, 1]} : vector<16x16x192xf32> to vector<16x16x64xf32>
    %cst_21 = arith.constant 0.000000e+00 : f32
    %51 = vector.broadcast %cst_21 : f32 to vector<1x16x64xf32>
    %52 = vector.extract_strided_slice %48 {offsets = [0, 0, 0], sizes = [15, 16, 64], strides = [1, 1, 1]} : vector<16x16x64xf32> to vector<15x16x64xf32>
    %53 = tpu.concatenate %51, %52 in 0 : vector<1x16x64xf32>, vector<15x16x64xf32> -> vector<16x16x64xf32>
    %54 = arith.addf %49, %53 : vector<16x16x64xf32>
    %55 = vector.extract_strided_slice %50 {offsets = [1, 0, 0], sizes = [15, 16, 64], strides = [1, 1, 1]} : vector<16x16x64xf32> to vector<15x16x64xf32>
    %56 = tpu.concatenate %55, %51 in 0 : vector<15x16x64xf32>, vector<1x16x64xf32> -> vector<16x16x64xf32>
    %57 = arith.addf %54, %56 : vector<16x16x64xf32>
    %58 = vector.broadcast %38 : vector<1x1x64xf32> to vector<16x16x64xf32>
    %59 = arith.addf %57, %58 : vector<16x16x64xf32>
    %cst_22 = arith.constant 2.000000e-01 : f32
    %60 = vector.broadcast %cst_22 : f32 to vector<16x16x64xf32>
    %61 = arith.mulf %60, %59 : vector<16x16x64xf32>
    %62 = arith.maximumf %59, %61 : vector<16x16x64xf32>
    %63 = arith.truncf %62 : vector<16x16x64xf32> to vector<16x16x64xbf16>
    %c0_23 = arith.constant 0 : index
    %c2 = arith.constant 2 : index
    %c0_24 = arith.constant 0 : index
    %c0_25 = arith.constant 0 : index
    %64 = vector.load %arg5[%c0_23, %c2, %c0_24, %c0_25] : memref<1x3x192x192xbf16, #tpu.memory_space<vmem>>, vector<1x1x192x192xbf16>
    %65 = vector.shape_cast %64 : vector<1x1x192x192xbf16> to vector<192x192xbf16>
    %c0_26 = arith.constant 0 : index
    %c2_27 = arith.constant 2 : index
    %c0_28 = arith.constant 0 : index
    %66 = vector.load %arg6[%c0_26, %c2_27, %c0_28] : memref<1x3x64xf32, #tpu.memory_space<vmem>>, vector<1x1x64xf32>
    %67 = vector.shape_cast %66 : vector<1x1x64xf32> to vector<64xf32>
    %68 = vector.shape_cast %67 : vector<64xf32> to vector<1x1x64xf32>
    %cst_29 = arith.constant 0.000000e+00 : bf16
    %69 = vector.broadcast %cst_29 : bf16 to vector<16x1x64xbf16>
    %70 = vector.extract_strided_slice %63 {offsets = [0, 0, 0], sizes = [16, 15, 64], strides = [1, 1, 1]} : vector<16x16x64xbf16> to vector<16x15x64xbf16>
    %71 = tpu.concatenate %69, %70 in 1 : vector<16x1x64xbf16>, vector<16x15x64xbf16> -> vector<16x16x64xbf16>
    %72 = vector.extract_strided_slice %63 {offsets = [0, 1, 0], sizes = [16, 15, 64], strides = [1, 1, 1]} : vector<16x16x64xbf16> to vector<16x15x64xbf16>
    %73 = tpu.concatenate %72, %69 in 1 : vector<16x15x64xbf16>, vector<16x1x64xbf16> -> vector<16x16x64xbf16>
    %74 = tpu.concatenate %71, %63, %73 in 2 : vector<16x16x64xbf16>, vector<16x16x64xbf16>, vector<16x16x64xbf16> -> vector<16x16x192xbf16>
    %75 = vector.shape_cast %74 : vector<16x16x192xbf16> to vector<256x192xbf16>
    %cst_30 = arith.constant dense<0.000000e+00> : vector<256x192xf32>
    %76 = tpu.matmul %75, %65, %cst_30 {dimension_numbers = #tpu.dot_dimension_numbers<[1], [0], [0], [1], [0, 0, 1, 1], [], []>} : vector<256x192xbf16>, vector<192x192xbf16>, vector<256x192xf32> -> vector<256x192xf32>
    %77 = vector.shape_cast %76 : vector<256x192xf32> to vector<16x16x192xf32>
    %78 = vector.extract_strided_slice %77 {offsets = [0, 0, 0], sizes = [16, 16, 64], strides = [1, 1, 1]} : vector<16x16x192xf32> to vector<16x16x64xf32>
    %79 = vector.extract_strided_slice %77 {offsets = [0, 0, 64], sizes = [16, 16, 64], strides = [1, 1, 1]} : vector<16x16x192xf32> to vector<16x16x64xf32>
    %80 = vector.extract_strided_slice %77 {offsets = [0, 0, 128], sizes = [16, 16, 64], strides = [1, 1, 1]} : vector<16x16x192xf32> to vector<16x16x64xf32>
    %cst_31 = arith.constant 0.000000e+00 : f32
    %81 = vector.broadcast %cst_31 : f32 to vector<1x16x64xf32>
    %82 = vector.extract_strided_slice %78 {offsets = [0, 0, 0], sizes = [15, 16, 64], strides = [1, 1, 1]} : vector<16x16x64xf32> to vector<15x16x64xf32>
    %83 = tpu.concatenate %81, %82 in 0 : vector<1x16x64xf32>, vector<15x16x64xf32> -> vector<16x16x64xf32>
    %84 = arith.addf %79, %83 : vector<16x16x64xf32>
    %85 = vector.extract_strided_slice %80 {offsets = [1, 0, 0], sizes = [15, 16, 64], strides = [1, 1, 1]} : vector<16x16x64xf32> to vector<15x16x64xf32>
    %86 = tpu.concatenate %85, %81 in 0 : vector<15x16x64xf32>, vector<1x16x64xf32> -> vector<16x16x64xf32>
    %87 = arith.addf %84, %86 : vector<16x16x64xf32>
    %88 = vector.broadcast %68 : vector<1x1x64xf32> to vector<16x16x64xf32>
    %89 = arith.addf %87, %88 : vector<16x16x64xf32>
    %90 = arith.extf %3 : vector<16x16x64xbf16> to vector<16x16x64xf32>
    %91 = arith.addf %90, %89 : vector<16x16x64xf32>
    %92 = arith.truncf %91 : vector<16x16x64xf32> to vector<16x16x64xbf16>
    %c0_32 = arith.constant 0 : index
    %c0_33 = arith.constant 0 : index
    %c0_34 = arith.constant 0 : index
    %93 = vector.load %arg10[%c0_32, %c0_33, %c0_34] : memref<16x16x64xbf16, #tpu.memory_space<vmem>>, vector<16x16x64xbf16>
    tpu.vector_store %arg10[%c0_32, %c0_33, %c0_34], %92 {strides = array<i32>} : memref<16x16x64xbf16, #tpu.memory_space<vmem>>, vector<16x16x64xbf16>,
    %c3_i32 = arith.constant 3 : i32
    %94 = arith.cmpi eq, %arg1, %c3_i32 : i32
    %95 = arith.extui %94 : i1 to i32
    %c0_i32_35 = arith.constant 0 : i32
    %96 = arith.cmpi ne, %95, %c0_i32_35 : i32
    scf.if %96 {
      %c0_36 = arith.constant 0 : index
      %c0_37 = arith.constant 0 : index
      %c0_38 = arith.constant 0 : index
      %97 = vector.load %arg10[%c0_36, %c0_37, %c0_38] : memref<16x16x64xbf16, #tpu.memory_space<vmem>>, vector<16x16x64xbf16>
      %98 = arith.extf %97 : vector<16x16x64xbf16> to vector<16x16x64xf32>
      %cst_39 = arith.constant 0.000000e+00 : f32
      %99 = vector.broadcast %cst_39 : f32 to vector<1x16x64xf32>
      %100 = tpu.concatenate %99, %98, %99 in 0 : vector<1x16x64xf32>, vector<16x16x64xf32>, vector<1x16x64xf32> -> vector<18x16x64xf32>
      %cst_40 = arith.constant 0.000000e+00 : f32
      %101 = vector.broadcast %cst_40 : f32 to vector<18x1x64xf32>
      %102 = tpu.concatenate %101, %100, %101 in 1 : vector<18x1x64xf32>, vector<18x16x64xf32>, vector<18x1x64xf32> -> vector<18x18x64xf32>
      %cst_41 = arith.constant 0.000000e+00 : f32
      %103 = vector.broadcast %cst_41 : f32 to vector<16x16x64xf32>
      %104 = vector.extract_strided_slice %102 {offsets = [0, 0, 0], sizes = [16, 16, 64], strides = [1, 1, 1]} : vector<18x18x64xf32> to vector<16x16x64xf32>
      %c0_42 = arith.constant 0 : index
      %c0_43 = arith.constant 0 : index
      %c0_44 = arith.constant 0 : index
      %105 = vector.load %arg7[%c0_42, %c0_43, %c0_44] : memref<3x3x64xf32, #tpu.memory_space<vmem>>, vector<1x1x64xf32>
      %106 = vector.shape_cast %105 : vector<1x1x64xf32> to vector<64xf32>
      %107 = vector.shape_cast %106 : vector<64xf32> to vector<1x1x64xf32>
      %108 = vector.broadcast %107 : vector<1x1x64xf32> to vector<16x16x64xf32>
      %109 = arith.mulf %104, %108 : vector<16x16x64xf32>
      %110 = arith.addf %103, %109 : vector<16x16x64xf32>
      %111 = vector.extract_strided_slice %102 {offsets = [0, 1, 0], sizes = [16, 16, 64], strides = [1, 1, 1]} : vector<18x18x64xf32> to vector<16x16x64xf32>
      %c0_45 = arith.constant 0 : index
      %c1_46 = arith.constant 1 : index
      %c0_47 = arith.constant 0 : index
      %112 = vector.load %arg7[%c0_45, %c1_46, %c0_47] : memref<3x3x64xf32, #tpu.memory_space<vmem>>, vector<1x1x64xf32>
      %113 = vector.shape_cast %112 : vector<1x1x64xf32> to vector<64xf32>
      %114 = vector.shape_cast %113 : vector<64xf32> to vector<1x1x64xf32>
      %115 = vector.broadcast %114 : vector<1x1x64xf32> to vector<16x16x64xf32>
      %116 = arith.mulf %111, %115 : vector<16x16x64xf32>
      %117 = arith.addf %110, %116 : vector<16x16x64xf32>
      %118 = vector.extract_strided_slice %102 {offsets = [0, 2, 0], sizes = [16, 16, 64], strides = [1, 1, 1]} : vector<18x18x64xf32> to vector<16x16x64xf32>
      %c0_48 = arith.constant 0 : index
      %c2_49 = arith.constant 2 : index
      %c0_50 = arith.constant 0 : index
      %119 = vector.load %arg7[%c0_48, %c2_49, %c0_50] : memref<3x3x64xf32, #tpu.memory_space<vmem>>, vector<1x1x64xf32>
      %120 = vector.shape_cast %119 : vector<1x1x64xf32> to vector<64xf32>
      %121 = vector.shape_cast %120 : vector<64xf32> to vector<1x1x64xf32>
      %122 = vector.broadcast %121 : vector<1x1x64xf32> to vector<16x16x64xf32>
      %123 = arith.mulf %118, %122 : vector<16x16x64xf32>
      %124 = arith.addf %117, %123 : vector<16x16x64xf32>
      %125 = vector.extract_strided_slice %102 {offsets = [1, 0, 0], sizes = [16, 16, 64], strides = [1, 1, 1]} : vector<18x18x64xf32> to vector<16x16x64xf32>
      %c1_51 = arith.constant 1 : index
      %c0_52 = arith.constant 0 : index
      %c0_53 = arith.constant 0 : index
      %126 = vector.load %arg7[%c1_51, %c0_52, %c0_53] : memref<3x3x64xf32, #tpu.memory_space<vmem>>, vector<1x1x64xf32>
      %127 = vector.shape_cast %126 : vector<1x1x64xf32> to vector<64xf32>
      %128 = vector.shape_cast %127 : vector<64xf32> to vector<1x1x64xf32>
      %129 = vector.broadcast %128 : vector<1x1x64xf32> to vector<16x16x64xf32>
      %130 = arith.mulf %125, %129 : vector<16x16x64xf32>
      %131 = arith.addf %124, %130 : vector<16x16x64xf32>
      %132 = vector.extract_strided_slice %102 {offsets = [1, 1, 0], sizes = [16, 16, 64], strides = [1, 1, 1]} : vector<18x18x64xf32> to vector<16x16x64xf32>
      %c1_54 = arith.constant 1 : index
      %c1_55 = arith.constant 1 : index
      %c0_56 = arith.constant 0 : index
      %133 = vector.load %arg7[%c1_54, %c1_55, %c0_56] : memref<3x3x64xf32, #tpu.memory_space<vmem>>, vector<1x1x64xf32>
      %134 = vector.shape_cast %133 : vector<1x1x64xf32> to vector<64xf32>
      %135 = vector.shape_cast %134 : vector<64xf32> to vector<1x1x64xf32>
      %136 = vector.broadcast %135 : vector<1x1x64xf32> to vector<16x16x64xf32>
      %137 = arith.mulf %132, %136 : vector<16x16x64xf32>
      %138 = arith.addf %131, %137 : vector<16x16x64xf32>
      %139 = vector.extract_strided_slice %102 {offsets = [1, 2, 0], sizes = [16, 16, 64], strides = [1, 1, 1]} : vector<18x18x64xf32> to vector<16x16x64xf32>
      %c1_57 = arith.constant 1 : index
      %c2_58 = arith.constant 2 : index
      %c0_59 = arith.constant 0 : index
      %140 = vector.load %arg7[%c1_57, %c2_58, %c0_59] : memref<3x3x64xf32, #tpu.memory_space<vmem>>, vector<1x1x64xf32>
      %141 = vector.shape_cast %140 : vector<1x1x64xf32> to vector<64xf32>
      %142 = vector.shape_cast %141 : vector<64xf32> to vector<1x1x64xf32>
      %143 = vector.broadcast %142 : vector<1x1x64xf32> to vector<16x16x64xf32>
      %144 = arith.mulf %139, %143 : vector<16x16x64xf32>
      %145 = arith.addf %138, %144 : vector<16x16x64xf32>
      %146 = vector.extract_strided_slice %102 {offsets = [2, 0, 0], sizes = [16, 16, 64], strides = [1, 1, 1]} : vector<18x18x64xf32> to vector<16x16x64xf32>
      %c2_60 = arith.constant 2 : index
      %c0_61 = arith.constant 0 : index
      %c0_62 = arith.constant 0 : index
      %147 = vector.load %arg7[%c2_60, %c0_61, %c0_62] : memref<3x3x64xf32, #tpu.memory_space<vmem>>, vector<1x1x64xf32>
      %148 = vector.shape_cast %147 : vector<1x1x64xf32> to vector<64xf32>
      %149 = vector.shape_cast %148 : vector<64xf32> to vector<1x1x64xf32>
      %150 = vector.broadcast %149 : vector<1x1x64xf32> to vector<16x16x64xf32>
      %151 = arith.mulf %146, %150 : vector<16x16x64xf32>
      %152 = arith.addf %145, %151 : vector<16x16x64xf32>
      %153 = vector.extract_strided_slice %102 {offsets = [2, 1, 0], sizes = [16, 16, 64], strides = [1, 1, 1]} : vector<18x18x64xf32> to vector<16x16x64xf32>
      %c2_63 = arith.constant 2 : index
      %c1_64 = arith.constant 1 : index
      %c0_65 = arith.constant 0 : index
      %154 = vector.load %arg7[%c2_63, %c1_64, %c0_65] : memref<3x3x64xf32, #tpu.memory_space<vmem>>, vector<1x1x64xf32>
      %155 = vector.shape_cast %154 : vector<1x1x64xf32> to vector<64xf32>
      %156 = vector.shape_cast %155 : vector<64xf32> to vector<1x1x64xf32>
      %157 = vector.broadcast %156 : vector<1x1x64xf32> to vector<16x16x64xf32>
      %158 = arith.mulf %153, %157 : vector<16x16x64xf32>
      %159 = arith.addf %152, %158 : vector<16x16x64xf32>
      %160 = vector.extract_strided_slice %102 {offsets = [2, 2, 0], sizes = [16, 16, 64], strides = [1, 1, 1]} : vector<18x18x64xf32> to vector<16x16x64xf32>
      %c2_66 = arith.constant 2 : index
      %c2_67 = arith.constant 2 : index
      %c0_68 = arith.constant 0 : index
      %161 = vector.load %arg7[%c2_66, %c2_67, %c0_68] : memref<3x3x64xf32, #tpu.memory_space<vmem>>, vector<1x1x64xf32>
      %162 = vector.shape_cast %161 : vector<1x1x64xf32> to vector<64xf32>
      %163 = vector.shape_cast %162 : vector<64xf32> to vector<1x1x64xf32>
      %164 = vector.broadcast %163 : vector<1x1x64xf32> to vector<16x16x64xf32>
      %165 = arith.mulf %160, %164 : vector<16x16x64xf32>
      %166 = arith.addf %159, %165 : vector<16x16x64xf32>
      %cst_69 = arith.constant dense<0.000000e+00> : vector<16x16xf32>
      %167 = vector.multi_reduction <add>, %166, %cst_69 [2] : vector<16x16x64xf32> to vector<16x16xf32>
      %c0_70 = arith.constant 0 : index
      %c0_71 = arith.constant 0 : index
      %168 = vector.load %arg8[%c0_70, %c0_71] : memref<1x1xf32, #tpu.memory_space<vmem>>, vector<1x1xf32>
      %169 = vector.broadcast %168 : vector<1x1xf32> to vector<16x16xf32>
      %170 = arith.addf %167, %169 : vector<16x16xf32>
      %c0_72 = arith.constant 0 : index
      %c0_73 = arith.constant 0 : index
      %c0_74 = arith.constant 0 : index
      %171 = vector.load %arg9[%c0_72, %c0_73, %c0_74] : memref<1x16x16xf32, #tpu.memory_space<vmem>>, vector<1x16x16xf32>
      %172 = vector.shape_cast %171 : vector<1x16x16xf32> to vector<16x16xf32>
      %173 = vector.shape_cast %170 : vector<16x16xf32> to vector<1x16x16xf32>
      tpu.vector_store %arg9[%c0_72, %c0_73, %c0_74], %173 {strides = array<i32>} : memref<1x16x16xf32, #tpu.memory_space<vmem>>, vector<1x16x16xf32>,
    } else {
    }
    return
  }
  func.func @transform_0(%arg0: i32, %arg1: i32) -> (i32, i32, i32) {
    %c0_i32 = arith.constant 0 : i32
    %c0_i32_0 = arith.constant 0 : i32
    %c0_i32_1 = arith.constant 0 : i32
    return %arg0, %c0_i32, %c0_i32_0 : i32, i32, i32
  }
  func.func @transform_1(%arg0: i32, %arg1: i32) -> (i32, i32, i32) {
    %c0_i32 = arith.constant 0 : i32
    %c0_i32_0 = arith.constant 0 : i32
    %c0_i32_1 = arith.constant 0 : i32
    %c0_i32_2 = arith.constant 0 : i32
    return %c0_i32, %c0_i32_0, %c0_i32_1 : i32, i32, i32
  }
  func.func @transform_2(%arg0: i32, %arg1: i32) -> (i32, i32) {
    %c0_i32 = arith.constant 0 : i32
    %c0_i32_0 = arith.constant 0 : i32
    %c0_i32_1 = arith.constant 0 : i32
    return %c0_i32, %c0_i32_0 : i32, i32
  }
  func.func @transform_3(%arg0: i32, %arg1: i32) -> (i32, i32, i32, i32) {
    %c0_i32 = arith.constant 0 : i32
    %c0_i32_0 = arith.constant 0 : i32
    %c0_i32_1 = arith.constant 0 : i32
    %c0_i32_2 = arith.constant 0 : i32
    return %arg1, %c0_i32, %c0_i32_0, %c0_i32_1 : i32, i32, i32, i32
  }
  func.func @transform_4(%arg0: i32, %arg1: i32) -> (i32, i32, i32) {
    %c0_i32 = arith.constant 0 : i32
    %c0_i32_0 = arith.constant 0 : i32
    %c0_i32_1 = arith.constant 0 : i32
    return %arg1, %c0_i32, %c0_i32_0 : i32, i32, i32
  }
  func.func @transform_5(%arg0: i32, %arg1: i32) -> (i32, i32, i32) {
    %c0_i32 = arith.constant 0 : i32
    %c0_i32_0 = arith.constant 0 : i32
    %c0_i32_1 = arith.constant 0 : i32
    %c0_i32_2 = arith.constant 0 : i32
    return %c0_i32, %c0_i32_0, %c0_i32_1 : i32, i32, i32
  }
  func.func @transform_6(%arg0: i32, %arg1: i32) -> (i32, i32) {
    %c0_i32 = arith.constant 0 : i32
    %c0_i32_0 = arith.constant 0 : i32
    %c0_i32_1 = arith.constant 0 : i32
    return %c0_i32, %c0_i32_0 : i32, i32
  }
  func.func @transform_7(%arg0: i32, %arg1: i32) -> (i32, i32, i32) {
    %c0_i32 = arith.constant 0 : i32
    %c0_i32_0 = arith.constant 0 : i32
    %c0_i32_1 = arith.constant 0 : i32
    return %arg0, %c0_i32, %c0_i32_0 : i32, i32, i32
  }
}

</mosaic_0001>

<bundles_post_ra>
// kernel: generator_forward.1
= control target key start
LH: loop header
LB: loop body
LE: loop exit
PB: predicated region body
PF: predicated region fallthrough
CT: control target
= control target key end

     0   :  { %s14762_s0 = inlined_call_operand.hbm [shape: f32[2,16,16], index: 0, kind: input, shape index: {}]   ;;  %s14763_s1 = inlined_call_operand.hbm [shape: f32[3,3,64], index: 1, kind: input, shape index: {}]   ;;  %s14764_s2 = inlined_call_operand.hbm [shape: f32[1,64], index: 2, kind: input, shape index: {}]   ;;  %s14765_s3 = inlined_call_operand.hbm [shape: bf16[4,3,192,192], index: 3, kind: input, shape index: {}]   ;;  %s14766_s4 = inlined_call_operand.vmem [shape: f32[4,3,64], index: 4, kind: input, shape index: {}]   ;;  %s14767_s5 = inlined_call_operand.hbm [shape: f32[3,3,64], index: 5, kind: input, shape index: {}]   ;;  %s14768_s6 = inlined_call_operand.<no memory space> [shape: f32[1,1], index: 6, kind: input, shape index: {}]   ;;  %s14769_s7 = inlined_call_operand.hbm [shape: f32[2,16,16], index: 7, kind: output, shape index: {}]  }
   0x1   :  { %14921 = sst [smem:[#allocation49_spill]] %s14762_s0  ;;  %v12_v0 = vstv %s14768_s6 }
   0x2   :  { %14922 = sst [smem:[#allocation50_spill]] %s14766_s4  ;;  %13 = vst [vmem:[#allocation3] sm:$0x1] %v12_v0 }
   0x3   :  { %14923 = sst [smem:[#allocation51_spill]] %s14769_s7 }
   0x4   :  { %14 = vsyncpa [#allocation5], 0 }
   0x5   :  { %16 = vsyncpa [#allocation5 + $0x1], 0 }
   0x6   :  { %17 = vsyncpa [#allocation8], 0 }
   0x7   :  { %18 = vsyncpa [#allocation11], 0 }
   0x8   :  { %20 = vsyncpa [#allocation11 + $0x1], 0 }
   0x9   :  { %21 = vsyncpa [#allocation6], 0 }
   0xa   :  { %23 = vsyncpa [#allocation6 + $0x1], 0  ;;  %s9404_s26 = smov 0   ;;  %s9406_s27 = smov 0  }
   0xb   :  { %s9408_s28 = smov 0   ;;  %s9410_s29 = smov 0  }
   0xc   :  { %s9412_s30 = smov 0   ;;  %s9414_s8 = smov 0  }
   0xd   :  { %s9416_s6 = smov 0   ;;  %s9418_s9 = smov 0  }
   0xe   :  { %s9420_s10 = smov 0   ;;  %s9422_s11 = smov 0  }
   0xf   :  { %s9424_s12 = smov 0  }
  0x10 LB: > { %14924 = sst [smem:[#allocation19_spill]] %s9314_s29  ;;  %s9458_s13 = sadd.s32 4294967295, %s9342_s12   ;;  %s9342_s12 = sphi %s9424_s12, %s29_s12   ;;  %s9338_s11 = sphi %s9422_s11, %s15153_s11   ;;  %s9334_s10 = sphi %s9420_s10, %s15152_s10   ;;  %s9330_s9 = sphi %s9418_s9, %s15151_s9   ;;  %s9326_s6 = sphi %s9416_s6, %s15150_s6   ;;  %s9322_s8 = sphi %s9414_s8, %s15149_s8   ;;  %s9318_s30 = sphi %s9412_s30, %s15148_s30   ;;  %s9314_s29 = sphi %s9410_s29, %s15147_s29   ;;  %s9310_s28 = sphi %s9408_s28, %s15146_s28   ;;  %s9306_s27 = sphi %s9406_s27, %s15145_s27   ;;  %s9302_s26 = sphi %s9404_s26, %s15144_s26  }
  0x11   : > { %14925 = sst [smem:[#allocation20_spill]] %s9326_s6  ;;  %s8508_s14 = sadd.s32 4294967294, %s9342_s12  }
  0x12   : > { %14926 = sst [smem:[#allocation21_spill]] %s9330_s9  ;;  %p61_p0 = scmp.ne.s32.totalorder %s9318_s30, %s9314_s29 }
  0x13   : > { %p14773_p1 = scmp.eq.s32.totalorder %s9458_s13, 0  ;;  %p129_p2 = scmp.ne.s32.totalorder %s9306_s27, %s9302_s26 }
  0x14   : > { %p227_p5 = scmp.eq.s32.totalorder %s8508_s14, 7  ;;  %p8509_p7 = scmp.ge.s32.totalorder %s9342_s12, 1 }
  0x15   : > { %p9468_p4 = por %p14773_p1, %p61_p0  ;;  %p9474_p6 = por %p129_p2, %p14773_p1 }
  0x16   : > { %p9479_p8 = por %p227_p5, %p61_p0  ;;  %p234_p9 = scmp.lt.s32.totalorder %s9342_s12, 9 }
  0x17   : > { %s14927_s15 = scalar_select %p9468_p4, 1, 0 }
  0x18   : > { %s14928_s16 = scalar_select %p9474_p6, 1, 0 }
  0x19   : > { %s14930_s17 = scalar_select %p9479_p8, 1, 0 }
  0x1a   : > { %14929 = sst [smem:[#allocation22_spill]] %s14928_s16  ;;  %p9484_p10 = pnand %p8509_p7, %p234_p9 }
  0x1b   : > { %14931 = sst [smem:[#allocation23_spill]] %s14930_s17  ;;  %s9344_s19 = smov [#allocation7]  }
  0x1c   : > { %s14932_s18 = scalar_select %p9484_p10, 1, 0 }
  0x1d   : > { %s246_s20 = sshll.u32 %s9344_s19, 4  ;;  %p8770_p11 = pneg %p9484_p10  ;;  %s9488_s20 = int_to_ptr.vmem [resolvable:$true] %s246_s20 }
  0x1e   : > { %s9345_s22 = smov [#allocation12]   ;;  %s9346_s24 = smov [#allocation9]  }
  0x1f   : > { %p9494_p12 = pnand %p8770_p11, %p14773_p1  ;;  %s270_s23 = sshll.u32 %s9345_s22, 4  ;;  %s9498_s23 = int_to_ptr.vmem [resolvable:$true] %s270_s23 }
  0x20   : > { %s9500_s25 = sshll.u32 %s9346_s24, 4  ;;  %s9064_s19 = scalar_lea.hbm %s14763_s1, 192  ;;  %s261_s25 = int_to_ptr.vmem [resolvable:$true] %s9500_s25 }
  0x21   : > { %p9065_p13 = scmp.ne.s32.totalorder %s14763_s1, %s9064_s19  ;;  %p9510_p0 = pneg %p9494_p12 }
  0x22   : > { %p9071_p7 = scmp.lt.u32.totalorder %s9064_s19, %s14763_s1 }
  0x23   : > { %p9067_p2 = pnand %p9510_p0, %p9065_p13 }
  0x25   : > { %p9068_p5 = pneg %p9067_p2 }
  0x27   : > { %p9073_p9 = pnand %p9071_p7, %p9068_p5 }
  0x29   : > { %9076 = shalt.err (!%p9073_p9)
}
  0x2a   : > { %s9077_s29 = scalar_lea.vmem %s9488_s20, 192  ;;  %p9085_p8 = scmp.lt.s32.totalorder %s9488_s20, %s9488_s20 }
  0x2b   : > { %p9078_p11 = scmp.ne.s32.totalorder %s9488_s20, %s9077_s29  ;;  %p9086_p6 = scmp.lt.s32.totalorder %s9077_s29, %s9077_s29 }
  0x2d   : > { %p9080_p1 = pnand %p9078_p11, %p9510_p0  ;;  %p9087_p13 = por %p9086_p6, %p9085_p8 }
  0x2f   : > { %p9081_p3 = pneg %p9080_p1 }
  0x31   : > { %p9088_p2 = pnand %p9087_p13, %p9081_p3 }
  0x33   : > { %9091 = shalt.err (!%p9088_p2)
}
  0x34   : > { %s9347_s17 = smov 64   ;;  %s9348_s26 = smov 4  }
  0x35   : > { %8773 = dma.hbm_to_vmem [thread:$0]  (!%p9494_p12), %s14763_s1, 192, %s9488_s20, [#allocation8], %s9347_s17, %s9347_s17, %s9348_s26  }
  0x36   : > { %s9092_s9 = scalar_lea.hbm %s14767_s5, 192 }
  0x37   : > { %p9093_p1 = scmp.ne.s32.totalorder %s14767_s5, %s9092_s9  ;;  %p9099_p8 = scmp.lt.u32.totalorder %s9092_s9, %s14767_s5 }
  0x39   : > { %p9095_p3 = pnand %p9093_p1, %p9510_p0 }
  0x3b   : > { %p9096_p6 = pneg %p9095_p3 }
  0x3d   : > { %p9101_p5 = pnand %p9099_p8, %p9096_p6 }
  0x3f   : > { %9104 = shalt.err (!%p9101_p5)
}
  0x40   : > { %s9105_s20 = scalar_lea.vmem %s9498_s23, 192  ;;  %p9113_p13 = scmp.lt.s32.totalorder %s9498_s23, %s9498_s23 }
  0x41   : > { %p9106_p7 = scmp.ne.s32.totalorder %s9498_s23, %s9105_s20  ;;  %p9114_p2 = scmp.lt.s32.totalorder %s9105_s20, %s9105_s20 }
  0x43   : > { %p9108_p9 = pnand %p9106_p7, %p9510_p0  ;;  %p9115_p1 = por %p9114_p2, %p9113_p13 }
  0x45   : > { %p9109_p11 = pneg %p9108_p9 }
  0x47   : > { %p9116_p3 = pnand %p9115_p1, %p9109_p11 }
  0x49   : > { %9119 = shalt.err (!%p9116_p3)
}
  0x4a   : > { %8779 = dma.hbm_to_vmem [thread:$0]  (!%p9494_p12), %s14767_s5, 192, %s9498_s23, [#allocation11], %s9347_s17, %s9347_s17, %s9348_s26  }
  0x4b   : > { %s9120_s14 = scalar_lea.hbm %s14764_s2, 16 }
  0x4c   : > { %p9121_p6 = scmp.ne.s32.totalorder %s14764_s2, %s9120_s14  ;;  %p9127_p7 = scmp.lt.u32.totalorder %s9120_s14, %s14764_s2 }
  0x4e   : > { %p9123_p8 = pnand %p9121_p6, %p9510_p0 }
  0x50   : > { %p9124_p5 = pneg %p9123_p8 }
  0x52   : > { %p9129_p9 = pnand %p9127_p7, %p9124_p5 }
  0x54   : > { %9132 = shalt.err (!%p9129_p9)
}
  0x55   : > { %s9133_s20 = scalar_lea.vmem %s261_s25, 16  ;;  %s9140_s23 = scalar_lea.vmem %s261_s25, 32 }
  0x56   : > { %p9134_p11 = scmp.ne.s32.totalorder %s261_s25, %s9133_s20  ;;  %p9141_p1 = scmp.lt.s32.totalorder %s261_s25, %s261_s25 }
  0x57   : > { %p9142_p3 = scmp.lt.s32.totalorder %s9140_s23, %s9133_s20 }
  0x58   : > { %p9136_p13 = pnand %p9134_p11, %p9510_p0 }
  0x59   : > { %p9143_p4 = por %p9142_p3, %p9141_p1 }
  0x5a   : > { %p9137_p2 = pneg %p9136_p13 }
  0x5c   : > { %p9144_p10 = pnand %p9143_p4, %p9137_p2 }
  0x5e   : > { %9147 = shalt.err (!%p9144_p10)
}
  0x5f   : > { %8776 = dma.hbm_to_vmem [thread:$0]  (!%p9494_p12), %s14764_s2, 16, %s261_s25, [#allocation8]  }
  0x60   : > { %s48_s7 = sadd.s32 1, %s9322_s8  ;;  %s41_s4 = sadd.s32 1, %s9338_s11 }
  0x61   : > { %p55_p4 = scmp.ne.s32.totalorder %s9322_s8, %s9318_s30  ;;  %p14781_p10 = scmp.eq.s32.totalorder %s9342_s12, 0 }
  0x62   : > { %p14780_p0 = scmp.lt.s32.totalorder %s9342_s12, 8  ;;  %p14935_p6 = scmp.eq.s32.totalorder %s9458_s13, 7 }
  0x63   : > { %s287_s6 = sand.u32 1, %s9322_s8   ;;  %p57_p5 = por %p14781_p10, %p55_p4 }
  0x64   : > { %p9581_p8 = por %p14935_p6, %p55_p4  ;;  %s8514_s9 = sshll.u32 %s287_s6, 4 }
  0x65   : > { %s8723_s16 = sshll.u32 %s9338_s11, 8  ;;  %s14937_s0 = sld [smem:[#allocation49_spill]] }
  0x66   : > { %s291_s25 = scalar_lea.vmem [#allocation4], %s8514_s9  ;;  %p9596_p12 = pnand %p14780_p0, %p57_p5 }
  0x67   : > { %s298_s24 = sshll.u32 %s291_s25, 4  ;;  %s9602_s20 = scalar_lea.sflag [#allocation5], %s287_s6  ;;  %s9600_s24 = int_to_ptr.vmem [resolvable:$true] %s298_s24 }
  0x68   : > { %p9150_p9 = pneg %p9596_p12 }
  0x6b   : > { %s9592_s22 = scalar_lea.hbm %s14937_s0, %s8723_s16  ;;  %s9153_s9 = scalar_lea.hbm %s14937_s0, 512 }
  0x6c   : > { %s9148_s23 = scalar_lea.hbm %s9592_s22, 256  ;;  %p9154_p2 = scmp.lt.u32.totalorder %s9592_s22, %s14937_s0 }
  0x6d   : > { %p9149_p7 = scmp.ne.s32.totalorder %s9592_s22, %s9148_s23  ;;  %p9155_p1 = scmp.lt.u32.totalorder %s9153_s9, %s9148_s23 }
  0x6e   : > { %p9157_p4 = scmp.lt.u32.totalorder %s9148_s23, %s9592_s22 }
  0x6f   : > { %p9151_p11 = pnand %p9150_p9, %p9149_p7  ;;  %p9156_p3 = por %p9155_p1, %p9154_p2 }
  0x71   : > { %p9152_p13 = pneg %p9151_p11  ;;  %p9158_p6 = por %p9157_p4, %p9156_p3 }
  0x73   : > { %p9159_p5 = pnand %p9158_p6, %p9152_p13 }
  0x75   : > { %9162 = shalt.err (!%p9159_p5)
}
  0x76   : > { %s9163_s6 = scalar_lea.vmem %s9600_s24, 256  ;;  %s9349_s19 = smov [#allocation4]  }
  0x77   : > { %p9164_p7 = scmp.ne.s32.totalorder %s9600_s24, %s9163_s6  ;;  %s9168_s25 = sshll.u32 %s9349_s19, 4  ;;  %s9169_s25 = int_to_ptr.vmem [resolvable:$false] %s9168_s25 }
  0x78   : > { %s9170_s17 = scalar_lea.vmem %s9169_s25, 512  ;;  %p9171_p10 = scmp.lt.s32.totalorder %s9600_s24, %s9169_s25 }
  0x79   : > { %p9166_p11 = pnand %p9164_p7, %p9150_p9  ;;  %p9172_p2 = scmp.lt.s32.totalorder %s9170_s17, %s9163_s6 }
  0x7b   : > { %p9167_p0 = pneg %p9166_p11  ;;  %p9173_p1 = por %p9172_p2, %p9171_p10 }
  0x7d   : > { %p9174_p3 = pnand %p9173_p1, %p9167_p0 }
  0x7f   : > { %9177 = shalt.err (!%p9174_p3)
}
  0x80   : > { %s14782_s23 = smov 128   ;;  %s14783_s26 = smov 8  }
  0x81   : > { %8783 = dma.hbm_to_vmem [thread:$0]  (!%p9596_p12), %s9592_s22, 256, %s9600_s24, %s9602_s20, %s14782_s23, %s14782_s23, %s14783_s26  }
  0x82   : > { %s38_s9 = sadd.s32 1, %s9334_s10  ;;  %s116_s16 = sadd.s32 1, %s9310_s28 }
  0x83   : > { %p39_p10 = scmp.ge.s32.totalorder %s38_s9, 4  ;;  %p123_p0 = scmp.ne.s32.totalorder %s9310_s28, %s9306_s27 }
  0x84   : > { %s308_s14 = sand.u32 1, %s9342_s12   ;;  %s310_s6 = sand.u32 1, %s9310_s28  }
  0x85   : > { %s15155_s9 = smov (%p39_p10, %s38_s9), 0  ;;  %s15157_s4 = smov (!%p39_p10, %s41_s4), %s9338_s11 }
  0x86   : > { %s113_s29 = ssub.s32 %s9334_s10, %s15155_s9  ;;  %p14939_p9 = scmp.eq.s32.totalorder %s9342_s12, 0 }
  0x87   : > { %p43_p12 = scmp.ge.s32.totalorder %s15157_s4, 2  ;;  %p114_p4 = scmp.eq.s32.totalorder %s113_s29, 0 }
  0x88   : > { %p125_p13 = por %p123_p0, %p14939_p9  ;;  %s8749_s22 = smul.u32 576, %s310_s6 }
  0x89   : > { %s15159_s4 = smov (%p43_p12, %s15157_s4), 0  ;;  %s8750_s19 = smul.u32 9216, %s9334_s10 }
  0x8a   : > { %s9651_s24 = scalar_select %p114_p4, %s9310_s28, %s116_s16  }
  0x8b   : > { %s45_s20 = ssub.s32 %s9338_s11, %s15159_s4  ;;  %s312_s25 = scalar_lea.vmem [#allocation10], %s8749_s22 }
  0x8c   : > { %p46_p6 = scmp.eq.s32.totalorder %s45_s20, 0  ;;  %s319_s17 = sshll.u32 %s312_s25, 4  ;;  %s9672_s17 = int_to_ptr.vmem [resolvable:$true] %s319_s17 }
  0x8d   : > { %p14940_p5 = scmp.lt.s32.totalorder %s9342_s12, 8  ;;  %s9670_s16 = scalar_lea.hbm %s14765_s3, %s8750_s19 }
  0x8e   : > { %s9665_s29 = scalar_select %p46_p6, %s9322_s8, %s48_s7  }
  0x8f   : > { %p9658_p7 = pnand %p14940_p5, %p125_p13  ;;  %s9674_s22 = scalar_lea.sflag [#allocation11], %s308_s14 }
  0x90   : > { %s9178_s20 = scalar_lea.hbm %s9670_s16, 9216  ;;  %s9183_s19 = scalar_lea.hbm %s14765_s3, 36864 }
  0x91   : > { %p9179_p11 = scmp.ne.s32.totalorder %s9670_s16, %s9178_s20  ;;  %p9180_p2 = pneg %p9658_p7 }
  0x92   : > { %p9184_p10 = scmp.lt.u32.totalorder %s9670_s16, %s14765_s3  ;;  %p9185_p0 = scmp.lt.u32.totalorder %s9183_s19, %s9178_s20 }
  0x93   : > { %p9181_p1 = pnand %p9180_p2, %p9179_p11  ;;  %p9187_p13 = scmp.lt.u32.totalorder %s9178_s20, %s9670_s16 }
  0x94   : > { %p9186_p9 = por %p9185_p0, %p9184_p10 }
  0x95   : > { %p9182_p3 = pneg %p9181_p1 }
  0x96   : > { %p9188_p12 = por %p9187_p13, %p9186_p9 }
  0x98   : > { %p9189_p4 = pnand %p9188_p12, %p9182_p3 }
  0x9a   : > { %9192 = shalt.err (!%p9189_p4)
}
  0x9b   : > { %s9193_s14 = scalar_lea.vmem %s9672_s17, 9216  ;;  %s9352_s7 = smov [#allocation10]  }
  0x9c   : > { %p9194_p6 = scmp.ne.s32.totalorder %s9672_s17, %s9193_s14  ;;  %s9198_s26 = sshll.u32 %s9352_s7, 4  ;;  %s9199_s26 = int_to_ptr.vmem [resolvable:$false] %s9198_s26 }
  0x9d   : > { %s9200_s25 = scalar_lea.vmem %s9199_s26, 18432  ;;  %p9201_p1 = scmp.lt.s32.totalorder %s9672_s17, %s9199_s26 }
  0x9e   : > { %p9196_p5 = pnand %p9194_p6, %p9180_p2  ;;  %p9202_p10 = scmp.lt.s32.totalorder %s9200_s25, %s9193_s14 }
  0xa0   : > { %p9197_p11 = pneg %p9196_p5  ;;  %p9203_p0 = por %p9202_p10, %p9201_p1 }
  0xa2   : > { %p9204_p9 = pnand %p9203_p0, %p9197_p11 }
  0xa4   : > { %9207 = shalt.err (!%p9204_p9)
}
  0xa5   : > { %s14942_s20 = smov 8   ;;  %s14943_s19 = smov 128  }
  0xa6   : > { %8786 = dma.hbm_to_vmem [thread:$0]  (!%p9658_p7), %s9670_s16, 9216, %s9672_s17, %s9674_s22, %s14943_s19, %s14943_s19, %s14942_s20  }
  0xa7   : > { %p14944_p2 = scmp.ne.s32.totalorder %s14932_s18, 0 }
  0xa9   : > { %338 = sbr.rel (%p14944_p2) target bundleno = 2893 (0xb4d), region = 48 }
  0xb0   : > { %s9708_s6 = sand.u32 1, %s9318_s30   ;;  %p14945_p3 = scmp.ne.s32.totalorder %s14927_s15, 0 }
  0xb1   : > { %s8519_s14 = sshll.u32 %s9708_s6, 4  ;;  %s341_s7 = scalar_lea.sflag [#allocation5], %s9708_s6 }
  0xb2   : > { %s9712_s26 = scalar_lea.vmem [#allocation4], %s8519_s14 }
  0xb3   : > { %9281 = dma.done.wait (%p14945_p3), %s341_s7, 256  }
  0xb4   : > { %9283 = vsyncadd (%p14945_p3), %s341_s7, 4294967040  ;;  %p14946_p7 = scmp.eq.s32.totalorder %s9458_s13, 0 }
  0xb6   : > { %9285 = dma.done.wait (%p14946_p7), [#allocation8], 208   ;;  %p14947_p13 = pmov %p14946_p7 }
  0xb7   : > { %s14948_s18 = sld [smem:[#allocation22_spill]]  ;;  %s357_s23 = sand.u32 1, %s9458_s13  }
  0xb8   : > { %9287 = vsyncadd (%p14947_p13), [#allocation8], 4294967088  ;;  %s359_s17 = sand.u32 1, %s9306_s27   ;;  %s358_s22 = scalar_lea.sflag [#allocation11], %s357_s23 }
  0xb9   : > { %s8751_s16 = smul.u32 576, %s359_s17 }
  0xbb   : > { %s9724_s25 = scalar_lea.vmem [#allocation10], %s8751_s16 }
  0xbd   : > { %p14949_p12 = scmp.ne.s32.totalorder %s14948_s18, 0 }
  0xbf   : > { %9289 = dma.done.wait (%p14949_p12), %s358_s22, 9216  }
  0xc0   : > { %9291 = vsyncadd (%p14949_p12), %s358_s22, 4294958080  ;;  %p14950_p4 = pmov %p14946_p7 }
  0xc2   : > { %9293 = dma.done.wait (%p14950_p4), [#allocation11], 192   ;;  %p14951_p6 = pmov %p14950_p4 }
  0xc3   : > { %s14952_s15 = sld [smem:[#allocation20_spill]]  ;;  %s14953_s17 = sld [smem:[#allocation50_spill]] }
  0xc4   : > { %9295 = vsyncadd (%p14951_p6), [#allocation11], 4294967104  ;;  %s9741_s0 = scalar_lea.vmem [#allocation13], %s8519_s14 }
  0xc9   : > { %p405_p5 = scmp.lt.s32.totalorder %s14952_s15, 3  ;;  %p8525_p11 = scmp.ne.s32.totalorder %s14952_s15, 0 }
  0xca   : > { %v416_v1 = vlaneseq (!%p8525_p11)  ;;  %v414_v3 = vld [vmem:[%s9712_s26] sm:$0xff] (!%p8525_p11)  ;;  %v415_v20 = vld [vmem:[%s9712_s26 + $0x8] sm:$0xff] (!%p8525_p11)  ;;  %v9353_v29 = vmov (!%p8525_p11), 0.0   ;;  %vm625_vm0 = vcmask (!%p8525_p11), 1040384   ;;  %vm930_vm1 = vcmask (!%p8525_p11), 1046528  }
  0xcb   : > { %s406_s20 = scalar_select %p405_p5, %s14952_s15, 3 }
  0xcc   : > { %413 = sbr.rel (%p8525_p11) target bundleno = 641 (0x281), region = 72  ;;  %v417_v2 = vshrl.u32 (!%p8525_p11), %v416_v1, 7  ;;  %v9746_v30 = vrot.slane (!%p8525_p11), %v9353_v29, 7  ;;  %v9748_v31 = vld [vmem:[#allocation7 + $0x1] ss:$0 sm:$0xff] (!%p8525_p11)  ;;  %vm1176_vm2 = vcmask (!%p8525_p11), 1045504  }
  0xcd   : > { %s8524_s19 = sshll.u32 %s406_s20, 2  ;;  %v9758_v34 = vld [vmem:[#allocation7 + $0x2] ss:$0 sm:$0xff] (!%p8525_p11)  ;;  %v9770_v40 = vld [vmem:[#allocation7] ss:$0 sm:$0xff] (!%p8525_p11)  ;;  %vm2496_vm3 = vcmask (!%p8525_p11), 523264  }
  0xce   : > { %s9739_s16 = scalar_lea.vmem %s14953_s17, %s8524_s19  ;;  %v429_v4 = vsub.s32 (!%p8525_p11), 1, %v417_v2  ;;  %v418_v5 = vsub.s32 (!%p8525_p11), 0, %v417_v2  ;;  %v440_v8 = vsub.s32 (!%p8525_p11), 2, %v417_v2  ;;  %v451_v10 = vsub.s32 (!%p8525_p11), 3, %v417_v2  ;;  %v9783_v56 = vld [vmem:[#allocation7 + $0x5] ss:$0 sm:$0xff] (!%p8525_p11) }
  0xcf   : > { %v462_v12 = vsub.s32 (!%p8525_p11), 4, %v417_v2  ;;  %v473_v14 = vsub.s32 (!%p8525_p11), 5, %v417_v2  ;;  %v484_v16 = vsub.s32 (!%p8525_p11), 6, %v417_v2  ;;  %v495_v18 = vsub.s32 (!%p8525_p11), 7, %v417_v2  ;;  %v9785_v57 = vld [vmem:[#allocation7 + $0x6] ss:$0 sm:$0xff] (!%p8525_p11) }
  0xd0   : > { %v430_v6 = vrot.slane (!%p8525_p11), %v414_v3, %v429_v4  ;;  %v419_v7 = vrot.slane (!%p8525_p11), %v414_v3, %v418_v5  ;;  %v441_v9 = vrot.slane (!%p8525_p11), %v414_v3, %v440_v8  ;;  %v452_v11 = vrot.slane (!%p8525_p11), %v414_v3, %v451_v10  ;;  %v9787_v58 = vld [vmem:[#allocation7 + $0x9] ss:$0 sm:$0xff] (!%p8525_p11)  ;;  %v9789_v59 = vld [vmem:[#allocation7 + $0xa] ss:$0 sm:$0xff] (!%p8525_p11)  ;;  %v9795_v2 = vld [vmem:[#allocation7 + $0x4] ss:$0 sm:$0xff] (!%p8525_p11) }
  0xd1   : > { %v463_v13 = vrot.slane (!%p8525_p11), %v414_v3, %v462_v12  ;;  %v474_v15 = vrot.slane (!%p8525_p11), %v414_v3, %v473_v14  ;;  %v485_v17 = vrot.slane (!%p8525_p11), %v414_v3, %v484_v16  ;;  %v496_v19 = vrot.slane (!%p8525_p11), %v414_v3, %v495_v18  ;;  %v9797_v3 = vld [vmem:[#allocation7 + $0x8] ss:$0 sm:$0xff] (!%p8525_p11) }
  0xd2   : > { %432 = vbcast.lane.b32.xlu1 (!%p8525_p11), %v430_v6, 256  ;;  %421 = vbcast.lane.b32.xlu0 (!%p8525_p11), %v419_v7, 256  ;;  %v507_v21 = vrot.slane (!%p8525_p11), %v415_v20, %v418_v5  ;;  %v518_v22 = vrot.slane (!%p8525_p11), %v415_v20, %v429_v4  ;;  %v529_v23 = vrot.slane (!%p8525_p11), %v415_v20, %v440_v8  ;;  %v9752_v32 = vsel (!%p8525_p11), %vm625_vm0, 0.0, %v9746_v30 }
  0xd3   : > { %v540_v24 = vrot.slane %v415_v20, %v451_v10  ;;  %v551_v25 = vrot.slane %v415_v20, %v462_v12  ;;  %v562_v26 = vrot.slane %v415_v20, %v473_v14  ;;  %v573_v27 = vrot.slane %v415_v20, %v484_v16 }
  0xd4   : > { %v584_v28 = vrot.slane %v415_v20, %v495_v18  ;;  %v9756_v33 = vsel %vm625_vm0, %v9746_v30, 0.0  ;;  %v834_v35 = vmul.f32 %v9748_v31, %v9752_v32  ;;  %v835_v36 = vmul.f32 %v9748_v31, %v9746_v30 }
  0xd5   : > { %v836_v37 = vmul.f32 %v9748_v31, %v9756_v33  ;;  %v1080_v38 = vmul.f32 %v9758_v34, %v9752_v32  ;;  %v1081_v39 = vmul.f32 %v9758_v34, %v9746_v30  ;;  %v1082_v44 = vmul.f32 %v9758_v34, %v9756_v33 }
  0xd6   : > { %436 = vbcast.lane.b32.xlu1 %v430_v6, 264  ;;  %425 = vbcast.lane.b32.xlu0 %v419_v7, 264  ;;  %v931_v41 = vrot.slane %v834_v35, 1  ;;  %v932_v42 = vrot.slane %v835_v36, 1  ;;  %v765_v45 = vmul.f32 %v9770_v40, %v9752_v32  ;;  %v766_v47 = vmul.f32 %v9770_v40, %v9746_v30 }
  0xd7   : > { %v934_v43 = vrot.slane %v836_v37, 1  ;;  %v1177_v46 = vrot.slane %v1080_v38, 2  ;;  %v1178_v50 = vrot.slane %v1081_v39, 2  ;;  %v1180_v53 = vrot.slane %v1082_v44, 2 }
  0xd8   : > { %v933_v49 = vsel %vm930_vm1, %v931_v41, %v932_v42  ;;  %v9820_v14 = vmul.f32 %v9789_v59, %v9756_v33 }
  0xd9   : > { %v935_v52 = vsel %vm930_vm1, %v932_v42, %v934_v43  ;;  %v1043_v61 = vadd.f32 %v933_v49, %v765_v45  ;;  %v1179_v0 = vsel %vm1176_vm2, %v1177_v46, %v1178_v50  ;;  %v1181_v1 = vsel %vm1176_vm2, %v1178_v50, %v1180_v53 }
  0xda   : > { %447 = vbcast.lane.b32.xlu1 %v441_v9, 264  ;;  %443 = vbcast.lane.b32.xlu0 %v441_v9, 256  ;;  %v1044_v62 = vadd.f32 %v935_v52, %v766_v47 }
  0xdb   : > { %v1289_v12 = vadd.f32 %v1179_v0, %v1043_v61 }
  0xde   : > { %458 = vbcast.lane.b32.xlu1 %v452_v11, 264  ;;  %454 = vbcast.lane.b32.xlu0 %v452_v11, 256 }
  0xe2   : > { %469 = vbcast.lane.b32.xlu1 %v463_v13, 264  ;;  %465 = vbcast.lane.b32.xlu0 %v463_v13, 256  ;;  %v9816_v13 = vadd.f32 %v1181_v1, %v1044_v62 }
  0xe6   : > { %480 = vbcast.lane.b32.xlu1 %v474_v15, 264  ;;  %476 = vbcast.lane.b32.xlu0 %v474_v15, 256 }
  0xea   : > { %491 = vbcast.lane.b32.xlu1 %v485_v17, 264  ;;  %487 = vbcast.lane.b32.xlu0 %v485_v17, 256 }
  0xee   : > { %502 = vbcast.lane.b32.xlu1 %v496_v19, 264  ;;  %498 = vbcast.lane.b32.xlu0 %v496_v19, 256 }
  0xf2   : > { %513 = vbcast.lane.b32.xlu1 %v507_v21, 264  ;;  %509 = vbcast.lane.b32.xlu0 %v507_v21, 256 }
  0xf6   : > { %524 = vbcast.lane.b32.xlu1 %v518_v22, 264  ;;  %520 = vbcast.lane.b32.xlu0 %v518_v22, 256 }
  0xfa   : > { %535 = vbcast.lane.b32.xlu1 %v529_v23, 264  ;;  %531 = vbcast.lane.b32.xlu0 %v529_v23, 256 }
  0xfe   : > { %546 = vbcast.lane.b32.xlu1 %v540_v24, 264  ;;  %542 = vbcast.lane.b32.xlu0 %v540_v24, 256 }
 0x102   : > { %557 = vbcast.lane.b32.xlu1 %v551_v25, 264  ;;  %553 = vbcast.lane.b32.xlu0 %v551_v25, 256 }
 0x106   : > { %568 = vbcast.lane.b32.xlu1 %v562_v26, 264  ;;  %564 = vbcast.lane.b32.xlu0 %v562_v26, 256 }
 0x10a   : > { %579 = vbcast.lane.b32.xlu1 %v573_v27, 264  ;;  %575 = vbcast.lane.b32.xlu0 %v573_v27, 256 }
 0x10e   : > { %590 = vbcast.lane.b32.xlu1 %v584_v28, 264  ;;  %586 = vbcast.lane.b32.xlu0 %v584_v28, 256 }
 0x144   : > { %v433_v48 = vpop.permute.xlu1 %432  ;;  %v9779_v51 = vpop.permute.xlu0 %421 }
 0x145   : > { %v631_v54 = vrot.slane %v433_v48, 7  ;;  %v628_v55 = vrot.slane %v9779_v51, 7 }
 0x147   : > { %v728_v60 = vsel %vm625_vm0, 0.0, %v631_v54  ;;  %v727_v6 = vsel %vm625_vm0, 0.0, %v628_v55 }
 0x148   : > { %v840_v63 = vmul.f32 %v9748_v31, %v728_v60  ;;  %v1086_v4 = vmul.f32 %v9758_v34, %v728_v60  ;;  %v9801_v5 = vmul.f32 %v9783_v56, %v728_v60  ;;  %v9807_v7 = vmul.f32 %v9785_v57, %v728_v60  ;;  %v437_v10 = vpop.permute.xlu1 %436  ;;  %v426_v41 = vpop.permute.xlu0 %425 }
 0x149   : > { %v9810_v8 = vmul.f32 %v9787_v58, %v728_v60  ;;  %v9813_v9 = vmul.f32 %v9789_v59, %v728_v60  ;;  %v769_v11 = vmul.f32 %v9770_v40, %v728_v60  ;;  %v9823_v16 = vmul.f32 %v9795_v2, %v728_v60 }
 0x14a   : > { %v941_v15 = vrot.slane %v840_v63, 1  ;;  %v9826_v17 = vmul.f32 %v9797_v3, %v728_v60  ;;  %v9829_v18 = vmul.f32 %v9748_v31, %v727_v6  ;;  %v1187_v19 = vrot.slane %v1086_v4, 2 }
 0x14b   : > { %v9833_v21 = vmul.f32 %v9770_v40, %v727_v6  ;;  %v632_v22 = vrot.slane %v437_v10, 7  ;;  %v1742_v23 = vrot.slane %v9807_v7, 2  ;;  %v9839_v26 = vmul.f32 %v9758_v34, %v727_v6 }
 0x14c   : > { %v1327_v27 = vmul.f32 %v9795_v2, %v727_v6  ;;  %v9843_v28 = vmul.f32 %v9783_v56, %v727_v6  ;;  %v936_v36 = vrot.slane %v9829_v18, 1  ;;  %v9864_v46 = vmul.f32 %v9785_v57, %v727_v6  ;;  %v9868_v60 = vpop.permute.xlu1 %447 }
 0x14d   : > { %v9846_v29 = vsel %vm625_vm0, %v631_v54, %v632_v22  ;;  %v745_v35 = vsel %vm625_vm0, %v632_v22, 0.0  ;;  %v1182_v50 = vrot.slane %v9839_v26, 2  ;;  %v629_v54 = vrot.slane %v426_v41, 7 }
 0x14e   : > { %v841_v37 = vmul.f32 %v9748_v31, %v9846_v29  ;;  %v842_v38 = vmul.f32 %v9748_v31, %v745_v35  ;;  %v1087_v39 = vmul.f32 %v9758_v34, %v9846_v29  ;;  %v1088_v42 = vmul.f32 %v9758_v34, %v745_v35 }
 0x14f   : > { %v9858_v43 = vmul.f32 %v9783_v56, %v9846_v29  ;;  %v1401_v44 = vmul.f32 %v9783_v56, %v745_v35  ;;  %v1645_v45 = vmul.f32 %v9785_v57, %v9846_v29  ;;  %v1646_v49 = vmul.f32 %v9785_v57, %v745_v35 }
 0x150   : > { %v942_v47 = vrot.slane %v841_v37, 1  ;;  %v944_v48 = vrot.slane %v842_v38, 1  ;;  %v1359_v52 = vadd.f32 %v1327_v27, %v1289_v12  ;;  %v1188_v53 = vrot.slane %v1087_v39, 2 }
 0x151   : > { %v1492_v61 = vrot.slane %v9843_v28, 1  ;;  %v1190_v62 = vrot.slane %v1088_v42, 2  ;;  %v14784_v63 = vrot.slane %v9858_v43, 1  ;;  %v1500_v0 = vrot.slane %v1401_v44, 1 }
 0x152   : > { %v943_v1 = vsel %vm930_vm1, %v941_v15, %v942_v47  ;;  %v945_v4 = vsel %vm930_vm1, %v942_v47, %v944_v48  ;;  %v1743_v6 = vrot.slane %v1645_v45, 2  ;;  %v1745_v7 = vrot.slane %v1646_v49, 2 }
 0x153   : > { %v770_v10 = vmul.f32 %v9770_v40, %v9846_v29  ;;  %v9878_v12 = vmul.f32 %v9787_v58, %v9846_v29  ;;  %v9881_v18 = vmul.f32 %v9787_v58, %v745_v35  ;;  %v635_v22 = vrot.slane %v9868_v60, 7  ;;  %v9984_v60 = vpop.permute.xlu1 %458 }
 0x154   : > { %v1737_v26 = vrot.slane %v9864_v46, 2  ;;  %v1189_v15 = vsel %vm1176_vm2, %v1187_v19, %v1188_v53  ;;  %v9888_v27 = vmul.f32 %v9789_v59, %v9846_v29  ;;  %v630_v28 = vsel %vm625_vm0, %v628_v55, %v629_v54 }
 0x155   : > { %v1047_v37 = vadd.f32 %v943_v1, %v769_v11  ;;  %v1048_v38 = vadd.f32 %v945_v4, %v770_v10  ;;  %v1191_v39 = vsel %vm1176_vm2, %v1188_v53, %v1190_v62  ;;  %v9897_v41 = vsel %vm930_vm1, %v14784_v63, %v1500_v0 }
 0x156   : > { %v9900_v42 = vsel %vm1176_vm2, %v1742_v23, %v1743_v6  ;;  %v9903_v19 = vsel %vm1176_vm2, %v1743_v6, %v1745_v7  ;;  %v2203_v44 = vmul.f32 %v9789_v59, %v745_v35  ;;  %v744_v51 = vsel %vm625_vm0, %v629_v54, 0.0 }
 0x157   : > { %v2053_v55 = vrot.slane %v9878_v12, 1  ;;  %v2055_v11 = vrot.slane %v9881_v18, 1  ;;  %v1330_v45 = vmul.f32 %v9795_v2, %v9846_v29  ;;  %v838_v46 = vmul.f32 %v9748_v31, %v630_v28 }
 0x158   : > { %v2298_v47 = vrot.slane %v9888_v27, 2  ;;  %v768_v23 = vmul.f32 %v9770_v40, %v630_v28  ;;  %v839_v48 = vmul.f32 %v9748_v31, %v744_v51  ;;  %v1084_v49 = vmul.f32 %v9758_v34, %v630_v28 }
 0x159   : > { %v937_v35 = vrot.slane %v838_v46, 1  ;;  %v1085_v53 = vmul.f32 %v9758_v34, %v744_v51  ;;  %v1328_v54 = vmul.f32 %v9795_v2, %v630_v28  ;;  %v1397_v62 = vmul.f32 %v9783_v56, %v630_v28 }
 0x15a   : > { %v939_v0 = vrot.slane %v839_v48, 1  ;;  %v1183_v1 = vrot.slane %v1084_v49, 2  ;;  %v1398_v4 = vmul.f32 %v9783_v56, %v744_v51  ;;  %v1642_v6 = vmul.f32 %v9785_v57, %v630_v28 }
 0x15b   : > { %v938_v7 = vsel %vm930_vm1, %v936_v36, %v937_v35  ;;  %v1185_v10 = vrot.slane %v1085_v53, 2  ;;  %v1360_v12 = vadd.f32 %v1328_v54, %v9816_v13  ;;  %v1493_v18 = vrot.slane %v1397_v62, 1 }
 0x15c   : > { %v940_v27 = vsel %vm930_vm1, %v937_v35, %v939_v0  ;;  %v1045_v46 = vadd.f32 %v938_v7, %v9833_v21  ;;  %v1184_v24 = vsel %vm1176_vm2, %v1182_v50, %v1183_v1  ;;  %v1495_v25 = vrot.slane %v1398_v4, 1 }
 0x15d   : > { %v1046_v20 = vadd.f32 %v940_v27, %v768_v23  ;;  %v1186_v48 = vsel %vm1176_vm2, %v1183_v1, %v1185_v10  ;;  %v1494_v49 = vsel %vm930_vm1, %v1492_v61, %v1493_v18  ;;  %v1643_v28 = vmul.f32 %v9785_v57, %v744_v51 }
 0x15e   : > { %v1291_v63 = vadd.f32 %v1184_v24, %v1045_v46  ;;  %v1496_v36 = vsel %vm930_vm1, %v1493_v18, %v1495_v25  ;;  %v1604_v53 = vadd.f32 %v1494_v49, %v1359_v52  ;;  %v1738_v13 = vrot.slane %v1642_v6, 2 }
 0x15f   : > { %v1292_v54 = vadd.f32 %v1186_v48, %v1046_v20  ;;  %v1605_v62 = vadd.f32 %v1496_v36, %v1360_v12  ;;  %v1740_v35 = vrot.slane %v1643_v28, 2  ;;  %v746_v21 = vsel %vm625_vm0, %v635_v22, 0.0 }
 0x160   : > { %v9933_v50 = vadd.f32 %v1189_v15, %v1047_v37  ;;  %v9935_v23 = vadd.f32 %v1191_v39, %v1048_v38  ;;  %v2300_v0 = vrot.slane %v2203_v44, 2  ;;  %v1739_v61 = vsel %vm1176_vm2, %v1737_v26, %v1738_v13  ;;  %v444_v39 = vpop.permute.xlu0 %443 }
 0x161   : > { %v1361_v24 = vadd.f32 %v9823_v16, %v1291_v63  ;;  %v1362_v51 = vadd.f32 %v1330_v45, %v1292_v54  ;;  %v1741_v25 = vsel %vm1176_vm2, %v1738_v13, %v1740_v35  ;;  %v1849_v52 = vadd.f32 %v1739_v61, %v1604_v53 }
 0x162   : > { %v14954_v20 = vrot.slane %v9858_v43, 1  ;;  %v14955_v1 = vrot.slane %v9801_v5, 1  ;;  %v1888_v15 = vmul.f32 %v9797_v3, %v9846_v29  ;;  %v1850_v37 = vadd.f32 %v1741_v25, %v1605_v62 }
 0x163   : > { %v845_v38 = vmul.f32 %v9748_v31, %v746_v21  ;;  %v2056_v26 = vsel %vm930_vm1, %v2053_v55, %v2055_v11  ;;  %v14956_v16 = vrot.slane %v9813_v9, 2  ;;  %v14957_v44 = vrot.slane %v9810_v8, 1  ;;  %v9964_v8 = vld [vmem:[#allocation9] ss:$0 sm:$0xff] }
 0x164   : > { %v1499_v4 = vsel %vm930_vm1, %v14955_v1, %v14954_v20  ;;  %v1919_v5 = vadd.f32 %v9826_v17, %v1849_v52  ;;  %v2301_v45 = vsel %vm1176_vm2, %v2298_v47, %v2300_v0  ;;  %v1920_v29 = vadd.f32 %v1888_v15, %v1850_v37 }
 0x165   : > { %v2299_v63 = vsel %vm1176_vm2, %v14956_v16, %v2298_v47  ;;  %v2054_v43 = vsel %vm930_vm1, %v14957_v44, %v2053_v55  ;;  %v9958_v6 = vmul.f32 %v9758_v34, %v746_v21  ;;  %v9961_v7 = vmul.f32 %v9783_v56, %v746_v21 }
 0x166   : > { %v1606_v11 = vadd.f32 %v1499_v4, %v1361_v24  ;;  %v1607_v9 = vadd.f32 %v9897_v41, %v1362_v51  ;;  %v2164_v10 = vadd.f32 %v2054_v43, %v1919_v5  ;;  %v634_v12 = vrot.slane %v444_v39, 7  ;;  %v9994_v24 = vpop.permute.xlu0 %454 }
 0x167   : > { %v2165_v55 = vadd.f32 %v2056_v26, %v1920_v29  ;;  %v949_v18 = vrot.slane %v845_v38, 1  ;;  %v9967_v17 = vmul.f32 %v9785_v57, %v746_v21  ;;  %v1961_v47 = vmul.f32 %v9787_v58, %v746_v21 }
 0x168   : > { %v2409_v27 = vadd.f32 %v2299_v63, %v2164_v10  ;;  %v9971_v46 = vmul.f32 %v9789_v59, %v746_v21  ;;  %v636_v48 = vsel %vm625_vm0, %v634_v12, %v635_v22  ;;  %v729_v41 = vsel %vm625_vm0, 0.0, %v634_v12 }
 0x169   : > { %v2410_v49 = vadd.f32 %v2301_v45, %v2165_v55  ;;  %v1195_v28 = vrot.slane %v9958_v6, 2  ;;  %v1505_v36 = vrot.slane %v9961_v7, 1  ;;  %v843_v53 = vmul.f32 %v9748_v31, %v729_v41 }
 0x16a   : > { %v1851_v13 = vadd.f32 %v9900_v42, %v1606_v11  ;;  %v1852_v54 = vadd.f32 %v9903_v19, %v1607_v9  ;;  %v2448_v62 = vadd.f32 %v9964_v8, %v2409_v27  ;;  %v844_v35 = vmul.f32 %v9748_v31, %v636_v48 }
 0x16b   : > { %v2449_v22 = vadd.f32 %v9964_v8, %v2410_v49  ;;  %v1750_v21 = vrot.slane %v9967_v17, 2  ;;  %v9989_v0 = vmul.f32 %v9758_v34, %v729_v41  ;;  %v9992_v61 = vmul.f32 %v9758_v34, %v636_v48 }
 0x16c   : > { %v2060_v42 = vrot.slane %v1961_v47, 1  ;;  %v2305_v19 = vrot.slane %v9971_v46, 2  ;;  %v946_v51 = vrot.slane %v843_v53, 1  ;;  %v947_v25 = vrot.slane %v844_v35, 1 }
 0x16d   : > { %v2480_v52 = vpack.c.bf16 %v2449_v22, %v2448_v62  ;;  %v1331_v20 = vmul.f32 %v9795_v2, %v729_v41  ;;  %v1402_v1 = vmul.f32 %v9783_v56, %v729_v41  ;;  %v638_v4 = vrot.slane %v9984_v60, 7 }
 0x16e   : > { %v771_v15 = vmul.f32 %v9770_v40, %v729_v41  ;;  %v772_v37 = vmul.f32 %v9770_v40, %v636_v48  ;;  %v1403_v38 = vmul.f32 %v9783_v56, %v636_v48  ;;  %v637_v39 = vrot.slane %v9994_v24, 7 }
 0x16f   : > { %2497 = vst.msk [vmem:[#allocation2] sm:$0xff] %vm2496_vm3, %v2480_v52  ;;  %v1192_v26 = vrot.slane %v9989_v0, 2  ;;  %v1193_v16 = vrot.slane %v9992_v61, 2  ;;  %v1332_v63 = vmul.f32 %v9795_v2, %v636_v48  ;;  %v1363_v44 = vadd.f32 %v1331_v20, %v9933_v50 }
 0x170   : > { %v948_v43 = vsel %vm930_vm1, %v946_v51, %v947_v25  ;;  %v1889_v5 = vmul.f32 %v9797_v3, %v729_v41  ;;  %v1890_v45 = vmul.f32 %v9797_v3, %v636_v48  ;;  %v1959_v29 = vmul.f32 %v9787_v58, %v729_v41 }
 0x171   : > { %v950_v7 = vsel %vm930_vm1, %v947_v25, %v949_v18  ;;  %v1502_v11 = vrot.slane %v1402_v1, 1  ;;  %v1647_v9 = vmul.f32 %v9785_v57, %v729_v41  ;;  %v1960_v10 = vmul.f32 %v9787_v58, %v636_v48 }
 0x172   : > { %v1503_v12 = vrot.slane %v1403_v38, 1  ;;  %v1648_v55 = vmul.f32 %v9785_v57, %v636_v48  ;;  %v1921_v47 = vadd.f32 %v1889_v5, %v1851_v13  ;;  %v1922_v50 = vadd.f32 %v1890_v45, %v1852_v54 }
 0x173   : > { %v2057_v27 = vrot.slane %v1959_v29, 1  ;;  %v2058_v46 = vrot.slane %v1960_v10, 1  ;;  %v2204_v49 = vmul.f32 %v9789_v59, %v729_v41  ;;  %v2205_v53 = vmul.f32 %v9789_v59, %v636_v48 }
 0x174   : > { %v1049_v62 = vadd.f32 %v948_v43, %v771_v15  ;;  %v1050_v35 = vadd.f32 %v950_v7, %v772_v37  ;;  %v1364_v18 = vadd.f32 %v1332_v63, %v9935_v23  ;;  %v747_v60 = vsel %vm625_vm0, %v638_v4, 0.0 }
 0x175   : > { %v2059_v22 = vsel %vm930_vm1, %v2057_v27, %v2058_v46  ;;  %v2061_v0 = vsel %vm930_vm1, %v2058_v46, %v2060_v42  ;;  %v2302_v61 = vrot.slane %v2204_v49, 2  ;;  %v2303_v24 = vrot.slane %v2205_v53, 2 }
 0x176   : > { %v1504_v13 = vsel %vm930_vm1, %v1502_v11, %v1503_v12  ;;  %v1747_v54 = vrot.slane %v1647_v9, 2  ;;  %v2166_v51 = vadd.f32 %v2059_v22, %v1921_v47  ;;  %v2167_v25 = vadd.f32 %v2061_v0, %v1922_v50 }
 0x177   : > { %v1748_v41 = vrot.slane %v1648_v55, 2  ;;  %v2304_v48 = vsel %vm1176_vm2, %v2302_v61, %v2303_v24  ;;  %v2306_v52 = vsel %vm1176_vm2, %v2303_v24, %v2305_v19  ;;  %v848_v23 = vmul.f32 %v9748_v31, %v747_v60 }
 0x178   : > { %v1506_v20 = vsel %vm930_vm1, %v1503_v12, %v1505_v36  ;;  %v2411_v1 = vadd.f32 %v2304_v48, %v2166_v51  ;;  %v2412_v15 = vadd.f32 %v2306_v52, %v2167_v25  ;;  %v10029_v42 = vmul.f32 %v9758_v34, %v747_v60 }
 0x179   : > { %v1608_v37 = vadd.f32 %v1504_v13, %v1363_v44  ;;  %v1609_v38 = vadd.f32 %v1506_v20, %v1364_v18  ;;  %v10032_v63 = vmul.f32 %v9783_v56, %v747_v60  ;;  %v10035_v43 = vmul.f32 %v9785_v57, %v747_v60  ;;  %v10072_v13 = vpop.permute.xlu1 %469 }
 0x17a   : > { %v2450_v5 = vadd.f32 %v9964_v8, %v2411_v1  ;;  %v2451_v19 = vadd.f32 %v9964_v8, %v2412_v15  ;;  %v1194_v45 = vsel %vm1176_vm2, %v1192_v26, %v1193_v16  ;;  %v1196_v36 = vsel %vm1176_vm2, %v1193_v16, %v1195_v28 }
 0x17b   : > { %v954_v29 = vrot.slane %v848_v23, 1  ;;  %v10044_v44 = vmul.f32 %v9787_v58, %v747_v60  ;;  %v10047_v7 = vmul.f32 %v9789_v59, %v747_v60  ;;  %v1749_v11 = vsel %vm1176_vm2, %v1747_v54, %v1748_v41 }
 0x17c   : > { %v2481_v9 = vpack.c.bf16 %v2451_v19, %v2450_v5  ;;  %v1200_v10 = vrot.slane %v10029_v42, 2  ;;  %v639_v12 = vsel %vm625_vm0, %v637_v39, %v638_v4  ;;  %v730_v26 = vsel %vm625_vm0, 0.0, %v637_v39 }
 0x17d   : > { %v1510_v6 = vrot.slane %v10032_v63, 1  ;;  %v1755_v28 = vrot.slane %v10035_v43, 2  ;;  %v846_v16 = vmul.f32 %v9748_v31, %v730_v26  ;;  %v847_v55 = vmul.f32 %v9748_v31, %v639_v12 }
 0x17e   : > { %2498 = vst.msk [vmem:[#allocation2 + $0x8] sm:$0xff] %vm2496_vm3, %v2481_v9  ;;  %v1295_v47 = vadd.f32 %v1194_v45, %v1049_v62  ;;  %v1296_v50 = vadd.f32 %v1196_v36, %v1050_v35  ;;  %v1092_v27 = vmul.f32 %v9758_v34, %v730_v26  ;;  %v10060_v46 = vmul.f32 %v9758_v34, %v639_v12 }
 0x17f   : > { %v2065_v4 = vrot.slane %v10044_v44, 1  ;;  %v2310_v39 = vrot.slane %v10047_v7, 2  ;;  %v951_v49 = vrot.slane %v846_v16, 1  ;;  %v952_v53 = vrot.slane %v847_v55, 1  ;;  %v466_v44 = vpop.permute.xlu0 %465  ;;  %v10087_v55 = vpop.permute.xlu1 %480 }
 0x180   : > { %v1751_v18 = vsel %vm1176_vm2, %v1748_v41, %v1750_v21  ;;  %v1333_v60 = vmul.f32 %v9795_v2, %v730_v26  ;;  %v1405_v62 = vmul.f32 %v9783_v56, %v730_v26  ;;  %v1406_v35 = vmul.f32 %v9783_v56, %v639_v12 }
 0x181   : > { %v1853_v22 = vadd.f32 %v1749_v11, %v1608_v37  ;;  %v1854_v0 = vadd.f32 %v1751_v18, %v1609_v38  ;;  %v773_v61 = vmul.f32 %v9770_v40, %v730_v26  ;;  %v1334_v24 = vmul.f32 %v9795_v2, %v639_v12 }
 0x182   : > { %v774_v54 = vmul.f32 %v9770_v40, %v639_v12  ;;  %v1197_v51 = vrot.slane %v1092_v27, 2  ;;  %v1198_v17 = vrot.slane %v10060_v46, 2  ;;  %v1365_v21 = vadd.f32 %v1333_v60, %v1295_v47 }
 0x183   : > { %v953_v25 = vsel %vm930_vm1, %v951_v49, %v952_v53  ;;  %v955_v41 = vsel %vm930_vm1, %v952_v53, %v954_v29  ;;  %v1366_v48 = vadd.f32 %v1334_v24, %v1296_v50  ;;  %v1891_v52 = vmul.f32 %v9797_v3, %v730_v26 }
 0x184   : > { %v1507_v23 = vrot.slane %v1405_v62, 1  ;;  %v1508_v20 = vrot.slane %v1406_v35, 1  ;;  %v1650_v1 = vmul.f32 %v9785_v57, %v730_v26  ;;  %v1892_v15 = vmul.f32 %v9797_v3, %v639_v12 }
 0x185   : > { %v1651_v37 = vmul.f32 %v9785_v57, %v639_v12  ;;  %v1923_v38 = vadd.f32 %v1891_v52, %v1853_v22  ;;  %v1962_v63 = vmul.f32 %v9787_v58, %v730_v26  ;;  %v1963_v5 = vmul.f32 %v9787_v58, %v639_v12 }
 0x186   : > { %v1924_v19 = vadd.f32 %v1892_v15, %v1854_v0  ;;  %v2207_v45 = vmul.f32 %v9789_v59, %v730_v26  ;;  %v2208_v36 = vmul.f32 %v9789_v59, %v639_v12  ;;  %v641_v29 = vrot.slane %v10072_v13, 7 }
 0x187   : > { %v1051_v7 = vadd.f32 %v953_v25, %v773_v61  ;;  %v1052_v11 = vadd.f32 %v955_v41, %v774_v54  ;;  %v2062_v9 = vrot.slane %v1962_v63, 1  ;;  %v2063_v16 = vrot.slane %v1963_v5, 1  ;;  %v10107_v25 = vpop.permute.xlu0 %476 }
 0x188   : > { %v1509_v47 = vsel %vm930_vm1, %v1507_v23, %v1508_v20  ;;  %v2307_v50 = vrot.slane %v2207_v45, 2  ;;  %v2308_v27 = vrot.slane %v2208_v36, 2  ;;  %v748_v46 = vsel %vm625_vm0, %v641_v29, 0.0  ;;  %v10112_v23 = vpop.permute.xlu1 %491 }
 0x189   : > { %v1511_v49 = vsel %vm930_vm1, %v1508_v20, %v1510_v6  ;;  %v1752_v26 = vrot.slane %v1650_v1, 2  ;;  %v2064_v12 = vsel %vm930_vm1, %v2062_v9, %v2063_v16  ;;  %v2066_v53 = vsel %vm930_vm1, %v2063_v16, %v2065_v4 }
 0x18a   : > { %v1753_v18 = vrot.slane %v1651_v37, 2  ;;  %v2168_v60 = vadd.f32 %v2064_v12, %v1923_v38  ;;  %v2169_v62 = vadd.f32 %v2066_v53, %v1924_v19  ;;  %v1199_v35 = vsel %vm1176_vm2, %v1197_v51, %v1198_v17 }
 0x18b   : > { %v2309_v22 = vsel %vm1176_vm2, %v2307_v50, %v2308_v27  ;;  %v2311_v0 = vsel %vm1176_vm2, %v2308_v27, %v2310_v39  ;;  %v851_v61 = vmul.f32 %v9748_v31, %v748_v46  ;;  %v10099_v24 = vmul.f32 %v9758_v34, %v748_v46 }
 0x18c   : > { %v2413_v6 = vadd.f32 %v2309_v22, %v2168_v60  ;;  %v2414_v13 = vadd.f32 %v2311_v0, %v2169_v62  ;;  %v10102_v54 = vmul.f32 %v9783_v56, %v748_v46  ;;  %v10105_v4 = vmul.f32 %v9785_v57, %v748_v46  ;;  %v10145_v27 = vpop.permute.xlu1 %502 }
 0x18d   : > { %v1610_v51 = vadd.f32 %v1509_v47, %v1365_v21  ;;  %v1611_v41 = vadd.f32 %v1511_v49, %v1366_v48  ;;  %v1201_v39 = vsel %vm1176_vm2, %v1198_v17, %v1200_v10  ;;  %v1297_v52 = vadd.f32 %v1199_v35, %v1051_v7  ;;  %v10137_v47 = vpop.permute.xlu0 %487 }
 0x18e   : > { %v2452_v20 = vadd.f32 %v9964_v8, %v2413_v6  ;;  %v2453_v1 = vadd.f32 %v9964_v8, %v2414_v13  ;;  %v10117_v15 = vmul.f32 %v9787_v58, %v748_v46  ;;  %v10120_v37 = vmul.f32 %v9789_v59, %v748_v46 }
 0x18f   : > { %v959_v38 = vrot.slane %v851_v61, 1  ;;  %v1205_v21 = vrot.slane %v10099_v24, 2  ;;  %v1298_v48 = vadd.f32 %v1201_v39, %v1052_v11  ;;  %v640_v42 = vrot.slane %v466_v44, 7 }
 0x190   : > { %v2482_v63 = vpack.c.bf16 %v2453_v1, %v2452_v20  ;;  %v1515_v10 = vrot.slane %v10102_v54, 1  ;;  %v1760_v17 = vrot.slane %v10105_v4, 2  ;;  %v1754_v5 = vsel %vm1176_vm2, %v1752_v26, %v1753_v18 }
 0x191   : > { %v1756_v19 = vsel %vm1176_vm2, %v1753_v18, %v1755_v28  ;;  %v642_v45 = vsel %vm625_vm0, %v640_v42, %v641_v29  ;;  %v731_v36 = vsel %vm625_vm0, 0.0, %v640_v42  ;;  %v644_v7 = vrot.slane %v10087_v55, 7 }
 0x192   : > { %2499 = vst.msk [vmem:[#allocation2 + $0x10] sm:$0xff] %vm2496_vm3, %v2482_v63  ;;  %v2070_v44 = vrot.slane %v10117_v15, 1  ;;  %v2315_v11 = vrot.slane %v10120_v37, 2  ;;  %v849_v9 = vmul.f32 %v9748_v31, %v731_v36  ;;  %v850_v16 = vmul.f32 %v9748_v31, %v642_v45 }
 0x193   : > { %v1855_v43 = vadd.f32 %v1754_v5, %v1610_v51  ;;  %v1856_v28 = vadd.f32 %v1756_v19, %v1611_v41  ;;  %v10140_v29 = vmul.f32 %v9758_v34, %v731_v36  ;;  %v10143_v50 = vmul.f32 %v9758_v34, %v642_v45 }
 0x194   : > { %v956_v46 = vrot.slane %v849_v9, 1  ;;  %v957_v49 = vrot.slane %v850_v16, 1  ;;  %v1408_v26 = vmul.f32 %v9783_v56, %v731_v36  ;;  %v1409_v12 = vmul.f32 %v9783_v56, %v642_v45 }
 0x195   : > { %v749_v53 = vsel %vm625_vm0, %v644_v7, 0.0  ;;  %v643_v18 = vrot.slane %v10107_v25, 7  ;;  %v647_v60 = vrot.slane %v10112_v23, 7  ;;  %v646_v62 = vrot.slane %v10137_v47, 7 }
 0x196   : > { %v775_v35 = vmul.f32 %v9770_v40, %v731_v36  ;;  %v958_v22 = vsel %vm930_vm1, %v956_v46, %v957_v49  ;;  %v1335_v0 = vmul.f32 %v9795_v2, %v731_v36  ;;  %v650_v61 = vrot.slane %v10145_v27, 7 }
 0x197   : > { %v776_v6 = vmul.f32 %v9770_v40, %v642_v45  ;;  %v960_v13 = vsel %vm930_vm1, %v957_v49, %v959_v38  ;;  %v1202_v54 = vrot.slane %v10140_v29, 2  ;;  %v1336_v25 = vmul.f32 %v9795_v2, %v642_v45 }
 0x198   : > { %v1203_v51 = vrot.slane %v10143_v50, 2  ;;  %v1367_v41 = vadd.f32 %v1335_v0, %v1297_v52  ;;  %v1512_v39 = vrot.slane %v1408_v26, 1  ;;  %v1513_v20 = vrot.slane %v1409_v12, 1 }
 0x199   : > { %v1053_v1 = vadd.f32 %v958_v22, %v775_v35  ;;  %v1368_v15 = vadd.f32 %v1336_v25, %v1298_v48  ;;  %v1893_v37 = vmul.f32 %v9797_v3, %v731_v36  ;;  %v1894_v42 = vmul.f32 %v9797_v3, %v642_v45 }
 0x19a   : > { %v1054_v63 = vadd.f32 %v960_v13, %v776_v6  ;;  %v1653_v5 = vmul.f32 %v9785_v57, %v731_v36  ;;  %v1965_v38 = vmul.f32 %v9787_v58, %v731_v36  ;;  %v1966_v19 = vmul.f32 %v9787_v58, %v642_v45 }
 0x19b   : > { %v1925_v9 = vadd.f32 %v1893_v37, %v1855_v43  ;;  %v1926_v16 = vadd.f32 %v1894_v42, %v1856_v28  ;;  %v2210_v29 = vmul.f32 %v9789_v59, %v731_v36  ;;  %v2211_v52 = vmul.f32 %v9789_v59, %v642_v45 }
 0x19c   : > { %v1514_v50 = vsel %vm930_vm1, %v1512_v39, %v1513_v20  ;;  %v1654_v48 = vmul.f32 %v9785_v57, %v642_v45  ;;  %v2067_v46 = vrot.slane %v1965_v38, 1  ;;  %v2068_v49 = vrot.slane %v1966_v19, 1 }
 0x19d   : > { %v1516_v26 = vsel %vm930_vm1, %v1513_v20, %v1515_v10  ;;  %v2312_v12 = vrot.slane %v2210_v29, 2  ;;  %v2313_v35 = vrot.slane %v2211_v52, 2  ;;  %v854_v22 = vmul.f32 %v9748_v31, %v749_v53 }
 0x19e   : > { %v2069_v0 = vsel %vm930_vm1, %v2067_v46, %v2068_v49  ;;  %v2071_v43 = vsel %vm930_vm1, %v2068_v49, %v2070_v44  ;;  %v10178_v36 = vmul.f32 %v9758_v34, %v749_v53  ;;  %v10181_v28 = vmul.f32 %v9783_v56, %v749_v53 }
 0x19f   : > { %v1612_v6 = vadd.f32 %v1514_v50, %v1367_v41  ;;  %v2170_v45 = vadd.f32 %v2069_v0, %v1925_v9  ;;  %v2171_v13 = vadd.f32 %v2071_v43, %v1926_v16  ;;  %v10184_v25 = vmul.f32 %v9785_v57, %v749_v53 }
 0x1a0   : > { %v1613_v10 = vadd.f32 %v1516_v26, %v1368_v15  ;;  %v1757_v39 = vrot.slane %v1653_v5, 2  ;;  %v2314_v20 = vsel %vm1176_vm2, %v2312_v12, %v2313_v35  ;;  %v2316_v37 = vsel %vm1176_vm2, %v2313_v35, %v2315_v11 }
 0x1a1   : > { %v1758_v42 = vrot.slane %v1654_v48, 2  ;;  %v2415_v44 = vadd.f32 %v2314_v20, %v2170_v45  ;;  %v2416_v38 = vadd.f32 %v2316_v37, %v2171_v13  ;;  %v10189_v19 = vmul.f32 %v9787_v58, %v749_v53 }
 0x1a2   : > { %v964_v29 = vrot.slane %v854_v22, 1  ;;  %v1210_v41 = vrot.slane %v10178_v36, 2  ;;  %v1520_v9 = vrot.slane %v10181_v28, 1  ;;  %v10194_v16 = vmul.f32 %v9789_v59, %v749_v53 }
 0x1a3   : > { %v2454_v15 = vadd.f32 %v9964_v8, %v2415_v44  ;;  %v2455_v5 = vadd.f32 %v9964_v8, %v2416_v38  ;;  %v1765_v11 = vrot.slane %v10184_v25, 2  ;;  %v1204_v52 = vsel %vm1176_vm2, %v1202_v54, %v1203_v51 }
 0x1a4   : > { %v1206_v50 = vsel %vm1176_vm2, %v1203_v51, %v1205_v21  ;;  %v1299_v48 = vadd.f32 %v1204_v52, %v1053_v1  ;;  %v645_v46 = vsel %vm625_vm0, %v643_v18, %v644_v7  ;;  %v732_v53 = vsel %vm625_vm0, 0.0, %v643_v18 }
 0x1a5   : > { %v2483_v49 = vpack.c.bf16 %v2455_v5, %v2454_v15  ;;  %v2075_v26 = vrot.slane %v10189_v19, 1  ;;  %v1300_v12 = vadd.f32 %v1206_v50, %v1054_v63  ;;  %v852_v35 = vmul.f32 %v9748_v31, %v732_v53 }
 0x1a6   : > { %v2320_v22 = vrot.slane %v10194_v16, 2  ;;  %v853_v54 = vmul.f32 %v9748_v31, %v645_v46  ;;  %v10212_v24 = vmul.f32 %v9758_v34, %v732_v53  ;;  %v10215_v21 = vmul.f32 %v9758_v34, %v645_v46 }
 0x1a7   : > { %2500 = vst.msk [vmem:[#allocation2 + $0x18] sm:$0xff] %vm2496_vm3, %v2483_v49  ;;  %v1759_v55 = vsel %vm1176_vm2, %v1757_v39, %v1758_v42  ;;  %v1761_v7 = vsel %vm1176_vm2, %v1758_v42, %v1760_v17  ;;  %v961_v18 = vrot.slane %v852_v35, 1  ;;  %v1411_v51 = vmul.f32 %v9783_v56, %v732_v53 }
 0x1a8   : > { %v1857_v1 = vadd.f32 %v1759_v55, %v1612_v6  ;;  %v1858_v63 = vadd.f32 %v1761_v7, %v1613_v10  ;;  %v962_v0 = vrot.slane %v853_v54, 1  ;;  %v1412_v43 = vmul.f32 %v9783_v56, %v645_v46 }
 0x1a9   : > { %v1337_v45 = vmul.f32 %v9795_v2, %v732_v53  ;;  %v1338_v13 = vmul.f32 %v9795_v2, %v645_v46  ;;  %v750_v39 = vsel %vm625_vm0, %v647_v60, 0.0  ;;  %v10234_v4 = vsel %vm625_vm0, %v646_v62, %v647_v60 }
 0x1aa   : > { %v777_v17 = vmul.f32 %v9770_v40, %v732_v53  ;;  %v778_v6 = vmul.f32 %v9770_v40, %v645_v46  ;;  %v1207_v10 = vrot.slane %v10212_v24, 2  ;;  %v1208_v20 = vrot.slane %v10215_v21, 2 }
 0x1ab   : > { %v963_v37 = vsel %vm930_vm1, %v961_v18, %v962_v0  ;;  %v1369_v42 = vadd.f32 %v1337_v45, %v1299_v48  ;;  %v1370_v44 = vadd.f32 %v1338_v13, %v1300_v12  ;;  %v1517_v38 = vrot.slane %v1411_v51, 1 }
 0x1ac   : > { %v965_v23 = vsel %vm930_vm1, %v962_v0, %v964_v29  ;;  %v1518_v19 = vrot.slane %v1412_v43, 1  ;;  %v1656_v16 = vmul.f32 %v9785_v57, %v732_v53  ;;  %v1895_v60 = vmul.f32 %v9797_v3, %v732_v53 }
 0x1ad   : > { %v1657_v15 = vmul.f32 %v9785_v57, %v645_v46  ;;  %v1896_v40 = vmul.f32 %v9797_v3, %v645_v46  ;;  %v1968_v5 = vmul.f32 %v9787_v58, %v732_v53  ;;  %v1969_v52 = vmul.f32 %v9787_v58, %v645_v46 }
 0x1ae   : > { %v1055_v50 = vadd.f32 %v963_v37, %v777_v17  ;;  %v1927_v49 = vadd.f32 %v1895_v60, %v1857_v1  ;;  %v2213_v48 = vmul.f32 %v9789_v59, %v732_v53  ;;  %v2214_v12 = vmul.f32 %v9789_v59, %v645_v46 }
 0x1af   : > { %v1056_v29 = vadd.f32 %v965_v23, %v778_v6  ;;  %v1928_v35 = vadd.f32 %v1896_v40, %v1858_v63  ;;  %v2072_v54 = vrot.slane %v1968_v5, 1  ;;  %v2073_v24 = vrot.slane %v1969_v52, 1 }
 0x1b0   : > { %v1519_v21 = vsel %vm930_vm1, %v1517_v38, %v1518_v19  ;;  %v2317_v55 = vrot.slane %v2213_v48, 2  ;;  %v2318_v7 = vrot.slane %v2214_v12, 2  ;;  %v857_v18 = vmul.f32 %v9748_v31, %v750_v39 }
 0x1b1   : > { %v2074_v51 = vsel %vm930_vm1, %v2072_v54, %v2073_v24  ;;  %v2076_v0 = vsel %vm930_vm1, %v2073_v24, %v2075_v26  ;;  %v10255_v1 = vmul.f32 %v9758_v34, %v750_v39  ;;  %v10258_v53 = vmul.f32 %v9783_v56, %v750_v39 }
 0x1b2   : > { %v1521_v46 = vsel %vm930_vm1, %v1518_v19, %v1520_v9  ;;  %v2172_v63 = vadd.f32 %v2074_v51, %v1927_v49  ;;  %v2173_v43 = vadd.f32 %v2076_v0, %v1928_v35  ;;  %v10264_v45 = vmul.f32 %v9785_v57, %v750_v39 }
 0x1b3   : > { %v1614_v13 = vadd.f32 %v1519_v21, %v1369_v42  ;;  %v1615_v17 = vadd.f32 %v1521_v46, %v1370_v44  ;;  %v2319_v6 = vsel %vm1176_vm2, %v2317_v55, %v2318_v7  ;;  %v2321_v26 = vsel %vm1176_vm2, %v2318_v7, %v2320_v22  ;;  %v10308_v21 = vpop.permute.xlu0 %498  ;;  %v10310_v55 = vld [vmem:[#allocation7] ss:$0 sm:$0xff] }
 0x1b4   : > { %v1762_v37 = vrot.slane %v1656_v16, 2  ;;  %v2417_v38 = vadd.f32 %v2319_v6, %v2172_v63  ;;  %v2418_v23 = vadd.f32 %v2321_v26, %v2173_v43  ;;  %v10269_v60 = vmul.f32 %v9787_v58, %v750_v39 }
 0x1b5   : > { %v1763_v28 = vrot.slane %v1657_v15, 2  ;;  %v969_v40 = vrot.slane %v857_v18, 1  ;;  %v1215_v9 = vrot.slane %v10255_v1, 2  ;;  %v1525_v19 = vrot.slane %v10258_v53, 1  ;;  %v10361_v53 = vld [vmem:[#allocation7 + $0x5] ss:$0 sm:$0xff] }
 0x1b6   : > { %v2456_v57 = vadd.f32 %v9964_v8, %v2417_v38  ;;  %v2457_v42 = vadd.f32 %v9964_v8, %v2418_v23  ;;  %v1770_v44 = vrot.slane %v10264_v45, 2  ;;  %v10277_v22 = vmul.f32 %v9789_v59, %v750_v39 }
 0x1b7   : > { %v1209_v16 = vsel %vm1176_vm2, %v1207_v10, %v1208_v20  ;;  %v1211_v15 = vsel %vm1176_vm2, %v1208_v20, %v1210_v41  ;;  %v733_v5 = vsel %vm625_vm0, 0.0, %v646_v62  ;;  %v856_v52 = vmul.f32 %v9748_v31, %v10234_v4  ;;  %v10294_v41 = vld [vmem:[#allocation7 + $0x2] ss:$0 sm:$0xff] }
 0x1b8   : > { %v2484_v49 = vpack.c.bf16 %v2457_v42, %v2456_v57  ;;  %v2080_v48 = vrot.slane %v10269_v60, 1  ;;  %v1301_v12 = vadd.f32 %v1209_v16, %v1055_v50  ;;  %v855_v59 = vmul.f32 %v9748_v31, %v733_v5  ;;  %v10326_v60 = vld [vmem:[#allocation7 + $0x9] ss:$0 sm:$0xff]  ;;  %v10330_v57 = vld [vmem:[#allocation7 + $0xa] ss:$0 sm:$0xff]  ;;  %v10340_v16 = vpop.permute.xlu0 %509 }
 0x1b9   : > { %v1764_v39 = vsel %vm1176_vm2, %v1762_v37, %v1763_v28  ;;  %v967_v10 = vrot.slane %v856_v52, 1  ;;  %v10292_v36 = vmul.f32 %v9758_v34, %v733_v5  ;;  %v10298_v47 = vmul.f32 %v10294_v41, %v10234_v4  ;;  %v10343_v52 = vld [vmem:[#allocation7 + $0x6] ss:$0 sm:$0xff] }
 0x1ba   : > { %2501 = vst.msk [vmem:[#allocation2 + $0x20] sm:$0xff] %vm2496_vm3, %v2484_v49  ;;  %v1766_v62 = vsel %vm1176_vm2, %v1763_v28, %v1765_v11  ;;  %v966_v20 = vrot.slane %v855_v59, 1  ;;  %v1414_v31 = vmul.f32 %v9783_v56, %v733_v5  ;;  %v1415_v50 = vmul.f32 %v9783_v56, %v10234_v4 }
 0x1bb   : > { %v2325_v34 = vrot.slane %v10277_v22, 2  ;;  %v1302_v35 = vadd.f32 %v1211_v15, %v1056_v29  ;;  %v1859_v54 = vadd.f32 %v1764_v39, %v1614_v13  ;;  %v1860_v24 = vadd.f32 %v1766_v62, %v1615_v17  ;;  %v10338_v22 = vpop.permute.xlu1 %513 }
 0x1bc   : > { %v779_v7 = vmul.f32 %v10310_v55, %v733_v5  ;;  %v780_v25 = vmul.f32 %v10310_v55, %v10234_v4  ;;  %v970_v11 = vsel %vm930_vm1, %v967_v10, %v969_v40  ;;  %v1339_v18 = vmul.f32 %v9795_v2, %v733_v5 }
 0x1bd   : > { %v968_v56 = vsel %vm930_vm1, %v966_v20, %v967_v10  ;;  %v1212_v51 = vrot.slane %v10292_v36, 2  ;;  %v1213_v29 = vrot.slane %v10298_v47, 2  ;;  %v1340_v0 = vmul.f32 %v9795_v2, %v10234_v4 }
 0x1be   : > { %v1522_v46 = vrot.slane %v1414_v31, 1  ;;  %v1523_v63 = vrot.slane %v1415_v50, 1  ;;  %v1897_v43 = vmul.f32 %v9797_v3, %v733_v5  ;;  %v1971_v13 = vmul.f32 %v9787_v58, %v733_v5  ;;  %v10353_v31 = vld [vmem:[#allocation7 + $0x1] ss:$0 sm:$0xff] }
 0x1bf   : > { %v1058_v17 = vadd.f32 %v970_v11, %v780_v25  ;;  %v1371_v6 = vadd.f32 %v1339_v18, %v1301_v12  ;;  %v1372_v26 = vadd.f32 %v1340_v0, %v1302_v35  ;;  %v1898_v37 = vmul.f32 %v9797_v3, %v10234_v4 }
 0x1c0   : > { %v1057_v38 = vadd.f32 %v968_v56, %v779_v7  ;;  %v1929_v23 = vadd.f32 %v1897_v43, %v1859_v54  ;;  %v1972_v28 = vmul.f32 %v10326_v60, %v10234_v4  ;;  %v2077_v2 = vrot.slane %v1971_v13, 1 }
 0x1c1   : > { %v1930_v40 = vadd.f32 %v1898_v37, %v1860_v24  ;;  %v2216_v42 = vmul.f32 %v10330_v57, %v733_v5  ;;  %v2217_v58 = vmul.f32 %v10330_v57, %v10234_v4  ;;  %v751_v3 = vsel %vm625_vm0, %v650_v61, 0.0 }
 0x1c2   : > { %v1524_v15 = vsel %vm930_vm1, %v1522_v46, %v1523_v63  ;;  %v1659_v49 = vmul.f32 %v10343_v52, %v733_v5  ;;  %v1660_v12 = vmul.f32 %v10343_v52, %v10234_v4  ;;  %v2078_v59 = vrot.slane %v1972_v28, 1  ;;  %v10377_v46 = vpop.permute.xlu1 %524 }
 0x1c3   : > { %v1526_v39 = vsel %vm930_vm1, %v1523_v63, %v1525_v19  ;;  %v1616_v10 = vadd.f32 %v1524_v15, %v1371_v6  ;;  %v2322_v36 = vrot.slane %v2216_v42, 2  ;;  %v2323_v47 = vrot.slane %v2217_v58, 2  ;;  %v10379_v63 = vpop.permute.xlu0 %520 }
 0x1c4   : > { %v2079_v62 = vsel %vm930_vm1, %v2077_v2, %v2078_v59  ;;  %v2081_v20 = vsel %vm930_vm1, %v2078_v59, %v2080_v48  ;;  %v10356_v50 = vmul.f32 %v10353_v31, %v751_v3  ;;  %v10359_v5 = vmul.f32 %v10294_v41, %v751_v3 }
 0x1c5   : > { %v2174_v4 = vadd.f32 %v2079_v62, %v1929_v23  ;;  %v2175_v35 = vadd.f32 %v2081_v20, %v1930_v40  ;;  %v10364_v19 = vmul.f32 %v10361_v53, %v751_v3  ;;  %v10367_v54 = vmul.f32 %v10343_v52, %v751_v3 }
 0x1c6   : > { %v1767_v24 = vrot.slane %v1659_v49, 2  ;;  %v2324_v48 = vsel %vm1176_vm2, %v2322_v36, %v2323_v47  ;;  %v2326_v7 = vsel %vm1176_vm2, %v2323_v47, %v2325_v34  ;;  %v10372_v25 = vmul.f32 %v10326_v60, %v751_v3  ;;  %v10407_v45 = vpop.permute.xlu1 %535 }
 0x1c7   : > { %v1768_v11 = vrot.slane %v1660_v12, 2  ;;  %v2419_v18 = vadd.f32 %v2324_v48, %v2174_v4  ;;  %v2420_v56 = vadd.f32 %v2326_v7, %v2175_v35  ;;  %v10375_v0 = vmul.f32 %v10330_v57, %v751_v3  ;;  %v10426_v7 = vld [vmem:[#allocation7 + $0x4] ss:$0 sm:$0xff] }
 0x1c8   : > { %v1617_v43 = vadd.f32 %v1526_v39, %v1372_v26  ;;  %v974_v13 = vrot.slane %v10356_v50, 1  ;;  %v1220_v6 = vrot.slane %v10359_v5, 2  ;;  %v1214_v34 = vsel %vm1176_vm2, %v1212_v51, %v1213_v29 }
 0x1c9   : > { %v2458_v37 = vadd.f32 %v9964_v8, %v2419_v18  ;;  %v2459_v23 = vadd.f32 %v9964_v8, %v2420_v56  ;;  %v1530_v28 = vrot.slane %v10364_v19, 1  ;;  %v1775_v2 = vrot.slane %v10367_v54, 2 }
 0x1ca   : > { %v2085_v40 = vrot.slane %v10372_v25, 1  ;;  %v1216_v26 = vsel %vm1176_vm2, %v1213_v29, %v1215_v9  ;;  %v1303_v42 = vadd.f32 %v1214_v34, %v1057_v38  ;;  %v649_v58 = vrot.slane %v10308_v21, 7 }
 0x1cb   : > { %v2485_v3 = vpack.c.bf16 %v2459_v23, %v2458_v37  ;;  %v2330_v51 = vrot.slane %v10375_v0, 2  ;;  %v1304_v15 = vadd.f32 %v1216_v26, %v1058_v17  ;;  %v1769_v49 = vsel %vm1176_vm2, %v1767_v24, %v1768_v11 }
 0x1cc   : > { %v1771_v12 = vsel %vm1176_vm2, %v1768_v11, %v1770_v44  ;;  %v651_v59 = vsel %vm625_vm0, %v649_v58, %v650_v61  ;;  %v734_v1 = vsel %vm625_vm0, 0.0, %v649_v58  ;;  %v653_v9 = vrot.slane %v10338_v22, 7  ;;  %v10409_v44 = vpop.permute.xlu0 %531 }
 0x1cd   : > { %2502 = vst.msk [vmem:[#allocation2 + $0x28] sm:$0xff] %vm2496_vm3, %v2485_v3  ;;  %v1861_v21 = vadd.f32 %v1769_v49, %v1616_v10  ;;  %v858_v29 = vmul.f32 %v10353_v31, %v734_v1  ;;  %v859_v17 = vmul.f32 %v10353_v31, %v651_v59  ;;  %v652_v38 = vrot.slane %v10340_v16, 7 }
 0x1ce   : > { %v1862_v27 = vadd.f32 %v1771_v12, %v1617_v43  ;;  %v10412_v61 = vmul.f32 %v10294_v41, %v734_v1  ;;  %v10415_v39 = vmul.f32 %v10294_v41, %v651_v59  ;;  %v656_v22 = vrot.slane %v10377_v46, 7 }
 0x1cf   : > { %v971_v10 = vrot.slane %v858_v29, 1  ;;  %v972_v36 = vrot.slane %v859_v17, 1  ;;  %v1417_v47 = vmul.f32 %v10361_v53, %v734_v1  ;;  %v1418_v62 = vmul.f32 %v10361_v53, %v651_v59  ;;  %v10439_v29 = vld [vmem:[#allocation7 + $0x8] ss:$0 sm:$0xff] }
 0x1d0   : > { %v752_v20 = vsel %vm625_vm0, %v653_v9, 0.0  ;;  %v655_v50 = vrot.slane %v10379_v63, 7  ;;  %v781_v24 = vmul.f32 %v10310_v55, %v734_v1  ;;  %v1341_v11 = vmul.f32 %v10426_v7, %v734_v1 }
 0x1d1   : > { %v973_v48 = vsel %vm930_vm1, %v971_v10, %v972_v36  ;;  %v10432_v18 = vsel %vm625_vm0, %v652_v38, %v653_v9  ;;  %v782_v56 = vmul.f32 %v10310_v55, %v651_v59  ;;  %v975_v43 = vsel %vm930_vm1, %v972_v36, %v974_v13 }
 0x1d2   : > { %v1217_v34 = vrot.slane %v10412_v61, 2  ;;  %v1342_v37 = vmul.f32 %v10426_v7, %v651_v59  ;;  %v1218_v23 = vrot.slane %v10415_v39, 2  ;;  %v1373_v26 = vadd.f32 %v1341_v11, %v1303_v42 }
 0x1d3   : > { %v1527_v58 = vrot.slane %v1417_v47, 1  ;;  %v1528_v3 = vrot.slane %v1418_v62, 1  ;;  %v1059_v49 = vadd.f32 %v973_v48, %v781_v24  ;;  %v1899_v9 = vmul.f32 %v10439_v29, %v734_v1 }
 0x1d4   : > { %v1374_v12 = vadd.f32 %v1342_v37, %v1304_v15  ;;  %v1900_v17 = vmul.f32 %v10439_v29, %v651_v59  ;;  %v1060_v10 = vadd.f32 %v975_v43, %v782_v56  ;;  %v1662_v13 = vmul.f32 %v10343_v52, %v734_v1 }
 0x1d5   : > { %v1974_v61 = vmul.f32 %v10326_v60, %v734_v1  ;;  %v1975_v36 = vmul.f32 %v10326_v60, %v651_v59  ;;  %v1931_v35 = vadd.f32 %v1899_v9, %v1861_v21  ;;  %v2219_v42 = vmul.f32 %v10330_v57, %v734_v1 }
 0x1d6   : > { %v1932_v39 = vadd.f32 %v1900_v17, %v1862_v27  ;;  %v2220_v47 = vmul.f32 %v10330_v57, %v651_v59  ;;  %v1529_v15 = vsel %vm930_vm1, %v1527_v58, %v1528_v3  ;;  %v1663_v62 = vmul.f32 %v10343_v52, %v651_v59 }
 0x1d7   : > { %v2082_v24 = vrot.slane %v1974_v61, 1  ;;  %v2083_v48 = vrot.slane %v1975_v36, 1  ;;  %v2327_v11 = vrot.slane %v2219_v42, 2  ;;  %v863_v43 = vmul.f32 %v10353_v31, %v752_v20 }
 0x1d8   : > { %v2328_v56 = vrot.slane %v2220_v47, 2  ;;  %v10452_v37 = vmul.f32 %v10294_v41, %v752_v20  ;;  %v10459_v27 = vmul.f32 %v10361_v53, %v752_v20  ;;  %v10462_v59 = vmul.f32 %v10343_v52, %v752_v20 }
 0x1d9   : > { %v2084_v21 = vsel %vm930_vm1, %v2082_v24, %v2083_v48  ;;  %v2086_v1 = vsel %vm930_vm1, %v2083_v48, %v2085_v40  ;;  %v1531_v58 = vsel %vm930_vm1, %v1528_v3, %v1530_v28  ;;  %v1618_v9 = vadd.f32 %v1529_v15, %v1373_v26 }
 0x1da   : > { %v2176_v17 = vadd.f32 %v2084_v21, %v1931_v35  ;;  %v2177_v61 = vadd.f32 %v2086_v1, %v1932_v39  ;;  %v1619_v36 = vadd.f32 %v1531_v58, %v1374_v12  ;;  %v1772_v42 = vrot.slane %v1662_v13, 2 }
 0x1db   : > { %v2329_v47 = vsel %vm1176_vm2, %v2327_v11, %v2328_v56  ;;  %v2331_v25 = vsel %vm1176_vm2, %v2328_v56, %v2330_v51  ;;  %v1773_v40 = vrot.slane %v1663_v62, 2  ;;  %v10472_v4 = vmul.f32 %v10326_v60, %v752_v20 }
 0x1dc   : > { %v2421_v24 = vadd.f32 %v2329_v47, %v2176_v17  ;;  %v2422_v48 = vadd.f32 %v2331_v25, %v2177_v61  ;;  %v979_v19 = vrot.slane %v863_v43, 1  ;;  %v1225_v28 = vrot.slane %v10452_v37, 2 }
 0x1dd   : > { %v1535_v35 = vrot.slane %v10459_v27, 1  ;;  %v1780_v26 = vrot.slane %v10462_v59, 2  ;;  %v10480_v0 = vmul.f32 %v10330_v57, %v752_v20  ;;  %v1219_v51 = vsel %vm1176_vm2, %v1217_v34, %v1218_v23 }
 0x1de   : > { %v2460_v3 = vadd.f32 %v9964_v8, %v2421_v24  ;;  %v2461_v12 = vadd.f32 %v9964_v8, %v2422_v48  ;;  %v1221_v13 = vsel %vm1176_vm2, %v1218_v23, %v1220_v6  ;;  %v1305_v39 = vadd.f32 %v1219_v51, %v1059_v49 }
 0x1df   : > { %v735_v15 = vsel %vm625_vm0, 0.0, %v652_v38  ;;  %v862_v62 = vmul.f32 %v10353_v31, %v10432_v18  ;;  %v2090_v8 = vrot.slane %v10472_v4, 1  ;;  %v1306_v56 = vadd.f32 %v1221_v13, %v1060_v10 }
 0x1e0   : > { %v2486_v11 = vpack.c.bf16 %v2461_v12, %v2460_v3  ;;  %v861_v20 = vmul.f32 %v10353_v31, %v735_v15  ;;  %v1774_v34 = vsel %vm1176_vm2, %v1772_v42, %v1773_v40  ;;  %v1107_v5 = vmul.f32 %v10294_v41, %v735_v15 }
 0x1e1   : > { %v977_v43 = vrot.slane %v862_v62, 1  ;;  %v1108_v6 = vmul.f32 %v10294_v41, %v10432_v18  ;;  %v1776_v16 = vsel %vm1176_vm2, %v1773_v40, %v1775_v2  ;;  %v1420_v4 = vmul.f32 %v10361_v53, %v735_v15 }
 0x1e2   : > { %2503 = vst.msk [vmem:[#allocation2 + $0x30] sm:$0xff] %vm2496_vm3, %v2486_v11  ;;  %v976_v38 = vrot.slane %v861_v20, 1  ;;  %v1421_v23 = vmul.f32 %v10361_v53, %v10432_v18  ;;  %v2335_v49 = vrot.slane %v10480_v0, 2  ;;  %v1863_v10 = vadd.f32 %v1774_v34, %v1618_v9 }
 0x1e3   : > { %v1864_v21 = vadd.f32 %v1776_v16, %v1619_v36  ;;  %v1343_v1 = vmul.f32 %v10426_v7, %v735_v15  ;;  %v783_v27 = vmul.f32 %v10310_v55, %v735_v15  ;;  %v784_v58 = vmul.f32 %v10310_v55, %v10432_v18 }
 0x1e4   : > { %v980_v54 = vsel %vm930_vm1, %v977_v43, %v979_v19  ;;  %v1344_v2 = vmul.f32 %v10426_v7, %v10432_v18  ;;  %v978_v17 = vsel %vm930_vm1, %v976_v38, %v977_v43  ;;  %v1222_v61 = vrot.slane %v1107_v5, 2 }
 0x1e5   : > { %v1223_v42 = vrot.slane %v1108_v6, 2  ;;  %v1375_v47 = vadd.f32 %v1343_v1, %v1305_v39  ;;  %v1532_v9 = vrot.slane %v1420_v4, 1  ;;  %v1533_v36 = vrot.slane %v1421_v23, 1 }
 0x1e6   : > { %v1376_v25 = vadd.f32 %v1344_v2, %v1306_v56  ;;  %v1977_v40 = vmul.f32 %v10326_v60, %v735_v15  ;;  %v1062_v24 = vadd.f32 %v980_v54, %v784_v58  ;;  %v1665_v48 = vmul.f32 %v10343_v52, %v735_v15 }
 0x1e7   : > { %v1901_v3 = vmul.f32 %v10439_v29, %v735_v15  ;;  %v1902_v19 = vmul.f32 %v10439_v29, %v10432_v18  ;;  %v1061_v12 = vadd.f32 %v978_v17, %v783_v27  ;;  %v1978_v0 = vmul.f32 %v10326_v60, %v10432_v18 }
 0x1e8   : > { %v2087_v51 = vrot.slane %v1977_v40, 1  ;;  %v2222_v13 = vmul.f32 %v10330_v57, %v735_v15  ;;  %v2223_v11 = vmul.f32 %v10330_v57, %v10432_v18  ;;  %v753_v56 = vsel %vm625_vm0, %v656_v22, 0.0 }
 0x1e9   : > { %v1933_v39 = vadd.f32 %v1901_v3, %v1863_v10  ;;  %v1934_v62 = vadd.f32 %v1902_v19, %v1864_v21  ;;  %v1534_v20 = vsel %vm930_vm1, %v1532_v9, %v1533_v36  ;;  %v1666_v34 = vmul.f32 %v10343_v52, %v10432_v18 }
 0x1ea   : > { %v2088_v43 = vrot.slane %v1978_v0, 1  ;;  %v2332_v5 = vrot.slane %v2222_v13, 2  ;;  %v1536_v6 = vsel %vm930_vm1, %v1533_v36, %v1535_v35  ;;  %v1620_v16 = vadd.f32 %v1534_v20, %v1375_v47 }
 0x1eb   : > { %v1777_v15 = vrot.slane %v1665_v48, 2  ;;  %v2333_v38 = vrot.slane %v2223_v11, 2  ;;  %v866_v10 = vmul.f32 %v10353_v31, %v753_v56  ;;  %v10534_v21 = vmul.f32 %v10294_v41, %v753_v56 }
 0x1ec   : > { %v2089_v4 = vsel %vm930_vm1, %v2087_v51, %v2088_v43  ;;  %v2091_v23 = vsel %vm930_vm1, %v2088_v43, %v2090_v8  ;;  %v10537_v18 = vmul.f32 %v10361_v53, %v753_v56  ;;  %v10540_v58 = vmul.f32 %v10343_v52, %v753_v56 }
 0x1ed   : > { %v2178_v1 = vadd.f32 %v2089_v4, %v1933_v39  ;;  %v2179_v27 = vadd.f32 %v2091_v23, %v1934_v62  ;;  %v1621_v35 = vadd.f32 %v1536_v6, %v1376_v25  ;;  %v2334_v54 = vsel %vm1176_vm2, %v2332_v5, %v2333_v38  ;;  %v10557_v25 = vld [vmem:[#allocation9] ss:$0 sm:$0xff] }
 0x1ee   : > { %v2336_v2 = vsel %vm1176_vm2, %v2333_v38, %v2335_v49  ;;  %v10545_v8 = vmul.f32 %v10326_v60, %v753_v56  ;;  %v1778_v17 = vrot.slane %v1666_v34, 2  ;;  %v1224_v36 = vsel %vm1176_vm2, %v1222_v61, %v1223_v42 }
 0x1ef   : > { %v2423_v47 = vadd.f32 %v2334_v54, %v2178_v1  ;;  %v2424_v9 = vadd.f32 %v2336_v2, %v2179_v27  ;;  %v984_v40 = vrot.slane %v866_v10, 1  ;;  %v1230_v48 = vrot.slane %v10534_v21, 2 }
 0x1f0   : > { %v1226_v3 = vsel %vm1176_vm2, %v1223_v42, %v1225_v28  ;;  %v657_v49 = vsel %vm625_vm0, %v655_v50, %v656_v22  ;;  %v1540_v61 = vrot.slane %v10537_v18, 1  ;;  %v1785_v51 = vrot.slane %v10540_v58, 2 }
 0x1f1   : > { %v2462_v19 = vadd.f32 %v10557_v25, %v2423_v47  ;;  %v2463_v0 = vadd.f32 %v10557_v25, %v2424_v9  ;;  %v2095_v37 = vrot.slane %v10545_v8, 1  ;;  %v10565_v28 = vmul.f32 %v10330_v57, %v753_v56 }
 0x1f2   : > { %v736_v46 = vsel %vm625_vm0, 0.0, %v655_v50  ;;  %v865_v22 = vmul.f32 %v10353_v31, %v657_v49  ;;  %v1307_v13 = vadd.f32 %v1224_v36, %v1061_v12  ;;  %v1308_v39 = vadd.f32 %v1226_v3, %v1062_v24 }
 0x1f3   : > { %v2487_v42 = vpack.c.bf16 %v2463_v0, %v2462_v19  ;;  %v864_v62 = vmul.f32 %v10353_v31, %v736_v46  ;;  %v1779_v11 = vsel %vm1176_vm2, %v1777_v15, %v1778_v17  ;;  %v1110_v34 = vmul.f32 %v10294_v41, %v736_v46 }
 0x1f4   : > { %v982_v20 = vrot.slane %v865_v22, 1  ;;  %v1111_v43 = vmul.f32 %v10294_v41, %v657_v49  ;;  %v1781_v63 = vsel %vm1176_vm2, %v1778_v17, %v1780_v26  ;;  %v1423_v56 = vmul.f32 %v10361_v53, %v736_v46 }
 0x1f5   : > { %2504 = vst.msk [vmem:[#allocation2 + $0x38] sm:$0xff] %vm2496_vm3, %v2487_v42  ;;  %v981_v50 = vrot.slane %v864_v62, 1  ;;  %v1424_v24 = vmul.f32 %v10361_v53, %v657_v49  ;;  %v2340_v12 = vrot.slane %v10565_v28, 2  ;;  %v1865_v5 = vadd.f32 %v1779_v11, %v1620_v16 }
 0x1f6   : > { %v1866_v6 = vadd.f32 %v1781_v63, %v1621_v35  ;;  %v1345_v15 = vmul.f32 %v10426_v7, %v736_v46  ;;  %v785_v38 = vmul.f32 %v10310_v55, %v736_v46  ;;  %v786_v4 = vmul.f32 %v10310_v55, %v657_v49 }
 0x1f7   : > { %v985_v23 = vsel %vm930_vm1, %v982_v20, %v984_v40  ;;  %v1346_v59 = vmul.f32 %v10426_v7, %v657_v49  ;;  %v983_v26 = vsel %vm930_vm1, %v981_v50, %v982_v20  ;;  %v1227_v10 = vrot.slane %v1110_v34, 2 }
 0x1f8   : > { %v1228_v1 = vrot.slane %v1111_v43, 2  ;;  %v1377_v27 = vadd.f32 %v1345_v15, %v1307_v13  ;;  %v1537_v54 = vrot.slane %v1423_v56, 1  ;;  %v1538_v2 = vrot.slane %v1424_v24, 1 }
 0x1f9   : > { %v1378_v18 = vadd.f32 %v1346_v59, %v1308_v39  ;;  %v1980_v16 = vmul.f32 %v10326_v60, %v736_v46  ;;  %v1064_v35 = vadd.f32 %v985_v23, %v786_v4  ;;  %v1668_v8 = vmul.f32 %v10343_v52, %v736_v46 }
 0x1fa   : > { %v1903_v17 = vmul.f32 %v10439_v29, %v736_v46  ;;  %v1904_v47 = vmul.f32 %v10439_v29, %v657_v49  ;;  %v1063_v9 = vadd.f32 %v983_v26, %v785_v38  ;;  %v1981_v36 = vmul.f32 %v10326_v60, %v657_v49 }
 0x1fb   : > { %v2092_v40 = vrot.slane %v1980_v16, 1  ;;  %v2225_v3 = vmul.f32 %v10330_v57, %v736_v46  ;;  %v2226_v28 = vmul.f32 %v10330_v57, %v657_v49  ;;  %v14958_v22 = vrot.slane %v10407_v45, 7 }
 0x1fc   : > { %v1935_v19 = vadd.f32 %v1903_v17, %v1865_v5  ;;  %v1936_v0 = vadd.f32 %v1904_v47, %v1866_v6  ;;  %v1539_v13 = vsel %vm930_vm1, %v1537_v54, %v1538_v2  ;;  %v1669_v39 = vmul.f32 %v10343_v52, %v657_v49 }
 0x1fd   : > { %v754_v42 = vsel %vm625_vm0, %v14958_v22, 0.0  ;;  %v2093_v62 = vrot.slane %v1981_v36, 1  ;;  %v2337_v11 = vrot.slane %v2225_v3, 2  ;;  %v1541_v20 = vsel %vm930_vm1, %v1538_v2, %v1540_v61 }
 0x1fe   : > { %v1622_v34 = vadd.f32 %v1539_v13, %v1377_v27  ;;  %v1782_v43 = vrot.slane %v1668_v8, 2  ;;  %v2338_v63 = vrot.slane %v2226_v28, 2  ;;  %v1623_v46 = vadd.f32 %v1541_v20, %v1378_v18 }
 0x1ff   : > { %v2094_v50 = vsel %vm930_vm1, %v2092_v40, %v2093_v62  ;;  %v2096_v56 = vsel %vm930_vm1, %v2093_v62, %v2095_v37  ;;  %v869_v24 = vmul.f32 %v10353_v31, %v754_v42  ;;  %v10605_v15 = vmul.f32 %v10294_v41, %v754_v42 }
 0x200   : > { %v2180_v5 = vadd.f32 %v2094_v50, %v1935_v19  ;;  %v2181_v6 = vadd.f32 %v2096_v56, %v1936_v0  ;;  %v10608_v49 = vmul.f32 %v10361_v53, %v754_v42  ;;  %v2339_v61 = vsel %vm1176_vm2, %v2337_v11, %v2338_v63  ;;  %v10654_v56 = vpop.permute.xlu1 %546 }
 0x201   : > { %v2341_v38 = vsel %vm1176_vm2, %v2338_v63, %v2340_v12  ;;  %v10613_v4 = vmul.f32 %v10343_v52, %v754_v42  ;;  %v10616_v23 = vmul.f32 %v10326_v60, %v754_v42  ;;  %v1783_v37 = vrot.slane %v1669_v39, 2 }
 0x202   : > { %v2425_v59 = vadd.f32 %v2339_v61, %v2180_v5  ;;  %v2426_v26 = vadd.f32 %v2341_v38, %v2181_v6  ;;  %v1229_v27 = vsel %vm1176_vm2, %v1227_v10, %v1228_v1  ;;  %v989_v18 = vrot.slane %v869_v24, 1  ;;  %v10656_v24 = vpop.permute.xlu0 %542 }
 0x203   : > { %v10620_v54 = vmul.f32 %v10330_v57, %v754_v42  ;;  %v1231_v2 = vsel %vm1176_vm2, %v1228_v1, %v1230_v48  ;;  %v14959_v12 = vmov %v14958_v22  ;;  %v14960_v16 = vrot.slane %v10409_v44, 7 }
 0x204   : > { %v2464_v17 = vadd.f32 %v10557_v25, %v2425_v59  ;;  %v2465_v47 = vadd.f32 %v10557_v25, %v2426_v26  ;;  %v1235_v10 = vrot.slane %v10605_v15, 2  ;;  %v1545_v36 = vrot.slane %v10608_v49, 1 }
 0x205   : > { %v660_v8 = vsel %vm625_vm0, %v14960_v16, %v14959_v12  ;;  %v1790_v40 = vrot.slane %v10613_v4, 2  ;;  %v2100_v21 = vrot.slane %v10616_v23, 1  ;;  %v14961_v48 = vmov %v14960_v16 }
 0x206   : > { %v737_v45 = vsel %vm625_vm0, 0.0, %v14961_v48  ;;  %v868_v1 = vmul.f32 %v10353_v31, %v660_v8  ;;  %v2488_v3 = vpack.c.bf16 %v2465_v47, %v2464_v17  ;;  %v1309_v19 = vadd.f32 %v1229_v27, %v1063_v9 }
 0x207   : > { %v1310_v0 = vadd.f32 %v1231_v2, %v1064_v35  ;;  %v867_v28 = vmul.f32 %v10353_v31, %v737_v45  ;;  %v2345_v22 = vrot.slane %v10620_v54, 2  ;;  %v1113_v13 = vmul.f32 %v10294_v41, %v737_v45 }
 0x208   : > { %v987_v42 = vrot.slane %v868_v1, 1  ;;  %v1114_v39 = vmul.f32 %v10294_v41, %v660_v8  ;;  %2505 = vst.msk [vmem:[#allocation2 + $0x40] sm:$0xff] %vm2496_vm3, %v2488_v3  ;;  %v1784_v44 = vsel %vm1176_vm2, %v1782_v43, %v1783_v37  ;;  %v1786_v62 = vsel %vm1176_vm2, %v1783_v37, %v1785_v51  ;;  %v10670_v3 = vpop.permute.xlu1 %557 }
 0x209   : > { %v986_v11 = vrot.slane %v867_v28, 1  ;;  %v1347_v35 = vmul.f32 %v10426_v7, %v737_v45  ;;  %v1348_v20 = vmul.f32 %v10426_v7, %v660_v8  ;;  %v1426_v63 = vmul.f32 %v10361_v53, %v737_v45 }
 0x20a   : > { %v990_v9 = vsel %vm930_vm1, %v987_v42, %v989_v18  ;;  %v1427_v50 = vmul.f32 %v10361_v53, %v660_v8  ;;  %v1867_v43 = vadd.f32 %v1784_v44, %v1622_v34  ;;  %v1868_v5 = vadd.f32 %v1786_v62, %v1623_v46 }
 0x20b   : > { %v787_v58 = vmul.f32 %v10310_v55, %v737_v45  ;;  %v788_v51 = vmul.f32 %v10310_v55, %v660_v8  ;;  %v1232_v6 = vrot.slane %v1113_v13, 2  ;;  %v1233_v49 = vrot.slane %v1114_v39, 2 }
 0x20c   : > { %v1379_v61 = vadd.f32 %v1347_v35, %v1309_v19  ;;  %v1380_v38 = vadd.f32 %v1348_v20, %v1310_v0  ;;  %v988_v23 = vsel %vm930_vm1, %v986_v11, %v987_v42  ;;  %v1671_v59 = vmul.f32 %v10343_v52, %v737_v45  ;;  %v10672_v19 = vpop.permute.xlu0 %553  ;;  %v10695_v15 = vpop.permute.xlu1 %568 }
 0x20d   : > { %v1066_v37 = vadd.f32 %v990_v9, %v788_v51  ;;  %v1983_v26 = vmul.f32 %v10326_v60, %v737_v45  ;;  %v1542_v27 = vrot.slane %v1426_v63, 1  ;;  %v1543_v18 = vrot.slane %v1427_v50, 1 }
 0x20e   : > { %v1905_v34 = vmul.f32 %v10439_v29, %v737_v45  ;;  %v1906_v46 = vmul.f32 %v10439_v29, %v660_v8  ;;  %v1672_v54 = vmul.f32 %v10343_v52, %v660_v8  ;;  %v1984_v2 = vmul.f32 %v10326_v60, %v660_v8 }
 0x20f   : > { %v2097_v12 = vrot.slane %v1983_v26, 1  ;;  %v2228_v16 = vmul.f32 %v10330_v57, %v737_v45  ;;  %v2229_v48 = vmul.f32 %v10330_v57, %v660_v8  ;;  %v662_v1 = vrot.slane %v10654_v56, 7 }
 0x210   : > { %v1937_v17 = vadd.f32 %v1905_v34, %v1867_v43  ;;  %v1938_v47 = vadd.f32 %v1906_v46, %v1868_v5  ;;  %v1065_v0 = vadd.f32 %v988_v23, %v787_v58  ;;  %v1787_v28 = vrot.slane %v1671_v59, 2 }
 0x211   : > { %v2098_v42 = vrot.slane %v1984_v2, 1  ;;  %v2342_v13 = vrot.slane %v2228_v16, 2  ;;  %v1544_v39 = vsel %vm930_vm1, %v1542_v27, %v1543_v18  ;;  %v1546_v44 = vsel %vm930_vm1, %v1543_v18, %v1545_v36 }
 0x212   : > { %v2343_v62 = vrot.slane %v2229_v48, 2  ;;  %v755_v45 = vsel %vm625_vm0, %v662_v1, 0.0  ;;  %v1624_v11 = vadd.f32 %v1544_v39, %v1379_v61  ;;  %v1788_v35 = vrot.slane %v1672_v54, 2 }
 0x213   : > { %v2099_v8 = vsel %vm930_vm1, %v2097_v12, %v2098_v42  ;;  %v2101_v9 = vsel %vm930_vm1, %v2098_v42, %v2100_v21  ;;  %v1234_v50 = vsel %vm1176_vm2, %v1232_v6, %v1233_v49  ;;  %v1236_v56 = vsel %vm1176_vm2, %v1233_v49, %v1235_v10  ;;  %v10697_v10 = vpop.permute.xlu0 %564 }
 0x214   : > { %v2182_v20 = vadd.f32 %v2099_v8, %v1937_v17  ;;  %v2183_v63 = vadd.f32 %v2101_v9, %v1938_v47  ;;  %v2344_v43 = vsel %vm1176_vm2, %v2342_v13, %v2343_v62  ;;  %v2346_v36 = vsel %vm1176_vm2, %v2343_v62, %v2345_v22  ;;  %v10723_v13 = vpop.permute.xlu1 %579 }
 0x215   : > { %v872_v5 = vmul.f32 %v10353_v31, %v755_v45  ;;  %v10687_v58 = vmul.f32 %v10294_v41, %v755_v45  ;;  %v10690_v21 = vmul.f32 %v10361_v53, %v755_v45  ;;  %v10693_v6 = vmul.f32 %v10343_v52, %v755_v45 }
 0x216   : > { %v2427_v51 = vadd.f32 %v2344_v43, %v2182_v20  ;;  %v2428_v61 = vadd.f32 %v2346_v36, %v2183_v63  ;;  %v1625_v49 = vadd.f32 %v1546_v44, %v1380_v38  ;;  %v1311_v23 = vadd.f32 %v1234_v50, %v1065_v0 }
 0x217   : > { %v1312_v22 = vadd.f32 %v1236_v56, %v1066_v37  ;;  %v1789_v59 = vsel %vm1176_vm2, %v1787_v28, %v1788_v35  ;;  %v10703_v18 = vmul.f32 %v10326_v60, %v755_v45  ;;  %v1791_v34 = vsel %vm1176_vm2, %v1788_v35, %v1790_v40  ;;  %v10725_v39 = vpop.permute.xlu0 %575 }
 0x218   : > { %v2466_v26 = vadd.f32 %v10557_v25, %v2427_v51  ;;  %v2467_v27 = vadd.f32 %v10557_v25, %v2428_v61  ;;  %v994_v46 = vrot.slane %v872_v5, 1  ;;  %v1240_v54 = vrot.slane %v10687_v58, 2 }
 0x219   : > { %v10710_v38 = vmul.f32 %v10330_v57, %v755_v45  ;;  %v661_v37 = vrot.slane %v10656_v24, 7  ;;  %v1550_v12 = vrot.slane %v10690_v21, 1  ;;  %v1795_v16 = vrot.slane %v10693_v6, 2 }
 0x21a   : > { %v2489_v2 = vpack.c.bf16 %v2467_v27, %v2466_v26  ;;  %v1869_v17 = vadd.f32 %v1789_v59, %v1624_v11  ;;  %v1870_v47 = vadd.f32 %v1791_v34, %v1625_v49  ;;  %v665_v40 = vrot.slane %v10670_v3, 7 }
 0x21b   : > { %v663_v48 = vsel %vm625_vm0, %v661_v37, %v662_v1  ;;  %v738_v4 = vsel %vm625_vm0, 0.0, %v661_v37  ;;  %v2105_v0 = vrot.slane %v10703_v18, 1  ;;  %v664_v42 = vrot.slane %v10672_v19, 7 }
 0x21c   : > { %2506 = vst.msk [vmem:[#allocation2 + $0x48] sm:$0xff] %vm2496_vm3, %v2489_v2  ;;  %v870_v28 = vmul.f32 %v10353_v31, %v738_v4  ;;  %v871_v24 = vmul.f32 %v10353_v31, %v663_v48  ;;  %v2350_v1 = vrot.slane %v10710_v38, 2  ;;  %v10729_v44 = vmul.f32 %v10294_v41, %v738_v4 }
 0x21d   : > { %v10732_v3 = vmul.f32 %v10294_v41, %v663_v48  ;;  %v668_v62 = vrot.slane %v10695_v15, 7  ;;  %v1429_v35 = vmul.f32 %v10361_v53, %v738_v4  ;;  %v1430_v8 = vmul.f32 %v10361_v53, %v663_v48 }
 0x21e   : > { %v991_v45 = vrot.slane %v870_v28, 1  ;;  %v992_v11 = vrot.slane %v871_v24, 1  ;;  %v756_v9 = vsel %vm625_vm0, %v665_v40, 0.0  ;;  %v667_v20 = vrot.slane %v10697_v10, 7  ;;  %v10900_v10 = vld [vmem:[#allocation7 + $0x1] ss:$0 sm:$0xff] }
 0x21f   : > { %v789_v56 = vmul.f32 %v10310_v55, %v738_v4  ;;  %v1349_v36 = vmul.f32 %v10426_v7, %v738_v4  ;;  %v10747_v5 = vsel %vm625_vm0, %v664_v42, %v665_v40  ;;  %v790_v51 = vmul.f32 %v10310_v55, %v663_v48 }
 0x220   : > { %v993_v43 = vsel %vm930_vm1, %v991_v45, %v992_v11  ;;  %v995_v61 = vsel %vm930_vm1, %v992_v11, %v994_v46  ;;  %v1237_v49 = vrot.slane %v10729_v44, 2  ;;  %v1350_v59 = vmul.f32 %v10426_v7, %v663_v48 }
 0x221   : > { %v1238_v26 = vrot.slane %v10732_v3, 2  ;;  %v1381_v27 = vadd.f32 %v1349_v36, %v1311_v23  ;;  %v1547_v18 = vrot.slane %v1429_v35, 1  ;;  %v1548_v34 = vrot.slane %v1430_v8, 1 }
 0x222   : > { %v1067_v38 = vadd.f32 %v993_v43, %v789_v56  ;;  %v1382_v37 = vadd.f32 %v1350_v59, %v1312_v22  ;;  %v1907_v2 = vmul.f32 %v10439_v29, %v738_v4  ;;  %v1908_v40 = vmul.f32 %v10439_v29, %v663_v48 }
 0x223   : > { %v1068_v28 = vadd.f32 %v995_v61, %v790_v51  ;;  %v1674_v24 = vmul.f32 %v10343_v52, %v738_v4  ;;  %v1986_v46 = vmul.f32 %v10326_v60, %v738_v4  ;;  %v1987_v44 = vmul.f32 %v10326_v60, %v663_v48 }
 0x224   : > { %v1939_v45 = vadd.f32 %v1907_v2, %v1869_v17  ;;  %v1940_v11 = vadd.f32 %v1908_v40, %v1870_v47  ;;  %v2231_v3 = vmul.f32 %v10330_v57, %v738_v4  ;;  %v2232_v23 = vmul.f32 %v10330_v57, %v663_v48 }
 0x225   : > { %v1549_v35 = vsel %vm930_vm1, %v1547_v18, %v1548_v34  ;;  %v1675_v22 = vmul.f32 %v10343_v52, %v663_v48  ;;  %v2102_v8 = vrot.slane %v1986_v46, 1  ;;  %v2103_v56 = vrot.slane %v1987_v44, 1 }
 0x226   : > { %v2347_v43 = vrot.slane %v2231_v3, 2  ;;  %v2348_v36 = vrot.slane %v2232_v23, 2  ;;  %v875_v51 = vmul.f32 %v10353_v31, %v756_v9  ;;  %v10765_v61 = vmul.f32 %v10294_v41, %v756_v9 }
 0x227   : > { %v2104_v17 = vsel %vm930_vm1, %v2102_v8, %v2103_v56  ;;  %v2106_v47 = vsel %vm930_vm1, %v2103_v56, %v2105_v0  ;;  %v10770_v4 = vmul.f32 %v10361_v53, %v756_v9  ;;  %v10773_v59 = vmul.f32 %v10343_v52, %v756_v9 }
 0x228   : > { %v1551_v48 = vsel %vm930_vm1, %v1548_v34, %v1550_v12  ;;  %v1626_v18 = vadd.f32 %v1549_v35, %v1381_v27  ;;  %v2184_v2 = vadd.f32 %v2104_v17, %v1939_v45  ;;  %v2185_v40 = vadd.f32 %v2106_v47, %v1940_v11 }
 0x229   : > { %v1627_v46 = vadd.f32 %v1551_v48, %v1382_v37  ;;  %v1792_v44 = vrot.slane %v1674_v24, 2  ;;  %v2349_v3 = vsel %vm1176_vm2, %v2347_v43, %v2348_v36  ;;  %v2351_v23 = vsel %vm1176_vm2, %v2348_v36, %v2350_v1 }
 0x22a   : > { %v1793_v0 = vrot.slane %v1675_v22, 2  ;;  %v2429_v8 = vadd.f32 %v2349_v3, %v2184_v2  ;;  %v2430_v56 = vadd.f32 %v2351_v23, %v2185_v40  ;;  %v10781_v50 = vmul.f32 %v10326_v60, %v756_v9 }
 0x22b   : > { %v999_v63 = vrot.slane %v875_v51, 1  ;;  %v1245_v21 = vrot.slane %v10765_v61, 2  ;;  %v1555_v12 = vrot.slane %v10770_v4, 1  ;;  %v1800_v27 = vrot.slane %v10773_v59, 2 }
 0x22c   : > { %v2468_v34 = vadd.f32 %v10557_v25, %v2429_v8  ;;  %v2469_v37 = vadd.f32 %v10557_v25, %v2430_v56  ;;  %v10789_v24 = vmul.f32 %v10330_v57, %v756_v9  ;;  %v1239_v1 = vsel %vm1176_vm2, %v1237_v49, %v1238_v26 }
 0x22d   : > { %v1241_v45 = vsel %vm1176_vm2, %v1238_v26, %v1240_v54  ;;  %v1313_v11 = vadd.f32 %v1239_v1, %v1067_v38  ;;  %v739_v35 = vsel %vm625_vm0, 0.0, %v664_v42  ;;  %v874_v22 = vmul.f32 %v10353_v31, %v10747_v5 }
 0x22e   : > { %v2490_v43 = vpack.c.bf16 %v2469_v37, %v2468_v34  ;;  %v2110_v36 = vrot.slane %v10781_v50, 1  ;;  %v1314_v51 = vadd.f32 %v1241_v45, %v1068_v28  ;;  %v873_v9 = vmul.f32 %v10353_v31, %v739_v35 }
 0x22f   : > { %v1794_v49 = vsel %vm1176_vm2, %v1792_v44, %v1793_v0  ;;  %v997_v17 = vrot.slane %v874_v22, 1  ;;  %v1119_v58 = vmul.f32 %v10294_v41, %v739_v35  ;;  %v10806_v54 = vmul.f32 %v10294_v41, %v10747_v5 }
 0x230   : > { %2507 = vst.msk [vmem:[#allocation2 + $0x50] sm:$0xff] %vm2496_vm3, %v2490_v43  ;;  %v1796_v19 = vsel %vm1176_vm2, %v1793_v0, %v1795_v16  ;;  %v996_v42 = vrot.slane %v873_v9, 1  ;;  %v1432_v50 = vmul.f32 %v10361_v53, %v739_v35  ;;  %v1433_v26 = vmul.f32 %v10361_v53, %v10747_v5 }
 0x231   : > { %v2355_v38 = vrot.slane %v10789_v24, 2  ;;  %v1871_v28 = vadd.f32 %v1794_v49, %v1626_v18  ;;  %v1872_v47 = vadd.f32 %v1796_v19, %v1627_v46  ;;  %v1351_v4 = vmul.f32 %v10426_v7, %v739_v35 }
 0x232   : > { %v791_v41 = vmul.f32 %v10310_v55, %v739_v35  ;;  %v792_v48 = vmul.f32 %v10310_v55, %v10747_v5  ;;  %v1000_v6 = vsel %vm930_vm1, %v997_v17, %v999_v63  ;;  %v1352_v16 = vmul.f32 %v10426_v7, %v10747_v5 }
 0x233   : > { %v998_v2 = vsel %vm930_vm1, %v996_v42, %v997_v17  ;;  %v1242_v40 = vrot.slane %v1119_v58, 2  ;;  %v1243_v44 = vrot.slane %v10806_v54, 2  ;;  %v1383_v3 = vadd.f32 %v1351_v4, %v1313_v11 }
 0x234   : > { %v1384_v18 = vadd.f32 %v1352_v16, %v1314_v51  ;;  %v1552_v46 = vrot.slane %v1432_v50, 1  ;;  %v1553_v23 = vrot.slane %v1433_v26, 1  ;;  %v1989_v0 = vmul.f32 %v10326_v60, %v739_v35  ;;  %v10847_v50 = vld [vmem:[#allocation7 + $0x2] ss:$0 sm:$0xff] }
 0x235   : > { %v1070_v8 = vadd.f32 %v1000_v6, %v792_v48  ;;  %v1677_v56 = vmul.f32 %v10343_v52, %v739_v35  ;;  %v1909_v55 = vmul.f32 %v10439_v29, %v739_v35  ;;  %v1910_v63 = vmul.f32 %v10439_v29, %v10747_v5 }
 0x236   : > { %v1069_v34 = vadd.f32 %v998_v2, %v791_v41  ;;  %v1990_v37 = vmul.f32 %v10326_v60, %v10747_v5  ;;  %v2107_v24 = vrot.slane %v1989_v0, 1  ;;  %v2234_v1 = vmul.f32 %v10330_v57, %v739_v35 }
 0x237   : > { %v1941_v45 = vadd.f32 %v1909_v55, %v1871_v28  ;;  %v1942_v11 = vadd.f32 %v1910_v63, %v1872_v47  ;;  %v2235_v22 = vmul.f32 %v10330_v57, %v10747_v5  ;;  %v757_v43 = vsel %vm625_vm0, %v668_v62, 0.0 }
 0x238   : > { %v1554_v51 = vsel %vm930_vm1, %v1552_v46, %v1553_v23  ;;  %v1678_v9 = vmul.f32 %v10343_v52, %v10747_v5  ;;  %v2108_v49 = vrot.slane %v1990_v37, 1  ;;  %v2352_v17 = vrot.slane %v2234_v1, 2  ;;  %v10868_v46 = vld [vmem:[#allocation7 + $0xa] ss:$0 sm:$0xff] }
 0x239   : > { %v1556_v60 = vsel %vm930_vm1, %v1553_v23, %v1555_v12  ;;  %v1628_v58 = vadd.f32 %v1554_v51, %v1383_v3  ;;  %v1797_v35 = vrot.slane %v1677_v56, 2  ;;  %v2353_v54 = vrot.slane %v2235_v22, 2 }
 0x23a   : > { %v2109_v19 = vsel %vm930_vm1, %v2107_v24, %v2108_v49  ;;  %v2111_v57 = vsel %vm930_vm1, %v2108_v49, %v2110_v36  ;;  %v10845_v42 = vmul.f32 %v10353_v31, %v757_v43  ;;  %v10850_v26 = vmul.f32 %v10847_v50, %v757_v43  ;;  %v10860_v31 = vld [vmem:[#allocation7 + $0x9] ss:$0 sm:$0xff] }
 0x23b   : > { %v1629_v5 = vadd.f32 %v1556_v60, %v1384_v18  ;;  %v2186_v28 = vadd.f32 %v2109_v19, %v1941_v45  ;;  %v2187_v47 = vadd.f32 %v2111_v57, %v1942_v11  ;;  %v10853_v12 = vmul.f32 %v10361_v53, %v757_v43  ;;  %v10894_v11 = vld [vmem:[#allocation7] ss:$0 sm:$0xff] }
 0x23c   : > { %v2354_v4 = vsel %vm1176_vm2, %v2352_v17, %v2353_v54  ;;  %v2356_v41 = vsel %vm1176_vm2, %v2353_v54, %v2355_v38  ;;  %v10858_v36 = vmul.f32 %v10343_v52, %v757_v43  ;;  %v10863_v48 = vmul.f32 %v10860_v31, %v757_v43 }
 0x23d   : > { %v1798_v6 = vrot.slane %v1678_v9, 2  ;;  %v2431_v16 = vadd.f32 %v2354_v4, %v2186_v28  ;;  %v2432_v2 = vadd.f32 %v2356_v41, %v2187_v47  ;;  %v1244_v3 = vsel %vm1176_vm2, %v1242_v40, %v1243_v44  ;;  %v10914_v9 = vld [vmem:[#allocation7 + $0x6] ss:$0 sm:$0xff] }
 0x23e   : > { %v1004_v53 = vrot.slane %v10845_v42, 1  ;;  %v1250_v18 = vrot.slane %v10850_v26, 2  ;;  %v10871_v38 = vmul.f32 %v10868_v46, %v757_v43  ;;  %v1246_v52 = vsel %vm1176_vm2, %v1243_v44, %v1245_v21 }
 0x23f   : > { %v2470_v23 = vadd.f32 %v10557_v25, %v2431_v16  ;;  %v2471_v0 = vadd.f32 %v10557_v25, %v2432_v2  ;;  %v1560_v56 = vrot.slane %v10853_v12, 1  ;;  %v669_v40 = vsel %vm625_vm0, %v667_v20, %v668_v62 }
 0x240   : > { %v1805_v55 = vrot.slane %v10858_v36, 2  ;;  %v2115_v63 = vrot.slane %v10863_v48, 1  ;;  %v1315_v37 = vadd.f32 %v1244_v3, %v1069_v34  ;;  %v740_v61 = vsel %vm625_vm0, 0.0, %v667_v20  ;;  %v10972_v36 = vld [vmem:[#allocation7 + $0x8] ss:$0 sm:$0xff] }
 0x241   : > { %v2491_v21 = vpack.c.bf16 %v2471_v0, %v2470_v23  ;;  %v1316_v44 = vadd.f32 %v1246_v52, %v1070_v8  ;;  %v1799_v24 = vsel %vm1176_vm2, %v1797_v35, %v1798_v6  ;;  %v1801_v15 = vsel %vm1176_vm2, %v1798_v6, %v1800_v27  ;;  %v10908_v27 = vld [vmem:[#allocation7 + $0x5] ss:$0 sm:$0xff] }
 0x242   : > { %v2360_v1 = vrot.slane %v10871_v38, 2  ;;  %v1873_v62 = vadd.f32 %v1799_v24, %v1628_v58  ;;  %v1874_v45 = vadd.f32 %v1801_v15, %v1629_v5  ;;  %v10897_v34 = vmul.f32 %v10894_v11, %v669_v40 }
 0x243   : > { %2508 = vst.msk [vmem:[#allocation2 + $0x58] sm:$0xff] %vm2496_vm3, %v2491_v21  ;;  %v10903_v20 = vmul.f32 %v10900_v10, %v669_v40  ;;  %v10906_v59 = vmul.f32 %v10847_v50, %v669_v40  ;;  %v1435_v8 = vmul.f32 %v10908_v27, %v740_v61  ;;  %v1436_v22 = vmul.f32 %v10908_v27, %v669_v40 }
 0x244   : > { %v1353_v43 = vmul.f32 %v10426_v7, %v740_v61  ;;  %v1354_v51 = vmul.f32 %v10426_v7, %v669_v40  ;;  %v1680_v49 = vmul.f32 %v10914_v9, %v740_v61  ;;  %v1681_v17 = vmul.f32 %v10914_v9, %v669_v40 }
 0x245   : > { %v1557_v60 = vrot.slane %v1435_v8, 1  ;;  %v1558_v58 = vrot.slane %v1436_v22, 1  ;;  %v1911_v35 = vmul.f32 %v10439_v29, %v740_v61  ;;  %v1912_v54 = vmul.f32 %v10439_v29, %v669_v40 }
 0x246   : > { %v10921_v19 = vmul.f32 %v10894_v11, %v740_v61  ;;  %v1385_v57 = vadd.f32 %v1353_v43, %v1315_v37  ;;  %v1992_v5 = vmul.f32 %v10860_v31, %v740_v61  ;;  %v1993_v7 = vmul.f32 %v10860_v31, %v669_v40 }
 0x247   : > { %v10926_v28 = vmul.f32 %v10900_v10, %v740_v61  ;;  %v1386_v47 = vadd.f32 %v1354_v51, %v1316_v44  ;;  %v1943_v12 = vadd.f32 %v1911_v35, %v1873_v62  ;;  %v1944_v4 = vadd.f32 %v1912_v54, %v1874_v45 }
 0x248   : > { %v1802_v41 = vrot.slane %v1680_v49, 2  ;;  %v1803_v48 = vrot.slane %v1681_v17, 2  ;;  %v2112_v6 = vrot.slane %v1992_v5, 1  ;;  %v2113_v16 = vrot.slane %v1993_v7, 1 }
 0x249   : > { %v1559_v29 = vsel %vm930_vm1, %v1557_v60, %v1558_v58  ;;  %v1561_v2 = vsel %vm930_vm1, %v1558_v58, %v1560_v56  ;;  %v2237_v3 = vmul.f32 %v10868_v46, %v740_v61  ;;  %v2238_v38 = vmul.f32 %v10868_v46, %v669_v40 }
 0x24a   : > { %v1630_v52 = vadd.f32 %v1559_v29, %v1385_v57  ;;  %v2114_v23 = vsel %vm930_vm1, %v2112_v6, %v2113_v16  ;;  %v2116_v0 = vsel %vm930_vm1, %v2113_v16, %v2115_v63  ;;  %v14962_v37 = vrot.slane %v10723_v13, 7 }
 0x24b   : > { %v2188_v44 = vadd.f32 %v2114_v23, %v1943_v12  ;;  %v2189_v24 = vadd.f32 %v2116_v0, %v1944_v4  ;;  %v2357_v15 = vrot.slane %v2237_v3, 2  ;;  %v2358_v62 = vrot.slane %v2238_v38, 2 }
 0x24c   : > { %v758_v21 = vsel %vm625_vm0, %v14962_v37, 0.0  ;;  %v1002_v45 = vrot.slane %v10903_v20, 1  ;;  %v10939_v56 = vmul.f32 %v10847_v50, %v740_v61  ;;  %v1631_v8 = vadd.f32 %v1561_v2, %v1386_v47  ;;  %v10986_v2 = vpop.permute.xlu1 %590 }
 0x24d   : > { %v1804_v40 = vsel %vm1176_vm2, %v1802_v41, %v1803_v48  ;;  %v2359_v22 = vsel %vm1176_vm2, %v2357_v15, %v2358_v62  ;;  %v2361_v63 = vsel %vm1176_vm2, %v2358_v62, %v2360_v1  ;;  %v10945_v43 = vmul.f32 %v10900_v10, %v758_v21 }
 0x24e   : > { %v1997_v51 = vmul.f32 %v10860_v31, %v758_v21  ;;  %v2433_v49 = vadd.f32 %v2359_v22, %v2188_v44  ;;  %v2434_v17 = vadd.f32 %v2361_v63, %v2189_v24  ;;  %v10949_v60 = vmul.f32 %v10847_v50, %v758_v21 }
 0x24f   : > { %v10952_v61 = vmul.f32 %v10908_v27, %v758_v21  ;;  %v2242_v58 = vmul.f32 %v10868_v46, %v758_v21  ;;  %v1806_v1 = vsel %vm1176_vm2, %v1803_v48, %v1805_v55  ;;  %v1875_v35 = vadd.f32 %v1804_v40, %v1630_v52 }
 0x250   : > { %v2120_v20 = vrot.slane %v1997_v51, 1  ;;  %v2472_v54 = vadd.f32 %v10557_v25, %v2433_v49  ;;  %v2473_v57 = vadd.f32 %v10557_v25, %v2434_v17  ;;  %v1876_v5 = vadd.f32 %v1806_v1, %v1631_v8 }
 0x251   : > { %v14963_v7 = vmov %v14962_v37  ;;  %v14964_v47 = vrot.slane %v10725_v39, 7  ;;  %v2365_v3 = vrot.slane %v2242_v58, 2  ;;  %v1248_v0 = vrot.slane %v10906_v59, 2 }
 0x252   : > { %v2492_v6 = vpack.c.bf16 %v2473_v57, %v2472_v54  ;;  %v1001_v15 = vrot.slane %v10926_v28, 1  ;;  %v10992_v62 = vmul.f32 %v10914_v9, %v758_v21  ;;  %v674_v40 = vrot.slane %v10986_v2, 7 }
 0x253   : > { %v10965_v12 = vsel %vm625_vm0, %v14964_v47, %v14963_v7  ;;  %v14965_v4 = vmov %v14964_v47  ;;  %v1247_v22 = vrot.slane %v10939_v56, 2  ;;  %v1009_v63 = vrot.slane %v10945_v43, 1 }
 0x254   : > { %v10970_v41 = vsel %vm625_vm0, 0.0, %v14965_v4  ;;  %v1914_v55 = vmul.f32 %v10972_v36, %v10965_v12  ;;  %v1996_v48 = vmul.f32 %v10860_v31, %v10965_v12  ;;  %v2241_v13 = vmul.f32 %v10868_v46, %v10965_v12  ;;  %2509 = vst.msk [vmem:[#allocation2 + $0x60] sm:$0xff] %vm2496_vm3, %v2492_v6 }
 0x255   : > { %v1913_v16 = vmul.f32 %v10972_v36, %v10970_v41  ;;  %v1995_v39 = vmul.f32 %v10860_v31, %v10970_v41  ;;  %v2240_v29 = vmul.f32 %v10868_v46, %v10970_v41  ;;  %v1255_v49 = vrot.slane %v10949_v60, 2 }
 0x256   : > { %v1946_v38 = vadd.f32 %v1914_v55, %v1876_v5  ;;  %v2118_v52 = vrot.slane %v1996_v48, 1  ;;  %v2363_v23 = vrot.slane %v2241_v13, 2  ;;  %v1565_v17 = vrot.slane %v10952_v61, 1 }
 0x257   : > { %v1945_v37 = vadd.f32 %v1913_v16, %v1875_v35  ;;  %v2117_v44 = vrot.slane %v1995_v39, 1  ;;  %v2362_v24 = vrot.slane %v2240_v29, 2  ;;  %v880_v56 = vmul.f32 %v10900_v10, %v10965_v12 }
 0x258   : > { %v2121_v8 = vsel %vm930_vm1, %v2118_v52, %v2120_v20  ;;  %v2366_v28 = vsel %vm1176_vm2, %v2363_v23, %v2365_v3  ;;  %v879_v20 = vmul.f32 %v10900_v10, %v10970_v41  ;;  %v1810_v43 = vrot.slane %v10992_v62, 2 }
 0x259   : > { %v2119_v59 = vsel %vm930_vm1, %v2117_v44, %v2118_v52  ;;  %v2191_v51 = vadd.f32 %v2121_v8, %v1946_v38  ;;  %v2364_v21 = vsel %vm1176_vm2, %v2362_v24, %v2363_v23  ;;  %v759_v54 = vsel %vm625_vm0, %v674_v40, 0.0  ;;  %v8919_v38 = vld [vmem:[#allocation7 + $0x4] ss:$0 sm:$0xff] }
 0x25a   : > { %v2190_v58 = vadd.f32 %v2119_v59, %v1945_v37  ;;  %v795_v61 = vmul.f32 %v10894_v11, %v10970_v41  ;;  %v1003_v5 = vsel %vm930_vm1, %v1001_v15, %v1002_v45  ;;  %v1005_v7 = vsel %vm930_vm1, %v1002_v45, %v1004_v53 }
 0x25b   : > { %v2436_v1 = vadd.f32 %v2366_v28, %v2191_v51  ;;  %v1006_v47 = vrot.slane %v879_v20, 1  ;;  %v1007_v4 = vrot.slane %v880_v56, 1  ;;  %v1071_v55 = vadd.f32 %v1003_v5, %v10921_v19  ;;  %v587_v5 = vpop.permute.xlu0 %586 }
 0x25c   : > { %v2435_v35 = vadd.f32 %v2364_v21, %v2190_v58  ;;  %v1072_v48 = vadd.f32 %v1005_v7, %v10897_v34  ;;  %v11022_v13 = vmul.f32 %v10908_v27, %v759_v54  ;;  %v11025_v6 = vmul.f32 %v10914_v9, %v759_v54 }
 0x25d   : > { %v2475_v57 = vadd.f32 %v10557_v25, %v2436_v1  ;;  %v796_v16 = vmul.f32 %v10894_v11, %v10965_v12  ;;  %v1249_v42 = vsel %vm1176_vm2, %v1247_v22, %v1248_v0  ;;  %v11031_v45 = vmul.f32 %v10860_v31, %v759_v54 }
 0x25e   : > { %v2474_v10 = vadd.f32 %v10557_v25, %v2435_v35  ;;  %v1125_v25 = vmul.f32 %v10847_v50, %v10970_v41  ;;  %v1317_v19 = vadd.f32 %v1249_v42, %v1071_v55  ;;  %v11036_v34 = vmul.f32 %v10868_v46, %v759_v54 }
 0x25f   : > { %v1008_v39 = vsel %vm930_vm1, %v1006_v47, %v1007_v4  ;;  %v1126_v29 = vmul.f32 %v10847_v50, %v10965_v12  ;;  %v1251_v11 = vsel %vm1176_vm2, %v1248_v0, %v1250_v18  ;;  %v1355_v52 = vmul.f32 %v8919_v38, %v10970_v41 }
 0x260   : > { %v2493_v53 = vpack.c.bf16 %v2475_v57, %v2474_v10  ;;  %v1318_v3 = vadd.f32 %v1251_v11, %v1072_v48  ;;  %v1356_v23 = vmul.f32 %v8919_v38, %v10965_v12  ;;  %v1438_v37 = vmul.f32 %v10908_v27, %v10970_v41 }
 0x261   : > { %v1570_v44 = vrot.slane %v11022_v13, 1  ;;  %v1010_v24 = vsel %vm930_vm1, %v1007_v4, %v1009_v63  ;;  %v1439_v50 = vmul.f32 %v10908_v27, %v10965_v12  ;;  %v1683_v26 = vmul.f32 %v10914_v9, %v10970_v41 }
 0x262   : > { %2510 = vst.msk [vmem:[#allocation2 + $0x68] sm:$0xff] %vm2496_vm3, %v2493_v53  ;;  %v1073_v18 = vadd.f32 %v1008_v39, %v795_v61  ;;  %v1252_v0 = vrot.slane %v1125_v25, 2  ;;  %v1387_v15 = vadd.f32 %v1355_v52, %v1317_v19  ;;  %v1388_v8 = vadd.f32 %v1356_v23, %v1318_v3 }
 0x263   : > { %v1253_v22 = vrot.slane %v1126_v29, 2  ;;  %v1562_v59 = vrot.slane %v1438_v37, 1  ;;  %v1563_v51 = vrot.slane %v1439_v50, 1  ;;  %v1684_v58 = vmul.f32 %v10914_v9, %v10965_v12 }
 0x264   : > { %v1074_v28 = vadd.f32 %v1010_v24, %v796_v16  ;;  %v1807_v21 = vrot.slane %v1683_v26, 2  ;;  %v2001_v63 = vmul.f32 %v10860_v31, %v9752_v32  ;;  %v2002_v1 = vmul.f32 %v10860_v31, %v9746_v30 }
 0x265   : > { %v1564_v41 = vsel %vm930_vm1, %v1562_v59, %v1563_v51  ;;  %v1566_v20 = vsel %vm930_vm1, %v1563_v51, %v1565_v17  ;;  %v1808_v56 = vrot.slane %v1684_v58, 2  ;;  %v2003_v35 = vmul.f32 %v10860_v31, %v9756_v33 }
 0x266   : > { %v1815_v54 = vrot.slane %v11025_v6, 2  ;;  %v2125_v12 = vrot.slane %v11031_v45, 1  ;;  %v1632_v61 = vadd.f32 %v1564_v41, %v1387_v15  ;;  %v1633_v57 = vadd.f32 %v1566_v20, %v1388_v8 }
 0x267   : > { %v2370_v7 = vrot.slane %v11036_v34, 2  ;;  %v1254_v47 = vsel %vm1176_vm2, %v1252_v0, %v1253_v22  ;;  %v2127_v10 = vrot.slane %v2001_v63, 1  ;;  %v2128_v4 = vrot.slane %v2002_v1, 1 }
 0x268   : > { %v1256_v17 = vsel %vm1176_vm2, %v1253_v22, %v1255_v49  ;;  %v1319_v55 = vadd.f32 %v1254_v47, %v1073_v18  ;;  %v2130_v48 = vrot.slane %v2003_v35, 1  ;;  %v2246_v33 = vmul.f32 %v10868_v46, %v9752_v32 }
 0x269   : > { %v1320_v6 = vadd.f32 %v1256_v17, %v1074_v28  ;;  %v1809_v16 = vsel %vm1176_vm2, %v1807_v21, %v1808_v56  ;;  %v1811_v42 = vsel %vm1176_vm2, %v1808_v56, %v1810_v43  ;;  %v673_v53 = vrot.slane %v587_v5, 7 }
 0x26a   : > { %v1877_v45 = vadd.f32 %v1809_v16, %v1632_v61  ;;  %v1878_v25 = vadd.f32 %v1811_v42, %v1633_v57  ;;  %v1917_v60 = vmul.f32 %v10972_v36, %v9752_v32  ;;  %v1918_v49 = vmul.f32 %v10972_v36, %v9746_v30  ;;  %v8920_v42 = vld [vmem:[#allocation9] ss:$0 sm:$0xff] }
 0x26b   : > { %v2129_v19 = vsel %vm930_vm1, %v2127_v10, %v2128_v4  ;;  %v2247_v39 = vmul.f32 %v10868_v46, %v9746_v30  ;;  %v675_v62 = vsel %vm625_vm0, %v673_v53, %v674_v40  ;;  %v742_v43 = vsel %vm625_vm0, 0.0, %v673_v53 }
 0x26c   : > { %v2131_v29 = vsel %vm930_vm1, %v2128_v4, %v2130_v48  ;;  %v2372_v11 = vrot.slane %v2246_v33, 2  ;;  %v1357_v3 = vmul.f32 %v8919_v38, %v742_v43  ;;  %v1358_v52 = vmul.f32 %v8919_v38, %v675_v62 }
 0x26d   : > { %v1441_v32 = vmul.f32 %v10908_v27, %v742_v43  ;;  %v1442_v23 = vmul.f32 %v10908_v27, %v675_v62  ;;  %v1686_v37 = vmul.f32 %v10914_v9, %v742_v43  ;;  %v1687_v24 = vmul.f32 %v10914_v9, %v675_v62 }
 0x26e   : > { %v1389_v30 = vadd.f32 %v1357_v3, %v1319_v55  ;;  %v1390_v50 = vadd.f32 %v1358_v52, %v1320_v6  ;;  %v1915_v2 = vmul.f32 %v10972_v36, %v742_v43  ;;  %v1916_v40 = vmul.f32 %v10972_v36, %v675_v62 }
 0x26f   : > { %v1567_v26 = vrot.slane %v1441_v32, 1  ;;  %v1568_v18 = vrot.slane %v1442_v23, 1  ;;  %v1812_v0 = vrot.slane %v1686_v37, 2  ;;  %v1813_v15 = vrot.slane %v1687_v24, 2 }
 0x270   : > { %v2373_v8 = vrot.slane %v2247_v39, 2  ;;  %v2375_v38 = vrot.slane %v9820_v14, 2  ;;  %v1998_v22 = vmul.f32 %v10860_v31, %v742_v43  ;;  %v1999_v27 = vmul.f32 %v10860_v31, %v675_v62 }
 0x271   : > { %v1569_v59 = vsel %vm930_vm1, %v1567_v26, %v1568_v18  ;;  %v1571_v9 = vsel %vm930_vm1, %v1568_v18, %v1570_v44  ;;  %v1947_v51 = vadd.f32 %v1915_v2, %v1877_v45  ;;  %v1948_v58 = vadd.f32 %v1916_v40, %v1878_v25 }
 0x272   : > { %v1634_v36 = vadd.f32 %v1569_v59, %v1389_v30  ;;  %v1635_v28 = vadd.f32 %v1571_v9, %v1390_v50  ;;  %v2122_v21 = vrot.slane %v1998_v22, 1  ;;  %v2123_v63 = vrot.slane %v1999_v27, 1 }
 0x273   : > { %v1814_v1 = vsel %vm1176_vm2, %v1812_v0, %v1813_v15  ;;  %v1816_v14 = vsel %vm1176_vm2, %v1813_v15, %v1815_v54  ;;  %v2243_v41 = vmul.f32 %v10868_v46, %v742_v43  ;;  %v2244_v31 = vmul.f32 %v10868_v46, %v675_v62 }
 0x274   : > { %v1879_v20 = vadd.f32 %v1814_v1, %v1634_v36  ;;  %v1880_v56 = vadd.f32 %v1816_v14, %v1635_v28  ;;  %v2124_v13 = vsel %vm930_vm1, %v2122_v21, %v2123_v63  ;;  %v2126_v44 = vsel %vm930_vm1, %v2123_v63, %v2125_v12 }
 0x275   : > { %v2192_v35 = vadd.f32 %v2124_v13, %v1947_v51  ;;  %v2193_v61 = vadd.f32 %v2126_v44, %v1948_v58  ;;  %v2367_v57 = vrot.slane %v2243_v41, 2  ;;  %v2368_v5 = vrot.slane %v2244_v31, 2 }
 0x276   : > { %v1949_v47 = vadd.f32 %v1917_v60, %v1879_v20  ;;  %v1950_v10 = vadd.f32 %v1918_v49, %v1880_v56  ;;  %v2374_v4 = vsel %vm1176_vm2, %v2372_v11, %v2373_v8  ;;  %v2376_v54 = vsel %vm1176_vm2, %v2373_v8, %v2375_v38 }
 0x277   : > { %v2369_v17 = vsel %vm1176_vm2, %v2367_v57, %v2368_v5  ;;  %v2371_v46 = vsel %vm1176_vm2, %v2368_v5, %v2370_v7 }
 0x278   : > { %v2194_v55 = vadd.f32 %v2129_v19, %v1949_v47  ;;  %v2195_v48 = vadd.f32 %v2131_v29, %v1950_v10  ;;  %v2437_v33 = vadd.f32 %v2369_v17, %v2192_v35  ;;  %v2438_v12 = vadd.f32 %v2371_v46, %v2193_v61 }
 0x27a   : > { %v2439_v6 = vadd.f32 %v2374_v4, %v2194_v55  ;;  %v2440_v16 = vadd.f32 %v2376_v54, %v2195_v48  ;;  %v2476_v53 = vadd.f32 %v8920_v42, %v2437_v33  ;;  %v2477_v45 = vadd.f32 %v8920_v42, %v2438_v12 }
 0x27c   : > { %v2478_v25 = vadd.f32 %v8920_v42, %v2439_v6  ;;  %v2479_v60 = vadd.f32 %v8920_v42, %v2440_v16  ;;  %v2494_v49 = vpack.c.bf16 %v2477_v45, %v2476_v53 }
 0x27e   : > { %v2495_v39 = vpack.c.bf16 %v2479_v60, %v2478_v25  ;;  %2511 = vst.msk [vmem:[#allocation2 + $0x70] sm:$0xff] %vm2496_vm3, %v2494_v49 }
 0x280   : > { %2512 = vst.msk [vmem:[#allocation2 + $0x78] sm:$0xff] %vm2496_vm3, %v2495_v39 }
 0x281 PF: > { %v2513_v34 = vld [vmem:[#allocation2] sm:$0xff]  ;;  %s9354_s13 = smov 64   ;;  %v11118_v7 = vld [vmem:[#allocation2 + $0x10] sm:$0xff]  ;;  %v11120_v62 = vld [vmem:[#allocation2 + $0x8] sm:$0xff]  ;;  %vm2749_vm4 = vcmask 1047552   ;;  %vm2816_vm6 = vcmask 523264  }
 0x282   : > { %2784 = vrot.lane.b32.xlu0 %v2513_v34, %s9354_s13  ;;  %v2555_v19 = vshrl.u32 %v2513_v34, 16  ;;  %2788 = vrot.lane.b32.xlu1 %v11118_v7, %s9354_s13  ;;  %v11124_v43 = vld [vmem:[#allocation2 + $0x18] sm:$0xff]  ;;  %v2558_v11 = vshll.u32 %v2513_v34, 16  ;;  %v11126_v3 = vld [vmem:[#allocation2 + $0x20] sm:$0xff]  ;;  %v11137_v30 = vld [vmem:[#allocation2 + $0x28] sm:$0xff]  ;;  %v9355_v6 = vmov 0.0  }
 0x283   : > { %v8921_v52 = vld [vmem:[%s9724_s25 + $0x4] ss:$8 sps:$4 sm:$0xff]   ;;  %v8923_v32 = vld [vmem:[%s9724_s25] ss:$8 sps:$4 sm:$0xff]   ;;  %v2521_v23 = vld [vmem:[#allocation2 + $0x40] sm:$0xff]  ;;  %v2565_v42 = vshll.u32 %v11120_v62, 16 }
 0x284   : > { %v2557_v29 = vrot.slane %v2555_v19, 7  ;;  %v8924_v37 = vld [vmem:[%s9724_s25 + $0x14] ss:$8 sps:$4 sm:$0xff]   ;;  %3049 = vmatprep.subr.bf16.mxu0 %v8921_v52  ;;  %v8926_v50 = vld [vmem:[%s9724_s25 + $0x10] ss:$8 sps:$4 sm:$0xff]   ;;  %8725 = vmatprep.subr.bf16.mxu1 %v8921_v52  ;;  %v2611_v40 = vshrl.u32 %v2521_v23, 16 }
 0x285   : > { %3050 = vmatpush1.bf16.msra.mxu0 %v8923_v32  ;;  %v8927_v2 = vld [vmem:[%s9724_s25 + $0x24] ss:$8 sps:$4 sm:$0xff]   ;;  %8737 = vmatpush1.bf16.msra.mxu1 %v8923_v32  ;;  %v2614_v26 = vshll.u32 %v2521_v23, 16  ;;  %v8929_v8 = vld [vmem:[%s9724_s25 + $0x20] ss:$8 sps:$4 sm:$0xff]   ;;  %v2701_v27 = vrot.slane %v2558_v11, 1 }
 0x286   : > { %2786 = vrot.lane.b32.xlu0 %v11120_v62, %s9354_s13  ;;  %v11133_v24 = vor.u32 %v2558_v11, %v2557_v29  ;;  %2790 = vrot.lane.b32.xlu1 %v11124_v43, %s9354_s13  ;;  %v11143_v18 = vld [vmem:[#allocation2 + $0x30] sm:$0xff]  ;;  %v2613_v0 = vrot.slane %v2611_v40, 7  ;;  %v11147_v15 = vld [vmem:[#allocation2 + $0x38] sm:$0xff]  ;;  %v8930_v38 = vld [vmem:[%s9724_s25 + $0x34] ss:$8 sps:$4 sm:$0xff]   ;;  %vm2682_vm8 = vcmask 1040384  }
 0x287   : > { %3051 = vmatprep.subr.bf16.mxu0 %v8924_v37  ;;  %8726 = vmatprep.subr.bf16.mxu1 %v8924_v37  ;;  %v2717_v59 = vrot.slane %v2614_v26, 1  ;;  %v11157_v9 = vld [vmem:[#allocation2 + $0x48] sm:$0xff]  ;;  %v8933_v58 = vld [vmem:[%s9724_s25 + $0x44] ss:$8 sps:$4 sm:$0xff]   ;;  %v2702_v36 = vor.u32 %v2701_v27, %v2555_v19  ;;  %vm2750_vm5 = vsmask.f32 7424 }
 0x288   : > { %v11151_v22 = vor.u32 %v2614_v26, %v2613_v0  ;;  %v8932_v51 = vld [vmem:[%s9724_s25 + $0x30] ss:$8 sps:$4 sm:$0xff]   ;;  %v11164_v21 = vld [vmem:[#allocation2 + $0x50] sm:$0xff]  ;;  %v8936_v14 = vld [vmem:[%s9724_s25 + $0x54] ss:$8 sps:$4 sm:$0xff]   ;;  %v2703_v53 = vrot.slane %v2565_v42, 1 }
 0x289   : > { %3052 = vmatpush1.bf16.msra.mxu0 %v8926_v50  ;;  %8738 = vmatpush1.bf16.msra.mxu1 %v8926_v50  ;;  %v2718_v28 = vor.u32 %v2717_v59, %v2611_v40  ;;  %v8935_v63 = vld [vmem:[%s9724_s25 + $0x40] ss:$8 sps:$4 sm:$0xff]   ;;  %vm11170_vm7 = vmand %vm2749_vm4, %vm2750_vm5  ;;  %v8938_v31 = vld [vmem:[%s9724_s25 + $0x50] ss:$8 sps:$4 sm:$0xff]   ;;  %vm2683_vm9 = vsmask.f32 256 }
 0x28a   : > { %2792 = vrot.lane.b32.xlu0 %v11126_v3, %s9354_s13  ;;  %2794 = vrot.lane.b32.xlu1 %v11137_v30, %s9354_s13  ;;  %v11167_v1 = vld [vmem:[#allocation2 + $0x58] sm:$0xff]  ;;  %v2752_v20 = vsel %vm11170_vm7, %v2702_v36, 0  ;;  %v11183_v13 = vld [vmem:[#allocation2 + $0x60] sm:$0xff]  ;;  %v11194_v47 = vld [vmem:[#allocation2 + $0x68] sm:$0xff]  ;;  %v2562_v45 = vshrl.u32 %v11120_v62, 16  ;;  %v14968_v25 = vmov 0 }
 0x28b   : > { %3053 = vmatprep.subr.bf16.mxu0 %v8927_v2  ;;  %8727 = vmatprep.subr.bf16.mxu1 %v8927_v2  ;;  %v2760_v56 = vsel %vm11170_vm7, %v2718_v28, 0  ;;  %v8939_v44 = vld [vmem:[%s9724_s25 + $0x64] ss:$8 sps:$4 sm:$0xff]   ;;  %v8941_v35 = vld [vmem:[%s9724_s25 + $0x60] ss:$8 sps:$4 sm:$0xff]   ;;  %vm11219_vm10 = vmand %vm2682_vm8, %vm2683_vm9  ;;  %v2572_v49 = vshll.u32 %v11118_v7, 16 }
 0x28c   : > { %8560 = vmatprep.mubr.msk.bf16.mxu0 %vm2816_vm6, %v2752_v20  ;;  %8568 = vmatprep.mubr.msk.bf16.mxu1 %vm2816_vm6, %v2760_v56  ;;  %v8942_v61 = vld [vmem:[%s9724_s25 + $0x74] ss:$8 sps:$4 sm:$0xff]   ;;  %v8944_v57 = vld [vmem:[%s9724_s25 + $0x70] ss:$8 sps:$4 sm:$0xff]   ;;  %v8945_v5 = vld [vmem:[%s9724_s25 + $0x84] ss:$8 sps:$4 sm:$0xff]   ;;  %v2704_v60 = vor.u32 %v2703_v53, %v2562_v45 }
 0x28d   : > { %3054 = vmatpush1.bf16.msra.mxu0 %v8929_v8  ;;  %8739 = vmatpush1.bf16.msra.mxu1 %v8929_v8  ;;  %v8947_v10 = vld [vmem:[%s9724_s25 + $0x80] ss:$8 sps:$4 sm:$0xff]   ;;  %v8948_v4 = vld [vmem:[%s9724_s25 + $0x94] ss:$8 sps:$4 sm:$0xff]   ;;  %v8950_v54 = vld [vmem:[%s9724_s25 + $0x90] ss:$8 sps:$4 sm:$0xff]  }
 0x28e   : > { %2796 = vrot.lane.b32.xlu0 %v11143_v18, %s9354_s13  ;;  %2798 = vrot.lane.b32.xlu1 %v11147_v15, %s9354_s13  ;;  %v8951_v17 = vld [vmem:[%s9724_s25 + $0xa4] ss:$8 sps:$4 sm:$0xff]   ;;  %v8953_v46 = vld [vmem:[%s9724_s25 + $0xa0] ss:$8 sps:$4 sm:$0xff]   ;;  %v14969_v25 = vsel %vm11219_vm10, 4294967295, %v14968_v25  ;;  %v2685_v39 = vsel %vm11219_vm10, 0, %v11133_v24 }
 0x28f   : > { %3055 = vmatprep.subr.bf16.mxu0 %v8930_v38  ;;  %8728 = vmatprep.subr.bf16.mxu1 %v8930_v38  ;;  %v8954_v55 = vld [vmem:[%s9724_s25 + $0xb4] ss:$8 sps:$4 sm:$0xff]   ;;  %v11204_v48 = vld [vmem:[#allocation2 + $0x70] sm:$0xff]  ;;  %v11206_v33 = vld [vmem:[#allocation2 + $0x78] sm:$0xff]  ;;  %14970 = vst [vmem:[#allocation24_spill] sm:$0xff] %v14969_v25  ;;  %v2564_v34 = vrot.slane %v2562_v45, 7 }
 0x290   : > { %v8956_v12 = vld [vmem:[%s9724_s25 + $0xb0] ss:$8 sps:$4 sm:$0xff]   ;;  %v2753_v29 = vsel %vm11170_vm7, %v2704_v60, 0  ;;  %v2705_v11 = vrot.slane %v2572_v49, 1  ;;  %v2621_v2 = vshll.u32 %v11157_v9, 16  ;;  %v2579_v0 = vshll.u32 %v11124_v43, 16 }
 0x291   : > { %3056 = vmatpush1.bf16.msra.mxu0 %v8932_v51  ;;  %8740 = vmatpush1.bf16.msra.mxu1 %v8932_v51  ;;  %v8576_v16 = vld [vmem:[%s9739_s16] ss:$0 sm:$0xff]  ;;  %v2567_v32 = vor.u32 %v2565_v42, %v2564_v34  ;;  %v2618_v8 = vshrl.u32 %v11157_v9, 16  ;;  %v2576_v28 = vshrl.u32 %v11124_v43, 16  ;;  %v2628_v20 = vshll.u32 %v11164_v21, 16  ;;  %s15002_s14 = sld [smem:[#allocation20_spill]] }
 0x292   : > { %2800 = vrot.lane.b32.xlu0 %v2521_v23, %s9354_s13  ;;  %2802 = vrot.lane.b32.xlu1 %v11157_v9, %s9354_s13  ;;  %v2569_v23 = vshrl.u32 %v11118_v7, 16  ;;  %v2707_v27 = vrot.slane %v2579_v0, 1  ;;  %v2719_v59 = vrot.slane %v2621_v2, 1  ;;  %v2586_v56 = vshll.u32 %v11126_v3, 16 }
 0x293   : > { %3057 = vmatprep.subr.bf16.mxu0 %v8933_v58  ;;  %8729 = vmatprep.subr.bf16.mxu1 %v8933_v58  ;;  %v2686_v40 = vsel %vm11219_vm10, 0, %v2567_v32  ;;  %v2578_v43 = vrot.slane %v2576_v28, 7  ;;  %v2635_v60 = vshll.u32 %v11167_v1, 16 }
 0x294   : > { %v2706_v50 = vor.u32 %v2705_v11, %v2569_v23  ;;  %v2571_v26 = vrot.slane %v2569_v23, 7  ;;  %v2708_v9 = vor.u32 %v2707_v27, %v2576_v28 }
 0x295   : > { %3058 = vmatpush1.bf16.msra.mxu0 %v8935_v63  ;;  %8741 = vmatpush1.bf16.msra.mxu1 %v8935_v63  ;;  %v2620_v63 = vrot.slane %v2618_v8, 7  ;;  %v2723_v32 = vrot.slane %v2635_v60, 1 }
 0x296   : > { %2804 = vrot.lane.b32.xlu0 %v11164_v21, %s9354_s13  ;;  %2806 = vrot.lane.b32.xlu1 %v11167_v1, %s9354_s13  ;;  %v2754_v7 = vsel %vm11170_vm7, %v2706_v50, 0  ;;  %v2574_v36 = vor.u32 %v2572_v49, %v2571_v26  ;;  %v2593_v49 = vshll.u32 %v11137_v30, 16 }
 0x297   : > { %3059 = vmatprep.subr.bf16.mxu0 %v8936_v14  ;;  %8730 = vmatprep.subr.bf16.mxu1 %v8936_v14  ;;  %p8707_p1 = scmp.ne.s32.totalorder %s15002_s14, 3 }
 0x299   : > { %3060 = vmatpush1.bf16.msra.mxu0 %v8938_v31  ;;  %8742 = vmatpush1.bf16.msra.mxu1 %v8938_v31  ;;  %v2720_v31 = vor.u32 %v2719_v59, %v2618_v8 }
 0x29a   : > { %2808 = vrot.lane.b32.xlu0 %v11183_v13, %s9354_s13  ;;  %3061 = vmatprep.subr.bf16.mxu0 %v8939_v44 }
 0x29b   : > { %8731 = vmatprep.subr.bf16.mxu1 %v8939_v44  ;;  %2810 = vrot.lane.b32.xlu1 %v11194_v47, %s9354_s13  ;;  %v2687_v44 = vsel %vm11219_vm10, 0, %v2574_v36 }
 0x29d   : > { %3062 = vmatpush1.bf16.msra.mxu0 %v8941_v35  ;;  %8743 = vmatpush1.bf16.msra.mxu1 %v8941_v35  ;;  %v2693_v35 = vsel %vm11219_vm10, 0, %v11151_v22  ;;  %v2583_v22 = vshrl.u32 %v11126_v3, 16 }
 0x29e   : > { %3063 = vmatprep.subr.bf16.mxu0 %v8942_v61  ;;  %8732 = vmatprep.subr.bf16.mxu1 %v8942_v61 }
 0x29f   : > { %2812 = vrot.lane.b32.xlu0 %v11204_v48, %s9354_s13  ;;  %2814 = vrot.lane.b32.xlu1 %v11206_v33, %s9354_s13 }
 0x2a1   : > { %3064 = vmatpush1.bf16.msra.mxu0 %v8944_v57  ;;  %8744 = vmatpush1.bf16.msra.mxu1 %v8944_v57  ;;  %v2623_v57 = vor.u32 %v2621_v2, %v2620_v63  ;;  %v2639_v63 = vshrl.u32 %v11183_v13, 16 }
 0x2a2   : > { %3065 = vmatprep.subr.bf16.mxu0 %v8945_v5  ;;  %8733 = vmatprep.subr.bf16.mxu1 %v8945_v5  ;;  %v2709_v5 = vrot.slane %v2586_v56, 1 }
 0x2a3   : > { %3271 = vrot.lane.b32.xlu0 %v9355_v6, %s9354_s13  ;;  %3553 = vrot.lane.b32.xlu1 %v8576_v16, %s9354_s13  ;;  %v2581_v6 = vor.u32 %v2579_v0, %v2578_v43  ;;  %v2694_v53 = vsel %vm11219_vm10, 0, %v2623_v57 }
 0x2a4   : > { %v2710_v16 = vor.u32 %v2709_v5, %v2583_v22  ;;  %v2649_v5 = vshll.u32 %v11194_v47, 16 }
 0x2a5   : > { %3066 = vmatpush1.bf16.msra.mxu0 %v8947_v10  ;;  %8745 = vmatpush1.bf16.msra.mxu1 %v8947_v10  ;;  %v2688_v3 = vsel %vm11219_vm10, 0, %v2581_v6 }
 0x2a6   : > { %3067 = vmatprep.subr.bf16.mxu0 %v8948_v4  ;;  %8734 = vmatprep.subr.bf16.mxu1 %v8948_v4  ;;  %v2755_v4 = vsel %vm11170_vm7, %v2708_v9, 0 }
 0x2a9   : > { %3068 = vmatpush1.bf16.msra.mxu0 %v8950_v54  ;;  %8746 = vmatpush1.bf16.msra.mxu1 %v8950_v54  ;;  %v2761_v54 = vsel %vm11170_vm7, %v2720_v31, 0 }
 0x2aa   : > { %3069 = vmatprep.subr.bf16.mxu0 %v8951_v17  ;;  %8735 = vmatprep.subr.bf16.mxu1 %v8951_v17  ;;  %v2625_v17 = vshrl.u32 %v11164_v21, 16 }
 0x2ac   : > { %v2627_v45 = vrot.slane %v2625_v17, 7 }
 0x2ad   : > { %3070 = vmatpush1.bf16.msra.mxu0 %v8953_v46  ;;  %8747 = vmatpush1.bf16.msra.mxu1 %v8953_v46  ;;  %v2721_v46 = vrot.slane %v2628_v20, 1 }
 0x2ae   : > { %3071 = vmatprep.subr.bf16.mxu0 %v8954_v55  ;;  %8736 = vmatprep.subr.bf16.mxu1 %v8954_v55 }
 0x2af   : > { %v2722_v21 = vor.u32 %v2721_v46, %v2625_v17 }
 0x2b1   : > { %3072 = vmatpush1.bf16.msra.mxu0 %v8956_v12  ;;  %8748 = vmatpush1.bf16.msra.mxu1 %v8956_v12  ;;  %v2762_v11 = vsel %vm11170_vm7, %v2722_v21, 0 }
 0x2f4   : > { %v2785_v19 = vpop.permute.xlu0 %2784  ;;  %v2789_v52 = vpop.permute.xlu1 %2788 }
 0x2f5   : > { %v2819_v62 = vsel %vm2816_vm6, %v2685_v39, %v2785_v19  ;;  %v2827_v55 = vsel %vm2816_vm6, %v2687_v44, %v2789_v52  ;;  %v2585_v39 = vrot.slane %v2583_v22, 7  ;;  %v2756_v19 = vsel %vm11170_vm7, %v2710_v16, 0 }
 0x2f6   : > { %3082 = vmatmul.mubr.bf16.vlgmr.msra.gmra.mrb[0].mxu0 %v2819_v62  ;;  %v2630_v62 = vor.u32 %v2628_v20, %v2627_v45  ;;  %v2632_v52 = vshrl.u32 %v11167_v1, 16  ;;  %v2642_v1 = vshll.u32 %v11183_v13, 16  ;;  %v2597_v20 = vshrl.u32 %v11143_v18, 16 }
 0x2f7   : > { %8561 = vmatprep.mubr.msk.bf16.mxu0 %vm2816_vm6, %v2753_v29  ;;  %v2711_v29 = vrot.slane %v2593_v49, 1  ;;  %v2588_v50 = vor.u32 %v2586_v56, %v2585_v39  ;;  %v2641_v13 = vrot.slane %v2639_v63, 7  ;;  %v2727_v22 = vrot.slane %v2649_v5, 1 }
 0x2f8   : > { %v2787_v37 = vpop.permute.xlu0 %2786  ;;  %v2791_v24 = vpop.permute.xlu1 %2790  ;;  %v2695_v26 = vsel %vm11219_vm10, 0, %v2630_v62  ;;  %v2724_v0 = vor.u32 %v2723_v32, %v2632_v52  ;;  %v2634_v8 = vrot.slane %v2632_v52, 7  ;;  %v2725_v9 = vrot.slane %v2642_v1, 1 }
 0x2f9   : > { %v2823_v51 = vsel %vm2816_vm6, %v2686_v40, %v2787_v37  ;;  %v2831_v23 = vsel %vm2816_vm6, %v2688_v3, %v2791_v24  ;;  %v2590_v37 = vshrl.u32 %v11137_v30, 16  ;;  %v2600_v24 = vshll.u32 %v11143_v18, 16 }
 0x2fa   : > { %v2689_v30 = vsel %vm11219_vm10, 0, %v2588_v50  ;;  %v2763_v36 = vsel %vm11170_vm7, %v2724_v0, 0  ;;  %v2637_v28 = vor.u32 %v2635_v60, %v2634_v8  ;;  %v2726_v57 = vor.u32 %v2725_v9, %v2639_v63 }
 0x2fb   : > { %v2712_v2 = vor.u32 %v2711_v29, %v2590_v37  ;;  %v2713_v59 = vrot.slane %v2600_v24, 1  ;;  %v2604_v16 = vshrl.u32 %v11147_v15, 16  ;;  %v2653_v29 = vshrl.u32 %v11204_v48, 16 }
 0x2fc   : > { %v11237_v38 = vpop.permute.xlu0 %2792  ;;  %v11242_v58 = vpop.permute.xlu1 %2794  ;;  %v2696_v43 = vsel %vm11219_vm10, 0, %v2637_v28  ;;  %v2764_v46 = vsel %vm11170_vm7, %v2726_v57, 0  ;;  %v2660_v0 = vshrl.u32 %v11206_v33, 16 }
 0x2fd   : > { %v2757_v27 = vsel %vm11170_vm7, %v2712_v2, 0  ;;  %v2835_v31 = vsel %vm2816_vm6, %v2689_v30, %v11237_v38  ;;  %v2714_v44 = vor.u32 %v2713_v59, %v2597_v20  ;;  %v2607_v38 = vshll.u32 %v11147_v15, 16 }
 0x2fe   : > { %3090 = vmatmul.mubr.bf16.gmra.mrb[4].mxu0 %v2823_v51  ;;  %v2606_v15 = vrot.slane %v2604_v16, 7  ;;  %v2655_v50 = vrot.slane %v2653_v29, 7  ;;  %v2663_v2 = vshll.u32 %v11206_v33, 16 }
 0x2ff   : > { %8562 = vmatprep.mubr.msk.bf16.mxu0 %vm2816_vm6, %v2754_v7  ;;  %v2592_v7 = vrot.slane %v2590_v37, 7 }
 0x300   : > { %v11246_v14 = vpop.permute.xlu0 %2796  ;;  %v11255_v61 = vpop.permute.xlu1 %2798  ;;  %v2609_v52 = vor.u32 %v2607_v38, %v2606_v15  ;;  %v2731_v8 = vrot.slane %v2663_v2, 1 }
 0x301   : > { %v2595_v56 = vor.u32 %v2593_v49, %v2592_v7  ;;  %v2656_v49 = vshll.u32 %v11204_v48, 16 }
 0x302   : > { %v2692_v48 = vsel %vm11219_vm10, 0, %v2609_v52  ;;  %v2732_v7 = vor.u32 %v2731_v8, %v2660_v0 }
 0x303   : > { %v2690_v18 = vsel %vm11219_vm10, 0, %v2595_v56 }
 0x304   : > { %v2801_v10 = vpop.permute.xlu0 %2800  ;;  %v2803_v42 = vpop.permute.xlu1 %2802  ;;  %v2839_v6 = vsel %vm2816_vm6, %v2690_v18, %v11242_v58 }
 0x305   : > { %v2851_v12 = vsel %vm2816_vm6, %v2693_v35, %v2801_v10  ;;  %v2855_v34 = vsel %vm2816_vm6, %v2694_v53, %v2803_v42  ;;  %v2599_v10 = vrot.slane %v2597_v20, 7 }
 0x306   : > { %3100 = vmatmul.mubr.bf16.gmra.mrb[8].mxu0 %v2827_v55  ;;  %3160 = vmatmul.mubr.bf16.vlgmr.msra.gmra.mrb[0].mxu1 %v2851_v12  ;;  %v2644_v55 = vor.u32 %v2642_v1, %v2641_v13  ;;  %v2646_v12 = vshrl.u32 %v11194_v47, 16  ;;  %v2847_v1 = vsel %vm2816_vm6, %v2692_v48, %v11255_v61 }
 0x307   : > { %8563 = vmatprep.mubr.msk.bf16.mxu0 %vm2816_vm6, %v2755_v4  ;;  %8569 = vmatprep.mubr.msk.bf16.mxu1 %vm2816_vm6, %v2761_v54  ;;  %v2758_v4 = vsel %vm11170_vm7, %v2714_v44, 0  ;;  %v2715_v54 = vrot.slane %v2607_v38, 1  ;;  %v2602_v42 = vor.u32 %v2600_v24, %v2599_v10 }
 0x308   : > { %v2805_v40 = vpop.permute.xlu0 %2804  ;;  %v2807_v35 = vpop.permute.xlu1 %2806  ;;  %v2697_v45 = vsel %vm11219_vm10, 0, %v2644_v55  ;;  %v2728_v60 = vor.u32 %v2727_v22, %v2646_v12  ;;  %v2648_v47 = vrot.slane %v2646_v12, 7 }
 0x309   : > { %v2859_v51 = vsel %vm2816_vm6, %v2695_v26, %v2805_v40  ;;  %v2863_v17 = vsel %vm2816_vm6, %v2696_v43, %v2807_v35  ;;  %v2716_v53 = vor.u32 %v2715_v54, %v2604_v16  ;;  %v2691_v58 = vsel %vm11219_vm10, 0, %v2602_v42 }
 0x30a   : > { %v2843_v62 = vsel %vm2816_vm6, %v2691_v58, %v11246_v14  ;;  %v2658_v26 = vor.u32 %v2656_v49, %v2655_v50 }
 0x30b   : > { %v2759_v3 = vsel %vm11170_vm7, %v2716_v53, 0 }
 0x30c   : > { %v2809_v21 = vpop.permute.xlu0 %2808  ;;  %v2699_v30 = vsel %vm11219_vm10, 0, %v2658_v26 }
 0x30d   : > { %v2867_v39 = vsel %vm2816_vm6, %v2697_v45, %v2809_v21  ;;  %v2811_v32 = vpop.permute.xlu1 %2810 }
 0x30e   : > { %3110 = vmatmul.mubr.bf16.gmra.mrb[12].mxu0 %v2831_v23  ;;  %3170 = vmatmul.mubr.bf16.gmra.mrb[4].mxu1 %v2855_v34  ;;  %v2765_v34 = vsel %vm11170_vm7, %v2728_v60, 0 }
 0x30f   : > { %8564 = vmatprep.mubr.msk.bf16.mxu0 %vm2816_vm6, %v2756_v19  ;;  %8570 = vmatprep.mubr.msk.bf16.mxu1 %vm2816_vm6, %v2762_v11  ;;  %v2651_v19 = vor.u32 %v2649_v5, %v2648_v47  ;;  %v2729_v11 = vrot.slane %v2656_v49, 1 }
 0x311   : > { %v2698_v23 = vsel %vm11219_vm10, 0, %v2651_v19  ;;  %v2730_v37 = vor.u32 %v2729_v11, %v2653_v29  ;;  %v2813_v24 = vpop.permute.xlu0 %2812  ;;  %v2815_v61 = vpop.permute.xlu1 %2814 }
 0x312   : > { %v2871_v14 = vsel %vm2816_vm6, %v2698_v23, %v2811_v32  ;;  %v2875_v59 = vsel %vm2816_vm6, %v2699_v30, %v2813_v24 }
 0x313   : > { %v2766_v40 = vsel %vm11170_vm7, %v2730_v37, 0 }
 0x316   : > { %3120 = vmatmul.mubr.bf16.gmra.mrb[16].mxu0 %v2835_v31  ;;  %3180 = vmatmul.mubr.bf16.gmra.mrb[8].mxu1 %v2859_v51  ;;  %v2767_v51 = vsel %vm11170_vm7, %v2732_v7, 0 }
 0x317   : > { %8565 = vmatprep.mubr.msk.bf16.mxu0 %vm2816_vm6, %v2757_v27  ;;  %8571 = vmatprep.mubr.msk.bf16.mxu1 %vm2816_vm6, %v2763_v36  ;;  %v2662_v27 = vrot.slane %v2660_v0, 7 }
 0x319   : > { %v2665_v33 = vor.u32 %v2663_v2, %v2662_v27 }
 0x31b   : > { %v2700_v36 = vsel %vm11219_vm10, 0, %v2665_v33 }
 0x31c   : > { %v2879_v28 = vsel %vm2816_vm6, %v2700_v36, %v2815_v61 }
 0x31e   : > { %3130 = vmatmul.mubr.bf16.gmra.mrb[20].mxu0 %v2839_v6  ;;  %3190 = vmatmul.mubr.bf16.gmra.mrb[12].mxu1 %v2863_v17 }
 0x31f   : > { %8566 = vmatprep.mubr.msk.bf16.mxu0 %vm2816_vm6, %v2758_v4  ;;  %8572 = vmatprep.mubr.msk.bf16.mxu1 %vm2816_vm6, %v2764_v46 }
 0x326   : > { %3140 = vmatmul.mubr.bf16.gmra.mrb[24].mxu0 %v2843_v62  ;;  %3200 = vmatmul.mubr.bf16.gmra.mrb[16].mxu1 %v2867_v39 }
 0x327   : > { %8567 = vmatprep.mubr.msk.bf16.mxu0 %vm2816_vm6, %v2759_v3  ;;  %8573 = vmatprep.mubr.msk.bf16.mxu1 %vm2816_vm6, %v2765_v34 }
 0x32e   : > { %3150 = vmatmul.mubr.bf16.gmra.mrb[28].mxu0 %v2847_v1  ;;  %3210 = vmatmul.mubr.bf16.gmra.mrb[20].mxu1 %v2871_v14 }
 0x32f   : > { %8574 = vmatprep.mubr.msk.bf16.mxu1 %vm2816_vm6, %v2766_v40 }
 0x336   : > { %3220 = vmatmul.mubr.bf16.gmra.mrb[24].mxu1 %v2875_v59 }
 0x337   : > { %8575 = vmatprep.mubr.msk.bf16.mxu1 %vm2816_vm6, %v2767_v51 }
 0x33e   : > { %3230 = vmatmul.mubr.bf16.gmra.mrb[28].mxu1 %v2879_v28 }
 0x3c9   : > { %v11353_v63 = vpop.f32.mrb[0].mxu0 }
 0x3ca   : > { %3273 = vrot.lane.b32.xlu0 %v11353_v63, %s9354_s13  ;;  %v3085_v9 = vpop.f32.mrb[1].mxu0 }
 0x3cb   : > { %v11357_v31 = vpop.f32.mrb[2].mxu0 }
 0x3cc   : > { %3275 = vrot.lane.b32.xlu1 %v11357_v31, %s9354_s13  ;;  %v3088_v20 = vpop.f32.mrb[3].mxu0 }
 0x3d1   : > { %v11361_v56 = vpop.f32.mrb[4].mxu0 }
 0x3d2   : > { %v3093_v44 = vpop.f32.mrb[5].mxu0 }
 0x3d3   : > { %v11363_v35 = vpop.f32.mrb[6].mxu0 }
 0x3d4   : > { %v3097_v43 = vpop.f32.mrb[7].mxu0 }
 0x3d9   : > { %v11365_v57 = vpop.f32.mrb[8].mxu0  ;;  %v11367_v13 = vpop.f32.mrb[0].mxu1 }
 0x3da   : > { %v3163_v5 = vpop.f32.mrb[1].mxu1  ;;  %3305 = vrot.lane.b32.xlu0 %v11367_v13, %s9354_s13  ;;  %v3103_v38 = vpop.f32.mrb[9].mxu0 }
 0x3db   : > { %v11371_v18 = vpop.f32.mrb[10].mxu0  ;;  %v11373_v10 = vpop.f32.mrb[2].mxu1 }
 0x3dc   : > { %v3167_v4 = vpop.f32.mrb[3].mxu1  ;;  %3307 = vrot.lane.b32.xlu1 %v11373_v10, %s9354_s13  ;;  %v3107_v54 = vpop.f32.mrb[11].mxu0 }
 0x3de   : > { %3454 = vrot.lane.b32.xlu0 %v3163_v5, %s9354_s13  ;;  %v8962_v5 = vld [vmem:[%s9724_s25 + $0xd4] ss:$8 sps:$4 sm:$0xff]  }
 0x3e0   : > { %3456 = vrot.lane.b32.xlu1 %v3167_v4, %s9354_s13  ;;  %v8965_v4 = vld [vmem:[%s9724_s25 + $0xe4] ss:$8 sps:$4 sm:$0xff]  }
 0x3e1   : > { %v11379_v17 = vpop.f32.mrb[12].mxu0  ;;  %v11381_v46 = vpop.f32.mrb[4].mxu1 }
 0x3e2   : > { %3277 = vrot.lane.b32.xlu0 %v11361_v56, %s9354_s13  ;;  %v3113_v55 = vpop.f32.mrb[13].mxu0  ;;  %v3173_v12 = vpop.f32.mrb[5].mxu1 }
 0x3e3   : > { %v11385_v22 = vpop.f32.mrb[14].mxu0  ;;  %v11387_v6 = vpop.f32.mrb[6].mxu1 }
 0x3e4   : > { %3426 = vrot.lane.b32.xlu1 %v3093_v44, %s9354_s13  ;;  %v3117_v16 = vpop.f32.mrb[15].mxu0  ;;  %v3177_v42 = vpop.f32.mrb[7].mxu1  ;;  %v8957_v44 = vld [vmem:[%s9724_s25 + $0xc0] ss:$8 sps:$4 sm:$0xff]  }
 0x3e6   : > { %3458 = vrot.lane.b32.xlu0 %v3173_v12, %s9354_s13  ;;  %v8966_v12 = vld [vmem:[%s9724_s25 + $0xf0] ss:$8 sps:$4 sm:$0xff]  }
 0x3e8   : > { %3279 = vrot.lane.b32.xlu1 %v11363_v35, %s9354_s13 }
 0x3e9   : > { %v11393_v53 = vpop.f32.mrb[16].mxu0  ;;  %v11395_v21 = vpop.f32.mrb[8].mxu1 }
 0x3ea   : > { %3428 = vrot.lane.b32.xlu0 %v3097_v43, %s9354_s13  ;;  %v3123_v45 = vpop.f32.mrb[17].mxu0  ;;  %v3183_v60 = vpop.f32.mrb[9].mxu1  ;;  %v8959_v43 = vld [vmem:[%s9724_s25 + $0xc4] ss:$8 sps:$4 sm:$0xff]  }
 0x3eb   : > { %v11398_v47 = vpop.f32.mrb[18].mxu0  ;;  %v11400_v49 = vpop.f32.mrb[10].mxu1  ;;  %4198 = vmatprep.subr.bf16.mxu1 %v8959_v43  ;;  %v8984_v43 = vld [vmem:[%s9724_s25 + $0x150] ss:$8 sps:$4 sm:$0xff]  }
 0x3ec   : > { %3460 = vrot.lane.b32.xlu1 %v3177_v42, %s9354_s13  ;;  %v3127_v58 = vpop.f32.mrb[19].mxu0  ;;  %v3187_v15 = vpop.f32.mrb[11].mxu1  ;;  %4199 = vmatpush1.bf16.msra.mxu1 %v8957_v44  ;;  %v8969_v42 = vld [vmem:[%s9724_s25 + $0x100] ss:$8 sps:$4 sm:$0xff]  }
 0x3ed   : > { %4200 = vmatprep.subr.bf16.mxu1 %v8962_v5  ;;  %v8989_v5 = vld [vmem:[%s9724_s25 + $0x164] ss:$8 sps:$4 sm:$0xff]  }
 0x3ee   : > { %3281 = vrot.lane.b32.xlu0 %v11365_v57, %s9354_s13 }
 0x3f0   : > { %3283 = vrot.lane.b32.xlu1 %v11371_v18, %s9354_s13 }
 0x3f1   : > { %v11407_v3 = vpop.f32.mrb[20].mxu0  ;;  %v11409_v39 = vpop.f32.mrb[12].mxu1 }
 0x3f2   : > { %14971 = vst [vmem:[#allocation25_spill] sm:$0xff] %v11409_v39  ;;  %3430 = vrot.lane.b32.xlu0 %v3103_v38, %s9354_s13  ;;  %v3133_v34 = vpop.f32.mrb[21].mxu0  ;;  %v3193_v19 = vpop.f32.mrb[13].mxu1  ;;  %v8960_v38 = vld [vmem:[%s9724_s25 + $0xd0] ss:$8 sps:$4 sm:$0xff]  }
 0x3f3   : > { %v11412_v29 = vpop.f32.mrb[22].mxu0  ;;  %v11414_v11 = vpop.f32.mrb[14].mxu1  ;;  %4201 = vmatpush1.bf16.msra.mxu1 %v8960_v38 }
 0x3f4   : > { %14972 = vst [vmem:[#allocation26_spill] sm:$0xff] %v11414_v11  ;;  %3432 = vrot.lane.b32.xlu1 %v3107_v54, %s9354_s13  ;;  %v3137_v62 = vpop.f32.mrb[23].mxu0  ;;  %v3197_v52 = vpop.f32.mrb[15].mxu1  ;;  %v8963_v54 = vld [vmem:[%s9724_s25 + $0xe0] ss:$8 sps:$4 sm:$0xff]   ;;  %4202 = vmatprep.subr.bf16.mxu1 %v8965_v4 }
 0x3f6   : > { %3285 = vrot.lane.b32.xlu0 %v11379_v17, %s9354_s13 }
 0x3f7   : > { %4203 = vmatpush1.bf16.msra.mxu1 %v8963_v54  ;;  %v8987_v54 = vld [vmem:[%s9724_s25 + $0x160] ss:$8 sps:$4 sm:$0xff]  }
 0x3f8   : > { %3287 = vrot.lane.b32.xlu1 %v11385_v22, %s9354_s13 }
 0x3f9   : > { %v11421_v32 = vpop.f32.mrb[24].mxu0  ;;  %v11423_v23 = vpop.f32.mrb[16].mxu1 }
 0x3fa   : > { %3434 = vrot.lane.b32.xlu0 %v3113_v55, %s9354_s13  ;;  %v3143_v37 = vpop.f32.mrb[25].mxu0  ;;  %v3203_v50 = vpop.f32.mrb[17].mxu1  ;;  %v8968_v55 = vld [vmem:[%s9724_s25 + $0xf4] ss:$8 sps:$4 sm:$0xff]  }
 0x3fb   : > { %v11426_v2 = vpop.f32.mrb[26].mxu0  ;;  %v11428_v48 = vpop.f32.mrb[18].mxu1  ;;  %4204 = vmatprep.subr.bf16.mxu1 %v8968_v55  ;;  %v8992_v55 = vld [vmem:[%s9724_s25 + $0x174] ss:$8 sps:$4 sm:$0xff]  }
 0x3fc   : > { %3436 = vrot.lane.b32.xlu1 %v3117_v16, %s9354_s13  ;;  %v3147_v14 = vpop.f32.mrb[27].mxu0  ;;  %v3207_v40 = vpop.f32.mrb[19].mxu1  ;;  %v8971_v16 = vld [vmem:[%s9724_s25 + $0x104] ss:$8 sps:$4 sm:$0xff]   ;;  %4205 = vmatpush1.bf16.msra.mxu1 %v8966_v12 }
 0x3fd   : > { %4206 = vmatprep.subr.bf16.mxu1 %v8971_v16 }
 0x3fe   : > { %3289 = vrot.lane.b32.xlu0 %v11393_v53, %s9354_s13 }
 0x400   : > { %3291 = vrot.lane.b32.xlu1 %v11398_v47, %s9354_s13  ;;  %4207 = vmatpush1.bf16.msra.mxu1 %v8969_v42 }
 0x401   : > { %v11435_v26 = vpop.f32.mrb[28].mxu0  ;;  %v11437_v0 = vpop.f32.mrb[20].mxu1 }
 0x402   : > { %3438 = vrot.lane.b32.xlu0 %v3123_v45, %s9354_s13  ;;  %v3153_v8 = vpop.f32.mrb[29].mxu0  ;;  %v11440_v1 = vpop.f32.mrb[21].mxu1  ;;  %v8974_v45 = vld [vmem:[%s9724_s25 + $0x114] ss:$8 sps:$4 sm:$0xff]  }
 0x403   : > { %v11442_v24 = vpop.f32.mrb[30].mxu0  ;;  %v11444_v30 = vpop.f32.mrb[22].mxu1  ;;  %4208 = vmatprep.subr.bf16.mxu1 %v8974_v45  ;;  %v8990_v45 = vld [vmem:[%s9724_s25 + $0x170] ss:$8 sps:$4 sm:$0xff]  }
 0x404   : > { %3440 = vrot.lane.b32.xlu1 %v3127_v58, %s9354_s13  ;;  %v3157_v7 = vpop.f32.mrb[31].mxu0  ;;  %v11447_v27 = vpop.f32.mrb[23].mxu1  ;;  %v8977_v58 = vld [vmem:[%s9724_s25 + $0x124] ss:$8 sps:$4 sm:$0xff]  }
 0x406   : > { %3293 = vrot.lane.b32.xlu0 %v11407_v3, %s9354_s13 }
 0x408   : > { %3295 = vrot.lane.b32.xlu1 %v11412_v29, %s9354_s13 }
 0x409   : > { %v11453_v59 = vpop.f32.mrb[24].mxu1 }
 0x40a   : > { %3442 = vrot.lane.b32.xlu0 %v3133_v34, %s9354_s13  ;;  %v11456_v51 = vpop.f32.mrb[25].mxu1  ;;  %v8980_v34 = vld [vmem:[%s9724_s25 + $0x134] ss:$8 sps:$4 sm:$0xff]  }
 0x40b   : > { %v11458_v33 = vpop.f32.mrb[26].mxu1 }
 0x40c   : > { %3444 = vrot.lane.b32.xlu1 %v3137_v62, %s9354_s13  ;;  %v11461_v61 = vpop.f32.mrb[27].mxu1  ;;  %v11518_v62 = vpop.permute.xlu1 %3553 }
 0x40e   : > { %3297 = vrot.lane.b32.xlu0 %v11421_v32, %s9354_s13 }
 0x410   : > { %3299 = vrot.lane.b32.xlu1 %v11426_v2, %s9354_s13 }
 0x411   : > { %v11467_v36 = vpop.f32.mrb[28].mxu1 }
 0x412   : > { %14973 = vst [vmem:[#allocation27_spill] sm:$0xff] %v11467_v36  ;;  %3446 = vrot.lane.b32.xlu0 %v3143_v37, %s9354_s13  ;;  %v11470_v28 = vpop.f32.mrb[29].mxu1  ;;  %v8983_v37 = vld [vmem:[%s9724_s25 + $0x144] ss:$8 sps:$4 sm:$0xff]  }
 0x413   : > { %v11472_v9 = vpop.f32.mrb[30].mxu1 }
 0x414   : > { %14974 = vst [vmem:[#allocation28_spill] sm:$0xff] %v11472_v9  ;;  %3448 = vrot.lane.b32.xlu1 %v3147_v14, %s9354_s13  ;;  %v11475_v20 = vpop.f32.mrb[31].mxu1 }
 0x416   : > { %3301 = vrot.lane.b32.xlu0 %v11435_v26, %s9354_s13 }
 0x418   : > { %3303 = vrot.lane.b32.xlu1 %v11442_v24, %s9354_s13 }
 0x41a   : > { %3450 = vrot.lane.b32.xlu0 %v3153_v8, %s9354_s13  ;;  %v8986_v8 = vld [vmem:[%s9724_s25 + $0x154] ss:$8 sps:$4 sm:$0xff]  }
 0x41c   : > { %3452 = vrot.lane.b32.xlu1 %v3157_v7, %s9354_s13 }
 0x41e   : > { %3462 = vrot.lane.b32.xlu0 %v3183_v60, %s9354_s13  ;;  %v8972_v60 = vld [vmem:[%s9724_s25 + $0x110] ss:$8 sps:$4 sm:$0xff]  }
 0x41f   : > { %4209 = vmatpush1.bf16.msra.mxu1 %v8972_v60 }
 0x420   : > { %3464 = vrot.lane.b32.xlu1 %v3187_v15, %s9354_s13  ;;  %v8975_v15 = vld [vmem:[%s9724_s25 + $0x120] ss:$8 sps:$4 sm:$0xff]   ;;  %4210 = vmatprep.subr.bf16.mxu1 %v8977_v58 }
 0x422   : > { %3309 = vrot.lane.b32.xlu0 %v11381_v46, %s9354_s13 }
 0x423   : > { %4211 = vmatpush1.bf16.msra.mxu1 %v8975_v15 }
 0x424   : > { %3311 = vrot.lane.b32.xlu1 %v11387_v6, %s9354_s13  ;;  %4212 = vmatprep.subr.bf16.mxu1 %v8980_v34 }
 0x426   : > { %3466 = vrot.lane.b32.xlu0 %v3193_v19, %s9354_s13  ;;  %v11516_v19 = vpop.permute.xlu0 %3271 }
 0x427   : > { %14975 = vst [vmem:[#allocation29_spill] sm:$0xff] %v11516_v19  ;;  %v3364_v16 = vadd.f32 %v11516_v19, %v11353_v63  ;;  %v3365_v34 = vadd.f32 %v11516_v19, %v11357_v31 }
 0x428   : > { %3468 = vrot.lane.b32.xlu1 %v3197_v52, %s9354_s13  ;;  %v8978_v52 = vld [vmem:[%s9724_s25 + $0x130] ss:$8 sps:$4 sm:$0xff]  }
 0x429   : > { %4213 = vmatpush1.bf16.msra.mxu1 %v8978_v52 }
 0x42a   : > { %3313 = vrot.lane.b32.xlu0 %v11395_v21, %s9354_s13  ;;  %4214 = vmatprep.subr.bf16.mxu1 %v8983_v37 }
 0x42c   : > { %3315 = vrot.lane.b32.xlu1 %v11400_v49, %s9354_s13 }
 0x42e   : > { %3470 = vrot.lane.b32.xlu0 %v3203_v50, %s9354_s13 }
 0x430   : > { %3472 = vrot.lane.b32.xlu1 %v3207_v40, %s9354_s13  ;;  %v8981_v40 = vld [vmem:[%s9724_s25 + $0x140] ss:$8 sps:$4 sm:$0xff]  }
 0x431   : > { %4215 = vmatpush1.bf16.msra.mxu1 %v8981_v40 }
 0x432   : > { %3317 = vrot.lane.b32.xlu0 %v11409_v39, %s9354_s13  ;;  %4216 = vmatprep.subr.bf16.mxu1 %v8986_v8 }
 0x434   : > { %3319 = vrot.lane.b32.xlu1 %v11414_v11, %s9354_s13 }
 0x435   : > { %4217 = vmatpush1.bf16.msra.mxu1 %v8984_v43 }
 0x436   : > { %4218 = vmatprep.subr.bf16.mxu1 %v8989_v5 }
 0x439   : > { %4219 = vmatpush1.bf16.msra.mxu1 %v8987_v54 }
 0x43a   : > { %4220 = vmatprep.subr.bf16.mxu1 %v8992_v55 }
 0x43c   : > { %v3274_v50 = vpop.permute.xlu0 %3273 }
 0x43d   : > { %4221 = vmatpush1.bf16.msra.mxu1 %v8990_v45  ;;  %v3366_v55 = vadd.f32 %v3274_v50, %v11361_v56 }
 0x43e   : > { %v3276_v14 = vpop.permute.xlu1 %3275 }
 0x43f   : > { %v3367_v36 = vadd.f32 %v3276_v14, %v11363_v35 }
 0x44c   : > { %v11524_v7 = vpop.permute.xlu0 %3305 }
 0x44e   : > { %v11526_v44 = vpop.permute.xlu1 %3307 }
 0x450   : > { %v11530_v38 = vpop.permute.xlu0 %3454 }
 0x452   : > { %v11532_v4 = vpop.permute.xlu1 %3456 }
 0x454   : > { %v3278_v12 = vpop.permute.xlu0 %3277 }
 0x455   : > { %v3368_v35 = vadd.f32 %v3278_v12, %v11365_v57 }
 0x456   : > { %v3427_v42 = vpop.permute.xlu1 %3426 }
 0x457   : > { %v3516_v60 = vadd.f32 %v3427_v42, %v3364_v16 }
 0x458   : > { %v11539_v58 = vpop.permute.xlu0 %3458 }
 0x459   : > { %v3556_v52 = vadd.f32 %v11518_v62, %v3516_v60 }
 0x45a   : > { %v3280_v15 = vpop.permute.xlu1 %3279 }
 0x45b   : > { %v3588_v43 = vmul.f32 0.2, %v3556_v52 }
 0x45c   : > { %v3429_v37 = vpop.permute.xlu0 %3428 }
 0x45d   : > { %v3517_v40 = vadd.f32 %v3429_v37, %v3365_v34  ;;  %v3620_v42 = vmax.f32 %v3556_v52, %v3588_v43 }
 0x45e   : > { %v11544_v8 = vpop.permute.xlu1 %3460 }
 0x45f   : > { %v3557_v63 = vadd.f32 %v11518_v62, %v3517_v40 }
 0x460   : > { %v3282_v5 = vpop.permute.xlu0 %3281 }
 0x461   : > { %v3589_v54 = vmul.f32 0.2, %v3557_v63 }
 0x462   : > { %v3284_v16 = vpop.permute.xlu1 %3283 }
 0x463   : > { %v3621_v9 = vmax.f32 %v3557_v63, %v3589_v54 }
 0x464   : > { %v3431_v45 = vpop.permute.xlu0 %3430 }
 0x465   : > { %v11549_v31 = vpack.c.bf16 %v3621_v9, %v3620_v42  ;;  %v3518_v60 = vadd.f32 %v3431_v45, %v3366_v55  ;;  %v3369_v55 = vadd.f32 %v3280_v15, %v11371_v18 }
 0x466   : > { %v3433_v19 = vpop.permute.xlu1 %3432 }
 0x467   : > { %14976 = vst [vmem:[#allocation30_spill] sm:$0xff] %v11549_v31  ;;  %v3558_v34 = vadd.f32 %v11518_v62, %v3518_v60  ;;  %v3519_v37 = vadd.f32 %v3433_v19, %v3367_v36  ;;  %v3695_v25 = vshrl.u32 %v11549_v31, 16  ;;  %v3698_v40 = vshll.u32 %v11549_v31, 16 }
 0x468   : > { %v3286_v11 = vpop.permute.xlu0 %3285 }
 0x469   : > { %v3590_v39 = vmul.f32 0.2, %v3558_v34  ;;  %v3559_v56 = vadd.f32 %v11518_v62, %v3519_v37  ;;  %v3697_v50 = vrot.slane %v3695_v25, 7  ;;  %v3870_v43 = vrot.slane %v3698_v40, 1 }
 0x46a   : > { %v3288_v52 = vpop.permute.xlu1 %3287 }
 0x46b   : > { %v3591_v9 = vmul.f32 0.2, %v3559_v56  ;;  %v3700_v14 = vor.u32 %v3698_v40, %v3697_v50  ;;  %v3871_v54 = vor.u32 %v3870_v43, %v3695_v25  ;;  %v3622_v36 = vmax.f32 %v3558_v34, %v3590_v39 }
 0x46c   : > { %v3435_v63 = vpop.permute.xlu0 %3434  ;;  %v3370_v40 = vadd.f32 %v3282_v5, %v11379_v17  ;;  %v3371_v43 = vadd.f32 %v3284_v16, %v11385_v22 }
 0x46d   : > { %v3623_v19 = vmax.f32 %v3559_v56, %v3591_v9  ;;  %v3520_v42 = vadd.f32 %v3435_v63, %v3368_v35  ;;  %3806 = vrot.lane.b32.xlu0 %v3700_v14, %s9354_s13  ;;  %v3918_v60 = vsel %vm11170_vm7, %v3871_v54, 0 }
 0x46e   : > { %v3437_v45 = vpop.permute.xlu1 %3436  ;;  %3950 = vrot.lane.b32.xlu1 %v3918_v60, %s9354_s13 }
 0x46f   : > { %v11560_v37 = vpack.c.bf16 %v3623_v19, %v3622_v36  ;;  %v3560_v31 = vadd.f32 %v11518_v62, %v3520_v42  ;;  %v3521_v57 = vadd.f32 %v3437_v45, %v3369_v55 }
 0x470   : > { %v3290_v12 = vpop.permute.xlu0 %3289 }
 0x471   : > { %v3592_v25 = vmul.f32 0.2, %v3560_v31  ;;  %v3561_v18 = vadd.f32 %v11518_v62, %v3521_v57  ;;  %3474 = vrot.lane.b32.xlu0 %v11440_v1, %s9354_s13  ;;  %v3702_v39 = vshrl.u32 %v11560_v37, 16  ;;  %v3705_v34 = vshll.u32 %v11560_v37, 16 }
 0x472   : > { %v11568_v15 = vpop.permute.xlu1 %3291  ;;  %3476 = vrot.lane.b32.xlu1 %v11447_v27, %s9354_s13  ;;  %v3372_v57 = vadd.f32 %v3286_v11, %v11393_v53 }
 0x473   : > { %v3593_v56 = vmul.f32 0.2, %v3561_v18  ;;  %v3704_v50 = vrot.slane %v3702_v39, 7  ;;  %v3872_v9 = vrot.slane %v3705_v34, 1  ;;  %v3624_v14 = vmax.f32 %v3560_v31, %v3592_v25 }
 0x474   : > { %v3439_v35 = vpop.permute.xlu0 %3438 }
 0x475   : > { %v3625_v63 = vmax.f32 %v3561_v18, %v3593_v56  ;;  %v3522_v1 = vadd.f32 %v3439_v35, %v3370_v40  ;;  %v3707_v54 = vor.u32 %v3705_v34, %v3704_v50  ;;  %v3873_v36 = vor.u32 %v3872_v9, %v3702_v39 }
 0x476   : > { %v3441_v55 = vpop.permute.xlu1 %3440  ;;  %v3373_v39 = vadd.f32 %v3288_v52, %v11398_v47 }
 0x477   : > { %v11575_v19 = vpack.c.bf16 %v3625_v63, %v3624_v14  ;;  %v3562_v42 = vadd.f32 %v11518_v62, %v3522_v1  ;;  %v3523_v17 = vadd.f32 %v3441_v55, %v3371_v43  ;;  %3808 = vrot.lane.b32.xlu0 %v3707_v54, %s9354_s13  ;;  %v3919_v27 = vsel %vm11170_vm7, %v3873_v36, 0 }
 0x478   : > { %v3294_v5 = vpop.permute.xlu0 %3293  ;;  %3952 = vrot.lane.b32.xlu1 %v3919_v27, %s9354_s13  ;;  %v3374_v27 = vadd.f32 %v3290_v12, %v11407_v3  ;;  %v3375_v3 = vadd.f32 %v11568_v15, %v11412_v29 }
 0x479   : > { %v3594_v22 = vmul.f32 0.2, %v3562_v42  ;;  %v3563_v16 = vadd.f32 %v11518_v62, %v3523_v17  ;;  %v3709_v31 = vshrl.u32 %v11575_v19, 16  ;;  %v3712_v60 = vshll.u32 %v11575_v19, 16 }
 0x47a   : > { %v11584_v45 = vpop.permute.xlu1 %3295 }
 0x47b   : > { %v3595_v25 = vmul.f32 0.2, %v3563_v16  ;;  %3321 = vrot.lane.b32.xlu0 %v11423_v23, %s9354_s13  ;;  %v3711_v18 = vrot.slane %v3709_v31, 7  ;;  %v3874_v40 = vrot.slane %v3712_v60, 1  ;;  %v3626_v56 = vmax.f32 %v3562_v42, %v3594_v22 }
 0x47c   : > { %v3443_v34 = vpop.permute.xlu0 %3442  ;;  %3323 = vrot.lane.b32.xlu1 %v11428_v48, %s9354_s13 }
 0x47d   : > { %v3627_v50 = vmax.f32 %v3563_v16, %v3595_v25  ;;  %v3524_v43 = vadd.f32 %v3443_v34, %v3372_v57  ;;  %v3714_v35 = vor.u32 %v3712_v60, %v3711_v18  ;;  %v3875_v14 = vor.u32 %v3874_v40, %v3709_v31 }
 0x47e   : > { %v3445_v9 = vpop.permute.xlu1 %3444 }
 0x47f   : > { %v11593_v63 = vpack.c.bf16 %v3627_v50, %v3626_v56  ;;  %v3564_v53 = vadd.f32 %v11518_v62, %v3524_v43  ;;  %v3525_v11 = vadd.f32 %v3445_v9, %v3373_v39  ;;  %3810 = vrot.lane.b32.xlu0 %v3714_v35, %s9354_s13  ;;  %v3920_v47 = vsel %vm11170_vm7, %v3875_v14, 0 }
 0x480   : > { %v3298_v1 = vpop.permute.xlu0 %3297  ;;  %3954 = vrot.lane.b32.xlu1 %v3920_v47, %s9354_s13  ;;  %v3376_v9 = vadd.f32 %v3294_v5, %v11421_v32  ;;  %v3377_v32 = vadd.f32 %v11584_v45, %v11426_v2 }
 0x481   : > { %v3596_v52 = vmul.f32 0.2, %v3564_v53  ;;  %v3565_v54 = vadd.f32 %v11518_v62, %v3525_v11  ;;  %v3378_v55 = vadd.f32 %v3298_v1, %v11435_v26  ;;  %v3716_v36 = vshrl.u32 %v11593_v63, 16 }
 0x482   : > { %v3300_v42 = vpop.permute.xlu1 %3299  ;;  %v3719_v17 = vshll.u32 %v11593_v63, 16 }
 0x483   : > { %v3597_v22 = vmul.f32 0.2, %v3565_v54  ;;  %v3530_v16 = vadd.f32 %v11530_v38, %v3378_v55  ;;  %v3379_v31 = vadd.f32 %v3300_v42, %v11442_v24  ;;  %3478 = vrot.lane.b32.xlu0 %v11456_v51, %s9354_s13  ;;  %v3628_v60 = vmax.f32 %v3564_v53, %v3596_v52 }
 0x484   : > { %v3447_v57 = vpop.permute.xlu0 %3446  ;;  %v3718_v26 = vrot.slane %v3716_v36, 7  ;;  %v3876_v25 = vrot.slane %v3719_v17, 1  ;;  %3480 = vrot.lane.b32.xlu1 %v11461_v61, %s9354_s13 }
 0x485   : > { %v3629_v18 = vmax.f32 %v3565_v54, %v3597_v22  ;;  %v3570_v39 = vadd.f32 %v11518_v62, %v3530_v16  ;;  %v3531_v34 = vadd.f32 %v11532_v4, %v3379_v31  ;;  %v3526_v40 = vadd.f32 %v3447_v57, %v3374_v27 }
 0x486   : > { %v3449_v24 = vpop.permute.xlu1 %3448  ;;  %v3721_v38 = vor.u32 %v3719_v17, %v3718_v26  ;;  %v3877_v12 = vor.u32 %v3876_v25, %v3716_v36 }
 0x487   : > { %v11615_v51 = vpack.c.bf16 %v3629_v18, %v3628_v60  ;;  %v3602_v56 = vmul.f32 0.2, %v3570_v39  ;;  %v3571_v50 = vadd.f32 %v11518_v62, %v3531_v34  ;;  %v3566_v43 = vadd.f32 %v11518_v62, %v3526_v40 }
 0x488   : > { %v3527_v35 = vadd.f32 %v3449_v24, %v3375_v3  ;;  %3812 = vrot.lane.b32.xlu0 %v3721_v38, %s9354_s13  ;;  %v3302_v4 = vpop.permute.xlu0 %3301  ;;  %v3921_v61 = vsel %vm11170_vm7, %v3877_v12, 0  ;;  %v3383_v3 = vadd.f32 %v11526_v44, %v11387_v6 }
 0x489   : > { %v3603_v29 = vmul.f32 0.2, %v3571_v50  ;;  %v3380_v15 = vadd.f32 %v3302_v4, %v11367_v13  ;;  %3956 = vrot.lane.b32.xlu1 %v3921_v61, %s9354_s13  ;;  %v3598_v14 = vmul.f32 0.2, %v3566_v43  ;;  %v3723_v1 = vshrl.u32 %v11615_v51, 16 }
 0x48a   : > { %v3567_v53 = vadd.f32 %v11518_v62, %v3527_v35  ;;  %v3304_v11 = vpop.permute.xlu1 %3303  ;;  %v3726_v47 = vshll.u32 %v11615_v51, 16  ;;  %v3634_v52 = vmax.f32 %v3570_v39, %v3602_v56  ;;  %v3382_v39 = vadd.f32 %v11524_v7, %v11381_v46 }
 0x48b   : > { %v3635_v54 = vmax.f32 %v3571_v50, %v3603_v29  ;;  %v3532_v55 = vadd.f32 %v11539_v58, %v3380_v15  ;;  %v3381_v36 = vadd.f32 %v3304_v11, %v11373_v10  ;;  %v3725_v42 = vrot.slane %v3723_v1, 7 }
 0x48c   : > { %v3599_v13 = vmul.f32 0.2, %v3567_v53  ;;  %3325 = vrot.lane.b32.xlu0 %v11437_v0, %s9354_s13  ;;  %v3451_v5 = vpop.permute.xlu0 %3450  ;;  %v3878_v17 = vrot.slane %v3726_v47, 1  ;;  %v3630_v10 = vmax.f32 %v3566_v43, %v3598_v14 }
 0x48d   : > { %v11634_v27 = vpack.c.bf16 %v3635_v54, %v3634_v52  ;;  %v3572_v22 = vadd.f32 %v11518_v62, %v3532_v55  ;;  %v3533_v16 = vadd.f32 %v11544_v8, %v3381_v36  ;;  %v3528_v31 = vadd.f32 %v3451_v5, %v3376_v9  ;;  %3327 = vrot.lane.b32.xlu1 %v11444_v30, %s9354_s13 }
 0x48e   : > { %v3631_v58 = vmax.f32 %v3567_v53, %v3599_v13  ;;  %v3453_v2 = vpop.permute.xlu1 %3452  ;;  %v3728_v45 = vor.u32 %v3726_v47, %v3725_v42  ;;  %v3879_v60 = vor.u32 %v3878_v17, %v3723_v1 }
 0x48f   : > { %v3604_v57 = vmul.f32 0.2, %v3572_v22  ;;  %v3573_v26 = vadd.f32 %v11518_v62, %v3533_v16  ;;  %v3568_v25 = vadd.f32 %v11518_v62, %v3528_v31  ;;  %v3529_v18 = vadd.f32 %v3453_v2, %v3377_v32 }
 0x490   : > { %v11644_v34 = vpack.c.bf16 %v3631_v58, %v3630_v10  ;;  %3814 = vrot.lane.b32.xlu0 %v3728_v45, %s9354_s13  ;;  %v3463_v8 = vpop.permute.xlu0 %3462  ;;  %v3922_v40 = vsel %vm11170_vm7, %v3879_v60, 0  ;;  %v3744_v10 = vshrl.u32 %v11634_v27, 16 }
 0x491   : > { %v3605_v24 = vmul.f32 0.2, %v3573_v26  ;;  %v3600_v38 = vmul.f32 0.2, %v3568_v25  ;;  %v3569_v12 = vadd.f32 %v11518_v62, %v3529_v18  ;;  %3958 = vrot.lane.b32.xlu1 %v3922_v40, %s9354_s13  ;;  %v3534_v56 = vadd.f32 %v3463_v8, %v3382_v39 }
 0x492   : > { %v3465_v50 = vpop.permute.xlu1 %3464  ;;  %v3730_v46 = vshrl.u32 %v11644_v34, 16  ;;  %v3733_v7 = vshll.u32 %v11644_v34, 16  ;;  %v3636_v43 = vmax.f32 %v3572_v22, %v3604_v57 }
 0x493   : > { %v3637_v35 = vmax.f32 %v3573_v26, %v3605_v24  ;;  %v3601_v4 = vmul.f32 0.2, %v3569_v12  ;;  %v3535_v61 = vadd.f32 %v3465_v50, %v3383_v3  ;;  %v3574_v9 = vadd.f32 %v11518_v62, %v3534_v56  ;;  %v14977_v56 = vld [vmem:[#allocation25_spill] sm:$0xff] }
 0x494   : > { %3482 = vrot.lane.b32.xlu0 %v11470_v28, %s9354_s13  ;;  %v3310_v6 = vpop.permute.xlu0 %3309  ;;  %v3732_v44 = vrot.slane %v3730_v46, 7  ;;  %v3880_v29 = vrot.slane %v3733_v7, 1  ;;  %v3632_v14 = vmax.f32 %v3568_v25, %v3600_v38  ;;  %v3746_v24 = vrot.slane %v3744_v10, 7 }
 0x495   : > { %v11658_v15 = vpack.c.bf16 %v3637_v35, %v3636_v43  ;;  %v3633_v53 = vmax.f32 %v3569_v12, %v3601_v4  ;;  %v3575_v11 = vadd.f32 %v11518_v62, %v3535_v61  ;;  %3484 = vrot.lane.b32.xlu1 %v11475_v20, %s9354_s13  ;;  %v3606_v1 = vmul.f32 0.2, %v3574_v9 }
 0x496   : > { %v3312_v47 = vpop.permute.xlu1 %3311  ;;  %v3735_v52 = vor.u32 %v3733_v7, %v3732_v44  ;;  %v3881_v54 = vor.u32 %v3880_v29, %v3730_v46  ;;  %v3384_v28 = vadd.f32 %v3310_v6, %v11395_v21  ;;  %v3747_v20 = vshll.u32 %v11634_v27, 16  ;;  %v14978_v6 = vld [vmem:[#allocation26_spill] sm:$0xff] }
 0x497   : > { %v11663_v55 = vpack.c.bf16 %v3633_v53, %v3632_v14  ;;  %v3607_v36 = vmul.f32 0.2, %v3575_v11  ;;  %v3638_v32 = vmax.f32 %v3574_v9, %v3606_v1  ;;  %v3385_v13 = vadd.f32 %v3312_v47, %v11400_v49 }
 0x498   : > { %3816 = vrot.lane.b32.xlu0 %v3735_v52, %s9354_s13  ;;  %v3467_v5 = vpop.permute.xlu0 %3466  ;;  %v3923_v42 = vsel %vm11170_vm7, %v3881_v54, 0  ;;  %v3884_v26 = vrot.slane %v3747_v20, 1  ;;  %v3754_v25 = vshll.u32 %v11658_v15, 16  ;;  %v3751_v38 = vshrl.u32 %v11658_v15, 16 }
 0x499   : > { %v3639_v17 = vmax.f32 %v3575_v11, %v3607_v36  ;;  %v3536_v22 = vadd.f32 %v3467_v5, %v3384_v28  ;;  %3960 = vrot.lane.b32.xlu1 %v3923_v42, %s9354_s13  ;;  %v3737_v16 = vshrl.u32 %v11663_v55, 16  ;;  %v3740_v31 = vshll.u32 %v11663_v55, 16 }
 0x49a   : > { %v3469_v21 = vpop.permute.xlu1 %3468  ;;  %v3885_v43 = vor.u32 %v3884_v26, %v3744_v10  ;;  %v3886_v35 = vrot.slane %v3754_v25, 1  ;;  %v3749_v53 = vor.u32 %v3747_v20, %v3746_v24  ;;  %v3753_v11 = vrot.slane %v3751_v38, 7 }
 0x49b   : > { %v11675_v49 = vpack.c.bf16 %v3639_v17, %v3638_v32  ;;  %v3576_v58 = vadd.f32 %v11518_v62, %v3536_v22  ;;  %v3537_v2 = vadd.f32 %v3469_v21, %v3385_v13  ;;  %v3739_v45 = vrot.slane %v3737_v16, 7 }
 0x49c   : > { %3329 = vrot.lane.b32.xlu0 %v11453_v59, %s9354_s13  ;;  %v3314_v60 = vpop.permute.xlu0 %3313  ;;  %v3882_v57 = vrot.slane %v3740_v31, 1  ;;  %v3925_v36 = vsel %vm11170_vm7, %v3885_v43, 0  ;;  %v3887_v28 = vor.u32 %v3886_v35, %v3751_v38  ;;  %v3756_v42 = vor.u32 %v3754_v25, %v3753_v11 }
 0x49d   : > { %v3608_v18 = vmul.f32 0.2, %v3576_v58  ;;  %v3577_v39 = vadd.f32 %v11518_v62, %v3537_v2  ;;  %3331 = vrot.lane.b32.xlu1 %v11458_v33, %s9354_s13  ;;  %v3742_v8 = vor.u32 %v3740_v31, %v3739_v45  ;;  %v3386_v50 = vadd.f32 %v3314_v60, %v14977_v56 }
 0x49e   : > { %v3316_v40 = vpop.permute.xlu1 %3315  ;;  %v3883_v3 = vor.u32 %v3882_v57, %v3737_v16  ;;  %v3761_v4 = vshll.u32 %v11675_v49, 16  ;;  %v3758_v1 = vshrl.u32 %v11675_v49, 16  ;;  %v3926_v31 = vsel %vm11170_vm7, %v3887_v28, 0 }
 0x49f   : > { %v3609_v12 = vmul.f32 0.2, %v3577_v39  ;;  %v3640_v61 = vmax.f32 %v3576_v58, %v3608_v18  ;;  %v3387_v44 = vadd.f32 %v3316_v40, %v14978_v6 }
 0x4a0   : > { %3818 = vrot.lane.b32.xlu0 %v3742_v8, %s9354_s13  ;;  %v3471_v46 = vpop.permute.xlu0 %3470  ;;  %v3924_v7 = vsel %vm11170_vm7, %v3883_v3, 0  ;;  %v3888_v32 = vrot.slane %v3761_v4, 1  ;;  %v3760_v20 = vrot.slane %v3758_v1, 7 }
 0x4a1   : > { %v3641_v9 = vmax.f32 %v3577_v39, %v3609_v12  ;;  %v3538_v29 = vadd.f32 %v3471_v46, %v3386_v50  ;;  %3962 = vrot.lane.b32.xlu1 %v3924_v7, %s9354_s13 }
 0x4a2   : > { %v3473_v14 = vpop.permute.xlu1 %3472  ;;  %v3889_v21 = vor.u32 %v3888_v32, %v3758_v1  ;;  %v3763_v45 = vor.u32 %v3761_v4, %v3760_v20  ;;  %v14980_v4 = vld [vmem:[#allocation30_spill] sm:$0xff] }
 0x4a3   : > { %v11693_v47 = vpack.c.bf16 %v3641_v9, %v3640_v61  ;;  %v3578_v52 = vadd.f32 %v11518_v62, %v3538_v29  ;;  %v3539_v54 = vadd.f32 %v3473_v14, %v3387_v44 }
 0x4a4   : > { %3820 = vrot.lane.b32.xlu0 %v3749_v53, %s9354_s13  ;;  %v3927_v26 = vsel %vm11170_vm7, %v3889_v21, 0  ;;  %v3318_v50 = vpop.permute.xlu0 %3317 }
 0x4a5   : > { %v3610_v13 = vmul.f32 0.2, %v3578_v52  ;;  %v3579_v5 = vadd.f32 %v11518_v62, %v3539_v54  ;;  %3964 = vrot.lane.b32.xlu1 %v3925_v36, %s9354_s13  ;;  %v3765_v17 = vshrl.u32 %v11693_v47, 16  ;;  %v3768_v22 = vshll.u32 %v11693_v47, 16 }
 0x4a6   : > { %v3320_v46 = vpop.permute.xlu1 %3319  ;;  %v3388_v6 = vadd.f32 %v3318_v50, %v11423_v23 }
 0x4a7   : > { %v3611_v16 = vmul.f32 0.2, %v3579_v5  ;;  %v3890_v10 = vrot.slane %v3768_v22, 1  ;;  %v3642_v58 = vmax.f32 %v3578_v52, %v3610_v13  ;;  %v3767_v60 = vrot.slane %v3765_v17, 7 }
 0x4a8   : > { %3822 = vrot.lane.b32.xlu0 %v3756_v42, %s9354_s13  ;;  %v3389_v29 = vadd.f32 %v3320_v46, %v11428_v48 }
 0x4a9   : > { %v3643_v2 = vmax.f32 %v3579_v5, %v3611_v16  ;;  %3966 = vrot.lane.b32.xlu1 %v3926_v31, %s9354_s13  ;;  %v3891_v25 = vor.u32 %v3890_v10, %v3765_v17  ;;  %v3770_v8 = vor.u32 %v3768_v22, %v3767_v60 }
 0x4ab   : > { %v11707_v57 = vpack.c.bf16 %v3643_v2, %v3642_v58  ;;  %v3928_v24 = vsel %vm11170_vm7, %v3891_v25, 0 }
 0x4ac   : > { %3824 = vrot.lane.b32.xlu0 %v3763_v45, %s9354_s13 }
 0x4ad   : > { %3968 = vrot.lane.b32.xlu1 %v3927_v26, %s9354_s13  ;;  %v3772_v18 = vshrl.u32 %v11707_v57, 16  ;;  %v3775_v39 = vshll.u32 %v11707_v57, 16 }
 0x4af   : > { %v3774_v40 = vrot.slane %v3772_v18, 7  ;;  %v3892_v3 = vrot.slane %v3775_v39, 1 }
 0x4b0   : > { %3826 = vrot.lane.b32.xlu0 %v3770_v8, %s9354_s13 }
 0x4b1   : > { %3970 = vrot.lane.b32.xlu1 %v3928_v24, %s9354_s13  ;;  %v3777_v38 = vor.u32 %v3775_v39, %v3774_v40  ;;  %v3893_v12 = vor.u32 %v3892_v3, %v3772_v18 }
 0x4b3   : > { %v3929_v56 = vsel %vm11170_vm7, %v3893_v12, 0 }
 0x4b4   : > { %3828 = vrot.lane.b32.xlu0 %v3777_v38, %s9354_s13 }
 0x4b5   : > { %3972 = vrot.lane.b32.xlu1 %v3929_v56, %s9354_s13 }
 0x4df   : > { %v3807_v7 = vpop.permute.xlu0 %3806 }
 0x4e0   : > { %v3854_v35 = vsel %vm11219_vm10, 0, %v3807_v7  ;;  %v3951_v9 = vpop.permute.xlu1 %3950 }
 0x4e1   : > { %v3983_v61 = vsel %vm2816_vm6, %v3854_v35, %v14980_v4  ;;  %8625 = vmatprep.mubr.msk.bf16.mxu1 %vm2816_vm6, %v3951_v9 }
 0x4e2   : > { %4231 = vmatmul.mubr.bf16.vlgmr.msra.gmra.mrb[32].mxu1 %v3983_v61 }
 0x4e3   : > { %v3475_v44 = vpop.permute.xlu0 %3474 }
 0x4e4   : > { %v3540_v14 = vadd.f32 %v3475_v44, %v3388_v6  ;;  %v3477_v53 = vpop.permute.xlu1 %3476 }
 0x4e5   : > { %v3541_v1 = vadd.f32 %v3477_v53, %v3389_v29 }
 0x4e6   : > { %v3580_v11 = vadd.f32 %v11518_v62, %v3540_v14 }
 0x4e7   : > { %v3581_v54 = vadd.f32 %v11518_v62, %v3541_v1 }
 0x4e8   : > { %v3612_v52 = vmul.f32 0.2, %v3580_v11 }
 0x4e9   : > { %v3809_v36 = vpop.permute.xlu0 %3808  ;;  %v3613_v32 = vmul.f32 0.2, %v3581_v54 }
 0x4ea   : > { %v3644_v28 = vmax.f32 %v3580_v11, %v3612_v52  ;;  %v3855_v23 = vsel %vm11219_vm10, 0, %v3809_v36  ;;  %v3953_v13 = vpop.permute.xlu1 %3952 }
 0x4eb   : > { %v3986_v5 = vsel %vm2816_vm6, %v3855_v23, %v11560_v37  ;;  %v3645_v42 = vmax.f32 %v3581_v54, %v3613_v32  ;;  %8626 = vmatprep.mubr.msk.bf16.mxu1 %vm2816_vm6, %v3953_v13 }
 0x4ec   : > { %4239 = vmatmul.mubr.bf16.gmra.mrb[36].mxu1 %v3986_v5 }
 0x4ed   : > { %v3322_v48 = vpop.permute.xlu0 %3321  ;;  %v11737_v20 = vpack.c.bf16 %v3645_v42, %v3644_v28 }
 0x4ee   : > { %v3324_v17 = vpop.permute.xlu1 %3323  ;;  %v3390_v45 = vadd.f32 %v3322_v48, %v11437_v0 }
 0x4ef   : > { %v3779_v22 = vshrl.u32 %v11737_v20, 16  ;;  %v3782_v16 = vshll.u32 %v11737_v20, 16  ;;  %v3391_v18 = vadd.f32 %v3324_v17, %v11444_v30 }
 0x4f1   : > { %v3811_v31 = vpop.permute.xlu0 %3810  ;;  %v3781_v10 = vrot.slane %v3779_v22, 7  ;;  %v3894_v58 = vrot.slane %v3782_v16, 1 }
 0x4f2   : > { %v3856_v21 = vsel %vm11219_vm10, 0, %v3811_v31  ;;  %v3955_v2 = vpop.permute.xlu1 %3954 }
 0x4f3   : > { %v3989_v37 = vsel %vm2816_vm6, %v3856_v21, %v11575_v19  ;;  %8627 = vmatprep.mubr.msk.bf16.mxu1 %vm2816_vm6, %v3955_v2  ;;  %v3784_v60 = vor.u32 %v3782_v16, %v3781_v10  ;;  %v3895_v26 = vor.u32 %v3894_v58, %v3779_v22  ;;  %v14981_v58 = vld [vmem:[#allocation27_spill] sm:$0xff] }
 0x4f4   : > { %4249 = vmatmul.mubr.bf16.gmra.mrb[40].mxu1 %v3989_v37 }
 0x4f5   : > { %v3479_v25 = vpop.permute.xlu0 %3478  ;;  %3830 = vrot.lane.b32.xlu0 %v3784_v60, %s9354_s13  ;;  %v3930_v8 = vsel %vm11170_vm7, %v3895_v26, 0  ;;  %v14982_v60 = vld [vmem:[#allocation28_spill] sm:$0xff] }
 0x4f6   : > { %v3542_v39 = vadd.f32 %v3479_v25, %v3390_v45  ;;  %3974 = vrot.lane.b32.xlu1 %v3930_v8, %s9354_s13  ;;  %v3481_v40 = vpop.permute.xlu1 %3480  ;;  %v14983_v25 = vld [vmem:[#allocation29_spill] sm:$0xff] }
 0x4f7   : > { %v3543_v0 = vadd.f32 %v3481_v40, %v3391_v18 }
 0x4f8   : > { %v3582_v19 = vadd.f32 %v11518_v62, %v3542_v39 }
 0x4f9   : > { %v3583_v24 = vadd.f32 %v11518_v62, %v3543_v0 }
 0x4fa   : > { %v3614_v3 = vmul.f32 0.2, %v3582_v19  ;;  %v3813_v38 = vpop.permute.xlu0 %3812 }
 0x4fb   : > { %v3857_v12 = vsel %vm11219_vm10, 0, %v3813_v38  ;;  %v3957_v30 = vpop.permute.xlu1 %3956  ;;  %v3615_v50 = vmul.f32 0.2, %v3583_v24 }
 0x4fc   : > { %v3646_v56 = vmax.f32 %v3582_v19, %v3614_v3  ;;  %8628 = vmatprep.mubr.msk.bf16.mxu1 %vm2816_vm6, %v3957_v30  ;;  %v3992_v46 = vsel %vm2816_vm6, %v3857_v12, %v11593_v63 }
 0x4fd   : > { %4259 = vmatmul.mubr.bf16.gmra.mrb[44].mxu1 %v3992_v46  ;;  %v3647_v7 = vmax.f32 %v3583_v24, %v3615_v50 }
 0x4fe   : > { %v3326_v35 = vpop.permute.xlu0 %3325 }
 0x4ff   : > { %v3328_v4 = vpop.permute.xlu1 %3327  ;;  %v11759_v61 = vpack.c.bf16 %v3647_v7, %v3646_v56  ;;  %v3392_v1 = vadd.f32 %v3326_v35, %v11453_v59 }
 0x500   : > { %v3393_v52 = vadd.f32 %v3328_v4, %v11458_v33 }
 0x501   : > { %v3786_v6 = vshrl.u32 %v11759_v61, 16  ;;  %v3789_v44 = vshll.u32 %v11759_v61, 16 }
 0x502   : > { %v3815_v9 = vpop.permute.xlu0 %3814 }
 0x503   : > { %v3858_v29 = vsel %vm11219_vm10, 0, %v3815_v9  ;;  %v3959_v14 = vpop.permute.xlu1 %3958  ;;  %v3788_v53 = vrot.slane %v3786_v6, 7  ;;  %v3896_v11 = vrot.slane %v3789_v44, 1 }
 0x504   : > { %8629 = vmatprep.mubr.msk.bf16.mxu1 %vm2816_vm6, %v3959_v14  ;;  %v3995_v63 = vsel %vm2816_vm6, %v3858_v29, %v11615_v51 }
 0x505   : > { %4269 = vmatmul.mubr.bf16.gmra.mrb[48].mxu1 %v3995_v63  ;;  %v3791_v36 = vor.u32 %v3789_v44, %v3788_v53  ;;  %v3897_v28 = vor.u32 %v3896_v11, %v3786_v6 }
 0x506   : > { %v3483_v54 = vpop.permute.xlu0 %3482 }
 0x507   : > { %v3544_v32 = vadd.f32 %v3483_v54, %v3392_v1  ;;  %v3485_v23 = vpop.permute.xlu1 %3484  ;;  %3832 = vrot.lane.b32.xlu0 %v3791_v36, %s9354_s13  ;;  %v3931_v5 = vsel %vm11170_vm7, %v3897_v28, 0 }
 0x508   : > { %v3545_v13 = vadd.f32 %v3485_v23, %v3393_v52  ;;  %3976 = vrot.lane.b32.xlu1 %v3931_v5, %s9354_s13 }
 0x509   : > { %v3584_v51 = vadd.f32 %v11518_v62, %v3544_v32 }
 0x50a   : > { %v3585_v59 = vadd.f32 %v11518_v62, %v3545_v13  ;;  %v3817_v42 = vpop.permute.xlu0 %3816 }
 0x50b   : > { %v3616_v48 = vmul.f32 0.2, %v3584_v51  ;;  %v3859_v33 = vsel %vm11219_vm10, 0, %v3817_v42  ;;  %v3961_v17 = vpop.permute.xlu1 %3960 }
 0x50c   : > { %v3617_v22 = vmul.f32 0.2, %v3585_v59  ;;  %8630 = vmatprep.mubr.msk.bf16.mxu1 %vm2816_vm6, %v3961_v17  ;;  %v3998_v16 = vsel %vm2816_vm6, %v3859_v33, %v11644_v34 }
 0x50d   : > { %v3648_v31 = vmax.f32 %v3584_v51, %v3616_v48  ;;  %4279 = vmatmul.mubr.bf16.gmra.mrb[52].mxu1 %v3998_v16 }
 0x50e   : > { %v3649_v21 = vmax.f32 %v3585_v59, %v3617_v22  ;;  %v3330_v10 = vpop.permute.xlu0 %3329 }
 0x50f   : > { %v3394_v2 = vadd.f32 %v3330_v10, %v14981_v58  ;;  %v3332_v37 = vpop.permute.xlu1 %3331 }
 0x510   : > { %v11782_v45 = vpack.c.bf16 %v3649_v21, %v3648_v31  ;;  %v3395_v26 = vadd.f32 %v3332_v37, %v14982_v60 }
 0x511   : > { %v3546_v18 = vadd.f32 %v3394_v2, %v14983_v25 }
 0x512   : > { %v3547_v39 = vadd.f32 %v3395_v26, %v14983_v25  ;;  %v3819_v8 = vpop.permute.xlu0 %3818  ;;  %v3793_v40 = vshrl.u32 %v11782_v45, 16  ;;  %v3796_v34 = vshll.u32 %v11782_v45, 16 }
 0x513   : > { %v3586_v19 = vadd.f32 %v11518_v62, %v3546_v18  ;;  %v3860_v0 = vsel %vm11219_vm10, 0, %v3819_v8  ;;  %v3963_v3 = vpop.permute.xlu1 %3962 }
 0x514   : > { %v3587_v24 = vadd.f32 %v11518_v62, %v3547_v39  ;;  %8631 = vmatprep.mubr.msk.bf16.mxu1 %vm2816_vm6, %v3963_v3  ;;  %v4001_v38 = vsel %vm2816_vm6, %v3860_v0, %v11663_v55  ;;  %v3795_v12 = vrot.slane %v3793_v40, 7  ;;  %v3898_v30 = vrot.slane %v3796_v34, 1 }
 0x515   : > { %v3618_v56 = vmul.f32 0.2, %v3586_v19  ;;  %4289 = vmatmul.mubr.bf16.gmra.mrb[56].mxu1 %v4001_v38 }
 0x516   : > { %v3619_v50 = vmul.f32 0.2, %v3587_v24  ;;  %v3821_v46 = vpop.permute.xlu0 %3820  ;;  %v3798_v7 = vor.u32 %v3796_v34, %v3795_v12  ;;  %v3899_v35 = vor.u32 %v3898_v30, %v3793_v40 }
 0x517   : > { %v3650_v4 = vmax.f32 %v3586_v19, %v3618_v56  ;;  %v3965_v9 = vpop.permute.xlu1 %3964  ;;  %v3861_v55 = vsel %vm11219_vm10, 0, %v3821_v46 }
 0x518   : > { %v3651_v6 = vmax.f32 %v3587_v24, %v3619_v50  ;;  %3834 = vrot.lane.b32.xlu0 %v3798_v7, %s9354_s13  ;;  %8632 = vmatprep.mubr.msk.bf16.mxu1 %vm2816_vm6, %v3965_v9  ;;  %v3932_v62 = vsel %vm11170_vm7, %v3899_v35, 0  ;;  %v4004_v29 = vsel %vm2816_vm6, %v3861_v55, %v11634_v27  ;;  %v8641_v27 = vld [vmem:[%s9739_s16 + $0x1] ss:$0 sm:$0xff] }
 0x519   : > { %3978 = vrot.lane.b32.xlu1 %v3932_v62, %s9354_s13 }
 0x51a   : > { %v3667_v44 = vpack.c.bf16 %v3651_v6, %v3650_v4  ;;  %v3823_v11 = vpop.permute.xlu0 %3822 }
 0x51b   : > { %v3967_v53 = vpop.permute.xlu1 %3966  ;;  %v3862_v28 = vsel %vm11219_vm10, 0, %v3823_v11 }
 0x51c   : > { %v3800_v14 = vshrl.u32 %v3667_v44, 16  ;;  %v3803_v63 = vshll.u32 %v3667_v44, 16  ;;  %v4007_v23 = vsel %vm2816_vm6, %v3862_v28, %v11658_v15 }
 0x51d   : > { %4299 = vmatmul.mubr.bf16.gmra.mrb[60].mxu1 %v4004_v29 }
 0x51e   : > { %8633 = vmatprep.mubr.msk.bf16.mxu1 %vm2816_vm6, %v3967_v53  ;;  %v3802_v1 = vrot.slane %v3800_v14, 7  ;;  %v3900_v52 = vrot.slane %v3803_v63, 1  ;;  %v3825_v5 = vpop.permute.xlu0 %3824 }
 0x51f   : > { %v3969_v13 = vpop.permute.xlu1 %3968  ;;  %v3863_v51 = vsel %vm11219_vm10, 0, %v3825_v5 }
 0x520   : > { %v3805_v54 = vor.u32 %v3803_v63, %v3802_v1  ;;  %v3901_v36 = vor.u32 %v3900_v52, %v3800_v14  ;;  %v4010_v59 = vsel %vm2816_vm6, %v3863_v51, %v11675_v49 }
 0x522   : > { %3836 = vrot.lane.b32.xlu0 %v3805_v54, %s9354_s13  ;;  %v3933_v32 = vsel %vm11170_vm7, %v3901_v36, 0  ;;  %v3827_v48 = vpop.permute.xlu0 %3826 }
 0x523   : > { %3980 = vrot.lane.b32.xlu1 %v3933_v32, %s9354_s13  ;;  %v3971_v42 = vpop.permute.xlu1 %3970  ;;  %v3864_v15 = vsel %vm11219_vm10, 0, %v3827_v48 }
 0x524   : > { %v4013_v33 = vsel %vm2816_vm6, %v3864_v15, %v11693_v47 }
 0x525   : > { %4309 = vmatmul.mubr.bf16.gmra.mrb[64].mxu1 %v4007_v23 }
 0x526   : > { %8634 = vmatprep.mubr.msk.bf16.mxu1 %vm2816_vm6, %v3969_v13  ;;  %4698 = vrot.lane.b32.xlu0 %v8641_v27, %s9354_s13  ;;  %v3829_v22 = vpop.permute.xlu0 %3828 }
 0x527   : > { %v3973_v17 = vpop.permute.xlu1 %3972  ;;  %v3865_v16 = vsel %vm11219_vm10, 0, %v3829_v22 }
 0x528   : > { %v4016_v49 = vsel %vm2816_vm6, %v3865_v16, %v11707_v57 }
 0x52d   : > { %4319 = vmatmul.mubr.bf16.gmra.mrb[68].mxu1 %v4010_v59 }
 0x52e   : > { %8635 = vmatprep.mubr.msk.bf16.mxu1 %vm2816_vm6, %v3971_v42 }
 0x535   : > { %4329 = vmatmul.mubr.bf16.gmra.mrb[72].mxu1 %v4013_v33 }
 0x536   : > { %8636 = vmatprep.mubr.msk.bf16.mxu1 %vm2816_vm6, %v3973_v17 }
 0x53d   : > { %4339 = vmatmul.mubr.bf16.gmra.mrb[76].mxu1 %v4016_v49  ;;  %v8995_v49 = vld [vmem:[%s9724_s25 + $0x184] ss:$8 sps:$4 sm:$0xff]  }
 0x53e   : > { %5343 = vmatprep.subr.bf16.mxu0 %v8995_v49 }
 0x567   : > { %v3831_v31 = vpop.permute.xlu0 %3830 }
 0x568   : > { %v3866_v21 = vsel %vm11219_vm10, 0, %v3831_v31  ;;  %v3975_v10 = vpop.permute.xlu1 %3974 }
 0x569   : > { %8637 = vmatprep.mubr.msk.bf16.mxu1 %vm2816_vm6, %v3975_v10  ;;  %v4019_v47 = vsel %vm2816_vm6, %v3866_v21, %v11737_v20  ;;  %v8993_v21 = vld [vmem:[%s9724_s25 + $0x180] ss:$8 sps:$4 sm:$0xff]  }
 0x56a   : > { %4349 = vmatmul.mubr.bf16.gmra.mrb[80].mxu1 %v4019_v47  ;;  %5344 = vmatpush1.bf16.msra.mxu0 %v8993_v21  ;;  %v9028_v21 = vld [vmem:[%s9724_s25 + $0x234] ss:$8 sps:$4 sm:$0xff]  }
 0x579   : > { %v3833_v58 = vpop.permute.xlu0 %3832 }
 0x57a   : > { %v3867_v2 = vsel %vm11219_vm10, 0, %v3833_v58  ;;  %v3977_v37 = vpop.permute.xlu1 %3976  ;;  %v8996_v58 = vld [vmem:[%s9724_s25 + $0x190] ss:$8 sps:$4 sm:$0xff]  }
 0x57b   : > { %8638 = vmatprep.mubr.msk.bf16.mxu1 %vm2816_vm6, %v3977_v37  ;;  %v4022_v57 = vsel %vm2816_vm6, %v3867_v2, %v11759_v61  ;;  %v8998_v2 = vld [vmem:[%s9724_s25 + $0x194] ss:$8 sps:$4 sm:$0xff]  }
 0x57c   : > { %4359 = vmatmul.mubr.bf16.gmra.mrb[84].mxu1 %v4022_v57  ;;  %v9001_v57 = vld [vmem:[%s9724_s25 + $0x1a4] ss:$8 sps:$4 sm:$0xff]   ;;  %5345 = vmatprep.subr.bf16.mxu0 %v8998_v2 }
 0x57d   : > { %5346 = vmatpush1.bf16.msra.mxu0 %v8996_v58  ;;  %v9026_v58 = vld [vmem:[%s9724_s25 + $0x230] ss:$8 sps:$4 sm:$0xff]  }
 0x57e   : > { %5347 = vmatprep.subr.bf16.mxu0 %v9001_v57 }
 0x58a   : > { %v3835_v60 = vpop.permute.xlu0 %3834 }
 0x58b   : > { %v3868_v26 = vsel %vm11219_vm10, 0, %v3835_v60  ;;  %v3979_v18 = vpop.permute.xlu1 %3978  ;;  %v8999_v60 = vld [vmem:[%s9724_s25 + $0x1a0] ss:$8 sps:$4 sm:$0xff]  }
 0x58c   : > { %8639 = vmatprep.mubr.msk.bf16.mxu1 %vm2816_vm6, %v3979_v18  ;;  %v4025_v20 = vsel %vm2816_vm6, %v3868_v26, %v11782_v45  ;;  %v9004_v26 = vld [vmem:[%s9724_s25 + $0x1b4] ss:$8 sps:$4 sm:$0xff]   ;;  %5348 = vmatpush1.bf16.msra.mxu0 %v8999_v60  ;;  %v9002_v18 = vld [vmem:[%s9724_s25 + $0x1b0] ss:$8 sps:$4 sm:$0xff]  }
 0x58d   : > { %4369 = vmatmul.mubr.bf16.gmra.mrb[88].mxu1 %v4025_v20  ;;  %5349 = vmatprep.subr.bf16.mxu0 %v9004_v26  ;;  %v9007_v20 = vld [vmem:[%s9724_s25 + $0x1c4] ss:$8 sps:$4 sm:$0xff]  }
 0x590   : > { %5350 = vmatpush1.bf16.msra.mxu0 %v9002_v18 }
 0x591   : > { %5351 = vmatprep.subr.bf16.mxu0 %v9007_v20 }
 0x594   : > { %v3837_v39 = vpop.permute.xlu0 %3836 }
 0x595   : > { %v3869_v8 = vsel %vm11219_vm10, 0, %v3837_v39  ;;  %v3981_v40 = vpop.permute.xlu1 %3980  ;;  %v9005_v39 = vld [vmem:[%s9724_s25 + $0x1c0] ss:$8 sps:$4 sm:$0xff]  }
 0x596   : > { %8640 = vmatprep.mubr.msk.bf16.mxu1 %vm2816_vm6, %v3981_v40  ;;  %v4028_v61 = vsel %vm2816_vm6, %v3869_v8, %v3667_v44  ;;  %v9010_v8 = vld [vmem:[%s9724_s25 + $0x1d4] ss:$8 sps:$4 sm:$0xff]   ;;  %5352 = vmatpush1.bf16.msra.mxu0 %v9005_v39  ;;  %v9008_v40 = vld [vmem:[%s9724_s25 + $0x1d0] ss:$8 sps:$4 sm:$0xff]  }
 0x597   : > { %4379 = vmatmul.mubr.bf16.gmra.mrb[92].mxu1 %v4028_v61  ;;  %5353 = vmatprep.subr.bf16.mxu0 %v9010_v8  ;;  %v9013_v61 = vld [vmem:[%s9724_s25 + $0x1e4] ss:$8 sps:$4 sm:$0xff]  }
 0x59a   : > { %5354 = vmatpush1.bf16.msra.mxu0 %v9008_v40 }
 0x59b   : > { %5355 = vmatprep.subr.bf16.mxu0 %v9013_v61 }
 0x5b5   : > { %v11850_v34 = vpop.f32.mrb[32].mxu1 }
 0x5b6   : > { %v4234_v19 = vpop.f32.mrb[33].mxu1  ;;  %4419 = vrot.lane.b32.xlu1 %v11850_v34, %s9354_s13 }
 0x5b7   : > { %v11854_v0 = vpop.f32.mrb[34].mxu1  ;;  %v9011_v19 = vld [vmem:[%s9724_s25 + $0x1e0] ss:$8 sps:$4 sm:$0xff]  }
 0x5b8   : > { %v4237_v45 = vpop.f32.mrb[35].mxu1  ;;  %4421 = vrot.lane.b32.xlu0 %v11854_v0, %s9354_s13  ;;  %5356 = vmatpush1.bf16.msra.mxu0 %v9011_v19 }
 0x5b9   : > { %v9016_v45 = vld [vmem:[%s9724_s25 + $0x1f4] ss:$8 sps:$4 sm:$0xff]  }
 0x5ba   : > { %5357 = vmatprep.subr.bf16.mxu0 %v9016_v45 }
 0x5bf   : > { %v11858_v3 = vpop.f32.mrb[36].mxu1 }
 0x5c0   : > { %v4242_v24 = vpop.f32.mrb[37].mxu1  ;;  %4423 = vrot.lane.b32.xlu1 %v11858_v3, %s9354_s13 }
 0x5c1   : > { %v11862_v38 = vpop.f32.mrb[38].mxu1  ;;  %4571 = vrot.lane.b32.xlu0 %v4242_v24, %s9354_s13  ;;  %v11983_v24 = vpop.permute.xlu0 %4698 }
 0x5c2   : > { %v4246_v12 = vpop.f32.mrb[39].mxu1 }
 0x5c4   : > { %4573 = vrot.lane.b32.xlu1 %v4246_v12, %s9354_s13  ;;  %v9014_v12 = vld [vmem:[%s9724_s25 + $0x1f0] ss:$8 sps:$4 sm:$0xff]  }
 0x5c5   : > { %4425 = vrot.lane.b32.xlu0 %v11862_v38, %s9354_s13  ;;  %5358 = vmatpush1.bf16.msra.mxu0 %v9014_v12 }
 0x5c7   : > { %v11868_v30 = vpop.f32.mrb[40].mxu1 }
 0x5c8   : > { %v4252_v56 = vpop.f32.mrb[41].mxu1  ;;  %4427 = vrot.lane.b32.xlu1 %v11868_v30, %s9354_s13 }
 0x5c9   : > { %v11872_v50 = vpop.f32.mrb[42].mxu1 }
 0x5ca   : > { %v4256_v46 = vpop.f32.mrb[43].mxu1  ;;  %4429 = vrot.lane.b32.xlu0 %v11872_v50, %s9354_s13 }
 0x5cc   : > { %4575 = vrot.lane.b32.xlu1 %v4252_v56, %s9354_s13  ;;  %v9019_v56 = vld [vmem:[%s9724_s25 + $0x204] ss:$8 sps:$4 sm:$0xff]  }
 0x5cd   : > { %5359 = vmatprep.subr.bf16.mxu0 %v9019_v56 }
 0x5ce   : > { %4577 = vrot.lane.b32.xlu0 %v4256_v46, %s9354_s13  ;;  %v9017_v46 = vld [vmem:[%s9724_s25 + $0x200] ss:$8 sps:$4 sm:$0xff]  }
 0x5cf   : > { %5360 = vmatpush1.bf16.msra.mxu0 %v9017_v46 }
 0x5d0   : > { %v11878_v7 = vpop.f32.mrb[44].mxu1 }
 0x5d1   : > { %v4262_v35 = vpop.f32.mrb[45].mxu1  ;;  %4431 = vrot.lane.b32.xlu1 %v11878_v7, %s9354_s13 }
 0x5d2   : > { %v11882_v4 = vpop.f32.mrb[46].mxu1 }
 0x5d3   : > { %v4266_v9 = vpop.f32.mrb[47].mxu1  ;;  %4433 = vrot.lane.b32.xlu0 %v11882_v4, %s9354_s13 }
 0x5d5   : > { %4579 = vrot.lane.b32.xlu1 %v4262_v35, %s9354_s13 }
 0x5d7   : > { %4581 = vrot.lane.b32.xlu0 %v4266_v9, %s9354_s13  ;;  %v9022_v9 = vld [vmem:[%s9724_s25 + $0x214] ss:$8 sps:$4 sm:$0xff]  }
 0x5d8   : > { %v11888_v6 = vpop.f32.mrb[48].mxu1  ;;  %5361 = vmatprep.subr.bf16.mxu0 %v9022_v9 }
 0x5d9   : > { %v4272_v62 = vpop.f32.mrb[49].mxu1  ;;  %4435 = vrot.lane.b32.xlu1 %v11888_v6, %s9354_s13 }
 0x5da   : > { %v11892_v55 = vpop.f32.mrb[50].mxu1 }
 0x5db   : > { %v4276_v44 = vpop.f32.mrb[51].mxu1  ;;  %4437 = vrot.lane.b32.xlu0 %v11892_v55, %s9354_s13 }
 0x5dd   : > { %4583 = vrot.lane.b32.xlu1 %v4272_v62, %s9354_s13 }
 0x5df   : > { %4585 = vrot.lane.b32.xlu0 %v4276_v44, %s9354_s13  ;;  %v9020_v44 = vld [vmem:[%s9724_s25 + $0x210] ss:$8 sps:$4 sm:$0xff]  }
 0x5e0   : > { %v11898_v29 = vpop.f32.mrb[52].mxu1  ;;  %5362 = vmatpush1.bf16.msra.mxu0 %v9020_v44 }
 0x5e1   : > { %v4282_v14 = vpop.f32.mrb[53].mxu1  ;;  %4439 = vrot.lane.b32.xlu1 %v11898_v29, %s9354_s13 }
 0x5e2   : > { %v11902_v63 = vpop.f32.mrb[54].mxu1 }
 0x5e3   : > { %v4286_v53 = vpop.f32.mrb[55].mxu1  ;;  %4441 = vrot.lane.b32.xlu0 %v11902_v63, %s9354_s13 }
 0x5e5   : > { %4587 = vrot.lane.b32.xlu1 %v4282_v14, %s9354_s13  ;;  %v4509_v14 = vadd.f32 %v11850_v34, %v14983_v25 }
 0x5e7   : > { %4589 = vrot.lane.b32.xlu0 %v4286_v53, %s9354_s13 }
 0x5e8   : > { %v11908_v11 = vpop.f32.mrb[56].mxu1 }
 0x5e9   : > { %4443 = vrot.lane.b32.xlu1 %v11908_v11, %s9354_s13  ;;  %v4292_v1 = vpop.f32.mrb[57].mxu1 }
 0x5ea   : > { %v11912_v52 = vpop.f32.mrb[58].mxu1 }
 0x5eb   : > { %4445 = vrot.lane.b32.xlu0 %v11912_v52, %s9354_s13  ;;  %v4296_v54 = vpop.f32.mrb[59].mxu1 }
 0x5ed   : > { %4591 = vrot.lane.b32.xlu1 %v4292_v1, %s9354_s13 }
 0x5ef   : > { %4593 = vrot.lane.b32.xlu0 %v4296_v54, %s9354_s13 }
 0x5f0   : > { %v11918_v36 = vpop.f32.mrb[60].mxu1 }
 0x5f1   : > { %4447 = vrot.lane.b32.xlu1 %v11918_v36, %s9354_s13  ;;  %v4302_v28 = vpop.f32.mrb[61].mxu1 }
 0x5f2   : > { %v11922_v32 = vpop.f32.mrb[62].mxu1 }
 0x5f3   : > { %4449 = vrot.lane.b32.xlu0 %v11922_v32, %s9354_s13  ;;  %v4306_v27 = vpop.f32.mrb[63].mxu1 }
 0x5f5   : > { %4595 = vrot.lane.b32.xlu1 %v4302_v28, %s9354_s13  ;;  %v4510_v28 = vadd.f32 %v11854_v0, %v14983_v25 }
 0x5f7   : > { %4597 = vrot.lane.b32.xlu0 %v4306_v27, %s9354_s13 }
 0x5f8   : > { %v11928_v23 = vpop.f32.mrb[64].mxu1 }
 0x5f9   : > { %4451 = vrot.lane.b32.xlu1 %v11928_v23, %s9354_s13  ;;  %v4312_v13 = vpop.f32.mrb[65].mxu1 }
 0x5fa   : > { %v11932_v5 = vpop.f32.mrb[66].mxu1 }
 0x5fb   : > { %4453 = vrot.lane.b32.xlu0 %v11932_v5, %s9354_s13  ;;  %v4316_v51 = vpop.f32.mrb[67].mxu1 }
 0x5fd   : > { %4599 = vrot.lane.b32.xlu1 %v4312_v13, %s9354_s13 }
 0x5ff   : > { %4601 = vrot.lane.b32.xlu0 %v4316_v51, %s9354_s13  ;;  %v9025_v51 = vld [vmem:[%s9724_s25 + $0x224] ss:$8 sps:$4 sm:$0xff]  }
 0x600   : > { %v11938_v59 = vpop.f32.mrb[68].mxu1  ;;  %5363 = vmatprep.subr.bf16.mxu0 %v9025_v51 }
 0x601   : > { %4455 = vrot.lane.b32.xlu1 %v11938_v59, %s9354_s13  ;;  %v4322_v42 = vpop.f32.mrb[69].mxu1 }
 0x602   : > { %v11942_v48 = vpop.f32.mrb[70].mxu1 }
 0x603   : > { %4457 = vrot.lane.b32.xlu0 %v11942_v48, %s9354_s13  ;;  %v4326_v15 = vpop.f32.mrb[71].mxu1 }
 0x605   : > { %4603 = vrot.lane.b32.xlu1 %v4322_v42, %s9354_s13 }
 0x607   : > { %4605 = vrot.lane.b32.xlu0 %v4326_v15, %s9354_s13 }
 0x608   : > { %v11948_v33 = vpop.f32.mrb[72].mxu1 }
 0x609   : > { %4459 = vrot.lane.b32.xlu1 %v11948_v33, %s9354_s13  ;;  %v4332_v17 = vpop.f32.mrb[73].mxu1 }
 0x60a   : > { %v11952_v22 = vpop.f32.mrb[74].mxu1 }
 0x60b   : > { %4461 = vrot.lane.b32.xlu0 %v11952_v22, %s9354_s13  ;;  %v4336_v16 = vpop.f32.mrb[75].mxu1 }
 0x60d   : > { %4607 = vrot.lane.b32.xlu1 %v4332_v17, %s9354_s13  ;;  %v9023_v17 = vld [vmem:[%s9724_s25 + $0x220] ss:$8 sps:$4 sm:$0xff]  }
 0x60e   : > { %5364 = vmatpush1.bf16.msra.mxu0 %v9023_v17 }
 0x60f   : > { %4609 = vrot.lane.b32.xlu0 %v4336_v16, %s9354_s13  ;;  %5365 = vmatprep.subr.bf16.mxu0 %v9028_v21 }
 0x610   : > { %v11959_v31 = vpop.f32.mrb[76].mxu1 }
 0x611   : > { %4463 = vrot.lane.b32.xlu1 %v11959_v31, %s9354_s13  ;;  %v4342_v10 = vpop.f32.mrb[77].mxu1 }
 0x612   : > { %v11964_v47 = vpop.f32.mrb[78].mxu1  ;;  %5366 = vmatpush1.bf16.msra.mxu0 %v9026_v58 }
 0x613   : > { %4465 = vrot.lane.b32.xlu0 %v11964_v47, %s9354_s13  ;;  %v4346_v37 = vpop.f32.mrb[79].mxu1 }
 0x615   : > { %4611 = vrot.lane.b32.xlu1 %v4342_v10, %s9354_s13 }
 0x617   : > { %4613 = vrot.lane.b32.xlu0 %v4346_v37, %s9354_s13 }
 0x628   : > { %v4420_v35 = vpop.permute.xlu1 %4419 }
 0x629   : > { %v4511_v0 = vadd.f32 %v4420_v35, %v11858_v3 }
 0x62a   : > { %v4422_v62 = vpop.permute.xlu0 %4421 }
 0x62b   : > { %v4512_v20 = vadd.f32 %v4422_v62, %v11862_v38 }
 0x632   : > { %v4424_v53 = vpop.permute.xlu1 %4423 }
 0x633   : > { %v4572_v1 = vpop.permute.xlu0 %4571 }
 0x634   : > { %v4661_v54 = vadd.f32 %v4572_v1, %v4509_v14  ;;  %v4513_v14 = vadd.f32 %v4424_v53, %v11868_v30 }
 0x636   : > { %v4701_v27 = vadd.f32 %v11983_v24, %v4661_v54  ;;  %v4574_v13 = vpop.permute.xlu1 %4573 }
 0x637   : > { %v4662_v42 = vadd.f32 %v4574_v13, %v4510_v28  ;;  %v4426_v15 = vpop.permute.xlu0 %4425 }
 0x638   : > { %v4733_v16 = vmul.f32 0.2, %v4701_v27  ;;  %v4514_v13 = vadd.f32 %v4426_v15, %v11872_v50 }
 0x639   : > { %v4702_v34 = vadd.f32 %v11983_v24, %v4662_v42 }
 0x63a   : > { %v4428_v49 = vpop.permute.xlu1 %4427  ;;  %v4765_v37 = vmax.f32 %v4701_v27, %v4733_v16 }
 0x63b   : > { %v4734_v10 = vmul.f32 0.2, %v4702_v34 }
 0x63c   : > { %v4430_v2 = vpop.permute.xlu0 %4429 }
 0x63d   : > { %v4766_v57 = vmax.f32 %v4702_v34, %v4734_v10  ;;  %v12001_v60 = vpop.f32.mrb[80].mxu1 }
 0x63e   : > { %v4352_v26 = vpop.f32.mrb[81].mxu1  ;;  %v4576_v18 = vpop.permute.xlu1 %4575 }
 0x63f   : > { %v12004_v39 = vpack.c.bf16 %v4766_v57, %v4765_v37  ;;  %v4663_v8 = vadd.f32 %v4576_v18, %v4511_v0  ;;  %4615 = vrot.lane.b32.xlu1 %v4352_v26, %s9354_s13  ;;  %v12007_v40 = vpop.f32.mrb[82].mxu1  ;;  %v4515_v57 = vadd.f32 %v4428_v49, %v11878_v7  ;;  %v4516_v18 = vadd.f32 %v4430_v2, %v11882_v4 }
 0x640   : > { %v4578_v61 = vpop.permute.xlu0 %4577  ;;  %v4356_v19 = vpop.f32.mrb[83].mxu1 }
 0x641   : > { %v4703_v3 = vadd.f32 %v11983_v24, %v4663_v8  ;;  %v4664_v45 = vadd.f32 %v4578_v61, %v4512_v20  ;;  %4617 = vrot.lane.b32.xlu0 %v4356_v19, %s9354_s13  ;;  %v4840_v12 = vshrl.u32 %v12004_v39, 16  ;;  %v4843_v56 = vshll.u32 %v12004_v39, 16 }
 0x643   : > { %v4432_v46 = vpop.permute.xlu1 %4431  ;;  %v4735_v38 = vmul.f32 0.2, %v4703_v3  ;;  %v4704_v35 = vadd.f32 %v11983_v24, %v4664_v45  ;;  %v4842_v9 = vrot.slane %v4840_v12, 7  ;;  %v5015_v44 = vrot.slane %v4843_v56, 1 }
 0x645   : > { %v4434_v62 = vpop.permute.xlu0 %4433  ;;  %v4736_v1 = vmul.f32 0.2, %v4704_v35  ;;  %v4845_v54 = vor.u32 %v4843_v56, %v4842_v9  ;;  %v5016_v27 = vor.u32 %v5015_v44, %v4840_v12  ;;  %v4767_v51 = vmax.f32 %v4703_v3, %v4735_v38 }
 0x647   : > { %v4580_v28 = vpop.permute.xlu1 %4579  ;;  %v4768_v42 = vmax.f32 %v4704_v35, %v4736_v1  ;;  %4951 = vrot.lane.b32.xlu1 %v4845_v54, %s9354_s13  ;;  %v5063_v34 = vsel %vm11170_vm7, %v5016_v27, 0 }
 0x648   : > { %v4665_v17 = vadd.f32 %v4580_v28, %v4513_v14  ;;  %5095 = vrot.lane.b32.xlu0 %v5063_v34, %s9354_s13 }
 0x649   : > { %v4582_v16 = vpop.permute.xlu0 %4581  ;;  %v12019_v21 = vpack.c.bf16 %v4768_v42, %v4767_v51  ;;  %v4517_v51 = vadd.f32 %v4432_v46, %v11888_v6 }
 0x64a   : > { %v4705_v10 = vadd.f32 %v11983_v24, %v4665_v17  ;;  %v4666_v30 = vadd.f32 %v4582_v16, %v4514_v13  ;;  %v4518_v17 = vadd.f32 %v4434_v62, %v11892_v55 }
 0x64b   : > { %v4436_v53 = vpop.permute.xlu1 %4435  ;;  %v4847_v15 = vshrl.u32 %v12019_v21, 16  ;;  %v4850_v37 = vshll.u32 %v12019_v21, 16 }
 0x64c   : > { %v4737_v58 = vmul.f32 0.2, %v4705_v10  ;;  %v4706_v50 = vadd.f32 %v11983_v24, %v4666_v30 }
 0x64d   : > { %v4438_v0 = vpop.permute.xlu0 %4437  ;;  %v5017_v8 = vrot.slane %v4850_v37, 1  ;;  %v4849_v12 = vrot.slane %v4847_v15, 7 }
 0x64e   : > { %v4738_v26 = vmul.f32 0.2, %v4706_v50  ;;  %v4769_v61 = vmax.f32 %v4705_v10, %v4737_v58 }
 0x64f   : > { %v4584_v20 = vpop.permute.xlu1 %4583  ;;  %v12028_v45 = vpop.f32.mrb[84].mxu1  ;;  %v5018_v49 = vor.u32 %v5017_v8, %v4847_v15  ;;  %v4852_v54 = vor.u32 %v4850_v37, %v4849_v12 }
 0x650   : > { %v4770_v19 = vmax.f32 %v4706_v50, %v4738_v26  ;;  %v4667_v3 = vadd.f32 %v4584_v20, %v4515_v57  ;;  %v4362_v38 = vpop.f32.mrb[85].mxu1 }
 0x651   : > { %v4586_v56 = vpop.permute.xlu0 %4585  ;;  %v12033_v14 = vpop.f32.mrb[86].mxu1  ;;  %4619 = vrot.lane.b32.xlu1 %v4362_v38, %s9354_s13  ;;  %v5064_v34 = vsel %vm11170_vm7, %v5018_v49, 0 }
 0x652   : > { %v12030_v35 = vpack.c.bf16 %v4770_v19, %v4769_v61  ;;  %v4707_v9 = vadd.f32 %v11983_v24, %v4667_v3  ;;  %v4668_v44 = vadd.f32 %v4586_v56, %v4516_v18  ;;  %v4366_v7 = vpop.f32.mrb[87].mxu1  ;;  %v4519_v3 = vadd.f32 %v4436_v53, %v11898_v29 }
 0x653   : > { %v12036_v4 = vpop.permute.xlu1 %4439  ;;  %4621 = vrot.lane.b32.xlu0 %v4366_v7, %s9354_s13  ;;  %v4520_v56 = vadd.f32 %v4438_v0, %v11902_v63 }
 0x654   : > { %v4739_v2 = vmul.f32 0.2, %v4707_v9  ;;  %v4708_v1 = vadd.f32 %v11983_v24, %v4668_v44  ;;  %v4854_v28 = vshrl.u32 %v12030_v35, 16  ;;  %v4857_v13 = vshll.u32 %v12030_v35, 16 }
 0x655   : > { %v4442_v27 = vpop.permute.xlu0 %4441  ;;  %4953 = vrot.lane.b32.xlu1 %v4852_v54, %s9354_s13 }
 0x656   : > { %v4740_v42 = vmul.f32 0.2, %v4708_v1  ;;  %v5019_v10 = vrot.slane %v4857_v13, 1  ;;  %v4771_v30 = vmax.f32 %v4707_v9, %v4739_v2  ;;  %v4856_v15 = vrot.slane %v4854_v28, 7 }
 0x657   : > { %v4588_v16 = vpop.permute.xlu1 %4587  ;;  %5097 = vrot.lane.b32.xlu0 %v5064_v34, %s9354_s13 }
 0x658   : > { %v4772_v58 = vmax.f32 %v4708_v1, %v4740_v42  ;;  %v4669_v50 = vadd.f32 %v4588_v16, %v4517_v51  ;;  %v5020_v62 = vor.u32 %v5019_v10, %v4854_v28  ;;  %v4859_v20 = vor.u32 %v4857_v13, %v4856_v15 }
 0x659   : > { %v4590_v37 = vpop.permute.xlu0 %4589  ;;  %4467 = vrot.lane.b32.xlu1 %v12001_v60, %s9354_s13  ;;  %v4521_v15 = vadd.f32 %v12036_v4, %v11908_v11 }
 0x65a   : > { %v12048_v57 = vpack.c.bf16 %v4772_v58, %v4771_v30  ;;  %v4709_v6 = vadd.f32 %v11983_v24, %v4669_v50  ;;  %v4670_v46 = vadd.f32 %v4590_v37, %v4518_v17  ;;  %v5065_v9 = vsel %vm11170_vm7, %v5020_v62, 0 }
 0x65b   : > { %v12053_v55 = vpop.permute.xlu1 %4443  ;;  %4469 = vrot.lane.b32.xlu0 %v12007_v40, %s9354_s13 }
 0x65c   : > { %v4741_v26 = vmul.f32 0.2, %v4709_v6  ;;  %v4710_v18 = vadd.f32 %v11983_v24, %v4670_v46  ;;  %v4861_v8 = vshrl.u32 %v12048_v57, 16  ;;  %v4864_v19 = vshll.u32 %v12048_v57, 16 }
 0x65d   : > { %v12059_v61 = vpop.permute.xlu0 %4445  ;;  %4955 = vrot.lane.b32.xlu1 %v4859_v20, %s9354_s13 }
 0x65e   : > { %v4742_v12 = vmul.f32 0.2, %v4710_v18  ;;  %v5021_v44 = vrot.slane %v4864_v19, 1  ;;  %v4773_v7 = vmax.f32 %v4709_v6, %v4741_v26  ;;  %v4863_v54 = vrot.slane %v4861_v8, 7 }
 0x65f   : > { %v4592_v38 = vpop.permute.xlu1 %4591  ;;  %5099 = vrot.lane.b32.xlu0 %v5065_v9, %s9354_s13  ;;  %v4522_v6 = vadd.f32 %v4442_v27, %v11912_v52 }
 0x660   : > { %v4774_v49 = vmax.f32 %v4710_v18, %v4742_v12  ;;  %v4671_v2 = vadd.f32 %v4592_v38, %v4519_v3  ;;  %v12067_v1 = vpop.f32.mrb[88].mxu1  ;;  %v5022_v17 = vor.u32 %v5021_v44, %v4861_v8  ;;  %v4866_v10 = vor.u32 %v4864_v19, %v4863_v54 }
 0x661   : > { %v4594_v28 = vpop.permute.xlu0 %4593  ;;  %v4372_v29 = vpop.f32.mrb[89].mxu1 }
 0x662   : > { %v12070_v53 = vpack.c.bf16 %v4774_v49, %v4773_v7  ;;  %v4711_v13 = vadd.f32 %v11983_v24, %v4671_v2  ;;  %v4672_v63 = vadd.f32 %v4594_v28, %v4520_v56  ;;  %v12073_v0 = vpop.f32.mrb[90].mxu1  ;;  %4623 = vrot.lane.b32.xlu1 %v4372_v29, %s9354_s13  ;;  %v5066_v62 = vsel %vm11170_vm7, %v5022_v17, 0 }
 0x663   : > { %v4376_v51 = vpop.f32.mrb[91].mxu1  ;;  %v12076_v42 = vpop.permute.xlu1 %4447 }
 0x664   : > { %v4743_v16 = vmul.f32 0.2, %v4711_v13  ;;  %v4712_v34 = vadd.f32 %v11983_v24, %v4672_v63  ;;  %4625 = vrot.lane.b32.xlu0 %v4376_v51, %s9354_s13  ;;  %v4868_v30 = vshrl.u32 %v12070_v53, 16  ;;  %v4871_v50 = vshll.u32 %v12070_v53, 16 }
 0x665   : > { %v4450_v58 = vpop.permute.xlu0 %4449  ;;  %v4524_v51 = vadd.f32 %v12059_v61, %v11922_v32 }
 0x666   : > { %v4744_v37 = vmul.f32 0.2, %v4712_v34  ;;  %4957 = vrot.lane.b32.xlu1 %v4866_v10, %s9354_s13  ;;  %v5023_v26 = vrot.slane %v4871_v50, 1  ;;  %v4775_v18 = vmax.f32 %v4711_v13, %v4743_v16  ;;  %v4870_v19 = vrot.slane %v4868_v30, 7 }
 0x667   : > { %v4596_v46 = vpop.permute.xlu1 %4595  ;;  %v4523_v13 = vadd.f32 %v12053_v55, %v11918_v36 }
 0x668   : > { %v4776_v20 = vmax.f32 %v4712_v34, %v4744_v37  ;;  %v4673_v8 = vadd.f32 %v4596_v46, %v4521_v15  ;;  %5101 = vrot.lane.b32.xlu0 %v5066_v62, %s9354_s13  ;;  %v5024_v38 = vor.u32 %v5023_v26, %v4868_v30  ;;  %v4873_v49 = vor.u32 %v4871_v50, %v4870_v19 }
 0x669   : > { %v4598_v3 = vpop.permute.xlu0 %4597  ;;  %v4525_v19 = vadd.f32 %v12076_v42, %v11928_v23 }
 0x66a   : > { %v12089_v12 = vpack.c.bf16 %v4776_v20, %v4775_v18  ;;  %v4713_v11 = vadd.f32 %v11983_v24, %v4673_v8  ;;  %v4674_v4 = vadd.f32 %v4598_v3, %v4522_v6  ;;  %v12092_v56 = vpop.f32.mrb[92].mxu1  ;;  %4471 = vrot.lane.b32.xlu1 %v12028_v45, %s9354_s13  ;;  %v5067_v16 = vsel %vm11170_vm7, %v5024_v38, 0 }
 0x66b   : > { %v4382_v52 = vpop.f32.mrb[93].mxu1  ;;  %v12096_v27 = vpop.permute.xlu1 %4451 }
 0x66c   : > { %v4745_v9 = vmul.f32 0.2, %v4713_v11  ;;  %v4714_v44 = vadd.f32 %v11983_v24, %v4674_v4  ;;  %v12099_v7 = vpop.f32.mrb[94].mxu1  ;;  %4473 = vrot.lane.b32.xlu0 %v12033_v14, %s9354_s13  ;;  %v4875_v2 = vshrl.u32 %v12089_v12, 16  ;;  %v4878_v29 = vshll.u32 %v12089_v12, 16 }
 0x66d   : > { %v4454_v54 = vpop.permute.xlu0 %4453  ;;  %v4386_v28 = vpop.f32.mrb[95].mxu1 }
 0x66e   : > { %v4746_v63 = vmul.f32 0.2, %v4714_v44  ;;  %4959 = vrot.lane.b32.xlu1 %v4873_v49, %s9354_s13  ;;  %v5025_v34 = vrot.slane %v4878_v29, 1  ;;  %v4777_v10 = vmax.f32 %v4713_v11, %v4745_v9  ;;  %v4877_v15 = vrot.slane %v4875_v2, 7 }
 0x66f   : > { %v4600_v17 = vpop.permute.xlu1 %4599  ;;  %v4526_v11 = vadd.f32 %v4450_v58, %v11932_v5 }
 0x670   : > { %v4778_v30 = vmax.f32 %v4714_v44, %v4746_v63  ;;  %v4675_v50 = vadd.f32 %v4600_v17, %v4523_v13  ;;  %5103 = vrot.lane.b32.xlu0 %v5067_v16, %s9354_s13  ;;  %v5026_v61 = vor.u32 %v5025_v34, %v4875_v2  ;;  %v4880_v26 = vor.u32 %v4878_v29, %v4877_v15 }
 0x671   : > { %v4602_v37 = vpop.permute.xlu0 %4601  ;;  %v4528_v15 = vadd.f32 %v4454_v54, %v11942_v48 }
 0x672   : > { %v12113_v6 = vpack.c.bf16 %v4778_v30, %v4777_v10  ;;  %v4715_v36 = vadd.f32 %v11983_v24, %v4675_v50  ;;  %v4676_v55 = vadd.f32 %v4602_v37, %v4524_v51  ;;  %4627 = vrot.lane.b32.xlu1 %v4382_v52, %s9354_s13  ;;  %v5068_v52 = vsel %vm11170_vm7, %v5026_v61, 0 }
 0x673   : > { %v4456_v32 = vpop.permute.xlu1 %4455  ;;  %v4527_v10 = vadd.f32 %v12096_v27, %v11938_v59 }
 0x674   : > { %v4747_v46 = vmul.f32 0.2, %v4715_v36  ;;  %v4716_v62 = vadd.f32 %v11983_v24, %v4676_v55  ;;  %4629 = vrot.lane.b32.xlu0 %v4386_v28, %s9354_s13  ;;  %v4882_v18 = vshrl.u32 %v12113_v6, 16  ;;  %v4885_v8 = vshll.u32 %v12113_v6, 16 }
 0x675   : > { %v4458_v20 = vpop.permute.xlu0 %4457 }
 0x676   : > { %v4748_v3 = vmul.f32 0.2, %v4716_v62  ;;  %4961 = vrot.lane.b32.xlu1 %v4880_v26, %s9354_s13  ;;  %v5027_v38 = vrot.slane %v4885_v8, 1  ;;  %v4779_v9 = vmax.f32 %v4715_v36, %v4747_v46  ;;  %v4884_v2 = vrot.slane %v4882_v18, 7 }
 0x677   : > { %v4604_v4 = vpop.permute.xlu1 %4603 }
 0x678   : > { %v4780_v44 = vmax.f32 %v4716_v62, %v4748_v3  ;;  %v4677_v49 = vadd.f32 %v4604_v4, %v4525_v19  ;;  %5105 = vrot.lane.b32.xlu0 %v5068_v52, %s9354_s13  ;;  %v5028_v58 = vor.u32 %v5027_v38, %v4882_v18  ;;  %v4887_v51 = vor.u32 %v4885_v8, %v4884_v2 }
 0x679   : > { %v4606_v28 = vpop.permute.xlu0 %4605  ;;  %v4530_v2 = vadd.f32 %v4458_v20, %v11952_v22 }
 0x67a   : > { %v12128_v29 = vpack.c.bf16 %v4780_v44, %v4779_v9  ;;  %v4717_v23 = vadd.f32 %v11983_v24, %v4677_v49  ;;  %v4678_v42 = vadd.f32 %v4606_v28, %v4526_v11  ;;  %4475 = vrot.lane.b32.xlu1 %v12067_v1, %s9354_s13  ;;  %v5069_v36 = vsel %vm11170_vm7, %v5028_v58, 0 }
 0x67b   : > { %v12133_v5 = vpop.permute.xlu1 %4459  ;;  %v4529_v9 = vadd.f32 %v4456_v32, %v11948_v33 }
 0x67c   : > { %v4749_v13 = vmul.f32 0.2, %v4717_v23  ;;  %v4718_v63 = vadd.f32 %v11983_v24, %v4678_v42  ;;  %4477 = vrot.lane.b32.xlu0 %v12073_v0, %s9354_s13  ;;  %v4889_v17 = vshrl.u32 %v12128_v29, 16  ;;  %v4892_v34 = vshll.u32 %v12128_v29, 16 }
 0x67d   : > { %v12139_v16 = vpop.permute.xlu0 %4461 }
 0x67e   : > { %v4750_v30 = vmul.f32 0.2, %v4718_v63  ;;  %4963 = vrot.lane.b32.xlu1 %v4887_v51, %s9354_s13  ;;  %v4891_v50 = vrot.slane %v4889_v17, 7  ;;  %v5029_v55 = vrot.slane %v4892_v34, 1  ;;  %v4781_v61 = vmax.f32 %v4717_v23, %v4749_v13 }
 0x67f   : > { %v4608_v37 = vpop.permute.xlu1 %4607 }
 0x680   : > { %v4782_v46 = vmax.f32 %v4718_v63, %v4750_v30  ;;  %v4679_v62 = vadd.f32 %v4608_v37, %v4527_v10  ;;  %5107 = vrot.lane.b32.xlu0 %v5069_v36, %s9354_s13  ;;  %v4894_v26 = vor.u32 %v4892_v34, %v4891_v50  ;;  %v5030_v8 = vor.u32 %v5029_v55, %v4889_v17 }
 0x681   : > { %v4610_v18 = vpop.permute.xlu0 %4609 }
 0x682   : > { %v12149_v59 = vpack.c.bf16 %v4782_v46, %v4781_v61  ;;  %v4719_v27 = vadd.f32 %v11983_v24, %v4679_v62  ;;  %v4680_v19 = vadd.f32 %v4610_v18, %v4528_v15  ;;  %4965 = vrot.lane.b32.xlu1 %v4894_v26, %s9354_s13  ;;  %v5070_v54 = vsel %vm11170_vm7, %v5030_v8, 0 }
 0x683   : > { %v12153_v48 = vpop.permute.xlu1 %4463 }
 0x684   : > { %v4751_v3 = vmul.f32 0.2, %v4719_v27  ;;  %v4720_v11 = vadd.f32 %v11983_v24, %v4680_v19  ;;  %5109 = vrot.lane.b32.xlu0 %v5070_v54, %s9354_s13  ;;  %v4896_v4 = vshrl.u32 %v12149_v59, 16  ;;  %v4899_v38 = vshll.u32 %v12149_v59, 16 }
 0x685   : > { %v12160_v52 = vpop.permute.xlu0 %4465 }
 0x686   : > { %v4752_v44 = vmul.f32 0.2, %v4720_v11  ;;  %v4898_v49 = vrot.slane %v4896_v4, 7  ;;  %v5031_v23 = vrot.slane %v4899_v38, 1  ;;  %v4783_v42 = vmax.f32 %v4719_v27, %v4751_v3 }
 0x687   : > { %v4612_v28 = vpop.permute.xlu1 %4611 }
 0x688   : > { %v4784_v58 = vmax.f32 %v4720_v11, %v4752_v44  ;;  %v4681_v13 = vadd.f32 %v4612_v28, %v4529_v9  ;;  %v4901_v63 = vor.u32 %v4899_v38, %v4898_v49  ;;  %v5032_v17 = vor.u32 %v5031_v23, %v4896_v4 }
 0x689   : > { %v4614_v51 = vpop.permute.xlu0 %4613  ;;  %v4531_v38 = vadd.f32 %v12133_v5, %v11959_v31  ;;  %v4532_v44 = vadd.f32 %v12139_v16, %v11964_v47 }
 0x68a   : > { %v12165_v34 = vpack.c.bf16 %v4784_v58, %v4783_v42  ;;  %v4721_v10 = vadd.f32 %v11983_v24, %v4681_v13  ;;  %v4682_v30 = vadd.f32 %v4614_v51, %v4530_v2  ;;  %4967 = vrot.lane.b32.xlu1 %v4901_v63, %s9354_s13  ;;  %v5071_v33 = vsel %vm11170_vm7, %v5032_v17, 0 }
 0x68b   : > { %5111 = vrot.lane.b32.xlu0 %v5071_v33, %s9354_s13 }
 0x68c   : > { %v4753_v32 = vmul.f32 0.2, %v4721_v10  ;;  %v4722_v22 = vadd.f32 %v11983_v24, %v4682_v30  ;;  %v4903_v20 = vshrl.u32 %v12165_v34, 16  ;;  %v4906_v50 = vshll.u32 %v12165_v34, 16 }
 0x68e   : > { %v4754_v15 = vmul.f32 0.2, %v4722_v22  ;;  %v4905_v37 = vrot.slane %v4903_v20, 7  ;;  %v5033_v36 = vrot.slane %v4906_v50, 1  ;;  %v4785_v55 = vmax.f32 %v4721_v10, %v4753_v32 }
 0x690   : > { %v4786_v61 = vmax.f32 %v4722_v22, %v4754_v15  ;;  %v4908_v46 = vor.u32 %v4906_v50, %v4905_v37  ;;  %v5034_v62 = vor.u32 %v5033_v36, %v4903_v20  ;;  %v4533_v22 = vadd.f32 %v12153_v48, %v12001_v60 }
 0x692   : > { %v12175_v26 = vpack.c.bf16 %v4786_v61, %v4785_v55  ;;  %4969 = vrot.lane.b32.xlu1 %v4908_v46, %s9354_s13  ;;  %v5072_v18 = vsel %vm11170_vm7, %v5034_v62, 0 }
 0x693   : > { %5113 = vrot.lane.b32.xlu0 %v5072_v18, %s9354_s13 }
 0x694   : > { %v4910_v8 = vshrl.u32 %v12175_v26, 16  ;;  %v4913_v27 = vshll.u32 %v12175_v26, 16 }
 0x696   : > { %v4912_v19 = vrot.slane %v4910_v8, 7  ;;  %v5035_v54 = vrot.slane %v4913_v27, 1 }
 0x698   : > { %v4915_v3 = vor.u32 %v4913_v27, %v4912_v19  ;;  %v5036_v11 = vor.u32 %v5035_v54, %v4910_v8 }
 0x69a   : > { %4971 = vrot.lane.b32.xlu1 %v4915_v3, %s9354_s13  ;;  %v5073_v4 = vsel %vm11170_vm7, %v5036_v11, 0 }
 0x69b   : > { %5115 = vrot.lane.b32.xlu0 %v5073_v4, %s9354_s13 }
 0x6b1   : > { %v4616_v9 = vpop.permute.xlu1 %4615 }
 0x6b2   : > { %v4683_v49 = vadd.f32 %v4616_v9, %v4531_v38 }
 0x6b3   : > { %v4618_v2 = vpop.permute.xlu0 %4617 }
 0x6b4   : > { %v4723_v28 = vadd.f32 %v11983_v24, %v4683_v49  ;;  %v4684_v23 = vadd.f32 %v4618_v2, %v4532_v44 }
 0x6b6   : > { %v4755_v42 = vmul.f32 0.2, %v4723_v28  ;;  %v4724_v58 = vadd.f32 %v11983_v24, %v4684_v23 }
 0x6b8   : > { %v4756_v13 = vmul.f32 0.2, %v4724_v58  ;;  %v4787_v51 = vmax.f32 %v4723_v28, %v4755_v42 }
 0x6b9   : > { %v4952_v63 = vpop.permute.xlu1 %4951 }
 0x6ba   : > { %v4788_v17 = vmax.f32 %v4724_v58, %v4756_v13  ;;  %v4999_v10 = vsel %vm11219_vm10, 0, %v4952_v63  ;;  %v5096_v5 = vpop.permute.xlu0 %5095 }
 0x6bb   : > { %v5128_v31 = vsel %vm2816_vm6, %v4999_v10, %v12004_v39  ;;  %8690 = vmatprep.mubr.msk.bf16.mxu0 %vm2816_vm6, %v5096_v5  ;;  %v4534_v39 = vadd.f32 %v12160_v52, %v12007_v40 }
 0x6bc   : > { %v12197_v47 = vpack.c.bf16 %v4788_v17, %v4787_v51  ;;  %5376 = vmatmul.mubr.bf16.vlgmr.msra.gmra.mrb[32].mxu0 %v5128_v31 }
 0x6be   : > { %v4917_v16 = vshrl.u32 %v12197_v47, 16  ;;  %v4920_v30 = vshll.u32 %v12197_v47, 16 }
 0x6c0   : > { %v4919_v33 = vrot.slane %v4917_v16, 7  ;;  %v5037_v32 = vrot.slane %v4920_v30, 1 }
 0x6c2   : > { %v4922_v20 = vor.u32 %v4920_v30, %v4919_v33  ;;  %v5038_v50 = vor.u32 %v5037_v32, %v4917_v16 }
 0x6c3   : > { %v4620_v15 = vpop.permute.xlu1 %4619 }
 0x6c4   : > { %v4685_v37 = vadd.f32 %v4620_v15, %v4533_v22  ;;  %4973 = vrot.lane.b32.xlu1 %v4922_v20, %s9354_s13  ;;  %v5074_v36 = vsel %vm11170_vm7, %v5038_v50, 0 }
 0x6c5   : > { %v4622_v55 = vpop.permute.xlu0 %4621  ;;  %5117 = vrot.lane.b32.xlu0 %v5074_v36, %s9354_s13 }
 0x6c6   : > { %v4725_v61 = vadd.f32 %v11983_v24, %v4685_v37  ;;  %v4686_v46 = vadd.f32 %v4622_v55, %v4534_v39 }
 0x6c7   : > { %v4954_v62 = vpop.permute.xlu1 %4953 }
 0x6c8   : > { %v4757_v60 = vmul.f32 0.2, %v4725_v61  ;;  %v4726_v48 = vadd.f32 %v11983_v24, %v4686_v46  ;;  %v5000_v18 = vsel %vm11219_vm10, 0, %v4954_v62 }
 0x6c9   : > { %v5098_v40 = vpop.permute.xlu0 %5097  ;;  %v5131_v52 = vsel %vm2816_vm6, %v5000_v18, %v12019_v21 }
 0x6ca   : > { %v4758_v8 = vmul.f32 0.2, %v4726_v48  ;;  %8691 = vmatprep.mubr.msk.bf16.mxu0 %vm2816_vm6, %v5098_v40  ;;  %v4789_v19 = vmax.f32 %v4725_v61, %v4757_v60 }
 0x6cb   : > { %5384 = vmatmul.mubr.bf16.gmra.mrb[36].mxu0 %v5131_v52  ;;  %v4468_v27 = vpop.permute.xlu1 %4467 }
 0x6cc   : > { %v4790_v54 = vmax.f32 %v4726_v48, %v4758_v8  ;;  %v4535_v2 = vadd.f32 %v4468_v27, %v12028_v45 }
 0x6cd   : > { %v4470_v3 = vpop.permute.xlu0 %4469 }
 0x6ce   : > { %v12217_v11 = vpack.c.bf16 %v4790_v54, %v4789_v19  ;;  %v4536_v58 = vadd.f32 %v4470_v3, %v12033_v14 }
 0x6cf   : > { %v4956_v4 = vpop.permute.xlu1 %4955 }
 0x6d0   : > { %v5001_v38 = vsel %vm11219_vm10, 0, %v4956_v4  ;;  %v4924_v9 = vshrl.u32 %v12217_v11, 16  ;;  %v4927_v44 = vshll.u32 %v12217_v11, 16 }
 0x6d1   : > { %v5100_v49 = vpop.permute.xlu0 %5099  ;;  %v5134_v21 = vsel %vm2816_vm6, %v5001_v38, %v12030_v35 }
 0x6d2   : > { %8692 = vmatprep.mubr.msk.bf16.mxu0 %vm2816_vm6, %v5100_v49  ;;  %v4926_v28 = vrot.slane %v4924_v9, 7  ;;  %v5039_v23 = vrot.slane %v4927_v44, 1 }
 0x6d3   : > { %5394 = vmatmul.mubr.bf16.gmra.mrb[40].mxu0 %v5134_v21 }
 0x6d4   : > { %v4624_v42 = vpop.permute.xlu1 %4623  ;;  %v4929_v63 = vor.u32 %v4927_v44, %v4926_v28  ;;  %v5040_v51 = vor.u32 %v5039_v23, %v4924_v9 }
 0x6d5   : > { %v4687_v13 = vadd.f32 %v4624_v42, %v4535_v2 }
 0x6d6   : > { %v4626_v17 = vpop.permute.xlu0 %4625  ;;  %4975 = vrot.lane.b32.xlu1 %v4929_v63, %s9354_s13  ;;  %v5075_v45 = vsel %vm11170_vm7, %v5040_v51, 0 }
 0x6d7   : > { %v4727_v10 = vadd.f32 %v11983_v24, %v4687_v13  ;;  %v4688_v31 = vadd.f32 %v4626_v17, %v4536_v58  ;;  %5119 = vrot.lane.b32.xlu0 %v5075_v45, %s9354_s13 }
 0x6d8   : > { %v4958_v35 = vpop.permute.xlu1 %4957 }
 0x6d9   : > { %v4759_v5 = vmul.f32 0.2, %v4727_v10  ;;  %v4728_v16 = vadd.f32 %v11983_v24, %v4688_v31  ;;  %v5002_v14 = vsel %vm11219_vm10, 0, %v4958_v35 }
 0x6da   : > { %v5102_v30 = vpop.permute.xlu0 %5101  ;;  %v5137_v33 = vsel %vm2816_vm6, %v5002_v14, %v12048_v57 }
 0x6db   : > { %v4760_v32 = vmul.f32 0.2, %v4728_v16  ;;  %8693 = vmatprep.mubr.msk.bf16.mxu0 %vm2816_vm6, %v5102_v30  ;;  %v4791_v20 = vmax.f32 %v4727_v10, %v4759_v5 }
 0x6dc   : > { %5404 = vmatmul.mubr.bf16.gmra.mrb[44].mxu0 %v5137_v33  ;;  %v4472_v22 = vpop.permute.xlu1 %4471 }
 0x6dd   : > { %v4792_v50 = vmax.f32 %v4728_v16, %v4760_v32  ;;  %v4537_v62 = vadd.f32 %v4472_v22, %v12067_v1 }
 0x6de   : > { %v4474_v15 = vpop.permute.xlu0 %4473 }
 0x6df   : > { %v12239_v39 = vpack.c.bf16 %v4792_v50, %v4791_v20  ;;  %v4538_v40 = vadd.f32 %v4474_v15, %v12073_v0 }
 0x6e0   : > { %v4960_v37 = vpop.permute.xlu1 %4959 }
 0x6e1   : > { %v5003_v36 = vsel %vm11219_vm10, 0, %v4960_v37  ;;  %v4931_v55 = vshrl.u32 %v12239_v39, 16  ;;  %v4934_v61 = vshll.u32 %v12239_v39, 16 }
 0x6e2   : > { %v5104_v46 = vpop.permute.xlu0 %5103  ;;  %v5140_v57 = vsel %vm2816_vm6, %v5003_v36, %v12070_v53 }
 0x6e3   : > { %8694 = vmatprep.mubr.msk.bf16.mxu0 %vm2816_vm6, %v5104_v46  ;;  %v4933_v60 = vrot.slane %v4931_v55, 7  ;;  %v5041_v48 = vrot.slane %v4934_v61, 1 }
 0x6e4   : > { %5414 = vmatmul.mubr.bf16.gmra.mrb[48].mxu0 %v5140_v57  ;;  %v4628_v18 = vpop.permute.xlu1 %4627 }
 0x6e5   : > { %v4689_v52 = vadd.f32 %v4628_v18, %v4537_v62  ;;  %v4936_v8 = vor.u32 %v4934_v61, %v4933_v60  ;;  %v5042_v27 = vor.u32 %v5041_v48, %v4931_v55 }
 0x6e6   : > { %v4630_v19 = vpop.permute.xlu0 %4629 }
 0x6e7   : > { %v4729_v54 = vadd.f32 %v11983_v24, %v4689_v52  ;;  %v4690_v3 = vadd.f32 %v4630_v19, %v4538_v40  ;;  %4977 = vrot.lane.b32.xlu1 %v4936_v8, %s9354_s13  ;;  %v5076_v1 = vsel %vm11170_vm7, %v5042_v27, 0 }
 0x6e8   : > { %5121 = vrot.lane.b32.xlu0 %v5076_v1, %s9354_s13  ;;  %v4962_v53 = vpop.permute.xlu1 %4961 }
 0x6e9   : > { %v4761_v4 = vmul.f32 0.2, %v4729_v54  ;;  %v4730_v38 = vadd.f32 %v11983_v24, %v4690_v3  ;;  %v5004_v0 = vsel %vm11219_vm10, 0, %v4962_v53 }
 0x6ea   : > { %v5106_v9 = vpop.permute.xlu0 %5105  ;;  %v5143_v44 = vsel %vm2816_vm6, %v5004_v0, %v12089_v12 }
 0x6eb   : > { %v4762_v49 = vmul.f32 0.2, %v4730_v38  ;;  %8695 = vmatprep.mubr.msk.bf16.mxu0 %vm2816_vm6, %v5106_v9  ;;  %v4793_v2 = vmax.f32 %v4729_v54, %v4761_v4 }
 0x6ec   : > { %5424 = vmatmul.mubr.bf16.gmra.mrb[52].mxu0 %v5143_v44  ;;  %v4476_v21 = vpop.permute.xlu1 %4475 }
 0x6ed   : > { %v4794_v28 = vmax.f32 %v4730_v38, %v4762_v49  ;;  %v4539_v23 = vadd.f32 %v4476_v21, %v12092_v56 }
 0x6ee   : > { %v4478_v42 = vpop.permute.xlu0 %4477 }
 0x6ef   : > { %v12262_v58 = vpack.c.bf16 %v4794_v28, %v4793_v2  ;;  %v4691_v13 = vadd.f32 %v4539_v23, %v14983_v25  ;;  %v4540_v63 = vadd.f32 %v4478_v42, %v12099_v7 }
 0x6f0   : > { %v4964_v51 = vpop.permute.xlu1 %4963 }
 0x6f1   : > { %v4731_v17 = vadd.f32 %v11983_v24, %v4691_v13  ;;  %v4692_v12 = vadd.f32 %v4540_v63, %v14983_v25  ;;  %v5005_v10 = vsel %vm11219_vm10, 0, %v4964_v51  ;;  %v4938_v31 = vshrl.u32 %v12262_v58, 16 }
 0x6f2   : > { %v5108_v45 = vpop.permute.xlu0 %5107  ;;  %v5146_v56 = vsel %vm2816_vm6, %v5005_v10, %v12113_v6  ;;  %v4941_v35 = vshll.u32 %v12262_v58, 16 }
 0x6f3   : > { %v4763_v5 = vmul.f32 0.2, %v4731_v17  ;;  %v4732_v16 = vadd.f32 %v11983_v24, %v4692_v12  ;;  %8696 = vmatprep.mubr.msk.bf16.mxu0 %vm2816_vm6, %v5108_v45  ;;  %v4940_v7 = vrot.slane %v4938_v31, 7 }
 0x6f4   : > { %5434 = vmatmul.mubr.bf16.gmra.mrb[56].mxu0 %v5146_v56  ;;  %v5043_v14 = vrot.slane %v4941_v35, 1  ;;  %v4966_v33 = vpop.permute.xlu1 %4965 }
 0x6f5   : > { %v4764_v30 = vmul.f32 0.2, %v4732_v16  ;;  %v4943_v32 = vor.u32 %v4941_v35, %v4940_v7  ;;  %v4795_v50 = vmax.f32 %v4731_v17, %v4763_v5  ;;  %v5006_v6 = vsel %vm11219_vm10, 0, %v4966_v33 }
 0x6f6   : > { %v5110_v22 = vpop.permute.xlu0 %5109  ;;  %v5044_v20 = vor.u32 %v5043_v14, %v4938_v31  ;;  %v5149_v36 = vsel %vm2816_vm6, %v5006_v6, %v12128_v29  ;;  %v8706_v29 = vld [vmem:[%s9739_s16 + $0x2] ss:$0 sm:$0xff] }
 0x6f7   : > { %v4796_v15 = vmax.f32 %v4732_v16, %v4764_v30  ;;  %4979 = vrot.lane.b32.xlu1 %v4943_v32, %s9354_s13  ;;  %8697 = vmatprep.mubr.msk.bf16.mxu0 %vm2816_vm6, %v5110_v22 }
 0x6f8   : > { %v5077_v24 = vsel %vm11170_vm7, %v5044_v20, 0 }
 0x6f9   : > { %v4812_v37 = vpack.c.bf16 %v4796_v15, %v4795_v50  ;;  %5123 = vrot.lane.b32.xlu0 %v5077_v24, %s9354_s13 }
 0x6fb   : > { %v4945_v55 = vshrl.u32 %v4812_v37, 16  ;;  %v4948_v61 = vshll.u32 %v4812_v37, 16 }
 0x6fc   : > { %5444 = vmatmul.mubr.bf16.gmra.mrb[60].mxu0 %v5149_v36  ;;  %v4968_v46 = vpop.permute.xlu1 %4967 }
 0x6fd   : > { %v4947_v57 = vrot.slane %v4945_v55, 7  ;;  %v5045_v62 = vrot.slane %v4948_v61, 1  ;;  %v5112_v60 = vpop.permute.xlu0 %5111  ;;  %v5007_v40 = vsel %vm11219_vm10, 0, %v4968_v46 }
 0x6fe   : > { %8698 = vmatprep.mubr.msk.bf16.mxu0 %vm2816_vm6, %v5112_v60  ;;  %v5152_v8 = vsel %vm2816_vm6, %v5007_v40, %v12149_v59 }
 0x6ff   : > { %v4950_v48 = vor.u32 %v4948_v61, %v4947_v57  ;;  %v5046_v18 = vor.u32 %v5045_v62, %v4945_v55 }
 0x701   : > { %4981 = vrot.lane.b32.xlu1 %v4950_v48, %s9354_s13  ;;  %v5078_v52 = vsel %vm11170_vm7, %v5046_v18, 0 }
 0x702   : > { %5125 = vrot.lane.b32.xlu0 %v5078_v52, %s9354_s13 }
 0x704   : > { %5454 = vmatmul.mubr.bf16.gmra.mrb[64].mxu0 %v5152_v8  ;;  %v4970_v27 = vpop.permute.xlu1 %4969 }
 0x705   : > { %v5114_v19 = vpop.permute.xlu0 %5113  ;;  %5843 = vrot.lane.b32.xlu1 %v8706_v29, %s9354_s13  ;;  %v5008_v54 = vsel %vm11219_vm10, 0, %v4970_v27 }
 0x706   : > { %8699 = vmatprep.mubr.msk.bf16.mxu0 %vm2816_vm6, %v5114_v19  ;;  %v5155_v41 = vsel %vm2816_vm6, %v5008_v54, %v12165_v34 }
 0x70c   : > { %5464 = vmatmul.mubr.bf16.gmra.mrb[68].mxu0 %v5155_v41  ;;  %v4972_v3 = vpop.permute.xlu1 %4971 }
 0x70d   : > { %v5116_v1 = vpop.permute.xlu0 %5115  ;;  %v5009_v59 = vsel %vm11219_vm10, 0, %v4972_v3 }
 0x70e   : > { %8700 = vmatprep.mubr.msk.bf16.mxu0 %vm2816_vm6, %v5116_v1  ;;  %v5158_v53 = vsel %vm2816_vm6, %v5009_v59, %v12175_v26 }
 0x714   : > { %5474 = vmatmul.mubr.bf16.gmra.mrb[72].mxu0 %v5158_v53 }
 0x736   : > { %v4974_v4 = vpop.permute.xlu1 %4973 }
 0x737   : > { %v5010_v38 = vsel %vm11219_vm10, 0, %v4974_v4  ;;  %v5118_v0 = vpop.permute.xlu0 %5117 }
 0x738   : > { %8701 = vmatprep.mubr.msk.bf16.mxu0 %vm2816_vm6, %v5118_v0  ;;  %v5161_v34 = vsel %vm2816_vm6, %v5010_v38, %v12197_v47 }
 0x739   : > { %5484 = vmatmul.mubr.bf16.gmra.mrb[76].mxu0 %v5161_v34 }
 0x748   : > { %v4976_v9 = vpop.permute.xlu1 %4975 }
 0x749   : > { %v5011_v44 = vsel %vm11219_vm10, 0, %v4976_v9  ;;  %v5120_v49 = vpop.permute.xlu0 %5119 }
 0x74a   : > { %8702 = vmatprep.mubr.msk.bf16.mxu0 %vm2816_vm6, %v5120_v49  ;;  %v5164_v26 = vsel %vm2816_vm6, %v5011_v44, %v12217_v11 }
 0x74b   : > { %5494 = vmatmul.mubr.bf16.gmra.mrb[80].mxu0 %v5164_v26 }
 0x759   : > { %v4978_v21 = vpop.permute.xlu1 %4977 }
 0x75a   : > { %v5012_v2 = vsel %vm11219_vm10, 0, %v4978_v21  ;;  %v5122_v28 = vpop.permute.xlu0 %5121 }
 0x75b   : > { %8703 = vmatprep.mubr.msk.bf16.mxu0 %vm2816_vm6, %v5122_v28  ;;  %v5167_v47 = vsel %vm2816_vm6, %v5012_v2, %v12239_v39 }
 0x75c   : > { %5504 = vmatmul.mubr.bf16.gmra.mrb[84].mxu0 %v5167_v47 }
 0x769   : > { %v4980_v23 = vpop.permute.xlu1 %4979 }
 0x76a   : > { %v5013_v42 = vsel %vm11219_vm10, 0, %v4980_v23 }
 0x76b   : > { %v5124_v13 = vpop.permute.xlu0 %5123  ;;  %v5170_v11 = vsel %vm2816_vm6, %v5013_v42, %v12262_v58 }
 0x76c   : > { %8704 = vmatprep.mubr.msk.bf16.mxu0 %vm2816_vm6, %v5124_v13 }
 0x76d   : > { %5514 = vmatmul.mubr.bf16.gmra.mrb[88].mxu0 %v5170_v11 }
 0x773   : > { %v4982_v63 = vpop.permute.xlu1 %4981 }
 0x774   : > { %v5014_v51 = vsel %vm11219_vm10, 0, %v4982_v63  ;;  %v5126_v17 = vpop.permute.xlu0 %5125 }
 0x775   : > { %8705 = vmatprep.mubr.msk.bf16.mxu0 %vm2816_vm6, %v5126_v17  ;;  %v5173_v39 = vsel %vm2816_vm6, %v5014_v51, %v4812_v37 }
 0x776   : > { %5524 = vmatmul.mubr.bf16.gmra.mrb[92].mxu0 %v5173_v39 }
 0x777   : > { %v12438_v38 = vpop.permute.xlu1 %5843 }
 0x78f   : > { %v12330_v12 = vpop.f32.mrb[32].mxu0 }
 0x790   : > { %v5379_v10 = vpop.f32.mrb[33].mxu0  ;;  %5564 = vrot.lane.b32.xlu1 %v12330_v12, %s9354_s13 }
 0x791   : > { %v12334_v58 = vpop.f32.mrb[34].mxu0 }
 0x792   : > { %v5382_v31 = vpop.f32.mrb[35].mxu0  ;;  %5566 = vrot.lane.b32.xlu0 %v12334_v58, %s9354_s13 }
 0x79e   : > { %v12338_v43 = vpop.f32.mrb[36].mxu0 }
 0x79f   : > { %v5387_v45 = vpop.f32.mrb[37].mxu0  ;;  %5568 = vrot.lane.b32.xlu1 %v12338_v43, %s9354_s13 }
 0x7a0   : > { %v12342_v56 = vpop.f32.mrb[38].mxu0 }
 0x7a1   : > { %v5391_v35 = vpop.f32.mrb[39].mxu0  ;;  %5570 = vrot.lane.b32.xlu0 %v12342_v56, %s9354_s13 }
 0x7a3   : > { %5716 = vrot.lane.b32.xlu1 %v5387_v45, %s9354_s13 }
 0x7a5   : > { %5718 = vrot.lane.b32.xlu0 %v5391_v35, %s9354_s13 }
 0x7a6   : > { %v12348_v5 = vpop.f32.mrb[40].mxu0 }
 0x7a7   : > { %v5397_v16 = vpop.f32.mrb[41].mxu0  ;;  %5572 = vrot.lane.b32.xlu1 %v12348_v5, %s9354_s13 }
 0x7a8   : > { %v12352_v7 = vpop.f32.mrb[42].mxu0 }
 0x7a9   : > { %v5401_v14 = vpop.f32.mrb[43].mxu0  ;;  %5574 = vrot.lane.b32.xlu0 %v12352_v7, %s9354_s13 }
 0x7ab   : > { %5720 = vrot.lane.b32.xlu1 %v5397_v16, %s9354_s13 }
 0x7ad   : > { %5722 = vrot.lane.b32.xlu0 %v5401_v14, %s9354_s13 }
 0x7af   : > { %v12358_v30 = vpop.f32.mrb[44].mxu0 }
 0x7b0   : > { %v5407_v33 = vpop.f32.mrb[45].mxu0  ;;  %5576 = vrot.lane.b32.xlu1 %v12358_v30, %s9354_s13 }
 0x7b1   : > { %v12362_v32 = vpop.f32.mrb[46].mxu0 }
 0x7b2   : > { %v5411_v22 = vpop.f32.mrb[47].mxu0  ;;  %5578 = vrot.lane.b32.xlu0 %v12362_v32, %s9354_s13 }
 0x7b4   : > { %5724 = vrot.lane.b32.xlu1 %v5407_v33, %s9354_s13 }
 0x7b6   : > { %5726 = vrot.lane.b32.xlu0 %v5411_v22, %s9354_s13 }
 0x7b7   : > { %v12368_v20 = vpop.f32.mrb[48].mxu0 }
 0x7b8   : > { %v5417_v50 = vpop.f32.mrb[49].mxu0  ;;  %5580 = vrot.lane.b32.xlu1 %v12368_v20, %s9354_s13 }
 0x7b9   : > { %v12372_v15 = vpop.f32.mrb[50].mxu0 }
 0x7ba   : > { %v5421_v6 = vpop.f32.mrb[51].mxu0  ;;  %5582 = vrot.lane.b32.xlu0 %v12372_v15, %s9354_s13 }
 0x7bc   : > { %5728 = vrot.lane.b32.xlu1 %v5417_v50, %s9354_s13 }
 0x7be   : > { %5730 = vrot.lane.b32.xlu0 %v5421_v6, %s9354_s13 }
 0x7bf   : > { %v12378_v24 = vpop.f32.mrb[52].mxu0 }
 0x7c0   : > { %v5427_v37 = vpop.f32.mrb[53].mxu0  ;;  %5584 = vrot.lane.b32.xlu1 %v12378_v24, %s9354_s13 }
 0x7c1   : > { %v12382_v36 = vpop.f32.mrb[54].mxu0 }
 0x7c2   : > { %v5431_v55 = vpop.f32.mrb[55].mxu0  ;;  %5586 = vrot.lane.b32.xlu0 %v12382_v36, %s9354_s13 }
 0x7c4   : > { %5732 = vrot.lane.b32.xlu1 %v5427_v37, %s9354_s13 }
 0x7c6   : > { %5734 = vrot.lane.b32.xlu0 %v5431_v55, %s9354_s13 }
 0x7c7   : > { %v12388_v61 = vpop.f32.mrb[56].mxu0 }
 0x7c8   : > { %5588 = vrot.lane.b32.xlu1 %v12388_v61, %s9354_s13  ;;  %v5437_v46 = vpop.f32.mrb[57].mxu0 }
 0x7c9   : > { %v12392_v57 = vpop.f32.mrb[58].mxu0 }
 0x7ca   : > { %5590 = vrot.lane.b32.xlu0 %v12392_v57, %s9354_s13  ;;  %v5441_v62 = vpop.f32.mrb[59].mxu0 }
 0x7cc   : > { %5736 = vrot.lane.b32.xlu1 %v5437_v46, %s9354_s13 }
 0x7ce   : > { %5738 = vrot.lane.b32.xlu0 %v5441_v62, %s9354_s13 }
 0x7cf   : > { %v12398_v60 = vpop.f32.mrb[60].mxu0 }
 0x7d0   : > { %5592 = vrot.lane.b32.xlu1 %v12398_v60, %s9354_s13  ;;  %v5447_v48 = vpop.f32.mrb[61].mxu0 }
 0x7d1   : > { %v12402_v18 = vpop.f32.mrb[62].mxu0 }
 0x7d2   : > { %5594 = vrot.lane.b32.xlu0 %v12402_v18, %s9354_s13  ;;  %v5451_v40 = vpop.f32.mrb[63].mxu0 }
 0x7d4   : > { %5740 = vrot.lane.b32.xlu1 %v5447_v48, %s9354_s13 }
 0x7d6   : > { %5742 = vrot.lane.b32.xlu0 %v5451_v40, %s9354_s13 }
 0x7d7   : > { %v12408_v52 = vpop.f32.mrb[64].mxu0 }
 0x7d8   : > { %5596 = vrot.lane.b32.xlu1 %v12408_v52, %s9354_s13  ;;  %v5457_v29 = vpop.f32.mrb[65].mxu0 }
 0x7d9   : > { %v12412_v8 = vpop.f32.mrb[66].mxu0 }
 0x7da   : > { %5598 = vrot.lane.b32.xlu0 %v12412_v8, %s9354_s13  ;;  %v5461_v27 = vpop.f32.mrb[67].mxu0 }
 0x7dc   : > { %5744 = vrot.lane.b32.xlu1 %v5457_v29, %s9354_s13 }
 0x7de   : > { %5746 = vrot.lane.b32.xlu0 %v5461_v27, %s9354_s13 }
 0x7df   : > { %v12418_v19 = vpop.f32.mrb[68].mxu0 }
 0x7e0   : > { %5600 = vrot.lane.b32.xlu1 %v12418_v19, %s9354_s13  ;;  %v5467_v54 = vpop.f32.mrb[69].mxu0 }
 0x7e1   : > { %v12422_v41 = vpop.f32.mrb[70].mxu0 }
 0x7e2   : > { %5602 = vrot.lane.b32.xlu0 %v12422_v41, %s9354_s13  ;;  %v5471_v3 = vpop.f32.mrb[71].mxu0 }
 0x7e4   : > { %5748 = vrot.lane.b32.xlu1 %v5467_v54, %s9354_s13 }
 0x7e6   : > { %5750 = vrot.lane.b32.xlu0 %v5471_v3, %s9354_s13 }
 0x7e7   : > { %v12428_v1 = vpop.f32.mrb[72].mxu0 }
 0x7e8   : > { %5604 = vrot.lane.b32.xlu1 %v12428_v1, %s9354_s13  ;;  %v5477_v59 = vpop.f32.mrb[73].mxu0 }
 0x7e9   : > { %v12432_v53 = vpop.f32.mrb[74].mxu0 }
 0x7ea   : > { %14984 = vst [vmem:[#allocation25_spill] sm:$0xff] %v12432_v53  ;;  %5606 = vrot.lane.b32.xlu0 %v12432_v53, %s9354_s13  ;;  %v5481_v4 = vpop.f32.mrb[75].mxu0 }
 0x7ec   : > { %5752 = vrot.lane.b32.xlu1 %v5477_v59, %s9354_s13 }
 0x7ee   : > { %5754 = vrot.lane.b32.xlu0 %v5481_v4, %s9354_s13 }
 0x802   : > { %v12442_v34 = vpop.permute.xlu1 %5564 }
 0x804   : > { %v5567_v49 = vpop.permute.xlu0 %5566 }
 0x80c   : > { %v12440_v0 = vpop.f32.mrb[76].mxu0 }
 0x80d   : > { %14985 = vst [vmem:[#allocation26_spill] sm:$0xff] %v12440_v0  ;;  %5608 = vrot.lane.b32.xlu1 %v12440_v0, %s9354_s13  ;;  %v5487_v9 = vpop.f32.mrb[77].mxu0  ;;  %v5656_v0 = vadd.f32 %v12442_v34, %v12338_v43 }
 0x80e   : > { %v12446_v44 = vpop.f32.mrb[78].mxu0 }
 0x80f   : > { %14986 = vst [vmem:[#allocation24_spill] sm:$0xff] %v12446_v44  ;;  %5610 = vrot.lane.b32.xlu0 %v12446_v44, %s9354_s13  ;;  %v5491_v26 = vpop.f32.mrb[79].mxu0 }
 0x811   : > { %5756 = vrot.lane.b32.xlu1 %v5487_v9, %s9354_s13  ;;  %v12451_v21 = vpop.permute.xlu1 %5568 }
 0x813   : > { %v12453_v2 = vpop.permute.xlu0 %5570  ;;  %5758 = vrot.lane.b32.xlu0 %v5491_v26, %s9354_s13 }
 0x815   : > { %v5717_v28 = vpop.permute.xlu1 %5716 }
 0x817   : > { %v5719_v47 = vpop.permute.xlu0 %5718 }
 0x819   : > { %v12456_v23 = vpop.permute.xlu1 %5572 }
 0x81b   : > { %v12458_v42 = vpop.permute.xlu0 %5574 }
 0x81d   : > { %v12460_v13 = vpop.permute.xlu1 %5720 }
 0x81e   : > { %v12462_v11 = vpop.f32.mrb[80].mxu0 }
 0x81f   : > { %14987 = vst [vmem:[#allocation30_spill] sm:$0xff] %v12462_v11  ;;  %v5723_v63 = vpop.permute.xlu0 %5722  ;;  %5612 = vrot.lane.b32.xlu1 %v12462_v11, %s9354_s13  ;;  %v5497_v51 = vpop.f32.mrb[81].mxu0  ;;  %v5657_v11 = vadd.f32 %v5567_v49, %v12342_v56  ;;  %v5659_v56 = vadd.f32 %v12453_v2, %v12352_v7 }
 0x820   : > { %v12466_v17 = vpop.f32.mrb[82].mxu0 }
 0x821   : > { %14988 = vst [vmem:[#allocation27_spill] sm:$0xff] %v12466_v17  ;;  %5614 = vrot.lane.b32.xlu0 %v12466_v17, %s9354_s13  ;;  %v5501_v39 = vpop.f32.mrb[83].mxu0 }
 0x822   : > { %v12470_v10 = vpop.permute.xlu1 %5576 }
 0x823   : > { %5760 = vrot.lane.b32.xlu1 %v5497_v51, %s9354_s13 }
 0x824   : > { %v12472_v31 = vpop.permute.xlu0 %5578 }
 0x825   : > { %5762 = vrot.lane.b32.xlu0 %v5501_v39, %s9354_s13 }
 0x826   : > { %v5725_v45 = vpop.permute.xlu1 %5724 }
 0x828   : > { %v5727_v35 = vpop.permute.xlu0 %5726 }
 0x829   : > { %v5811_v34 = vadd.f32 %v5727_v35, %v5659_v56 }
 0x82a   : > { %v12476_v16 = vpop.permute.xlu1 %5580 }
 0x82c   : > { %v12478_v14 = vpop.permute.xlu0 %5582 }
 0x82e   : > { %v12480_v33 = vpop.permute.xlu1 %5728 }
 0x82f   : > { %v12482_v22 = vpop.f32.mrb[84].mxu0 }
 0x830   : > { %14989 = vst [vmem:[#allocation28_spill] sm:$0xff] %v12482_v22  ;;  %v5731_v50 = vpop.permute.xlu0 %5730  ;;  %5616 = vrot.lane.b32.xlu1 %v12482_v22, %s9354_s13  ;;  %v5507_v6 = vpop.f32.mrb[85].mxu0 }
 0x831   : > { %v12486_v37 = vpop.f32.mrb[86].mxu0 }
 0x832   : > { %14990 = vst [vmem:[#allocation29_spill] sm:$0xff] %v12486_v37  ;;  %5618 = vrot.lane.b32.xlu0 %v12486_v37, %s9354_s13  ;;  %v5511_v55 = vpop.f32.mrb[87].mxu0  ;;  %v12490_v46 = vpop.permute.xlu1 %5584  ;;  %v5654_v37 = vadd.f32 %v12330_v12, %v14983_v25  ;;  %v5809_v12 = vadd.f32 %v5723_v63, %v5657_v11  ;;  %v5661_v63 = vadd.f32 %v12458_v42, %v12362_v32 }
 0x834   : > { %v12492_v62 = vpop.permute.xlu0 %5586  ;;  %5764 = vrot.lane.b32.xlu1 %v5507_v6, %s9354_s13  ;;  %v5655_v6 = vadd.f32 %v12334_v58, %v14983_v25  ;;  %v5806_v44 = vadd.f32 %v5717_v28, %v5654_v37  ;;  %v5808_v28 = vadd.f32 %v12460_v13, %v5656_v0  ;;  %v5658_v37 = vadd.f32 %v12451_v21, %v12348_v5 }
 0x835   : > { %v5849_v43 = vadd.f32 %v12438_v38, %v5809_v12  ;;  %v5851_v5 = vadd.f32 %v12438_v38, %v5811_v34  ;;  %v5663_v21 = vadd.f32 %v12472_v31, %v12372_v15  ;;  %v5665_v15 = vadd.f32 %v12478_v14, %v12382_v36 }
 0x836   : > { %5766 = vrot.lane.b32.xlu0 %v5511_v55, %s9354_s13  ;;  %v12496_v48 = vpop.permute.xlu1 %5732  ;;  %v5807_v22 = vadd.f32 %v5719_v47, %v5655_v6  ;;  %v5846_v49 = vadd.f32 %v12438_v38, %v5806_v44  ;;  %v5848_v7 = vadd.f32 %v12438_v38, %v5808_v28  ;;  %v5810_v2 = vadd.f32 %v5725_v45, %v5658_v37 }
 0x837   : > { %v5813_v44 = vadd.f32 %v5731_v50, %v5661_v63  ;;  %v5662_v45 = vadd.f32 %v12470_v10, %v12368_v20  ;;  %v14993_v63 = vld [vmem:[#allocation25_spill] sm:$0xff] }
 0x838   : > { %v5735_v40 = vpop.permute.xlu0 %5734  ;;  %v5847_v53 = vadd.f32 %v12438_v38, %v5807_v22  ;;  %v5850_v13 = vadd.f32 %v12438_v38, %v5810_v2  ;;  %v5664_v22 = vadd.f32 %v12476_v16, %v12378_v24 }
 0x83a   : > { %v12498_v29 = vpop.permute.xlu1 %5588 }
 0x83b   : > { %v5668_v6 = vadd.f32 %v12498_v29, %v12398_v60 }
 0x83c   : > { %v12500_v27 = vpop.permute.xlu0 %5590 }
 0x83e   : > { %v12502_v54 = vpop.permute.xlu1 %5736 }
 0x83f   : > { %v5816_v14 = vadd.f32 %v12502_v54, %v5664_v22 }
 0x840   : > { %v12504_v3 = vpop.f32.mrb[88].mxu0  ;;  %v5739_v59 = vpop.permute.xlu0 %5738 }
 0x841   : > { %14991 = vst [vmem:[#allocation31_spill] sm:$0xff] %v12504_v3  ;;  %5620 = vrot.lane.b32.xlu1 %v12504_v3, %s9354_s13  ;;  %v5517_v4 = vpop.f32.mrb[89].mxu0  ;;  %v5817_v10 = vadd.f32 %v5739_v59, %v5665_v15  ;;  %v5669_v59 = vadd.f32 %v12500_v27, %v12402_v18 }
 0x842   : > { %v12508_v9 = vpop.f32.mrb[90].mxu0  ;;  %v12510_v26 = vpop.permute.xlu1 %5592 }
 0x843   : > { %14992 = vst [vmem:[#allocation32_spill] sm:$0xff] %v12508_v9  ;;  %5622 = vrot.lane.b32.xlu0 %v12508_v9, %s9354_s13  ;;  %v5521_v51 = vpop.f32.mrb[91].mxu0  ;;  %v5857_v24 = vadd.f32 %v12438_v38, %v5817_v10  ;;  %v14996_v10 = vld [vmem:[#allocation30_spill] sm:$0xff] }
 0x844   : > { %v12514_v39 = vpop.permute.xlu0 %5594 }
 0x845   : > { %5768 = vrot.lane.b32.xlu1 %v5517_v4, %s9354_s13 }
 0x846   : > { %v12520_v55 = vpop.permute.xlu1 %5740 }
 0x847   : > { %5770 = vrot.lane.b32.xlu0 %v5521_v51, %s9354_s13 }
 0x848   : > { %v5743_v3 = vpop.permute.xlu0 %5742 }
 0x849   : > { %v12524_v17 = vpop.f32.mrb[92].mxu0 }
 0x84a   : > { %v5527_v9 = vpop.f32.mrb[93].mxu0  ;;  %v12536_v47 = vpop.permute.xlu1 %5596 }
 0x84b   : > { %5772 = vrot.lane.b32.xlu1 %v5527_v9, %s9354_s13  ;;  %v12528_v4 = vpop.f32.mrb[94].mxu0  ;;  %v5666_v9 = vadd.f32 %v12490_v46, %v12388_v61  ;;  %v5672_v28 = vadd.f32 %v12536_v47, %v12418_v19 }
 0x84c   : > { %v12530_v58 = vpop.permute.xlu0 %5598  ;;  %v5531_v51 = vpop.f32.mrb[95].mxu0 }
 0x84d   : > { %5774 = vrot.lane.b32.xlu0 %v5531_v51, %s9354_s13  ;;  %v5671_v51 = vadd.f32 %v12514_v39, %v12412_v8  ;;  %v5673_v56 = vadd.f32 %v12530_v58, %v12422_v41 }
 0x84e   : > { %v5745_v0 = vpop.permute.xlu1 %5744 }
 0x84f   : > { %5944 = vrot.lane.b32.xlu1 %v5847_v53, %s9354_s13  ;;  %v5660_v53 = vadd.f32 %v12456_v23, %v12358_v30  ;;  %v5853_v30 = vadd.f32 %v12438_v38, %v5813_v44  ;;  %v5815_v23 = vadd.f32 %v5735_v40, %v5663_v21  ;;  %v5667_v40 = vadd.f32 %v12492_v62, %v12392_v57 }
 0x850   : > { %v5747_v11 = vpop.permute.xlu0 %5746  ;;  %v5856_v57 = vadd.f32 %v12438_v38, %v5816_v14  ;;  %v5818_v62 = vadd.f32 %v12520_v55, %v5666_v9  ;;  %v5820_v27 = vadd.f32 %v5745_v0, %v5668_v6  ;;  %v5670_v55 = vadd.f32 %v12510_v26, %v12408_v52 }
 0x851   : > { %5942 = vrot.lane.b32.xlu0 %v5846_v49, %s9354_s13  ;;  %v5812_v32 = vadd.f32 %v12480_v33, %v5660_v53  ;;  %v5814_v33 = vadd.f32 %v12496_v48, %v5662_v45  ;;  %v5855_v20 = vadd.f32 %v12438_v38, %v5815_v23  ;;  %v5819_v16 = vadd.f32 %v5743_v3, %v5667_v40 }
 0x852   : > { %v5601_v35 = vpop.permute.xlu1 %5600  ;;  %v5821_v46 = vadd.f32 %v5747_v11, %v5669_v59  ;;  %v5858_v18 = vadd.f32 %v12438_v38, %v5818_v62  ;;  %v5860_v49 = vadd.f32 %v12438_v38, %v5820_v27 }
 0x853   : > { %5948 = vrot.lane.b32.xlu1 %v5849_v43, %s9354_s13  ;;  %v5852_v31 = vadd.f32 %v12438_v38, %v5812_v32  ;;  %v5854_v36 = vadd.f32 %v12438_v38, %v5814_v33  ;;  %v5859_v61 = vadd.f32 %v12438_v38, %v5819_v16  ;;  %v5674_v34 = vadd.f32 %v5601_v35, %v12428_v1  ;;  %v14994_v32 = vld [vmem:[#allocation26_spill] sm:$0xff] }
 0x854   : > { %v12560_v42 = vpop.permute.xlu0 %5602  ;;  %v5861_v12 = vadd.f32 %v12438_v38, %v5821_v46  ;;  %v14999_v46 = vld [vmem:[#allocation29_spill] sm:$0xff] }
 0x855   : > { %5946 = vrot.lane.b32.xlu0 %v5848_v7, %s9354_s13  ;;  %v5675_v7 = vadd.f32 %v12560_v42, %v14993_v63  ;;  %v9030_v63 = vld [vmem:[#allocation2 + $0x8] sm:$0xff] }
 0x856   : > { %v5749_v48 = vpop.permute.xlu1 %5748 }
 0x857   : > { %5952 = vrot.lane.b32.xlu1 %v5851_v5, %s9354_s13  ;;  %v5822_v8 = vadd.f32 %v5749_v48, %v5670_v55 }
 0x858   : > { %v5751_v50 = vpop.permute.xlu0 %5750 }
 0x859   : > { %5950 = vrot.lane.b32.xlu0 %v5850_v13, %s9354_s13  ;;  %v5823_v60 = vadd.f32 %v5751_v50, %v5671_v51  ;;  %v5862_v37 = vadd.f32 %v12438_v38, %v5822_v8  ;;  %v15001_v8 = vld [vmem:[#allocation32_spill] sm:$0xff] }
 0x85a   : > { %v5605_v3 = vpop.permute.xlu1 %5604 }
 0x85b   : > { %5956 = vrot.lane.b32.xlu1 %v5853_v30, %s9354_s13  ;;  %v5863_v52 = vadd.f32 %v12438_v38, %v5823_v60  ;;  %v5676_v45 = vadd.f32 %v5605_v3, %v14994_v32  ;;  %v14995_v30 = vld [vmem:[#allocation24_spill] sm:$0xff] }
 0x85c   : > { %v5607_v54 = vpop.permute.xlu0 %5606 }
 0x85d   : > { %5954 = vrot.lane.b32.xlu0 %v5852_v31, %s9354_s13  ;;  %v5677_v23 = vadd.f32 %v5607_v54, %v14995_v30  ;;  %v14998_v54 = vld [vmem:[#allocation28_spill] sm:$0xff] }
 0x85e   : > { %v5753_v39 = vpop.permute.xlu1 %5752 }
 0x85f   : > { %5960 = vrot.lane.b32.xlu1 %v5855_v20, %s9354_s13  ;;  %v5824_v43 = vadd.f32 %v5753_v39, %v5672_v28 }
 0x860   : > { %v5755_v29 = vpop.permute.xlu0 %5754 }
 0x861   : > { %5958 = vrot.lane.b32.xlu0 %v5854_v36, %s9354_s13  ;;  %v5825_v26 = vadd.f32 %v5755_v29, %v5673_v56  ;;  %v5864_v58 = vadd.f32 %v12438_v38, %v5824_v43  ;;  %v14997_v36 = vld [vmem:[#allocation27_spill] sm:$0xff] }
 0x863   : > { %5964 = vrot.lane.b32.xlu1 %v5857_v24, %s9354_s13  ;;  %v5865_v41 = vadd.f32 %v12438_v38, %v5825_v26 }
 0x865   : > { %5962 = vrot.lane.b32.xlu0 %v5856_v57, %s9354_s13 }
 0x867   : > { %5968 = vrot.lane.b32.xlu1 %v5859_v61, %s9354_s13 }
 0x869   : > { %5966 = vrot.lane.b32.xlu0 %v5858_v18, %s9354_s13 }
 0x86b   : > { %5972 = vrot.lane.b32.xlu1 %v5861_v12, %s9354_s13  ;;  %v15000_v12 = vld [vmem:[#allocation31_spill] sm:$0xff] }
 0x86d   : > { %5970 = vrot.lane.b32.xlu0 %v5860_v49, %s9354_s13 }
 0x86f   : > { %5976 = vrot.lane.b32.xlu1 %v5863_v52, %s9354_s13 }
 0x871   : > { %5974 = vrot.lane.b32.xlu0 %v5862_v37, %s9354_s13  ;;  %v9029_v37 = vld [vmem:[#allocation2] sm:$0xff] }
 0x872   : > { %v5879_v43 = vunpack.c.h.bf16 %v9029_v37 }
 0x873   : > { %5980 = vrot.lane.b32.xlu1 %v5865_v41, %s9354_s13 }
 0x875   : > { %5978 = vrot.lane.b32.xlu0 %v5864_v58, %s9354_s13 }
 0x87f   : > { %v5609_v19 = vpop.permute.xlu1 %5608 }
 0x880   : > { %v5678_v50 = vadd.f32 %v5609_v19, %v14996_v10  ;;  %v5878_v19 = vunpack.c.l.bf16 %v9029_v37 }
 0x881   : > { %v5611_v47 = vpop.permute.xlu0 %5610 }
 0x882   : > { %v5679_v14 = vadd.f32 %v5611_v47, %v14997_v36 }
 0x883   : > { %v5757_v11 = vpop.permute.xlu1 %5756 }
 0x884   : > { %v5826_v2 = vadd.f32 %v5757_v11, %v5674_v34 }
 0x885   : > { %v5759_v0 = vpop.permute.xlu0 %5758 }
 0x886   : > { %v5866_v53 = vadd.f32 %v12438_v38, %v5826_v2  ;;  %v5827_v5 = vadd.f32 %v5759_v0, %v5675_v7  ;;  %v5881_v7 = vunpack.c.h.bf16 %v9030_v63 }
 0x888   : > { %v5867_v44 = vadd.f32 %v12438_v38, %v5827_v5  ;;  %5982 = vrot.lane.b32.xlu0 %v5866_v53, %s9354_s13  ;;  %v5880_v5 = vunpack.c.l.bf16 %v9030_v63 }
 0x88a   : > { %5984 = vrot.lane.b32.xlu1 %v5867_v44, %s9354_s13 }
 0x891   : > { %v5613_v21 = vpop.permute.xlu1 %5612 }
 0x892   : > { %v5680_v6 = vadd.f32 %v5613_v21, %v14998_v54 }
 0x893   : > { %v5615_v13 = vpop.permute.xlu0 %5614 }
 0x894   : > { %v5681_v3 = vadd.f32 %v5615_v13, %v14999_v46 }
 0x895   : > { %v5761_v1 = vpop.permute.xlu1 %5760 }
 0x896   : > { %v5828_v35 = vadd.f32 %v5761_v1, %v5676_v45  ;;  %v9031_v1 = vld [vmem:[#allocation2 + $0x10] sm:$0xff] }
 0x897   : > { %v5763_v42 = vpop.permute.xlu0 %5762  ;;  %v5883_v30 = vunpack.c.h.bf16 %v9031_v1 }
 0x898   : > { %v5868_v15 = vadd.f32 %v12438_v38, %v5828_v35  ;;  %v5829_v31 = vadd.f32 %v5763_v42, %v5677_v23  ;;  %v5882_v23 = vunpack.c.l.bf16 %v9031_v1 }
 0x89a   : > { %v5869_v33 = vadd.f32 %v12438_v38, %v5829_v31  ;;  %5986 = vrot.lane.b32.xlu0 %v5868_v15, %s9354_s13 }
 0x89c   : > { %5988 = vrot.lane.b32.xlu1 %v5869_v33, %s9354_s13  ;;  %v9032_v33 = vld [vmem:[#allocation2 + $0x18] sm:$0xff] }
 0x8a2   : > { %v5617_v22 = vpop.permute.xlu1 %5616 }
 0x8a3   : > { %v5682_v60 = vadd.f32 %v5617_v22, %v15000_v12  ;;  %v5885_v22 = vunpack.c.h.bf16 %v9032_v33  ;;  %v9035_v12 = vld [vmem:[#allocation2 + $0x30] sm:$0xff] }
 0x8a4   : > { %v5619_v20 = vpop.permute.xlu0 %5618 }
 0x8a5   : > { %v5683_v39 = vadd.f32 %v5619_v20, %v15001_v8  ;;  %v5884_v20 = vunpack.c.l.bf16 %v9032_v33 }
 0x8a6   : > { %v5765_v40 = vpop.permute.xlu1 %5764 }
 0x8a7   : > { %v5830_v48 = vadd.f32 %v5765_v40, %v5678_v50 }
 0x8a8   : > { %v5767_v9 = vpop.permute.xlu0 %5766 }
 0x8a9   : > { %v5870_v24 = vadd.f32 %v12438_v38, %v5830_v48  ;;  %v5831_v16 = vadd.f32 %v5767_v9, %v5679_v14  ;;  %v9033_v48 = vld [vmem:[#allocation2 + $0x20] sm:$0xff] }
 0x8aa   : > { %v5887_v9 = vunpack.c.h.bf16 %v9033_v48 }
 0x8ab   : > { %v5871_v59 = vadd.f32 %v12438_v38, %v5831_v16  ;;  %5990 = vrot.lane.b32.xlu0 %v5870_v24, %s9354_s13  ;;  %v5886_v24 = vunpack.c.l.bf16 %v9033_v48 }
 0x8ad   : > { %5992 = vrot.lane.b32.xlu1 %v5871_v59, %s9354_s13 }
 0x8b3   : > { %v5621_v57 = vpop.permute.xlu1 %5620 }
 0x8b4   : > { %v5684_v29 = vadd.f32 %v5621_v57, %v12524_v17 }
 0x8b5   : > { %v5623_v62 = vpop.permute.xlu0 %5622 }
 0x8b6   : > { %v5685_v28 = vadd.f32 %v5623_v62, %v12528_v4  ;;  %v5836_v41 = vadd.f32 %v5684_v29, %v14983_v25  ;;  %v5890_v29 = vunpack.c.l.bf16 %v9035_v12 }
 0x8b7   : > { %v5769_v61 = vpop.permute.xlu1 %5768 }
 0x8b8   : > { %v5832_v51 = vadd.f32 %v5769_v61, %v5680_v6  ;;  %v5837_v34 = vadd.f32 %v5685_v28, %v14983_v25  ;;  %v5876_v2 = vadd.f32 %v12438_v38, %v5836_v41  ;;  %v9034_v6 = vld [vmem:[#allocation2 + $0x28] sm:$0xff] }
 0x8b9   : > { %v5771_v18 = vpop.permute.xlu0 %5770  ;;  %v5889_v61 = vunpack.c.h.bf16 %v9034_v6  ;;  %v5888_v46 = vunpack.c.l.bf16 %v9034_v6 }
 0x8ba   : > { %v5872_v27 = vadd.f32 %v12438_v38, %v5832_v51  ;;  %v5833_v55 = vadd.f32 %v5771_v18, %v5681_v3  ;;  %v5877_v21 = vadd.f32 %v12438_v38, %v5837_v34 }
 0x8bc   : > { %v5873_v56 = vadd.f32 %v12438_v38, %v5833_v55  ;;  %5994 = vrot.lane.b32.xlu0 %v5872_v27, %s9354_s13 }
 0x8bd   : > { %v5773_v49 = vpop.permute.xlu1 %5772 }
 0x8be   : > { %5996 = vrot.lane.b32.xlu1 %v5873_v56, %s9354_s13  ;;  %v5834_v52 = vadd.f32 %v5773_v49, %v5682_v60  ;;  %v5891_v60 = vunpack.c.h.bf16 %v9035_v12 }
 0x8bf   : > { %v5775_v26 = vpop.permute.xlu0 %5774 }
 0x8c0   : > { %v5874_v58 = vadd.f32 %v12438_v38, %v5834_v52  ;;  %v5835_v17 = vadd.f32 %v5775_v26, %v5683_v39  ;;  %v9036_v52 = vld [vmem:[#allocation2 + $0x38] sm:$0xff] }
 0x8c1   : > { %v5945_v47 = vpop.permute.xlu1 %5944  ;;  %v5893_v26 = vunpack.c.h.bf16 %v9036_v52  ;;  %v5892_v37 = vunpack.c.l.bf16 %v9036_v52  ;;  %v9044_v52 = vld [vmem:[#allocation2 + $0x78] sm:$0xff] }
 0x8c2   : > { %v5875_v11 = vadd.f32 %v12438_v38, %v5835_v17  ;;  %5998 = vrot.lane.b32.xlu0 %v5874_v58, %s9354_s13  ;;  %v6039_v0 = vadd.f32 %v5945_v47, %v5879_v43  ;;  %v9037_v47 = vld [vmem:[#allocation2 + $0x40] sm:$0xff] }
 0x8c3   : > { %v5943_v4 = vpop.permute.xlu0 %5942  ;;  %v5895_v34 = vunpack.c.h.bf16 %v9037_v47 }
 0x8c4   : > { %v6038_v53 = vadd.f32 %v5943_v4, %v5878_v19  ;;  %6000 = vrot.lane.b32.xlu1 %v5875_v11, %s9354_s13  ;;  %v5894_v11 = vunpack.c.l.bf16 %v9037_v47 }
 0x8c5   : > { %v5949_v44 = vpop.permute.xlu1 %5948 }
 0x8c6   : > { %v6070_v13 = vpack.c.bf16 %v6039_v0, %v6038_v53  ;;  %6002 = vrot.lane.b32.xlu0 %v5876_v2, %s9354_s13  ;;  %v6041_v32 = vadd.f32 %v5949_v44, %v5881_v7  ;;  %v9038_v53 = vld [vmem:[#allocation2 + $0x48] sm:$0xff] }
 0x8c7   : > { %v5947_v25 = vpop.permute.xlu0 %5946  ;;  %v5896_v44 = vunpack.c.l.bf16 %v9038_v53 }
 0x8c8   : > { %6086 = vst.msk [vmem:[#allocation2] sm:$0xff] %vm2816_vm6, %v6070_v13  ;;  %v6040_v45 = vadd.f32 %v5947_v25, %v5880_v5  ;;  %6004 = vrot.lane.b32.xlu1 %v5877_v21, %s9354_s13  ;;  %v5897_v5 = vunpack.c.h.bf16 %v9038_v53 }
 0x8c9   : > { %v5953_v35 = vpop.permute.xlu1 %5952 }
 0x8ca   : > { %v6071_v42 = vpack.c.bf16 %v6041_v32, %v6040_v45  ;;  %v6043_v31 = vadd.f32 %v5953_v35, %v5883_v30  ;;  %v9039_v30 = vld [vmem:[#allocation2 + $0x50] sm:$0xff] }
 0x8cb   : > { %v5951_v15 = vpop.permute.xlu0 %5950  ;;  %v5899_v35 = vunpack.c.h.bf16 %v9039_v30 }
 0x8cc   : > { %6087 = vst.msk [vmem:[#allocation2 + $0x8] sm:$0xff] %vm2816_vm6, %v6071_v42  ;;  %v6042_v38 = vadd.f32 %v5951_v15, %v5882_v23  ;;  %v5898_v23 = vunpack.c.l.bf16 %v9039_v30 }
 0x8cd   : > { %v5957_v10 = vpop.permute.xlu1 %5956 }
 0x8ce   : > { %v6072_v50 = vpack.c.bf16 %v6043_v31, %v6042_v38  ;;  %v6045_v36 = vadd.f32 %v5957_v10, %v5885_v22  ;;  %v9040_v22 = vld [vmem:[#allocation2 + $0x58] sm:$0xff] }
 0x8cf   : > { %v5955_v40 = vpop.permute.xlu0 %5954  ;;  %v5901_v10 = vunpack.c.h.bf16 %v9040_v22 }
 0x8d0   : > { %6088 = vst.msk [vmem:[#allocation2 + $0x10] sm:$0xff] %vm2816_vm6, %v6072_v50  ;;  %v6044_v14 = vadd.f32 %v5955_v40, %v5884_v20  ;;  %v5900_v20 = vunpack.c.l.bf16 %v9040_v22 }
 0x8d1   : > { %v5961_v16 = vpop.permute.xlu1 %5960 }
 0x8d2   : > { %v6073_v59 = vpack.c.bf16 %v6045_v36, %v6044_v14  ;;  %v6047_v62 = vadd.f32 %v5961_v16, %v5887_v9  ;;  %v9041_v9 = vld [vmem:[#allocation2 + $0x60] sm:$0xff] }
 0x8d3   : > { %v5959_v57 = vpop.permute.xlu0 %5958  ;;  %v5903_v16 = vunpack.c.h.bf16 %v9041_v9 }
 0x8d4   : > { %6089 = vst.msk [vmem:[#allocation2 + $0x18] sm:$0xff] %vm2816_vm6, %v6073_v59  ;;  %v6046_v54 = vadd.f32 %v5959_v57, %v5886_v24  ;;  %v5902_v24 = vunpack.c.l.bf16 %v9041_v9 }
 0x8d5   : > { %v5965_v3 = vpop.permute.xlu1 %5964 }
 0x8d6   : > { %v6074_v51 = vpack.c.bf16 %v6047_v62, %v6046_v54  ;;  %v6049_v27 = vadd.f32 %v5965_v3, %v5889_v61  ;;  %v9042_v61 = vld [vmem:[#allocation2 + $0x68] sm:$0xff] }
 0x8d7   : > { %v5963_v18 = vpop.permute.xlu0 %5962  ;;  %v5905_v3 = vunpack.c.h.bf16 %v9042_v61 }
 0x8d8   : > { %6090 = vst.msk [vmem:[#allocation2 + $0x20] sm:$0xff] %vm2816_vm6, %v6074_v51  ;;  %v6048_v55 = vadd.f32 %v5963_v18, %v5888_v46  ;;  %v5904_v46 = vunpack.c.l.bf16 %v9042_v61 }
 0x8d9   : > { %v5969_v56 = vpop.permute.xlu1 %5968 }
 0x8da   : > { %v6075_v49 = vpack.c.bf16 %v6049_v27, %v6048_v55  ;;  %v6051_v39 = vadd.f32 %v5969_v56, %v5891_v60  ;;  %v9043_v60 = vld [vmem:[#allocation2 + $0x70] sm:$0xff] }
 0x8db   : > { %v5967_v8 = vpop.permute.xlu0 %5966  ;;  %v5907_v56 = vunpack.c.h.bf16 %v9043_v60 }
 0x8dc   : > { %6091 = vst.msk [vmem:[#allocation2 + $0x28] sm:$0xff] %vm2816_vm6, %v6075_v49  ;;  %v6050_v28 = vadd.f32 %v5967_v8, %v5890_v29  ;;  %v5906_v29 = vunpack.c.l.bf16 %v9043_v60 }
 0x8dd   : > { %v5973_v43 = vpop.permute.xlu1 %5972 }
 0x8de   : > { %v6076_v41 = vpack.c.bf16 %v6051_v39, %v6050_v28  ;;  %v6053_v17 = vadd.f32 %v5973_v43, %v5893_v26  ;;  %v5908_v26 = vunpack.c.l.bf16 %v9044_v52 }
 0x8df   : > { %v5971_v58 = vpop.permute.xlu0 %5970 }
 0x8e0   : > { %6092 = vst.msk [vmem:[#allocation2 + $0x30] sm:$0xff] %vm2816_vm6, %v6076_v41  ;;  %v6052_v19 = vadd.f32 %v5971_v58, %v5892_v37  ;;  %v5909_v37 = vunpack.c.h.bf16 %v9044_v52 }
 0x8e1   : > { %v5977_v4 = vpop.permute.xlu1 %5976 }
 0x8e2   : > { %v6077_v63 = vpack.c.bf16 %v6053_v17, %v6052_v19  ;;  %v6055_v2 = vadd.f32 %v5977_v4, %v5895_v34 }
 0x8e3   : > { %v5975_v7 = vpop.permute.xlu0 %5974 }
 0x8e4   : > { %6093 = vst.msk [vmem:[#allocation2 + $0x38] sm:$0xff] %vm2816_vm6, %v6077_v63  ;;  %v6054_v0 = vadd.f32 %v5975_v7, %v5894_v11 }
 0x8e5   : > { %v5981_v21 = vpop.permute.xlu1 %5980 }
 0x8e6   : > { %v6078_v13 = vpack.c.bf16 %v6055_v2, %v6054_v0  ;;  %v6057_v32 = vadd.f32 %v5981_v21, %v5897_v5 }
 0x8e7   : > { %v5979_v25 = vpop.permute.xlu0 %5978 }
 0x8e8   : > { %6094 = vst.msk [vmem:[#allocation2 + $0x40] sm:$0xff] %vm2816_vm6, %v6078_v13  ;;  %v6056_v45 = vadd.f32 %v5979_v25, %v5896_v44 }
 0x8ea   : > { %v6079_v1 = vpack.c.bf16 %v6057_v32, %v6056_v45 }
 0x8ec   : > { %6095 = vst.msk [vmem:[#allocation2 + $0x48] sm:$0xff] %vm2816_vm6, %v6079_v1 }
 0x8fa   : > { %v5983_v42 = vpop.permute.xlu0 %5982 }
 0x8fb   : > { %v6058_v31 = vadd.f32 %v5983_v42, %v5898_v23 }
 0x8fc   : > { %v5985_v15 = vpop.permute.xlu1 %5984 }
 0x8fd   : > { %v6059_v38 = vadd.f32 %v5985_v15, %v5899_v35 }
 0x8ff   : > { %v6080_v33 = vpack.c.bf16 %v6059_v38, %v6058_v31 }
 0x901   : > { %6096 = vst.msk [vmem:[#allocation2 + $0x50] sm:$0xff] %vm2816_vm6, %v6080_v33 }
 0x90c   : > { %v5987_v50 = vpop.permute.xlu0 %5986 }
 0x90d   : > { %v6060_v36 = vadd.f32 %v5987_v50, %v5900_v20 }
 0x90e   : > { %v5989_v40 = vpop.permute.xlu1 %5988 }
 0x90f   : > { %v6061_v14 = vadd.f32 %v5989_v40, %v5901_v10 }
 0x911   : > { %v6081_v48 = vpack.c.bf16 %v6061_v14, %v6060_v36 }
 0x913   : > { %6097 = vst.msk [vmem:[#allocation2 + $0x58] sm:$0xff] %vm2816_vm6, %v6081_v48 }
 0x91d   : > { %v5991_v59 = vpop.permute.xlu0 %5990 }
 0x91e   : > { %v6062_v62 = vadd.f32 %v5991_v59, %v5902_v24 }
 0x91f   : > { %v5993_v57 = vpop.permute.xlu1 %5992 }
 0x920   : > { %v6063_v54 = vadd.f32 %v5993_v57, %v5903_v16 }
 0x922   : > { %v6082_v6 = vpack.c.bf16 %v6063_v54, %v6062_v62 }
 0x924   : > { %6098 = vst.msk [vmem:[#allocation2 + $0x60] sm:$0xff] %vm2816_vm6, %v6082_v6 }
 0x92e   : > { %v5995_v51 = vpop.permute.xlu0 %5994 }
 0x92f   : > { %v6064_v27 = vadd.f32 %v5995_v51, %v5904_v46 }
 0x930   : > { %v5997_v18 = vpop.permute.xlu1 %5996 }
 0x931   : > { %v6065_v55 = vadd.f32 %v5997_v18, %v5905_v3 }
 0x933   : > { %v6083_v12 = vpack.c.bf16 %v6065_v55, %v6064_v27 }
 0x934   : > { %v5999_v49 = vpop.permute.xlu0 %5998 }
 0x935   : > { %6099 = vst.msk [vmem:[#allocation2 + $0x68] sm:$0xff] %vm2816_vm6, %v6083_v12  ;;  %v6066_v39 = vadd.f32 %v5999_v49, %v5906_v29 }
 0x936   : > { %v6001_v8 = vpop.permute.xlu1 %6000 }
 0x937   : > { %v6067_v28 = vadd.f32 %v6001_v8, %v5907_v56 }
 0x938   : > { %v6003_v43 = vpop.permute.xlu0 %6002 }
 0x939   : > { %v6084_v41 = vpack.c.bf16 %v6067_v28, %v6066_v39  ;;  %v6068_v17 = vadd.f32 %v6003_v43, %v5908_v26  ;;  %6105 = sbr.rel (%p8707_p1) target bundleno = 2867 (0xb33), region = 76 }
 0x93a   : > { %v6005_v58 = vpop.permute.xlu1 %6004 }
 0x93b   : > { %6100 = vst.msk [vmem:[#allocation2 + $0x70] sm:$0xff] %vm2816_vm6, %v6084_v41  ;;  %v6069_v19 = vadd.f32 %v6005_v58, %v5909_v37 }
 0x93d   : > { %v6085_v47 = vpack.c.bf16 %v6069_v19, %v6068_v17 }
 0x93f   : > { %6101 = vst.msk [vmem:[#allocation2 + $0x78] sm:$0xff] %vm2816_vm6, %v6085_v47 }
 0x940   : > { %v6106_v34 = vld [vmem:[#allocation2] sm:$0xff]  ;;  %v6107_v11 = vld [vmem:[#allocation2 + $0x8] sm:$0xff]  ;;  %v12672_v0 = vld [vmem:[#allocation12 + $0x1] ss:$0 sm:$0xff]  ;;  %v9356_v5 = vmov 0.0   ;;  %vm6491_vm11 = vcmask 1046528  }
 0x941   : > { %v6122_v4 = vunpack.c.l.bf16 %v6106_v34  ;;  %v6123_v63 = vunpack.c.h.bf16 %v6106_v34  ;;  %v6124_v7 = vunpack.c.l.bf16 %v6107_v11  ;;  %v6125_v2 = vunpack.c.h.bf16 %v6107_v11  ;;  %v12674_v53 = vld [vmem:[#allocation12 + $0x2] ss:$0 sm:$0xff]  ;;  %v12682_v1 = vld [vmem:[#allocation12] ss:$0 sm:$0xff]  ;;  %v12692_v35 = vld [vmem:[#allocation12 + $0x5] ss:$0 sm:$0xff] }
 0x942   : > { %v12676_v44 = vrot.slane %v9356_v5, 7  ;;  %vm6737_vm12 = vcmask 1045504   ;;  %v12703_v38 = vld [vmem:[#allocation12 + $0x6] ss:$0 sm:$0xff]  ;;  %v12717_v40 = vld [vmem:[#allocation12 + $0x4] ss:$0 sm:$0xff] }
 0x943   : > { %v6189_v21 = vrot.slane %v6122_v4, 7  ;;  %v6190_v13 = vrot.slane %v6123_v63, 7  ;;  %v6192_v25 = vrot.slane %v6124_v7, 7  ;;  %v6193_v32 = vrot.slane %v6125_v2, 7  ;;  %v12719_v36 = vld [vmem:[#allocation12 + $0x9] ss:$0 sm:$0xff] }
 0x944   : > { %15003 = vst [vmem:[#allocation33_spill] sm:$0xff] %v12676_v44  ;;  %v12680_v45 = vsel %vm2682_vm8, 0.0, %v12676_v44  ;;  %v12686_v30 = vmul.f32 %v12672_v0, %v12676_v44  ;;  %v12690_v23 = vmul.f32 %v12674_v53, %v12676_v44  ;;  %v12707_v33 = vsel %vm2682_vm8, %v12676_v44, 0.0  ;;  %v12732_v54 = vld [vmem:[#allocation12 + $0x8] ss:$0 sm:$0xff] }
 0x945   : > { %15004 = vst [vmem:[#allocation34_spill] sm:$0xff] %v12680_v45  ;;  %v12695_v42 = vsel %vm2682_vm8, %v6189_v21, %v6190_v13  ;;  %v12698_v15 = vsel %vm2682_vm8, %v6192_v25, %v6193_v32  ;;  %v12701_v31 = vsel %vm2682_vm8, 0.0, %v6189_v21  ;;  %15005 = vst [vmem:[#allocation35_spill] sm:$0xff] %v12707_v33  ;;  %v12710_v22 = vsel %vm2682_vm8, 0.0, %v6192_v25  ;;  %v12738_v51 = vld [vmem:[#allocation12 + $0xa] ss:$0 sm:$0xff] }
 0x946   : > { %v6395_v20 = vmul.f32 %v12672_v0, %v12680_v45  ;;  %v6493_v10 = vrot.slane %v12686_v30, 1  ;;  %v6641_v50 = vmul.f32 %v12674_v53, %v12680_v45  ;;  %v6326_v14 = vmul.f32 %v12682_v1, %v12680_v45 }
 0x947   : > { %v6739_v48 = vrot.slane %v12690_v23, 2  ;;  %v6957_v9 = vmul.f32 %v12692_v35, %v12701_v31  ;;  %v6958_v24 = vmul.f32 %v12692_v35, %v12695_v42  ;;  %v7202_v57 = vmul.f32 %v12703_v38, %v12701_v31  ;;  %v6113_v23 = vld [vmem:[#allocation2 + $0x38] sm:$0xff] }
 0x948   : > { %v6492_v16 = vrot.slane %v6395_v20, 1  ;;  %v6738_v59 = vrot.slane %v6641_v50, 2  ;;  %v7203_v62 = vmul.f32 %v12703_v38, %v12695_v42  ;;  %v6888_v6 = vmul.f32 %v12717_v40, %v12701_v31 }
 0x949   : > { %v7053_v61 = vrot.slane %v6957_v9, 1  ;;  %v7054_v46 = vrot.slane %v6958_v24, 1  ;;  %v7517_v3 = vmul.f32 %v12719_v36, %v12710_v22  ;;  %v7298_v55 = vrot.slane %v7202_v57, 2  ;;  %v6114_v24 = vld [vmem:[#allocation2 + $0x40] sm:$0xff] }
 0x94a   : > { %v6494_v18 = vsel %vm6491_vm11, %v6492_v16, %v6493_v10  ;;  %v6740_v27 = vsel %vm6737_vm12, %v6738_v59, %v6739_v48  ;;  %v7299_v12 = vrot.slane %v7203_v62, 2  ;;  %v7448_v29 = vmul.f32 %v12732_v54, %v12710_v22 }
 0x94b   : > { %v6604_v60 = vadd.f32 %v6494_v18, %v6326_v14  ;;  %v7518_v56 = vmul.f32 %v12719_v36, %v12698_v15  ;;  %v7613_v49 = vrot.slane %v7517_v3, 1  ;;  %v7055_v8 = vsel %vm6491_vm11, %v7053_v61, %v7054_v46 }
 0x94c   : > { %v7762_v39 = vmul.f32 %v12738_v51, %v12710_v22  ;;  %v7763_v28 = vmul.f32 %v12738_v51, %v12698_v15  ;;  %v12752_v52 = vsel %vm2682_vm8, %v6190_v13, 0.0  ;;  %v7300_v37 = vsel %vm6737_vm12, %v7298_v55, %v7299_v12 }
 0x94d   : > { %v6850_v26 = vadd.f32 %v6740_v27, %v6604_v60  ;;  %v7614_v43 = vrot.slane %v7518_v56, 1  ;;  %v12756_v41 = vsel %vm2682_vm8, %v6193_v32, 0.0  ;;  %v6397_v19 = vmul.f32 %v12672_v0, %v12707_v33 }
 0x94e   : > { %15006 = vst [vmem:[#allocation36_spill] sm:$0xff] %v12756_v41  ;;  %v7858_v58 = vrot.slane %v7762_v39, 2  ;;  %v7859_v17 = vrot.slane %v7763_v28, 2  ;;  %v6643_v47 = vmul.f32 %v12674_v53, %v12707_v33  ;;  %v6327_v4 = vmul.f32 %v12682_v1, %v12676_v44 }
 0x94f   : > { %v6920_v34 = vadd.f32 %v6888_v6, %v6850_v26  ;;  %v7615_v11 = vsel %vm6491_vm11, %v7613_v49, %v7614_v43  ;;  %v6959_v63 = vmul.f32 %v12692_v35, %v12752_v52  ;;  %v6495_v7 = vrot.slane %v6397_v19, 1  ;;  %v6115_v6 = vld [vmem:[#allocation2 + $0x48] sm:$0xff] }
 0x950   : > { %v6741_v2 = vrot.slane %v6643_v47, 2  ;;  %v6889_v5 = vmul.f32 %v12717_v40, %v12695_v42  ;;  %v7204_v21 = vmul.f32 %v12703_v38, %v12752_v52  ;;  %v7860_v25 = vsel %vm6737_vm12, %v7858_v58, %v7859_v17 }
 0x951   : > { %v7165_v13 = vadd.f32 %v7055_v8, %v6920_v34  ;;  %v7056_v32 = vrot.slane %v6959_v63, 1  ;;  %v7519_v30 = vmul.f32 %v12719_v36, %v12756_v41  ;;  %v6496_v20 = vsel %vm6491_vm11, %v6493_v10, %v6495_v7 }
 0x952   : > { %v6742_v50 = vsel %vm6737_vm12, %v6739_v48, %v6741_v2  ;;  %v7301_v14 = vrot.slane %v7204_v21, 2  ;;  %v7764_v9 = vmul.f32 %v12738_v51, %v12756_v41  ;;  %v6605_v59 = vadd.f32 %v6496_v20, %v6327_v4 }
 0x953   : > { %v7410_v16 = vadd.f32 %v7300_v37, %v7165_v13  ;;  %v7449_v57 = vmul.f32 %v12732_v54, %v12698_v15  ;;  %v7616_v62 = vrot.slane %v7519_v30, 1  ;;  %v7057_v61 = vsel %vm6491_vm11, %v7054_v46, %v7056_v32 }
 0x954   : > { %v7302_v3 = vsel %vm6737_vm12, %v7299_v12, %v7301_v14  ;;  %v6136_v18 = vunpack.c.l.bf16 %v6113_v23  ;;  %v6137_v10 = vunpack.c.h.bf16 %v6113_v23  ;;  %v6851_v48 = vadd.f32 %v6742_v50, %v6605_v59 }
 0x955   : > { %v7480_v27 = vadd.f32 %v7448_v29, %v7410_v16  ;;  %v7861_v55 = vrot.slane %v7764_v9, 2  ;;  %v6138_v60 = vunpack.c.l.bf16 %v6114_v24  ;;  %v7617_v56 = vsel %vm6491_vm11, %v7614_v43, %v7616_v62 }
 0x956   : > { %v6139_v49 = vunpack.c.h.bf16 %v6114_v24  ;;  %v6140_v8 = vunpack.c.l.bf16 %v6115_v6  ;;  %v6141_v39 = vunpack.c.h.bf16 %v6115_v6  ;;  %v6921_v26 = vadd.f32 %v6889_v5, %v6851_v48 }
 0x957   : > { %v7725_v28 = vadd.f32 %v7615_v11, %v7480_v27  ;;  %v6210_v37 = vrot.slane %v6136_v18, 7  ;;  %v12783_v58 = vrot.slane %v6137_v10, 7  ;;  %v6213_v19 = vrot.slane %v6138_v60, 7 }
 0x958   : > { %v12785_v46 = vrot.slane %v6139_v49, 7  ;;  %v6216_v12 = vrot.slane %v6140_v8, 7  ;;  %v12787_v47 = vrot.slane %v6141_v39, 7  ;;  %v7166_v34 = vadd.f32 %v7057_v61, %v6921_v26 }
 0x959   : > { %v7970_v29 = vadd.f32 %v7860_v25, %v7725_v28  ;;  %v12791_v4 = vsel %vm2682_vm8, %v6210_v37, %v12783_v58  ;;  %v12794_v43 = vsel %vm2682_vm8, 0.0, %v6210_v37  ;;  %v7862_v11 = vsel %vm6737_vm12, %v7859_v17, %v7861_v55  ;;  %v6108_v55 = vld [vmem:[#allocation2 + $0x10] sm:$0xff] }
 0x95a   : > { %15007 = vst [vmem:[#allocation37_spill] sm:$0xff] %v12791_v4  ;;  %15008 = vst [vmem:[#allocation38_spill] sm:$0xff] %v12794_v43  ;;  %v12799_v63 = vsel %vm2682_vm8, %v6213_v19, %v12785_v46  ;;  %v12803_v7 = vsel %vm2682_vm8, %v6216_v12, %v12787_v47  ;;  %v12806_v2 = vsel %vm2682_vm8, 0.0, %v6213_v19  ;;  %v7411_v21 = vadd.f32 %v7302_v3, %v7166_v34 }
 0x95b   : > { %15009 = vst [vmem:[#allocation39_spill] sm:$0xff] %v12799_v63  ;;  %15010 = vst [vmem:[#allocation40_spill] sm:$0xff] %v12806_v2  ;;  %v8002_v5 = vsel %vm2816_vm6, %v7970_v29, 0.0  ;;  %v12810_v13 = vsel %vm2682_vm8, 0.0, %v6216_v12  ;;  %v6419_v17 = vmul.f32 %v12672_v0, %v12794_v43  ;;  %v6342_v25 = vmul.f32 %v12682_v1, %v12794_v43 }
 0x95c   : > { %8003 = vadd.xlane.f32.xlu0 %v8002_v5  ;;  %v12818_v32 = vmul.f32 %v12672_v0, %v12791_v4  ;;  %v6665_v30 = vmul.f32 %v12674_v53, %v12794_v43  ;;  %v12824_v23 = vmul.f32 %v12674_v53, %v12791_v4  ;;  %v7481_v20 = vadd.f32 %v7449_v57, %v7411_v21 }
 0x95d   : > { %v6532_v50 = vrot.slane %v6419_v17, 1  ;;  %v6981_v14 = vmul.f32 %v12692_v35, %v12806_v2  ;;  %v12830_v9 = vmul.f32 %v12692_v35, %v12799_v63  ;;  %v7226_v62 = vmul.f32 %v12703_v38, %v12806_v2 }
 0x95e   : > { %v14806_v24 = vrot.slane %v12818_v32, 1  ;;  %v6778_v16 = vrot.slane %v6665_v30, 2  ;;  %v14805_v59 = vrot.slane %v12824_v23, 2  ;;  %v7726_v6 = vadd.f32 %v7617_v56, %v7481_v20 }
 0x95f   : > { %v7093_v61 = vrot.slane %v6981_v14, 1  ;;  %v14804_v57 = vrot.slane %v12830_v9, 1  ;;  %v12839_v3 = vmul.f32 %v12703_v38, %v12799_v63  ;;  %v6904_v27 = vmul.f32 %v12717_v40, %v12806_v2 }
 0x960   : > { %v6534_v18 = vsel %vm6491_vm11, %v6532_v50, %v14806_v24  ;;  %v6780_v10 = vsel %vm6737_vm12, %v6778_v16, %v14805_v59  ;;  %v7338_v48 = vrot.slane %v7226_v62, 2  ;;  %v7971_v60 = vadd.f32 %v7862_v11, %v7726_v6 }
 0x961   : > { %v6620_v56 = vadd.f32 %v6534_v18, %v6342_v25  ;;  %v14802_v49 = vrot.slane %v12839_v3, 2  ;;  %v7464_v8 = vmul.f32 %v12732_v54, %v12810_v13  ;;  %v7541_v39 = vmul.f32 %v12719_v36, %v12810_v13 }
 0x962   : > { %v12856_v28 = vmul.f32 %v12719_v36, %v12803_v7  ;;  %v7786_v26 = vmul.f32 %v12738_v51, %v12810_v13  ;;  %v12862_v37 = vmul.f32 %v12738_v51, %v12803_v7  ;;  %v8005_v19 = vsel %vm2816_vm6, %v7971_v60, 0.0 }
 0x963   : > { %v6866_v12 = vadd.f32 %v6780_v10, %v6620_v56  ;;  %v7095_v29 = vsel %vm6491_vm11, %v7093_v61, %v14804_v57  ;;  %v6126_v34 = vunpack.c.l.bf16 %v6108_v55  ;;  %8006 = vadd.xlane.f32.xlu0 %v8005_v19  ;;  %v7340_v11 = vsel %vm6737_vm12, %v7338_v48, %v14802_v49 }
 0x964   : > { %v7653_v5 = vrot.slane %v7541_v39, 1  ;;  %v14801_v21 = vrot.slane %v12856_v28, 1  ;;  %v7898_v17 = vrot.slane %v7786_v26, 2  ;;  %v14803_v30 = vrot.slane %v12862_v37, 2 }
 0x965   : > { %v6936_v25 = vadd.f32 %v6904_v27, %v6866_v12  ;;  %v6127_v20 = vunpack.c.h.bf16 %v6108_v55  ;;  %v6195_v50 = vrot.slane %v6126_v34, 7  ;;  %v6328_v16 = vmul.f32 %v12682_v1, %v12701_v31 }
 0x966   : > { %v7655_v14 = vsel %vm6491_vm11, %v7653_v5, %v14801_v21  ;;  %v6398_v62 = vmul.f32 %v12672_v0, %v12701_v31  ;;  %v12882_v6 = vmul.f32 %v12672_v0, %v12695_v42  ;;  %v6644_v27 = vmul.f32 %v12674_v53, %v12701_v31 }
 0x967   : > { %v7181_v61 = vadd.f32 %v7095_v29, %v6936_v25  ;;  %v12884_v18 = vrot.slane %v6127_v20, 7  ;;  %v12887_v10 = vsel %vm2682_vm8, 0.0, %v6195_v50  ;;  %v12894_v60 = vmul.f32 %v12674_v53, %v12695_v42 }
 0x968   : > { %v6497_v48 = vrot.slane %v6398_v62, 1  ;;  %v14812_v55 = vrot.slane %v12882_v6, 1  ;;  %v6890_v56 = vmul.f32 %v12717_v40, %v12710_v22  ;;  %v6743_v19 = vrot.slane %v6644_v27, 2 }
 0x969   : > { %v7426_v39 = vadd.f32 %v7340_v11, %v7181_v61  ;;  %v12900_v26 = vsel %vm2682_vm8, %v6195_v50, %v12884_v18  ;;  %v6960_v12 = vmul.f32 %v12692_v35, %v12710_v22  ;;  %v14808_v29 = vrot.slane %v12894_v60, 2 }
 0x96a   : > { %v6499_v31 = vsel %vm6491_vm11, %v6497_v48, %v14812_v55  ;;  %v12910_v34 = vmul.f32 %v12692_v35, %v12698_v15  ;;  %v7205_v11 = vmul.f32 %v12703_v38, %v12710_v22  ;;  %v12916_v50 = vmul.f32 %v12703_v38, %v12698_v15 }
 0x96b   : > { %v7496_v5 = vadd.f32 %v7464_v8, %v7426_v39  ;;  %v6606_v25 = vadd.f32 %v6499_v31, %v6328_v16  ;;  %v7058_v20 = vrot.slane %v6960_v12, 1  ;;  %v7900_v62 = vsel %vm6737_vm12, %v7898_v17, %v14803_v30  ;;  %v6116_v39 = vld [vmem:[#allocation2 + $0x50] sm:$0xff] }
 0x96c   : > { %v6745_v61 = vsel %vm6737_vm12, %v6743_v19, %v14808_v29  ;;  %v14807_v27 = vrot.slane %v12910_v34, 1  ;;  %v7303_v48 = vrot.slane %v7205_v11, 2  ;;  %v14811_v8 = vrot.slane %v12916_v50, 2 }
 0x96d   : > { %v7741_v21 = vadd.f32 %v7655_v14, %v7496_v5  ;;  %v6852_v49 = vadd.f32 %v6745_v61, %v6606_v25  ;;  %v7520_v16 = vmul.f32 %v12719_v36, %v12887_v10  ;;  %v12933_v17 = vmul.f32 %v12719_v36, %v12900_v26 }
 0x96e   : > { %v7060_v12 = vsel %vm6491_vm11, %v7058_v20, %v14807_v27  ;;  %v7765_v19 = vmul.f32 %v12738_v51, %v12887_v10  ;;  %v12939_v14 = vmul.f32 %v12738_v51, %v12900_v26  ;;  %v7305_v5 = vsel %vm6737_vm12, %v7303_v48, %v14811_v8 }
 0x96f   : > { %v7986_v31 = vadd.f32 %v7900_v62, %v7741_v21  ;;  %v6922_v11 = vadd.f32 %v6890_v56, %v6852_v49  ;;  %v7618_v25 = vrot.slane %v7520_v16, 1  ;;  %v14810_v20 = vrot.slane %v12933_v17, 1 }
 0x970   : > { %v7863_v61 = vrot.slane %v7765_v19, 2  ;;  %v14809_v30 = vrot.slane %v12939_v14, 2  ;;  %v6142_v57 = vunpack.c.l.bf16 %v6116_v39  ;;  %v7450_v27 = vmul.f32 %v12732_v54, %v12887_v10 }
 0x971   : > { %v8050_v59 = vsel %vm2816_vm6, %v7986_v31, 0.0  ;;  %v7167_v24 = vadd.f32 %v7060_v12, %v6922_v11  ;;  %v6143_v29 = vunpack.c.h.bf16 %v6116_v39  ;;  %v7620_v49 = vsel %vm6491_vm11, %v7618_v25, %v14810_v20 }
 0x972   : > { %8051 = vadd.xlane.f32.xlu0 %v8050_v59  ;;  %v6219_v21 = vrot.slane %v6142_v57, 7  ;;  %v6344_v56 = vmul.f32 %v12682_v1, %v12806_v2  ;;  %v6422_v62 = vmul.f32 %v12672_v0, %v12806_v2  ;;  %v12960_v12 = vmul.f32 %v12672_v0, %v12799_v63 }
 0x973   : > { %v7412_v48 = vadd.f32 %v7305_v5, %v7167_v24  ;;  %v12956_v16 = vrot.slane %v6143_v29, 7  ;;  %v6668_v59 = vmul.f32 %v12674_v53, %v12806_v2  ;;  %v7865_v57 = vsel %vm6737_vm12, %v7863_v61, %v14809_v30 }
 0x974   : > { %v12968_v39 = vsel %vm2682_vm8, 0.0, %v6219_v21  ;;  %v6537_v19 = vrot.slane %v6422_v62, 1  ;;  %v12972_v24 = vmul.f32 %v12674_v53, %v12799_v63  ;;  %v14819_v31 = vrot.slane %v12960_v12, 1 }
 0x975   : > { %v7482_v29 = vadd.f32 %v7450_v27, %v7412_v48  ;;  %v6783_v11 = vrot.slane %v6668_v59, 2  ;;  %v6906_v5 = vmul.f32 %v12717_v40, %v12810_v13  ;;  %v6984_v61 = vmul.f32 %v12692_v35, %v12810_v13 }
 0x976   : > { %v14820_v25 = vrot.slane %v12972_v24, 2  ;;  %v12982_v30 = vmul.f32 %v12692_v35, %v12803_v7  ;;  %v7229_v62 = vmul.f32 %v12703_v38, %v12810_v13  ;;  %v12988_v27 = vsel %vm2682_vm8, %v6219_v21, %v12956_v16 }
 0x977   : > { %v7727_v20 = vadd.f32 %v7620_v49, %v7482_v29  ;;  %v6539_v48 = vsel %vm6491_vm11, %v6537_v19, %v14819_v31  ;;  %v12995_v59 = vmul.f32 %v12703_v38, %v12803_v7  ;;  %v7098_v33 = vrot.slane %v6984_v61, 1 }
 0x978   : > { %v6622_v8 = vadd.f32 %v6539_v48, %v6344_v56  ;;  %v6785_v55 = vsel %vm6737_vm12, %v6783_v11, %v14820_v25  ;;  %v14824_v49 = vrot.slane %v12982_v30, 1  ;;  %v7343_v44 = vrot.slane %v7229_v62, 2 }
 0x979   : > { %v7972_v29 = vadd.f32 %v7865_v57, %v7727_v20  ;;  %v14823_v21 = vrot.slane %v12995_v59, 2  ;;  %v7544_v45 = vmul.f32 %v12719_v36, %v12968_v39  ;;  %v7466_v31 = vmul.f32 %v12732_v54, %v12968_v39 }
 0x97a   : > { %v6868_v19 = vadd.f32 %v6785_v55, %v6622_v8  ;;  %v13008_v56 = vmul.f32 %v12719_v36, %v12988_v27  ;;  %v7789_v11 = vmul.f32 %v12738_v51, %v12968_v39  ;;  %v7100_v20 = vsel %vm6491_vm11, %v7098_v33, %v14824_v49 }
 0x97b   : > { %v8008_v61 = vsel %vm2816_vm6, %v7972_v29, 0.0  ;;  %v7658_v57 = vrot.slane %v7544_v45, 1  ;;  %v13018_v55 = vmul.f32 %v12738_v51, %v12988_v27  ;;  %v7345_v62 = vsel %vm6737_vm12, %v7343_v44, %v14823_v21 }
 0x97c   : > { %15011 = vst [vmem:[#allocation41_spill] sm:$0xff] %v13008_v56  ;;  %8009 = vadd.xlane.f32.xlu1 %v8008_v61  ;;  %v6938_v8 = vadd.f32 %v6906_v5, %v6868_v19  ;;  %v14825_v48 = vrot.slane %v13008_v56, 1  ;;  %v7903_v25 = vrot.slane %v7789_v11, 2  ;;  %v13027_v2 = vsel %vm2682_vm8, %v12884_v18, 0.0 }
 0x97d   : > { %v14831_v29 = vrot.slane %v13018_v55, 2  ;;  %15012 = vst [vmem:[#allocation42_spill] sm:$0xff] %v13027_v2  ;;  %v6400_v45 = vmul.f32 %v12672_v0, %v12752_v52  ;;  %v6646_v33 = vmul.f32 %v12674_v53, %v12752_v52  ;;  %v6329_v19 = vmul.f32 %v12682_v1, %v12695_v42 }
 0x97e   : > { %v7183_v5 = vadd.f32 %v7100_v20, %v6938_v8  ;;  %v7660_v44 = vsel %vm6491_vm11, %v7658_v57, %v14825_v48  ;;  %v6962_v11 = vmul.f32 %v12692_v35, %v12756_v41  ;;  %v6891_v21 = vmul.f32 %v12717_v40, %v12698_v15  ;;  %v6109_v8 = vld [vmem:[#allocation2 + $0x18] sm:$0xff] }
 0x97f   : > { %v6500_v61 = vrot.slane %v6400_v45, 1  ;;  %v6746_v18 = vrot.slane %v6646_v33, 2  ;;  %v7207_v49 = vmul.f32 %v12703_v38, %v12756_v41  ;;  %v7905_v20 = vsel %vm6737_vm12, %v7903_v25, %v14831_v29 }
 0x980   : > { %v7428_v52 = vadd.f32 %v7345_v62, %v7183_v5  ;;  %v7061_v57 = vrot.slane %v6962_v11, 1  ;;  %v7522_v42 = vmul.f32 %v12719_v36, %v13027_v2  ;;  %v15013_v48 = vrot.slane %v12882_v6, 1 }
 0x981   : > { %v15014_v33 = vrot.slane %v12894_v60, 2  ;;  %v7306_v56 = vrot.slane %v7207_v49, 2  ;;  %v7767_v62 = vmul.f32 %v12738_v51, %v13027_v2  ;;  %v7451_v25 = vmul.f32 %v12732_v54, %v12900_v26 }
 0x982   : > { %v6501_v45 = vsel %vm6491_vm11, %v15013_v48, %v6500_v61  ;;  %v7498_v5 = vadd.f32 %v7466_v31, %v7428_v52  ;;  %v7621_v11 = vrot.slane %v7522_v42, 1  ;;  %v15015_v29 = vrot.slane %v12910_v34, 1 }
 0x983   : > { %v6747_v43 = vsel %vm6737_vm12, %v15014_v33, %v6746_v18  ;;  %v6607_v41 = vadd.f32 %v6501_v45, %v6329_v19  ;;  %v15016_v48 = vrot.slane %v12916_v50, 2  ;;  %v6128_v61 = vunpack.c.l.bf16 %v6109_v8 }
 0x984   : > { %v7062_v6 = vsel %vm6491_vm11, %v15015_v29, %v7061_v57  ;;  %v6129_v18 = vunpack.c.h.bf16 %v6109_v8  ;;  %v7743_v49 = vadd.f32 %v7660_v44, %v7498_v5  ;;  %v15017_v2 = vrot.slane %v12933_v17, 1 }
 0x985   : > { %v7307_v60 = vsel %vm6737_vm12, %v15016_v48, %v7306_v56  ;;  %v6853_v33 = vadd.f32 %v6747_v43, %v6607_v41  ;;  %v7866_v19 = vrot.slane %v7767_v62, 2  ;;  %v6198_v52 = vrot.slane %v6128_v61, 7 }
 0x986   : > { %v7622_v31 = vsel %vm6491_vm11, %v15017_v2, %v7621_v11  ;;  %v13068_v45 = vrot.slane %v6129_v18, 7  ;;  %v6330_v34 = vmul.f32 %v12682_v1, %v12710_v22  ;;  %v6401_v50 = vmul.f32 %v12672_v0, %v12710_v22 }
 0x987   : > { %v7988_v29 = vadd.f32 %v7905_v20, %v7743_v49  ;;  %v6923_v56 = vadd.f32 %v6891_v21, %v6853_v33  ;;  %v13076_v44 = vmul.f32 %v12672_v0, %v12698_v15  ;;  %v6647_v41 = vmul.f32 %v12674_v53, %v12710_v22 }
 0x988   : > { %v13082_v43 = vsel %vm2682_vm8, %v6198_v52, %v13068_v45  ;;  %v13085_v2 = vsel %vm2682_vm8, 0.0, %v6198_v52  ;;  %v6502_v17 = vrot.slane %v6401_v50, 1  ;;  %v13089_v57 = vmul.f32 %v12674_v53, %v12698_v15 }
 0x989   : > { %v8056_v21 = vsel %vm2816_vm6, %v7988_v29, 0.0  ;;  %v7168_v20 = vadd.f32 %v7062_v6, %v6923_v56  ;;  %v14839_v42 = vrot.slane %v13076_v44, 1  ;;  %v6748_v8 = vrot.slane %v6647_v41, 2 }
 0x98a   : > { %8057 = vadd.xlane.f32.xlu0 %v8056_v21  ;;  %v14838_v22 = vrot.slane %v13089_v57, 2  ;;  %v6892_v62 = vmul.f32 %v12717_v40, %v12887_v10  ;;  %v6963_v5 = vmul.f32 %v12692_v35, %v12887_v10  ;;  %v13100_v11 = vmul.f32 %v12692_v35, %v12900_v26 }
 0x98b   : > { %v7413_v48 = vadd.f32 %v7307_v60, %v7168_v20  ;;  %v6504_v6 = vsel %vm6491_vm11, %v6502_v17, %v14839_v42  ;;  %v7208_v61 = vmul.f32 %v12703_v38, %v12887_v10  ;;  %v13109_v18 = vmul.f32 %v12703_v38, %v12900_v26 }
 0x98c   : > { %v6608_v49 = vadd.f32 %v6504_v6, %v6330_v34  ;;  %v6750_v33 = vsel %vm6737_vm12, %v6748_v8, %v14838_v22  ;;  %v7063_v52 = vrot.slane %v6963_v5, 1  ;;  %v14837_v50 = vrot.slane %v13100_v11, 1 }
 0x98d   : > { %v7483_v60 = vadd.f32 %v7451_v25, %v7413_v48  ;;  %v15018_v29 = vrot.slane %v12939_v14, 2  ;;  %v7308_v41 = vrot.slane %v7208_v61, 2  ;;  %v14835_v17 = vrot.slane %v13109_v18, 2 }
 0x98e   : > { %v6854_v21 = vadd.f32 %v6750_v33, %v6608_v49  ;;  %v7452_v20 = vmul.f32 %v12732_v54, %v13085_v2  ;;  %v7523_v34 = vmul.f32 %v12719_v36, %v13085_v2  ;;  %v13125_v8 = vmul.f32 %v12719_v36, %v13082_v43 }
 0x98f   : > { %v7867_v56 = vsel %vm6737_vm12, %v15018_v29, %v7866_v19  ;;  %v7728_v5 = vadd.f32 %v7622_v31, %v7483_v60  ;;  %v7065_v14 = vsel %vm6491_vm11, %v7063_v52, %v14837_v50  ;;  %v7768_v25 = vmul.f32 %v12738_v51, %v13085_v2 }
 0x990   : > { %v13134_v19 = vmul.f32 %v12738_v51, %v13082_v43  ;;  %v6924_v48 = vadd.f32 %v6892_v62, %v6854_v21  ;;  %v7623_v6 = vrot.slane %v7523_v34, 1  ;;  %v14834_v61 = vrot.slane %v13125_v8, 1 }
 0x991   : > { %v13139_v49 = vsel %vm2682_vm8, %v12783_v58, 0.0  ;;  %v7973_v31 = vadd.f32 %v7867_v56, %v7728_v5  ;;  %v7310_v33 = vsel %vm6737_vm12, %v7308_v41, %v14835_v17  ;;  %v7868_v52 = vrot.slane %v7768_v25, 2 }
 0x992   : > { %15019 = vst [vmem:[#allocation43_spill] sm:$0xff] %v13134_v19  ;;  %15020 = vst [vmem:[#allocation44_spill] sm:$0xff] %v13139_v49  ;;  %v14836_v60 = vrot.slane %v13134_v19, 2  ;;  %v7169_v29 = vadd.f32 %v7065_v14, %v6924_v48  ;;  %v7625_v62 = vsel %vm6491_vm11, %v7623_v6, %v14834_v61  ;;  %v13150_v21 = vsel %vm2682_vm8, %v12785_v46, 0.0  ;;  %v6117_v48 = vld [vmem:[#allocation2 + $0x58] sm:$0xff] }
 0x993   : > { %15021 = vst [vmem:[#allocation45_spill] sm:$0xff] %v13150_v21  ;;  %v13154_v58 = vsel %vm2682_vm8, %v12787_v47, 0.0  ;;  %v8011_v56 = vsel %vm2816_vm6, %v7973_v31, 0.0  ;;  %v6343_v41 = vmul.f32 %v12682_v1, %v12791_v4  ;;  %v6421_v34 = vmul.f32 %v12672_v0, %v13139_v49 }
 0x994   : > { %v6667_v5 = vmul.f32 %v12674_v53, %v13139_v49  ;;  %8012 = vadd.xlane.f32.xlu1 %v8011_v56  ;;  %v7414_v14 = vadd.f32 %v7310_v33, %v7169_v29  ;;  %v7870_v46 = vsel %vm6737_vm12, %v7868_v52, %v14836_v60  ;;  %v6983_v47 = vmul.f32 %v12692_v35, %v13150_v21 }
 0x995   : > { %v7228_v25 = vmul.f32 %v12703_v38, %v13150_v21  ;;  %v6535_v6 = vrot.slane %v6421_v34, 1  ;;  %v6905_v61 = vmul.f32 %v12717_v40, %v12799_v63  ;;  %v7543_v56 = vmul.f32 %v12719_v36, %v13154_v58 }
 0x996   : > { %v6781_v31 = vrot.slane %v6667_v5, 2  ;;  %v7484_v33 = vadd.f32 %v7452_v20, %v7414_v14  ;;  %v7096_v29 = vrot.slane %v6983_v47, 1  ;;  %v7788_v52 = vmul.f32 %v12738_v51, %v13154_v58 }
 0x997   : > { %v7341_v17 = vrot.slane %v7228_v25, 2  ;;  %v15022_v60 = vrot.slane %v12818_v32, 1  ;;  %v15023_v22 = vrot.slane %v12824_v23, 2  ;;  %v7656_v5 = vrot.slane %v7543_v56, 1 }
 0x998   : > { %v6144_v42 = vunpack.c.l.bf16 %v6117_v48  ;;  %v7729_v49 = vadd.f32 %v7625_v62, %v7484_v33  ;;  %v15024_v19 = vrot.slane %v12830_v9, 1  ;;  %v7465_v14 = vmul.f32 %v12732_v54, %v12803_v7 }
 0x999   : > { %v6536_v50 = vsel %vm6491_vm11, %v15022_v60, %v6535_v6  ;;  %v6782_v34 = vsel %vm6737_vm12, %v15023_v22, %v6781_v31  ;;  %v15025_v47 = vrot.slane %v12839_v3, 2  ;;  %v15026_v60 = vrot.slane %v12856_v28, 1 }
 0x99a   : > { %v6621_v4 = vadd.f32 %v6536_v50, %v6343_v41  ;;  %v7097_v20 = vsel %vm6491_vm11, %v15024_v19, %v7096_v29  ;;  %v6145_v22 = vunpack.c.h.bf16 %v6117_v48  ;;  %v6222_v25 = vrot.slane %v6144_v42, 7 }
 0x99b   : > { %v7342_v32 = vsel %vm6737_vm12, %v15025_v47, %v7341_v17  ;;  %v7657_v23 = vsel %vm6491_vm11, %v15026_v60, %v7656_v5  ;;  %v7974_v6 = vadd.f32 %v7870_v46, %v7729_v49  ;;  %v7901_v50 = vrot.slane %v7788_v52, 2 }
 0x99c   : > { %v6867_v62 = vadd.f32 %v6782_v34, %v6621_v4  ;;  %v6425_v9 = vmul.f32 %v12672_v0, %v12810_v13  ;;  %v13195_v19 = vrot.slane %v6145_v22, 7  ;;  %v13198_v41 = vsel %vm2682_vm8, 0.0, %v6222_v25 }
 0x99d   : > { %v6346_v3 = vmul.f32 %v12682_v1, %v12810_v13  ;;  %v13204_v28 = vmul.f32 %v12672_v0, %v12803_v7  ;;  %v8014_v42 = vsel %vm2816_vm6, %v7974_v6, 0.0  ;;  %v6671_v49 = vmul.f32 %v12674_v53, %v12810_v13 }
 0x99e   : > { %v6937_v17 = vadd.f32 %v6905_v61, %v6867_v62  ;;  %v6542_v4 = vrot.slane %v6425_v9, 1  ;;  %8015 = vadd.xlane.f32.xlu0 %v8014_v42  ;;  %v13211_v46 = vsel %vm2682_vm8, %v6222_v25, %v13195_v19  ;;  %v13216_v31 = vmul.f32 %v12674_v53, %v12803_v7 }
 0x99f   : > { %v14850_v48 = vrot.slane %v13204_v28, 1  ;;  %v6908_v56 = vmul.f32 %v12717_v40, %v12968_v39  ;;  %v6788_v61 = vrot.slane %v6671_v49, 2  ;;  %v6987_v29 = vmul.f32 %v12692_v35, %v12968_v39 }
 0x9a0   : > { %v7182_v33 = vadd.f32 %v7097_v20, %v6937_v17  ;;  %v13224_v13 = vmul.f32 %v12692_v35, %v12988_v27  ;;  %v14849_v34 = vrot.slane %v13216_v31, 2  ;;  %v7232_v5 = vmul.f32 %v12703_v38, %v12968_v39 }
 0x9a1   : > { %v6544_v52 = vsel %vm6491_vm11, %v6542_v4, %v14850_v48  ;;  %v13234_v20 = vmul.f32 %v12703_v38, %v12988_v27  ;;  %v7103_v22 = vrot.slane %v6987_v29, 1  ;;  %v15027_v6 = vrot.slane %v12862_v37, 2 }
 0x9a2   : > { %v7427_v47 = vadd.f32 %v7342_v32, %v7182_v33  ;;  %v6624_v60 = vadd.f32 %v6544_v52, %v6346_v3  ;;  %v14845_v25 = vrot.slane %v13224_v13, 1  ;;  %v6790_v9 = vsel %vm6737_vm12, %v6788_v61, %v14849_v34 }
 0x9a3   : > { %v7902_v62 = vsel %vm6737_vm12, %v15027_v6, %v7901_v50  ;;  %v7348_v42 = vrot.slane %v7232_v5, 2  ;;  %v14848_v17 = vrot.slane %v13234_v20, 2  ;;  %v7468_v32 = vmul.f32 %v12732_v54, %v13198_v41 }
 0x9a4   : > { %v7497_v4 = vadd.f32 %v7465_v14, %v7427_v47  ;;  %v6870_v49 = vadd.f32 %v6790_v9, %v6624_v60  ;;  %v7547_v3 = vmul.f32 %v12719_v36, %v13198_v41  ;;  %v7105_v37 = vsel %vm6491_vm11, %v7103_v22, %v14845_v25 }
 0x9a5   : > { %v13253_v50 = vmul.f32 %v12719_v36, %v13211_v46  ;;  %v7792_v33 = vmul.f32 %v12738_v51, %v13198_v41  ;;  %v13259_v14 = vmul.f32 %v12738_v51, %v13211_v46  ;;  %v7350_v52 = vsel %vm6737_vm12, %v7348_v42, %v14848_v17 }
 0x9a6   : > { %v7742_v61 = vadd.f32 %v7657_v23, %v7497_v4  ;;  %v6940_v29 = vadd.f32 %v6908_v56, %v6870_v49  ;;  %v7663_v5 = vrot.slane %v7547_v3, 1  ;;  %v13268_v6 = vsel %vm2682_vm8, %v12956_v16, 0.0 }
 0x9a7   : > { %v14847_v47 = vrot.slane %v13253_v50, 1  ;;  %v7908_v60 = vrot.slane %v7792_v33, 2  ;;  %v14846_v22 = vrot.slane %v13259_v14, 2  ;;  %v6424_v23 = vmul.f32 %v12672_v0, %v13150_v21 }
 0x9a8   : > { %v7987_v9 = vadd.f32 %v7902_v62, %v7742_v61  ;;  %v7185_v25 = vadd.f32 %v7105_v37, %v6940_v29  ;;  %v6670_v56 = vmul.f32 %v12674_v53, %v13150_v21  ;;  %v6345_v16 = vmul.f32 %v12682_v1, %v12799_v63 }
 0x9a9   : > { %v7665_v42 = vsel %vm6491_vm11, %v7663_v5, %v14847_v47  ;;  %v7910_v4 = vsel %vm6737_vm12, %v7908_v60, %v14846_v22  ;;  %v6986_v62 = vmul.f32 %v12692_v35, %v13154_v58  ;;  %v6540_v37 = vrot.slane %v6424_v23, 1  ;;  %v6110_v22 = vld [vmem:[#allocation2 + $0x20] sm:$0xff] }
 0x9aa   : > { %v8053_v49 = vsel %vm2816_vm6, %v7987_v9, 0.0  ;;  %v7430_v3 = vadd.f32 %v7350_v52, %v7185_v25  ;;  %v6786_v33 = vrot.slane %v6670_v56, 2  ;;  %v6907_v61 = vmul.f32 %v12717_v40, %v12803_v7 }
 0x9ab   : > { %8054 = vadd.xlane.f32.xlu1 %v8053_v49  ;;  %v7101_v29 = vrot.slane %v6986_v62, 1  ;;  %v7231_v5 = vmul.f32 %v12703_v38, %v13154_v58  ;;  %v7546_v60 = vmul.f32 %v12719_v36, %v13268_v6  ;;  %v15028_v17 = vrot.slane %v12960_v12, 1 }
 0x9ac   : > { %v7500_v47 = vadd.f32 %v7468_v32, %v7430_v3  ;;  %v15029_v25 = vrot.slane %v12972_v24, 2  ;;  %v7791_v23 = vmul.f32 %v12738_v51, %v13268_v6  ;;  %v7467_v49 = vmul.f32 %v12732_v54, %v12988_v27 }
 0x9ad   : > { %v6541_v9 = vsel %vm6491_vm11, %v15028_v17, %v6540_v37  ;;  %v7346_v62 = vrot.slane %v7231_v5, 2  ;;  %v7661_v34 = vrot.slane %v7546_v60, 1  ;;  %v15030_v32 = vrot.slane %v12982_v30, 1 }
 0x9ae   : > { %v6787_v52 = vsel %vm6737_vm12, %v15029_v25, %v6786_v33  ;;  %v6623_v56 = vadd.f32 %v6541_v9, %v6345_v16  ;;  %v7745_v48 = vadd.f32 %v7665_v42, %v7500_v47  ;;  %v6130_v3 = vunpack.c.l.bf16 %v6110_v22  ;;  %v15032_v25 = vld [vmem:[#allocation41_spill] sm:$0xff] }
 0x9af   : > { %v7102_v12 = vsel %vm6491_vm11, %v15030_v32, %v7101_v29  ;;  %v6131_v17 = vunpack.c.h.bf16 %v6110_v22  ;;  %v15031_v24 = vrot.slane %v12995_v59, 2  ;;  %v15033_v21 = vrot.slane %v15032_v25, 1 }
 0x9b0   : > { %v6869_v37 = vadd.f32 %v6787_v52, %v6623_v56  ;;  %v7906_v5 = vrot.slane %v7791_v23, 2  ;;  %v7990_v9 = vadd.f32 %v7910_v4, %v7745_v48  ;;  %v6201_v63 = vrot.slane %v6130_v3, 7 }
 0x9b1   : > { %v7347_v33 = vsel %vm6737_vm12, %v15031_v24, %v7346_v62  ;;  %v7662_v16 = vsel %vm6491_vm11, %v15033_v21, %v7661_v34  ;;  %v13310_v60 = vrot.slane %v6131_v17, 7  ;;  %v6332_v30 = vmul.f32 %v12682_v1, %v12887_v10 }
 0x9b2   : > { %v6939_v47 = vadd.f32 %v6907_v61, %v6869_v37  ;;  %v6404_v22 = vmul.f32 %v12672_v0, %v12887_v10  ;;  %v13318_v59 = vmul.f32 %v12672_v0, %v12900_v26  ;;  %v6650_v42 = vmul.f32 %v12674_v53, %v12887_v10 }
 0x9b3   : > { %v8062_v21 = vsel %vm2816_vm6, %v7990_v9, 0.0  ;;  %v13325_v48 = vsel %vm2682_vm8, %v6201_v63, %v13310_v60  ;;  %v13328_v34 = vsel %vm2682_vm8, 0.0, %v6201_v63  ;;  %v13332_v4 = vmul.f32 %v12674_v53, %v12900_v26 }
 0x9b4   : > { %8063 = vadd.xlane.f32.xlu0 %v8062_v21  ;;  %v7184_v61 = vadd.f32 %v7102_v12, %v6939_v47  ;;  %v6507_v29 = vrot.slane %v6404_v22, 1  ;;  %v14862_v52 = vrot.slane %v13318_v59, 1  ;;  %v6753_v23 = vrot.slane %v6650_v42, 2 }
 0x9b5   : > { %v14861_v10 = vrot.slane %v13332_v4, 2  ;;  %v6894_v56 = vmul.f32 %v12717_v40, %v13085_v2  ;;  %v6966_v62 = vmul.f32 %v12692_v35, %v13085_v2  ;;  %v13342_v63 = vmul.f32 %v12692_v35, %v13082_v43 }
 0x9b6   : > { %v7429_v32 = vadd.f32 %v7347_v33, %v7184_v61  ;;  %v6509_v12 = vsel %vm6491_vm11, %v6507_v29, %v14862_v52  ;;  %v7211_v3 = vmul.f32 %v12703_v38, %v13085_v2  ;;  %v13351_v17 = vmul.f32 %v12703_v38, %v13082_v43 }
 0x9b7   : > { %v6610_v37 = vadd.f32 %v6509_v12, %v6332_v30  ;;  %v6755_v24 = vsel %vm6737_vm12, %v6753_v23, %v14861_v10  ;;  %v7068_v25 = vrot.slane %v6966_v62, 1  ;;  %v14855_v9 = vrot.slane %v13342_v63, 1  ;;  %v13494_v10 = vld [vmem:[#allocation12 + $0x8] ss:$0 sm:$0xff] }
 0x9b8   : > { %v7499_v33 = vadd.f32 %v7467_v49, %v7429_v32  ;;  %v15034_v47 = vrot.slane %v13018_v55, 2  ;;  %v7313_v42 = vrot.slane %v7211_v3, 2  ;;  %v14858_v21 = vrot.slane %v13351_v17, 2 }
 0x9b9   : > { %v6856_v61 = vadd.f32 %v6755_v24, %v6610_v37  ;;  %v7454_v29 = vmul.f32 %v12732_v54, %v13328_v34  ;;  %v7526_v30 = vmul.f32 %v12719_v36, %v13328_v34  ;;  %v13367_v23 = vmul.f32 %v12719_v36, %v13325_v48 }
 0x9ba   : > { %v7907_v22 = vsel %vm6737_vm12, %v15034_v47, %v7906_v5  ;;  %v7744_v62 = vadd.f32 %v7662_v16, %v7499_v33  ;;  %v7070_v55 = vsel %vm6491_vm11, %v7068_v25, %v14855_v9  ;;  %v7771_v49 = vmul.f32 %v12738_v51, %v13328_v34 }
 0x9bb   : > { %v13376_v5 = vmul.f32 %v12738_v51, %v13325_v48  ;;  %v6926_v32 = vadd.f32 %v6894_v56, %v6856_v61  ;;  %v7315_v12 = vsel %vm6737_vm12, %v7313_v42, %v14858_v21  ;;  %v7628_v3 = vrot.slane %v7526_v30, 1  ;;  %v15035_v56 = vld [vmem:[#allocation36_spill] sm:$0xff]  ;;  %v15045_v21 = vld [vmem:[#allocation43_spill] sm:$0xff] }
 0x9bc   : > { %v14857_v37 = vrot.slane %v13367_v23, 1  ;;  %v7989_v16 = vadd.f32 %v7907_v22, %v7744_v62  ;;  %v7873_v24 = vrot.slane %v7771_v49, 2  ;;  %v13385_v25 = vsel %vm2682_vm8, %v13068_v45, 0.0  ;;  %v15036_v62 = vld [vmem:[#allocation42_spill] sm:$0xff] }
 0x9bd   : > { %v14856_v33 = vrot.slane %v13376_v5, 2  ;;  %v7171_v47 = vadd.f32 %v7070_v55, %v6926_v32  ;;  %v6331_v9 = vmul.f32 %v12682_v1, %v12698_v15  ;;  %v6403_v61 = vmul.f32 %v12672_v0, %v15035_v56 }
 0x9be   : > { %v6649_v42 = vmul.f32 %v12674_v53, %v15035_v56  ;;  %v8059_v30 = vsel %vm2816_vm6, %v7989_v16, 0.0  ;;  %v7630_v22 = vsel %vm6491_vm11, %v7628_v3, %v14857_v37  ;;  %v6965_v55 = vmul.f32 %v12692_v35, %v15036_v62 }
 0x9bf   : > { %v7875_v45 = vsel %vm6737_vm12, %v7873_v24, %v14856_v33  ;;  %8060 = vadd.xlane.f32.xlu1 %v8059_v30  ;;  %v7416_v1 = vadd.f32 %v7315_v12, %v7171_v47  ;;  %v6505_v15 = vrot.slane %v6403_v61, 1  ;;  %v7210_v53 = vmul.f32 %v12703_v38, %v15036_v62  ;;  %v6118_v24 = vld [vmem:[#allocation2 + $0x60] sm:$0xff] }
 0x9c0   : > { %v6751_v0 = vrot.slane %v6649_v42, 2  ;;  %v6893_v49 = vmul.f32 %v12717_v40, %v12900_v26  ;;  %v7066_v32 = vrot.slane %v6965_v55, 1  ;;  %v7525_v3 = vmul.f32 %v12719_v36, %v13385_v25 }
 0x9c1   : > { %v7770_v16 = vmul.f32 %v12738_v51, %v13385_v25  ;;  %v7486_v56 = vadd.f32 %v7454_v29, %v7416_v1  ;;  %v15037_v35 = vrot.slane %v13076_v44, 1  ;;  %v15038_v47 = vrot.slane %v13089_v57, 2 }
 0x9c2   : > { %v7311_v61 = vrot.slane %v7210_v53, 2  ;;  %v15039_v40 = vrot.slane %v13100_v11, 1  ;;  %v7453_v36 = vmul.f32 %v12732_v54, %v13082_v43  ;;  %v7626_v51 = vrot.slane %v7525_v3, 1  ;;  %v13427_v11 = vld [vmem:[#allocation12] ss:$0 sm:$0xff] }
 0x9c3   : > { %v6506_v12 = vsel %vm6491_vm11, %v15037_v35, %v6505_v15  ;;  %v6752_v38 = vsel %vm6737_vm12, %v15038_v47, %v6751_v0  ;;  %v7731_v55 = vadd.f32 %v7630_v22, %v7486_v56  ;;  %v7871_v29 = vrot.slane %v7770_v16, 2  ;;  %v13433_v3 = vld [vmem:[#allocation12 + $0x1] ss:$0 sm:$0xff] }
 0x9c4   : > { %v6609_v42 = vadd.f32 %v6506_v12, %v6331_v9  ;;  %v7067_v30 = vsel %vm6491_vm11, %v15039_v40, %v7066_v32  ;;  %v6146_v1 = vunpack.c.l.bf16 %v6118_v24  ;;  %v6147_v44 = vunpack.c.h.bf16 %v6118_v24  ;;  %v13441_v24 = vld [vmem:[#allocation12 + $0x2] ss:$0 sm:$0xff] }
 0x9c5   : > { %v15040_v15 = vrot.slane %v13109_v18, 2  ;;  %v15041_v0 = vrot.slane %v13125_v8, 1  ;;  %v6348_v53 = vmul.f32 %v13427_v11, %v12968_v39  ;;  %v7976_v54 = vadd.f32 %v7875_v45, %v7731_v55 }
 0x9c6   : > { %v6855_v33 = vadd.f32 %v6752_v38, %v6609_v42  ;;  %v6225_v32 = vrot.slane %v6146_v1, 7  ;;  %v13431_v22 = vrot.slane %v6147_v44, 7  ;;  %v6428_v18 = vmul.f32 %v13433_v3, %v12968_v39  ;;  %v13459_v42 = vld [vmem:[#allocation12 + $0x4] ss:$0 sm:$0xff] }
 0x9c7   : > { %v7312_v57 = vsel %vm6737_vm12, %v15040_v15, %v7311_v61  ;;  %v7627_v9 = vsel %vm6491_vm11, %v15041_v0, %v7626_v51  ;;  %v13439_v8 = vmul.f32 %v13433_v3, %v12988_v27  ;;  %v6674_v56 = vmul.f32 %v13441_v24, %v12968_v39  ;;  %v13463_v51 = vld [vmem:[#allocation12 + $0x5] ss:$0 sm:$0xff] }
 0x9c8   : > { %v6925_v16 = vadd.f32 %v6893_v49, %v6855_v33  ;;  %v13447_v45 = vmul.f32 %v13441_v24, %v12988_v27  ;;  %v8020_v35 = vsel %vm2816_vm6, %v7976_v54, 0.0  ;;  %v13452_v12 = vsel %vm2682_vm8, %v6225_v32, %v13431_v22 }
 0x9c9   : > { %v13455_v33 = vsel %vm2682_vm8, 0.0, %v6225_v32  ;;  %v6547_v49 = vrot.slane %v6428_v18, 1  ;;  %8021 = vadd.xlane.f32.xlu0 %v8020_v35  ;;  %v14859_v38 = vrot.slane %v13439_v8, 1  ;;  %v6793_v61 = vrot.slane %v6674_v56, 2 }
 0x9ca   : > { %15042 = vst [vmem:[#allocation41_spill] sm:$0xff] %v13447_v45  ;;  %v7170_v47 = vadd.f32 %v7067_v30, %v6925_v16  ;;  %v14860_v39 = vrot.slane %v13447_v45, 2  ;;  %v6910_v40 = vmul.f32 %v13459_v42, %v13198_v41  ;;  %v6990_v55 = vmul.f32 %v13463_v51, %v13198_v41  ;;  %v13471_v30 = vld [vmem:[#allocation12 + $0x6] ss:$0 sm:$0xff] }
 0x9cb   : > { %v13469_v1 = vmul.f32 %v13463_v51, %v13211_v46  ;;  %v7235_v44 = vmul.f32 %v13471_v30, %v13198_v41  ;;  %v6549_v0 = vsel %vm6491_vm11, %v6547_v49, %v14859_v38  ;;  %v13483_v32 = vmul.f32 %v13471_v30, %v13211_v46  ;;  %v13490_v38 = vld [vmem:[#allocation12 + $0x9] ss:$0 sm:$0xff] }
 0x9cc   : > { %v7415_v15 = vadd.f32 %v7312_v57, %v7170_v47  ;;  %v6795_v54 = vsel %vm6737_vm12, %v6793_v61, %v14860_v39  ;;  %v6626_v18 = vadd.f32 %v6549_v0, %v6348_v53  ;;  %v7108_v16 = vrot.slane %v6990_v55, 1 }
 0x9cd   : > { %15043 = vst [vmem:[#allocation36_spill] sm:$0xff] %v13469_v1  ;;  %15044 = vst [vmem:[#allocation42_spill] sm:$0xff] %v13483_v32  ;;  %v14867_v56 = vrot.slane %v13469_v1, 1  ;;  %v7353_v35 = vrot.slane %v7235_v44, 2  ;;  %v15046_v57 = vrot.slane %v15045_v21, 2  ;;  %v14865_v49 = vrot.slane %v13483_v32, 2 }
 0x9ce   : > { %v7485_v37 = vadd.f32 %v7453_v36, %v7415_v15  ;;  %v7550_v61 = vmul.f32 %v13490_v38, %v13455_v33  ;;  %v6872_v39 = vadd.f32 %v6795_v54, %v6626_v18  ;;  %v7470_v53 = vmul.f32 %v13494_v10, %v13455_v33  ;;  %v13502_v21 = vld [vmem:[#allocation12 + $0xa] ss:$0 sm:$0xff] }
 0x9cf   : > { %v7872_v47 = vsel %vm6737_vm12, %v15046_v57, %v7871_v29  ;;  %v13500_v36 = vmul.f32 %v13490_v38, %v13452_v12  ;;  %v7795_v29 = vmul.f32 %v13502_v21, %v13455_v33  ;;  %v7110_v44 = vsel %vm6491_vm11, %v7108_v16, %v14867_v56 }
 0x9d0   : > { %v7730_v55 = vadd.f32 %v7627_v9, %v7485_v37  ;;  %v7668_v15 = vrot.slane %v7550_v61, 1  ;;  %v13511_v0 = vmul.f32 %v13502_v21, %v13452_v12  ;;  %v6942_v54 = vadd.f32 %v6910_v40, %v6872_v39 }
 0x9d1   : > { %15047 = vst [vmem:[#allocation43_spill] sm:$0xff] %v13500_v36  ;;  %v7355_v18 = vsel %vm6737_vm12, %v7353_v35, %v14865_v49  ;;  %v14864_v57 = vrot.slane %v13500_v36, 1  ;;  %v7913_v52 = vrot.slane %v7795_v29, 2  ;;  %v13520_v9 = vsel %vm2682_vm8, %v13195_v19, 0.0 }
 0x9d2   : > { %15048 = vst [vmem:[#allocation46_spill] sm:$0xff] %v13511_v0  ;;  %v7975_v45 = vadd.f32 %v7872_v47, %v7730_v55  ;;  %v14866_v37 = vrot.slane %v13511_v0, 2  ;;  %v6427_v16 = vmul.f32 %v13433_v3, %v13154_v58  ;;  %v7187_v61 = vadd.f32 %v7110_v44, %v6942_v54 }
 0x9d3   : > { %v7670_v39 = vsel %vm6491_vm11, %v7668_v15, %v14864_v57  ;;  %v6347_v40 = vmul.f32 %v13427_v11, %v12803_v7  ;;  %v6673_v35 = vmul.f32 %v13441_v24, %v13154_v58  ;;  %v6909_v19 = vmul.f32 %v13459_v42, %v12988_v27  ;;  %v6111_v58 = vld [vmem:[#allocation2 + $0x28] sm:$0xff] }
 0x9d4   : > { %v8017_v47 = vsel %vm2816_vm6, %v7975_v45, 0.0  ;;  %v6545_v29 = vrot.slane %v6427_v16, 1  ;;  %v6989_v55 = vmul.f32 %v13463_v51, %v13268_v6  ;;  %v7432_v44 = vadd.f32 %v7355_v18, %v7187_v61 }
 0x9d5   : > { %8018 = vadd.xlane.f32.xlu1 %v8017_v47  ;;  %v7915_v15 = vsel %vm6737_vm12, %v7913_v52, %v14866_v37  ;;  %v6791_v54 = vrot.slane %v6673_v35, 2  ;;  %v7234_v7 = vmul.f32 %v13471_v30, %v13268_v6  ;;  %v15049_v45 = vrot.slane %v13204_v28, 1 }
 0x9d6   : > { %v7106_v57 = vrot.slane %v6989_v55, 1  ;;  %v7549_v49 = vmul.f32 %v13490_v38, %v13520_v9  ;;  %v7794_v18 = vmul.f32 %v13502_v21, %v13520_v9  ;;  %v7502_v61 = vadd.f32 %v7470_v53, %v7432_v44 }
 0x9d7   : > { %v6546_v16 = vsel %vm6491_vm11, %v15049_v45, %v6545_v29  ;;  %v15050_v52 = vrot.slane %v13216_v31, 2  ;;  %v7351_v37 = vrot.slane %v7234_v7, 2  ;;  %v7469_v56 = vmul.f32 %v13494_v10, %v13211_v46 }
 0x9d8   : > { %v6625_v47 = vadd.f32 %v6546_v16, %v6347_v40  ;;  %v7666_v28 = vrot.slane %v7549_v49, 1  ;;  %v7911_v0 = vrot.slane %v7794_v18, 2  ;;  %v6132_v29 = vunpack.c.l.bf16 %v6111_v58 }
 0x9d9   : > { %v6792_v35 = vsel %vm6737_vm12, %v15050_v52, %v6791_v54  ;;  %v7747_v55 = vadd.f32 %v7670_v39, %v7502_v61  ;;  %v15051_v36 = vrot.slane %v13224_v13, 1  ;;  %v6133_v1 = vunpack.c.h.bf16 %v6111_v58 }
 0x9da   : > { %v6871_v45 = vadd.f32 %v6792_v35, %v6625_v47  ;;  %v15052_v53 = vrot.slane %v13234_v20, 2  ;;  %v15053_v40 = vrot.slane %v13253_v50, 1  ;;  %v15054_v54 = vrot.slane %v13259_v14, 2 }
 0x9db   : > { %v7107_v32 = vsel %vm6491_vm11, %v15051_v36, %v7106_v57  ;;  %v6204_v7 = vrot.slane %v6132_v29, 7  ;;  %v7992_v39 = vadd.f32 %v7915_v15, %v7747_v55  ;;  %v13565_v18 = vrot.slane %v6133_v1, 7 }
 0x9dc   : > { %v7352_v31 = vsel %vm6737_vm12, %v15052_v53, %v7351_v37  ;;  %v7667_v44 = vsel %vm6491_vm11, %v15053_v40, %v7666_v28  ;;  %v7912_v49 = vsel %vm6737_vm12, %v15054_v54, %v7911_v0  ;;  %v6941_v16 = vadd.f32 %v6909_v19, %v6871_v45 }
 0x9dd   : > { %v6407_v13 = vmul.f32 %v13433_v3, %v13085_v2  ;;  %v6334_v20 = vmul.f32 %v13427_v11, %v13085_v2  ;;  %v13573_v50 = vmul.f32 %v13433_v3, %v13082_v43  ;;  %v6653_v14 = vmul.f32 %v13441_v24, %v13085_v2 }
 0x9de   : > { %v13579_v36 = vmul.f32 %v13441_v24, %v13082_v43  ;;  %v8068_v1 = vsel %vm2816_vm6, %v7992_v39, 0.0  ;;  %v7186_v0 = vadd.f32 %v7107_v32, %v6941_v16  ;;  %v13583_v57 = vsel %vm2682_vm8, 0.0, %v6204_v7 }
 0x9df   : > { %v6512_v37 = vrot.slane %v6407_v13, 1  ;;  %8069 = vadd.xlane.f32.xlu0 %v8068_v1  ;;  %v13587_v19 = vsel %vm2682_vm8, %v6204_v7, %v13565_v18  ;;  %v14883_v15 = vrot.slane %v13573_v50, 1  ;;  %v6758_v58 = vrot.slane %v6653_v14, 2 }
 0x9e0   : > { %v14882_v2 = vrot.slane %v13579_v36, 2  ;;  %v7431_v61 = vadd.f32 %v7352_v31, %v7186_v0  ;;  %v6969_v47 = vmul.f32 %v13463_v51, %v13328_v34  ;;  %v13595_v32 = vmul.f32 %v13463_v51, %v13325_v48 }
 0x9e1   : > { %v7214_v52 = vmul.f32 %v13471_v30, %v13328_v34  ;;  %v6514_v35 = vsel %vm6491_vm11, %v6512_v37, %v14883_v15  ;;  %v6896_v29 = vmul.f32 %v13459_v42, %v13328_v34  ;;  %v13609_v55 = vmul.f32 %v13471_v30, %v13325_v48  ;;  %v15066_v15 = vld [vmem:[#allocation36_spill] sm:$0xff] }
 0x9e2   : > { %v6760_v28 = vsel %vm6737_vm12, %v6758_v58, %v14882_v2  ;;  %v7501_v45 = vadd.f32 %v7469_v56, %v7431_v61  ;;  %v6612_v53 = vadd.f32 %v6514_v35, %v6334_v20  ;;  %v7073_v31 = vrot.slane %v6969_v47, 1 }
 0x9e3   : > { %v14875_v40 = vrot.slane %v13595_v32, 1  ;;  %v7318_v54 = vrot.slane %v7214_v52, 2  ;;  %v14873_v7 = vrot.slane %v13609_v55, 2  ;;  %v7529_v39 = vmul.f32 %v13490_v38, %v13583_v57 }
 0x9e4   : > { %v13617_v16 = vmul.f32 %v13490_v38, %v13587_v19  ;;  %v7746_v13 = vadd.f32 %v7667_v44, %v7501_v45  ;;  %v6858_v14 = vadd.f32 %v6760_v28, %v6612_v53  ;;  %v7456_v1 = vmul.f32 %v13494_v10, %v13583_v57 }
 0x9e5   : > { %v7774_v56 = vmul.f32 %v13502_v21, %v13583_v57  ;;  %v7075_v20 = vsel %vm6491_vm11, %v7073_v31, %v14875_v40  ;;  %v7633_v0 = vrot.slane %v7529_v39, 1  ;;  %v13629_v58 = vmul.f32 %v13502_v21, %v13587_v19 }
 0x9e6   : > { %v14872_v37 = vrot.slane %v13617_v16, 1  ;;  %v7991_v61 = vadd.f32 %v7912_v49, %v7746_v13  ;;  %v6928_v44 = vadd.f32 %v6896_v29, %v6858_v14  ;;  %v7320_v47 = vsel %vm6737_vm12, %v7318_v54, %v14873_v7 }
 0x9e7   : > { %v7878_v52 = vrot.slane %v7774_v56, 2  ;;  %v14874_v28 = vrot.slane %v13629_v58, 2  ;;  %v13640_v45 = vsel %vm2682_vm8, %v13310_v60, 0.0  ;;  %v6406_v53 = vmul.f32 %v13433_v3, %v15036_v62 }
 0x9e8   : > { %v7635_v35 = vsel %vm6491_vm11, %v7633_v0, %v14872_v37  ;;  %v8065_v49 = vsel %vm2816_vm6, %v7991_v61, 0.0  ;;  %v7173_v29 = vadd.f32 %v7075_v20, %v6928_v44  ;;  %v6333_v31 = vmul.f32 %v13427_v11, %v12900_v26  ;;  %v6119_v0 = vld [vmem:[#allocation2 + $0x68] sm:$0xff] }
 0x9e9   : > { %v6652_v54 = vmul.f32 %v13441_v24, %v15036_v62  ;;  %8066 = vadd.xlane.f32.xlu1 %v8065_v49  ;;  %v6510_v39 = vrot.slane %v6406_v53, 1  ;;  %v6895_v13 = vmul.f32 %v13459_v42, %v13082_v43  ;;  %v6968_v60 = vmul.f32 %v13463_v51, %v13385_v25 }
 0x9ea   : > { %v7213_v14 = vmul.f32 %v13471_v30, %v13385_v25  ;;  %v7418_v56 = vadd.f32 %v7320_v47, %v7173_v29  ;;  %v7880_v20 = vsel %vm6737_vm12, %v7878_v52, %v14874_v28  ;;  %v7528_v62 = vmul.f32 %v13490_v38, %v13640_v45 }
 0x9eb   : > { %v6756_v26 = vrot.slane %v6652_v54, 2  ;;  %v15055_v61 = vrot.slane %v13318_v59, 1  ;;  %v7071_v53 = vrot.slane %v6968_v60, 1  ;;  %v7773_v37 = vmul.f32 %v13502_v21, %v13640_v45 }
 0x9ec   : > { %v7316_v49 = vrot.slane %v7213_v14, 2  ;;  %v7488_v7 = vadd.f32 %v7456_v1, %v7418_v56  ;;  %v15056_v29 = vrot.slane %v13332_v4, 2  ;;  %v7631_v54 = vrot.slane %v7528_v62, 1 }
 0x9ed   : > { %v6511_v44 = vsel %vm6491_vm11, %v15055_v61, %v6510_v39  ;;  %v15057_v28 = vrot.slane %v13342_v63, 1  ;;  %v15058_v59 = vrot.slane %v13351_v17, 2  ;;  %v7455_v60 = vmul.f32 %v13494_v10, %v13325_v48 }
 0x9ee   : > { %v6611_v47 = vadd.f32 %v6511_v44, %v6333_v31  ;;  %v6757_v52 = vsel %vm6737_vm12, %v15056_v29, %v6756_v26  ;;  %v6148_v14 = vunpack.c.l.bf16 %v6119_v0  ;;  %v7733_v61 = vadd.f32 %v7635_v35, %v7488_v7 }
 0x9ef   : > { %v7072_v40 = vsel %vm6491_vm11, %v15057_v28, %v7071_v53  ;;  %v7317_v39 = vsel %vm6737_vm12, %v15058_v59, %v7316_v49  ;;  %v7876_v31 = vrot.slane %v7773_v37, 2  ;;  %v6149_v56 = vunpack.c.h.bf16 %v6119_v0 }
 0x9f0   : > { %v6857_v1 = vadd.f32 %v6757_v52, %v6611_v47  ;;  %v15059_v4 = vrot.slane %v13367_v23, 1  ;;  %v6228_v62 = vrot.slane %v6148_v14, 7  ;;  %v6350_v63 = vmul.f32 %v13427_v11, %v13198_v41 }
 0x9f1   : > { %v6431_v17 = vmul.f32 %v13433_v3, %v13198_v41  ;;  %v7978_v28 = vadd.f32 %v7880_v20, %v7733_v61  ;;  %v13683_v53 = vrot.slane %v6149_v56, 7  ;;  %v13687_v7 = vmul.f32 %v13433_v3, %v13211_v46 }
 0x9f2   : > { %v7632_v26 = vsel %vm6491_vm11, %v15059_v4, %v7631_v54  ;;  %v6927_v44 = vadd.f32 %v6895_v13, %v6857_v1  ;;  %v13690_v37 = vsel %vm2682_vm8, 0.0, %v6228_v62  ;;  %v6677_v35 = vmul.f32 %v13441_v24, %v13198_v41 }
 0x9f3   : > { %v6552_v23 = vrot.slane %v6431_v17, 1  ;;  %v13696_v0 = vmul.f32 %v13441_v24, %v13211_v46  ;;  %v8026_v20 = vsel %vm2816_vm6, %v7978_v28, 0.0  ;;  %v13701_v49 = vsel %vm2682_vm8, %v6228_v62, %v13683_v53 }
 0x9f4   : > { %v7172_v13 = vadd.f32 %v7072_v40, %v6927_v44  ;;  %v14881_v47 = vrot.slane %v13687_v7, 1  ;;  %8027 = vadd.xlane.f32.xlu0 %v8026_v20  ;;  %v6798_v29 = vrot.slane %v6677_v35, 2  ;;  %v6912_v41 = vmul.f32 %v13459_v42, %v13455_v33 }
 0x9f5   : > { %v14880_v52 = vrot.slane %v13696_v0, 2  ;;  %v6993_v54 = vmul.f32 %v13463_v51, %v13455_v33  ;;  %v13714_v14 = vmul.f32 %v13463_v51, %v13452_v12  ;;  %v7238_v61 = vmul.f32 %v13471_v30, %v13455_v33 }
 0x9f6   : > { %v7417_v59 = vadd.f32 %v7317_v39, %v7172_v13  ;;  %v6554_v40 = vsel %vm6491_vm11, %v6552_v23, %v14881_v47  ;;  %v13723_v39 = vmul.f32 %v13471_v30, %v13452_v12  ;;  %v15060_v17 = vrot.slane %v13376_v5, 2 }
 0x9f7   : > { %v6628_v1 = vadd.f32 %v6554_v40, %v6350_v63  ;;  %v6800_v56 = vsel %vm6737_vm12, %v6798_v29, %v14880_v52  ;;  %v7113_v4 = vrot.slane %v6993_v54, 1  ;;  %v14879_v44 = vrot.slane %v13714_v14, 1 }
 0x9f8   : > { %v7487_v62 = vadd.f32 %v7455_v60, %v7417_v59  ;;  %v7877_v28 = vsel %vm6737_vm12, %v15060_v17, %v7876_v31  ;;  %v7358_v23 = vrot.slane %v7238_v61, 2  ;;  %v14878_v63 = vrot.slane %v13723_v39, 2 }
 0x9f9   : > { %v6874_v35 = vadd.f32 %v6800_v56, %v6628_v1  ;;  %v7553_v20 = vmul.f32 %v13490_v38, %v13690_v37  ;;  %v13734_v13 = vmul.f32 %v13490_v38, %v13701_v49  ;;  %v7115_v5 = vsel %vm6491_vm11, %v7113_v4, %v14879_v44 }
 0x9fa   : > { %v7732_v29 = vadd.f32 %v7632_v26, %v7487_v62  ;;  %v7798_v60 = vmul.f32 %v13502_v21, %v13690_v37  ;;  %v13743_v31 = vmul.f32 %v13502_v21, %v13701_v49  ;;  %v7472_v59 = vmul.f32 %v13494_v10, %v13690_v37 }
 0x9fb   : > { %15061 = vst [vmem:[#allocation47_spill] sm:$0xff] %v13734_v13  ;;  %v6944_v54 = vadd.f32 %v6912_v41, %v6874_v35  ;;  %v7673_v40 = vrot.slane %v7553_v20, 1  ;;  %v14877_v61 = vrot.slane %v13734_v13, 1  ;;  %v7360_v26 = vsel %vm6737_vm12, %v7358_v23, %v14878_v63  ;;  %v15064_v63 = vld [vmem:[#allocation41_spill] sm:$0xff] }
 0x9fc   : > { %15062 = vst [vmem:[#allocation48_spill] sm:$0xff] %v13743_v31  ;;  %v7977_v1 = vadd.f32 %v7877_v28, %v7732_v29  ;;  %v7918_v56 = vrot.slane %v7798_v60, 2  ;;  %v14876_v4 = vrot.slane %v13743_v31, 2  ;;  %v13757_v41 = vsel %vm2682_vm8, %v13431_v22, 0.0 }
 0x9fd   : > { %v7189_v62 = vadd.f32 %v7115_v5, %v6944_v54  ;;  %v7675_v17 = vsel %vm6491_vm11, %v7673_v40, %v14877_v61  ;;  %v6430_v35 = vmul.f32 %v13433_v3, %v13268_v6  ;;  %v6349_v20 = vmul.f32 %v13427_v11, %v12988_v27 }
 0x9fe   : > { %v8023_v28 = vsel %vm2816_vm6, %v7977_v1, 0.0  ;;  %v7920_v23 = vsel %vm6737_vm12, %v7918_v56, %v14876_v4  ;;  %v6676_v29 = vmul.f32 %v13441_v24, %v13268_v6  ;;  %v6992_v22 = vmul.f32 %v13463_v51, %v13520_v9  ;;  %v6112_v6 = vld [vmem:[#allocation2 + $0x30] sm:$0xff] }
 0x9ff   : > { %8024 = vadd.xlane.f32.xlu1 %v8023_v28  ;;  %v7434_v5 = vadd.f32 %v7360_v26, %v7189_v62  ;;  %v6550_v60 = vrot.slane %v6430_v35, 1  ;;  %v7237_v54 = vmul.f32 %v13471_v30, %v13520_v9  ;;  %v6911_v1 = vmul.f32 %v13459_v42, %v13211_v46 }
 0xa00   : > { %v6796_v40 = vrot.slane %v6676_v29, 2  ;;  %v7552_v56 = vmul.f32 %v13490_v38, %v13757_v41  ;;  %v7797_v27 = vmul.f32 %v13502_v21, %v13757_v41  ;;  %v15063_v26 = vrot.slane %v13439_v8, 1 }
 0xa01   : > { %v7504_v28 = vadd.f32 %v7472_v59, %v7434_v5  ;;  %v7111_v35 = vrot.slane %v6992_v22, 1  ;;  %v7356_v4 = vrot.slane %v7237_v54, 2  ;;  %v15065_v29 = vrot.slane %v15064_v63, 2  ;;  %v15070_v54 = vld [vmem:[#allocation43_spill] sm:$0xff] }
 0xa02   : > { %v6551_v62 = vsel %vm6491_vm11, %v15063_v26, %v6550_v60  ;;  %v7471_v52 = vmul.f32 %v13494_v10, %v13452_v12  ;;  %v7671_v47 = vrot.slane %v7552_v56, 1  ;;  %v15067_v31 = vrot.slane %v15066_v15, 1  ;;  %v15068_v60 = vld [vmem:[#allocation42_spill] sm:$0xff] }
 0xa03   : > { %v6627_v61 = vadd.f32 %v6551_v62, %v6349_v20  ;;  %v6797_v44 = vsel %vm6737_vm12, %v15065_v29, %v6796_v40  ;;  %v7749_v2 = vadd.f32 %v7675_v17, %v7504_v28  ;;  %v7916_v5 = vrot.slane %v7797_v27, 2 }
 0xa04   : > { %v7112_v59 = vsel %vm6491_vm11, %v15067_v31, %v7111_v35  ;;  %v6134_v8 = vunpack.c.l.bf16 %v6112_v6  ;;  %v15069_v22 = vrot.slane %v15068_v60, 2  ;;  %v15071_v63 = vrot.slane %v15070_v54, 1 }
 0xa05   : > { %v6873_v13 = vadd.f32 %v6797_v44, %v6627_v61  ;;  %v6135_v26 = vunpack.c.h.bf16 %v6112_v6  ;;  %v7994_v62 = vadd.f32 %v7920_v23, %v7749_v2  ;;  %v6336_v17 = vmul.f32 %v13427_v11, %v13328_v34 }
 0xa06   : > { %v7357_v20 = vsel %vm6737_vm12, %v15069_v22, %v7356_v4  ;;  %v7672_v40 = vsel %vm6491_vm11, %v15071_v63, %v7671_v47  ;;  %v6207_v29 = vrot.slane %v6134_v8, 7  ;;  %v6410_v15 = vmul.f32 %v13433_v3, %v13328_v34 }
 0xa07   : > { %v6943_v31 = vadd.f32 %v6911_v1, %v6873_v13  ;;  %v13800_v56 = vrot.slane %v6135_v26, 7  ;;  %v13804_v44 = vmul.f32 %v13433_v3, %v13325_v48  ;;  %v6656_v61 = vmul.f32 %v13441_v24, %v13328_v34 }
 0xa08   : > { %v8074_v47 = vsel %vm2816_vm6, %v7994_v62, 0.0  ;;  %v13810_v2 = vsel %vm2682_vm8, 0.0, %v6207_v29  ;;  %v6517_v4 = vrot.slane %v6410_v15, 1  ;;  %v13814_v23 = vmul.f32 %v13441_v24, %v13325_v48  ;;  %v15073_v15 = vld [vmem:[#allocation46_spill] sm:$0xff] }
 0xa09   : > { %8075 = vadd.xlane.f32.xlu0 %v8074_v47  ;;  %v7188_v13 = vadd.f32 %v7112_v59, %v6943_v31  ;;  %v13818_v1 = vsel %vm2682_vm8, %v6207_v29, %v13800_v56  ;;  %v14886_v27 = vrot.slane %v13804_v44, 1  ;;  %v6763_v6 = vrot.slane %v6656_v61, 2 }
 0xa0a   : > { %v14891_v34 = vrot.slane %v13814_v23, 2  ;;  %v6898_v28 = vmul.f32 %v13459_v42, %v13583_v57  ;;  %v6972_v35 = vmul.f32 %v13463_v51, %v13583_v57  ;;  %v13828_v8 = vmul.f32 %v13463_v51, %v13587_v19 }
 0xa0b   : > { %v7433_v59 = vadd.f32 %v7357_v20, %v7188_v13  ;;  %v6519_v60 = vsel %vm6491_vm11, %v6517_v4, %v14886_v27  ;;  %v7217_v22 = vmul.f32 %v13471_v30, %v13583_v57  ;;  %v13837_v54 = vmul.f32 %v13471_v30, %v13587_v19 }
 0xa0c   : > { %v6614_v63 = vadd.f32 %v6519_v60, %v6336_v17  ;;  %v6765_v26 = vsel %vm6737_vm12, %v6763_v6, %v14891_v34  ;;  %v7078_v62 = vrot.slane %v6972_v35, 1  ;;  %v14887_v29 = vrot.slane %v13828_v8, 1 }
 0xa0d   : > { %15072 = vst [vmem:[#allocation41_spill] sm:$0xff] %v13837_v54  ;;  %v7503_v20 = vadd.f32 %v7471_v52, %v7433_v59  ;;  %v15074_v31 = vrot.slane %v15073_v15, 2  ;;  %v7323_v47 = vrot.slane %v7217_v22, 2  ;;  %v14890_v4 = vrot.slane %v13837_v54, 2 }
 0xa0e   : > { %v6860_v13 = vadd.f32 %v6765_v26, %v6614_v63  ;;  %v7458_v27 = vmul.f32 %v13494_v10, %v13810_v2  ;;  %v7532_v17 = vmul.f32 %v13490_v38, %v13810_v2  ;;  %v13853_v6 = vmul.f32 %v13490_v38, %v13818_v1 }
 0xa0f   : > { %v7917_v61 = vsel %vm6737_vm12, %v15074_v31, %v7916_v5  ;;  %v7748_v35 = vadd.f32 %v7672_v40, %v7503_v20  ;;  %v7080_v52 = vsel %vm6491_vm11, %v7078_v62, %v14887_v29  ;;  %v7777_v5 = vmul.f32 %v13502_v21, %v13810_v2 }
 0xa10   : > { %15075 = vst [vmem:[#allocation36_spill] sm:$0xff] %v13853_v6  ;;  %v13862_v59 = vmul.f32 %v13502_v21, %v13818_v1  ;;  %v6930_v60 = vadd.f32 %v6898_v28, %v6860_v13  ;;  %v7325_v22 = vsel %vm6737_vm12, %v7323_v47, %v14890_v4  ;;  %v7638_v63 = vrot.slane %v7532_v17, 1 }
 0xa11   : > { %v14889_v26 = vrot.slane %v13853_v6, 1  ;;  %v7993_v40 = vadd.f32 %v7917_v61, %v7748_v35  ;;  %v7883_v20 = vrot.slane %v7777_v5, 2  ;;  %v13871_v62 = vsel %vm2682_vm8, %v13565_v18, 0.0 }
 0xa12   : > { %15076 = vst [vmem:[#allocation42_spill] sm:$0xff] %v13862_v59  ;;  %v14888_v15 = vrot.slane %v13862_v59, 2  ;;  %v7175_v31 = vadd.f32 %v7080_v52, %v6930_v60  ;;  %v6335_v29 = vmul.f32 %v13427_v11, %v13082_v43  ;;  %v6409_v28 = vmul.f32 %v13433_v3, %v13385_v25 }
 0xa13   : > { %v6655_v47 = vmul.f32 %v13441_v24, %v13385_v25  ;;  %v8071_v13 = vsel %vm2816_vm6, %v7993_v40, 0.0  ;;  %v7640_v61 = vsel %vm6491_vm11, %v7638_v63, %v14889_v26  ;;  %v6971_v17 = vmul.f32 %v13463_v51, %v13640_v45 }
 0xa14   : > { %v7885_v18 = vsel %vm6737_vm12, %v7883_v20, %v14888_v15  ;;  %8072 = vadd.xlane.f32.xlu1 %v8071_v13  ;;  %v7420_v43 = vadd.f32 %v7325_v22, %v7175_v31  ;;  %v6515_v35 = vrot.slane %v6409_v28, 1  ;;  %v7216_v25 = vmul.f32 %v13471_v30, %v13640_v45  ;;  %v6120_v20 = vld [vmem:[#allocation2 + $0x70] sm:$0xff] }
 0xa15   : > { %v6761_v52 = vrot.slane %v6655_v47, 2  ;;  %v6897_v5 = vmul.f32 %v13459_v42, %v13325_v48  ;;  %v7076_v60 = vrot.slane %v6971_v17, 1  ;;  %v7531_v63 = vmul.f32 %v13490_v38, %v13871_v62 }
 0xa16   : > { %v7776_v40 = vmul.f32 %v13502_v21, %v13871_v62  ;;  %v7490_v15 = vadd.f32 %v7458_v27, %v7420_v43  ;;  %v15077_v13 = vrot.slane %v13573_v50, 1  ;;  %v15078_v31 = vrot.slane %v13579_v36, 2 }
 0xa17   : > { %v7321_v47 = vrot.slane %v7216_v25, 2  ;;  %v15079_v17 = vrot.slane %v13595_v32, 1  ;;  %v7457_v34 = vmul.f32 %v13494_v10, %v13587_v19  ;;  %v7636_v59 = vrot.slane %v7531_v63, 1 }
 0xa18   : > { %v6516_v22 = vsel %vm6491_vm11, %v15077_v13, %v6515_v35  ;;  %v6762_v28 = vsel %vm6737_vm12, %v15078_v31, %v6761_v52  ;;  %v7735_v6 = vadd.f32 %v7640_v61, %v7490_v15  ;;  %v7881_v27 = vrot.slane %v7776_v40, 2 }
 0xa19   : > { %v6613_v26 = vadd.f32 %v6516_v22, %v6335_v29  ;;  %v7077_v4 = vsel %vm6491_vm11, %v15079_v17, %v7076_v60  ;;  %v6150_v43 = vunpack.c.l.bf16 %v6120_v20  ;;  %v6151_v50 = vunpack.c.h.bf16 %v6120_v20 }
 0xa1a   : > { %v15080_v35 = vrot.slane %v13609_v55, 2  ;;  %v15081_v52 = vrot.slane %v13617_v16, 1  ;;  %v6352_v32 = vmul.f32 %v13427_v11, %v13455_v33  ;;  %v7980_v25 = vadd.f32 %v7885_v18, %v7735_v6 }
 0xa1b   : > { %v6859_v54 = vadd.f32 %v6762_v28, %v6613_v26  ;;  %v6231_v60 = vrot.slane %v6150_v43, 7  ;;  %v13915_v13 = vrot.slane %v6151_v50, 7  ;;  %v6434_v15 = vmul.f32 %v13433_v3, %v13455_v33 }
 0xa1c   : > { %v7322_v36 = vsel %vm6737_vm12, %v15080_v35, %v7321_v47  ;;  %v7637_v29 = vsel %vm6491_vm11, %v15081_v52, %v7636_v59  ;;  %v13921_v55 = vmul.f32 %v13433_v3, %v13452_v12  ;;  %v6680_v16 = vmul.f32 %v13441_v24, %v13455_v33 }
 0xa1d   : > { %v6929_v61 = vadd.f32 %v6897_v5, %v6859_v54  ;;  %v13927_v59 = vmul.f32 %v13441_v24, %v13452_v12  ;;  %v8032_v6 = vsel %vm2816_vm6, %v7980_v25, 0.0  ;;  %v13932_v26 = vsel %vm2682_vm8, %v6231_v60, %v13915_v13 }
 0xa1e   : > { %v13935_v18 = vsel %vm2682_vm8, 0.0, %v6231_v60  ;;  %v6557_v54 = vrot.slane %v6434_v15, 1  ;;  %8033 = vadd.xlane.f32.xlu0 %v8032_v6  ;;  %v14906_v63 = vrot.slane %v13921_v55, 1  ;;  %v6803_v40 = vrot.slane %v6680_v16, 2 }
 0xa1f   : > { %v7174_v5 = vadd.f32 %v7077_v4, %v6929_v61  ;;  %v14905_v33 = vrot.slane %v13927_v59, 2  ;;  %v6914_v20 = vmul.f32 %v13459_v42, %v13690_v37  ;;  %v6996_v22 = vmul.f32 %v13463_v51, %v13690_v37 }
 0xa20   : > { %v13945_v31 = vmul.f32 %v13463_v51, %v13701_v49  ;;  %v7241_v28 = vmul.f32 %v13471_v30, %v13690_v37  ;;  %v6559_v4 = vsel %vm6491_vm11, %v6557_v54, %v14906_v63  ;;  %v13957_v43 = vmul.f32 %v13471_v30, %v13701_v49 }
 0xa21   : > { %v7419_v47 = vadd.f32 %v7322_v36, %v7174_v5  ;;  %v6805_v17 = vsel %vm6737_vm12, %v6803_v40, %v14905_v33  ;;  %v6630_v50 = vadd.f32 %v6559_v4, %v6352_v32  ;;  %v7118_v35 = vrot.slane %v6996_v22, 1 }
 0xa22   : > { %v14899_v52 = vrot.slane %v13945_v31, 1  ;;  %v7363_v25 = vrot.slane %v7241_v28, 2  ;;  %v15082_v36 = vrot.slane %v13629_v58, 2  ;;  %v14897_v61 = vrot.slane %v13957_v43, 2 }
 0xa23   : > { %v7489_v60 = vadd.f32 %v7457_v34, %v7419_v47  ;;  %v7556_v16 = vmul.f32 %v13490_v38, %v13935_v18  ;;  %v6876_v6 = vadd.f32 %v6805_v17, %v6630_v50  ;;  %v7474_v54 = vmul.f32 %v13494_v10, %v13935_v18 }
 0xa24   : > { %v7882_v15 = vsel %vm6737_vm12, %v15082_v36, %v7881_v27  ;;  %v13970_v32 = vmul.f32 %v13490_v38, %v13932_v26  ;;  %v7801_v34 = vmul.f32 %v13502_v21, %v13935_v18  ;;  %v7120_v58 = vsel %vm6491_vm11, %v7118_v35, %v14899_v52 }
 0xa25   : > { %v7734_v5 = vadd.f32 %v7637_v29, %v7489_v60  ;;  %v7678_v27 = vrot.slane %v7556_v16, 1  ;;  %v13979_v40 = vmul.f32 %v13502_v21, %v13932_v26  ;;  %v6946_v22 = vadd.f32 %v6914_v20, %v6876_v6 }
 0xa26   : > { %v7365_v28 = vsel %vm6737_vm12, %v7363_v25, %v14897_v61  ;;  %v14896_v47 = vrot.slane %v13970_v32, 1  ;;  %v7923_v4 = vrot.slane %v7801_v34, 2  ;;  %v13988_v50 = vsel %vm2682_vm8, %v13683_v53, 0.0 }
 0xa27   : > { %v7979_v17 = vadd.f32 %v7882_v15, %v7734_v5  ;;  %v14895_v29 = vrot.slane %v13979_v40, 2  ;;  %v6433_v35 = vmul.f32 %v13433_v3, %v13520_v9  ;;  %v7191_v60 = vadd.f32 %v7120_v58, %v6946_v22 }
 0xa28   : > { %v7680_v20 = vsel %vm6491_vm11, %v7678_v27, %v14896_v47  ;;  %v6351_v25 = vmul.f32 %v13427_v11, %v13211_v46  ;;  %v6679_v36 = vmul.f32 %v13441_v24, %v13520_v9  ;;  %v6913_v53 = vmul.f32 %v13459_v42, %v13452_v12 }
 0xa29   : > { %v8029_v15 = vsel %vm2816_vm6, %v7979_v17, 0.0  ;;  %v6555_v16 = vrot.slane %v6433_v35, 1  ;;  %v6995_v6 = vmul.f32 %v13463_v51, %v13757_v41  ;;  %v7436_v34 = vadd.f32 %v7365_v28, %v7191_v60 }
 0xa2a   : > { %8030 = vadd.xlane.f32.xlu1 %v8029_v15  ;;  %v7925_v5 = vsel %vm6737_vm12, %v7923_v4, %v14895_v29  ;;  %v6801_v58 = vrot.slane %v6679_v36, 2  ;;  %v7240_v46 = vmul.f32 %v13471_v30, %v13757_v41  ;;  %v15083_v9 = vrot.slane %v13687_v7, 1 }
 0xa2b   : > { %v7116_v22 = vrot.slane %v6995_v6, 1  ;;  %v7555_v17 = vmul.f32 %v13490_v38, %v13988_v50  ;;  %v7800_v35 = vmul.f32 %v13502_v21, %v13988_v50  ;;  %v7506_v28 = vadd.f32 %v7474_v54, %v7436_v34 }
 0xa2c   : > { %v6556_v27 = vsel %vm6491_vm11, %v15083_v9, %v6555_v16  ;;  %v15084_v15 = vrot.slane %v13696_v0, 2  ;;  %v7361_v36 = vrot.slane %v7240_v46, 2  ;;  %v15085_v29 = vrot.slane %v13714_v14, 1  ;;  %v15087_v14 = vld [vmem:[#allocation47_spill] sm:$0xff] }
 0xa2d   : > { %v6629_v60 = vadd.f32 %v6556_v27, %v6351_v25  ;;  %v7473_v16 = vmul.f32 %v13494_v10, %v13701_v49  ;;  %v7676_v6 = vrot.slane %v7555_v17, 1  ;;  %v7921_v9 = vrot.slane %v7800_v35, 2 }
 0xa2e   : > { %v6802_v4 = vsel %vm6737_vm12, %v15084_v15, %v6801_v58  ;;  %v7117_v7 = vsel %vm6491_vm11, %v15085_v29, %v7116_v22  ;;  %v7751_v47 = vadd.f32 %v7680_v20, %v7506_v28  ;;  %v6338_v54 = vmul.f32 %v13427_v11, %v13583_v57 }
 0xa2f   : > { %v6875_v61 = vadd.f32 %v6802_v4, %v6629_v60  ;;  %v6413_v0 = vmul.f32 %v13433_v3, %v13583_v57  ;;  %v15086_v25 = vrot.slane %v13723_v39, 2  ;;  %v15088_v58 = vrot.slane %v15087_v14, 1 }
 0xa30   : > { %v14036_v46 = vmul.f32 %v13433_v3, %v13587_v19  ;;  %v6659_v20 = vmul.f32 %v13441_v24, %v13583_v57  ;;  %v7996_v27 = vadd.f32 %v7925_v5, %v7751_v47  ;;  %v14042_v35 = vmul.f32 %v13441_v24, %v13587_v19 }
 0xa31   : > { %v7362_v34 = vsel %vm6737_vm12, %v15086_v25, %v7361_v36  ;;  %v7677_v29 = vsel %vm6491_vm11, %v15088_v58, %v7676_v6  ;;  %v6945_v22 = vadd.f32 %v6913_v53, %v6875_v61  ;;  %v6522_v17 = vrot.slane %v6413_v0, 1  ;;  %v15089_v58 = vld [vmem:[#allocation48_spill] sm:$0xff] }
 0xa32   : > { %v14898_v39 = vrot.slane %v14036_v46, 1  ;;  %v6768_v28 = vrot.slane %v6659_v20, 2  ;;  %v6900_v60 = vmul.f32 %v13459_v42, %v13810_v2  ;;  %v6975_v15 = vmul.f32 %v13463_v51, %v13810_v2 }
 0xa33   : > { %v8080_v4 = vsel %vm2816_vm6, %v7996_v27, 0.0  ;;  %v7190_v36 = vadd.f32 %v7117_v7, %v6945_v22  ;;  %v14901_v57 = vrot.slane %v14042_v35, 2  ;;  %v14053_v61 = vmul.f32 %v13463_v51, %v13818_v1 }
 0xa34   : > { %8081 = vadd.xlane.f32.xlu0 %v8080_v4  ;;  %v6524_v47 = vsel %vm6491_vm11, %v6522_v17, %v14898_v39  ;;  %v7083_v53 = vrot.slane %v6975_v15, 1  ;;  %v7220_v5 = vmul.f32 %v13471_v30, %v13810_v2  ;;  %v14062_v6 = vmul.f32 %v13471_v30, %v13818_v1  ;;  %v15091_v15 = vld [vmem:[#allocation38_spill] sm:$0xff] }
 0xa35   : > { %v7435_v7 = vadd.f32 %v7362_v34, %v7190_v36  ;;  %v6616_v0 = vadd.f32 %v6524_v47, %v6338_v54  ;;  %v6770_v25 = vsel %vm6737_vm12, %v6768_v28, %v14901_v57  ;;  %v14900_v14 = vrot.slane %v14053_v61, 1  ;;  %v15092_v34 = vld [vmem:[#allocation37_spill] sm:$0xff] }
 0xa36   : > { %v15090_v20 = vrot.slane %v15089_v58, 2  ;;  %v7328_v22 = vrot.slane %v7220_v5, 2  ;;  %v14904_v17 = vrot.slane %v14062_v6, 2  ;;  %v7535_v4 = vmul.f32 %v13490_v38, %v15091_v15 }
 0xa37   : > { %v7505_v39 = vadd.f32 %v7473_v16, %v7435_v7  ;;  %v6862_v52 = vadd.f32 %v6770_v25, %v6616_v0  ;;  %v7460_v54 = vmul.f32 %v13494_v10, %v15091_v15  ;;  %v14078_v28 = vmul.f32 %v13490_v38, %v15092_v34 }
 0xa38   : > { %v7922_v27 = vsel %vm6737_vm12, %v15090_v20, %v7921_v9  ;;  %v7085_v36 = vsel %vm6491_vm11, %v7083_v53, %v14900_v14  ;;  %v7643_v9 = vrot.slane %v7535_v4, 1  ;;  %v7780_v47 = vmul.f32 %v13502_v21, %v15091_v15 }
 0xa39   : > { %15093 = vst [vmem:[#allocation43_spill] sm:$0xff] %v14078_v28  ;;  %v14087_v5 = vmul.f32 %v13502_v21, %v15092_v34  ;;  %v7750_v16 = vadd.f32 %v7677_v29, %v7505_v39  ;;  %v6932_v7 = vadd.f32 %v6900_v60, %v6862_v52  ;;  %v7330_v0 = vsel %vm6737_vm12, %v7328_v22, %v14904_v17 }
 0xa3a   : > { %v14903_v25 = vrot.slane %v14078_v28, 1  ;;  %v7888_v58 = vrot.slane %v7780_v47, 2  ;;  %v14096_v53 = vsel %vm2682_vm8, %v13800_v56, 0.0  ;;  %v6412_v4 = vmul.f32 %v13433_v3, %v13640_v45 }
 0xa3b   : > { %15094 = vst [vmem:[#allocation46_spill] sm:$0xff] %v14087_v5  ;;  %v14902_v20 = vrot.slane %v14087_v5, 2  ;;  %v7995_v14 = vadd.f32 %v7922_v27, %v7750_v16  ;;  %v7177_v57 = vadd.f32 %v7085_v36, %v6932_v7  ;;  %v6337_v52 = vmul.f32 %v13427_v11, %v13325_v48 }
 0xa3c   : > { %v6658_v29 = vmul.f32 %v13441_v24, %v13640_v45  ;;  %v7645_v39 = vsel %vm6491_vm11, %v7643_v9, %v14903_v25  ;;  %v6520_v60 = vrot.slane %v6412_v4, 1  ;;  %v6974_v22 = vmul.f32 %v13463_v51, %v13871_v62  ;;  %v6121_v45 = vld [vmem:[#allocation2 + $0x78] sm:$0xff] }
 0xa3d   : > { %v7890_v56 = vsel %vm6737_vm12, %v7888_v58, %v14902_v20  ;;  %v8077_v27 = vsel %vm2816_vm6, %v7995_v14, 0.0  ;;  %v7422_v36 = vadd.f32 %v7330_v0, %v7177_v57  ;;  %v7219_v48 = vmul.f32 %v13471_v30, %v13871_v62 }
 0xa3e   : > { %v6766_v47 = vrot.slane %v6658_v29, 2  ;;  %8078 = vadd.xlane.f32.xlu1 %v8077_v27  ;;  %v15095_v16 = vrot.slane %v13804_v44, 1  ;;  %v6899_v7 = vmul.f32 %v13459_v42, %v13587_v19  ;;  %v7081_v58 = vrot.slane %v6974_v22, 1 }
 0xa3f   : > { %v7534_v4 = vmul.f32 %v13490_v38, %v14096_v53  ;;  %v7492_v20 = vadd.f32 %v7460_v54, %v7422_v36  ;;  %v15096_v57 = vrot.slane %v13814_v23, 2  ;;  %v7326_v29 = vrot.slane %v7219_v48, 2  ;;  %v15098_v36 = vld [vmem:[#allocation41_spill] sm:$0xff]  ;;  %v15100_v48 = vld [vmem:[#allocation36_spill] sm:$0xff] }
 0xa40   : > { %v6521_v9 = vsel %vm6491_vm11, %v15095_v16, %v6520_v60  ;;  %v7459_v27 = vmul.f32 %v13494_v10, %v13818_v1  ;;  %v7779_v60 = vmul.f32 %v13502_v21, %v14096_v53  ;;  %v6152_v16 = vunpack.c.l.bf16 %v6121_v45 }
 0xa41   : > { %v6615_v14 = vadd.f32 %v6521_v9, %v6337_v52  ;;  %v6767_v0 = vsel %vm6737_vm12, %v15096_v57, %v6766_v47  ;;  %v7641_v44 = vrot.slane %v7534_v4, 1  ;;  %v7737_v25 = vadd.f32 %v7645_v39, %v7492_v20  ;;  %v15102_v20 = vld [vmem:[#allocation42_spill] sm:$0xff] }
 0xa42   : > { %v15097_v17 = vrot.slane %v13828_v8, 1  ;;  %v6153_v52 = vunpack.c.h.bf16 %v6121_v45  ;;  %v15099_v23 = vrot.slane %v15098_v36, 2  ;;  %v15101_v9 = vrot.slane %v15100_v48, 1 }
 0xa43   : > { %v6861_v22 = vadd.f32 %v6767_v0, %v6615_v14  ;;  %v7886_v4 = vrot.slane %v7779_v60, 2  ;;  %v6234_v33 = vrot.slane %v6152_v16, 7  ;;  %v7982_v63 = vadd.f32 %v7890_v56, %v7737_v25 }
 0xa44   : > { %v7082_v54 = vsel %vm6491_vm11, %v15097_v17, %v7081_v58  ;;  %v7327_v47 = vsel %vm6737_vm12, %v15099_v23, %v7326_v29  ;;  %v7642_v57 = vsel %vm6491_vm11, %v15101_v9, %v7641_v44  ;;  %v14138_v28 = vrot.slane %v6153_v52, 7 }
 0xa45   : > { %v6931_v5 = vadd.f32 %v6899_v7, %v6861_v22  ;;  %v6437_v8 = vmul.f32 %v13433_v3, %v13690_v37  ;;  %v15103_v17 = vrot.slane %v15102_v20, 2  ;;  %v6354_v45 = vmul.f32 %v13427_v11, %v13690_v37 }
 0xa46   : > { %v14149_v58 = vmul.f32 %v13433_v3, %v13701_v49  ;;  %v6683_v25 = vmul.f32 %v13441_v24, %v13690_v37  ;;  %v8038_v56 = vsel %vm2816_vm6, %v7982_v63, 0.0  ;;  %v14155_v14 = vsel %vm2682_vm8, 0.0, %v6234_v33 }
 0xa47   : > { %v7887_v39 = vsel %vm6737_vm12, %v15103_v17, %v7886_v4  ;;  %v7176_v7 = vadd.f32 %v7082_v54, %v6931_v5  ;;  %v6562_v0 = vrot.slane %v6437_v8, 1  ;;  %8039 = vadd.xlane.f32.xlu0 %v8038_v56  ;;  %v14159_v29 = vsel %vm2682_vm8, %v6234_v33, %v14138_v28 }
 0xa48   : > { %v6563_v11 = vrot.slane %v14149_v58, 1  ;;  %v14164_v3 = vmul.f32 %v13441_v24, %v13701_v49  ;;  %v6808_v44 = vrot.slane %v6683_v25, 2  ;;  %v6999_v63 = vmul.f32 %v13463_v51, %v13935_v18 }
 0xa49   : > { %v7421_v37 = vadd.f32 %v7327_v47, %v7176_v7  ;;  %v14170_v5 = vmul.f32 %v13463_v51, %v13932_v26  ;;  %v7244_v60 = vmul.f32 %v13471_v30, %v13935_v18  ;;  %v6916_v24 = vmul.f32 %v13459_v42, %v13935_v18 }
 0xa4a   : > { %v6564_v33 = vsel %vm6491_vm11, %v6562_v0, %v6563_v11  ;;  %v6809_v16 = vrot.slane %v14164_v3, 2  ;;  %v14182_v22 = vmul.f32 %v13471_v30, %v13932_v26  ;;  %v7123_v51 = vrot.slane %v6999_v63, 1 }
 0xa4b   : > { %v7491_v54 = vadd.f32 %v7459_v27, %v7421_v37  ;;  %v6632_v52 = vadd.f32 %v6564_v33, %v6354_v45  ;;  %v7124_v36 = vrot.slane %v14170_v5, 1  ;;  %v7368_v47 = vrot.slane %v7244_v60, 2  ;;  %v14223_v60 = vld [vmem:[#allocation12 + $0x2] ss:$0 sm:$0xff] }
 0xa4c   : > { %v6810_v23 = vsel %vm6737_vm12, %v6808_v44, %v6809_v16  ;;  %v14910_v48 = vrot.slane %v14182_v22, 2  ;;  %v7559_v9 = vmul.f32 %v13490_v38, %v14155_v14  ;;  %v14193_v30 = vmul.f32 %v13490_v38, %v14159_v29  ;;  %v14214_v44 = vld [vmem:[#allocation12 + $0x1] ss:$0 sm:$0xff] }
 0xa4d   : > { %v7736_v42 = vadd.f32 %v7642_v57, %v7491_v54  ;;  %v6878_v4 = vadd.f32 %v6810_v23, %v6632_v52  ;;  %v7125_v27 = vsel %vm6491_vm11, %v7123_v51, %v7124_v36  ;;  %v7804_v20 = vmul.f32 %v13502_v21, %v14155_v14  ;;  %v14231_v52 = vld [vmem:[#allocation12 + $0x5] ss:$0 sm:$0xff] }
 0xa4e   : > { %v7683_v8 = vrot.slane %v7559_v9, 1  ;;  %v14202_v17 = vmul.f32 %v13502_v21, %v14159_v29  ;;  %v7476_v57 = vmul.f32 %v13494_v10, %v14155_v14  ;;  %v14909_v38 = vrot.slane %v14193_v30, 1  ;;  %v14219_v10 = vld [vmem:[#allocation12] ss:$0 sm:$0xff]  ;;  %v14239_v9 = vld [vmem:[#allocation12 + $0x6] ss:$0 sm:$0xff] }
 0xa4f   : > { %v7981_v45 = vadd.f32 %v7887_v39, %v7736_v42  ;;  %v6948_v25 = vadd.f32 %v6916_v24, %v6878_v4  ;;  %v7370_v56 = vsel %vm6737_vm12, %v7368_v47, %v14910_v48  ;;  %v7928_v7 = vrot.slane %v7804_v20, 2  ;;  %v14235_v47 = vld [vmem:[#allocation12 + $0x4] ss:$0 sm:$0xff]  ;;  %v14246_v20 = vld [vmem:[#allocation12 + $0x9] ss:$0 sm:$0xff] }
 0xa50   : > { %v14212_v0 = vsel %vm2682_vm8, %v13915_v13, 0.0  ;;  %v6436_v21 = vmul.f32 %v14214_v44, %v13757_v41  ;;  %v6353_v63 = vmul.f32 %v14219_v10, %v13452_v12  ;;  %v6682_v33 = vmul.f32 %v14223_v60, %v13757_v41 }
 0xa51   : > { %v8035_v39 = vsel %vm2816_vm6, %v7981_v45, 0.0  ;;  %v7193_v37 = vadd.f32 %v7125_v27, %v6948_v25  ;;  %v7685_v13 = vsel %vm6491_vm11, %v7683_v8, %v14909_v38  ;;  %v14911_v24 = vrot.slane %v14202_v17, 2  ;;  %v14250_v25 = vld [vmem:[#allocation12 + $0xa] ss:$0 sm:$0xff]  ;;  %v14263_v38 = vld [vmem:[#allocation12 + $0x8] ss:$0 sm:$0xff] }
 0xa52   : > { %8036 = vadd.xlane.f32.xlu1 %v8035_v39  ;;  %v6560_v54 = vrot.slane %v6436_v21, 1  ;;  %v6998_v51 = vmul.f32 %v14231_v52, %v13988_v50  ;;  %v6806_v12 = vrot.slane %v6682_v33, 2  ;;  %v6915_v41 = vmul.f32 %v14235_v47, %v13701_v49 }
 0xa53   : > { %v7438_v23 = vadd.f32 %v7370_v56, %v7193_v37  ;;  %v7243_v42 = vmul.f32 %v14239_v9, %v13988_v50  ;;  %v15104_v4 = vrot.slane %v13921_v55, 1  ;;  %v7558_v45 = vmul.f32 %v14246_v20, %v14212_v0 }
 0xa54   : > { %v7121_v8 = vrot.slane %v6998_v51, 1  ;;  %v7803_v56 = vmul.f32 %v14250_v25, %v14212_v0  ;;  %v15105_v37 = vrot.slane %v13927_v59, 2  ;;  %v15106_v51 = vrot.slane %v13945_v31, 1 }
 0xa55   : > { %v6561_v27 = vsel %vm6491_vm11, %v15104_v4, %v6560_v54  ;;  %v7508_v21 = vadd.f32 %v7476_v57, %v7438_v23  ;;  %v7366_v55 = vrot.slane %v7243_v42, 2  ;;  %v7930_v54 = vsel %vm6737_vm12, %v7928_v7, %v14911_v24 }
 0xa56   : > { %v6631_v39 = vadd.f32 %v6561_v27, %v6353_v63  ;;  %v6807_v33 = vsel %vm6737_vm12, %v15105_v37, %v6806_v12  ;;  %v7122_v4 = vsel %vm6491_vm11, %v15106_v51, %v7121_v8  ;;  %v7475_v48 = vmul.f32 %v14263_v38, %v13932_v26 }
 0xa57   : > { %v7681_v57 = vrot.slane %v7558_v45, 1  ;;  %v7753_v63 = vadd.f32 %v7685_v13, %v7508_v21  ;;  %v7926_v59 = vrot.slane %v7803_v56, 2  ;;  %v6416_v12 = vmul.f32 %v14214_v44, %v13810_v2 }
 0xa58   : > { %v6877_v23 = vadd.f32 %v6807_v33, %v6631_v39  ;;  %v15107_v42 = vrot.slane %v13957_v43, 2  ;;  %v6340_v31 = vmul.f32 %v14219_v10, %v13810_v2  ;;  %v14276_v27 = vmul.f32 %v14214_v44, %v13818_v1 }
 0xa59   : > { %v6662_v8 = vmul.f32 %v14223_v60, %v13810_v2  ;;  %v7998_v13 = vadd.f32 %v7930_v54, %v7753_v63  ;;  %v6527_v56 = vrot.slane %v6416_v12, 1  ;;  %v14282_v21 = vmul.f32 %v14223_v60, %v13818_v1 }
 0xa5a   : > { %v7367_v7 = vsel %vm6737_vm12, %v15107_v42, %v7366_v55  ;;  %v6947_v45 = vadd.f32 %v6915_v41, %v6877_v23  ;;  %v14912_v43 = vrot.slane %v14276_v27, 1  ;;  %v6902_v37 = vmul.f32 %v14235_v47, %v15091_v15 }
 0xa5b   : > { %v6773_v39 = vrot.slane %v6662_v8, 2  ;;  %v6978_v33 = vmul.f32 %v14231_v52, %v15091_v15  ;;  %v8086_v55 = vsel %vm2816_vm6, %v7998_v13, 0.0  ;;  %v14918_v2 = vrot.slane %v14282_v21, 2 }
 0xa5c   : > { %v7192_v51 = vadd.f32 %v7122_v4, %v6947_v45  ;;  %v14293_v41 = vmul.f32 %v14231_v52, %v15092_v34  ;;  %8087 = vadd.xlane.f32.xlu0 %v8086_v55  ;;  %v6529_v54 = vsel %vm6491_vm11, %v6527_v56, %v14912_v43  ;;  %v7223_v23 = vmul.f32 %v14239_v9, %v15091_v15  ;;  %v15109_v15 = vld [vmem:[#allocation40_spill] sm:$0xff] }
 0xa5d   : > { %v7088_v63 = vrot.slane %v6978_v33, 1  ;;  %v14302_v12 = vmul.f32 %v14239_v9, %v15092_v34  ;;  %v6618_v42 = vadd.f32 %v6529_v54, %v6340_v31  ;;  %v6775_v8 = vsel %vm6737_vm12, %v6773_v39, %v14918_v2  ;;  %v15111_v54 = vld [vmem:[#allocation39_spill] sm:$0xff] }
 0xa5e   : > { %v7437_v4 = vadd.f32 %v7367_v7, %v7192_v51  ;;  %v14914_v13 = vrot.slane %v14293_v41, 1  ;;  %v15108_v45 = vrot.slane %v13970_v32, 1  ;;  %v7333_v33 = vrot.slane %v7223_v23, 2 }
 0xa5f   : > { %v14913_v55 = vrot.slane %v14302_v12, 2  ;;  %v7538_v24 = vmul.f32 %v14246_v20, %v15109_v15  ;;  %v15110_v7 = vrot.slane %v13979_v40, 2  ;;  %v6864_v51 = vadd.f32 %v6775_v8, %v6618_v42 }
 0xa60   : > { %v7682_v56 = vsel %vm6491_vm11, %v15108_v45, %v7681_v57  ;;  %v7507_v43 = vadd.f32 %v7475_v48, %v7437_v4  ;;  %v14319_v39 = vmul.f32 %v14246_v20, %v15111_v54  ;;  %v7090_v32 = vsel %vm6491_vm11, %v7088_v63, %v14914_v13 }
 0xa61   : > { %v7927_v31 = vsel %vm6737_vm12, %v15110_v7, %v7926_v59  ;;  %v7648_v57 = vrot.slane %v7538_v24, 1  ;;  %v7783_v23 = vmul.f32 %v14250_v25, %v15109_v15  ;;  %v14328_v48 = vmul.f32 %v14250_v25, %v15111_v54 }
 0xa62   : > { %v7752_v40 = vadd.f32 %v7682_v56, %v7507_v43  ;;  %v6934_v4 = vadd.f32 %v6902_v37, %v6864_v51  ;;  %v7462_v59 = vmul.f32 %v14263_v38, %v15109_v15  ;;  %v14915_v42 = vrot.slane %v14319_v39, 1 }
 0xa63   : > { %v7335_v8 = vsel %vm6737_vm12, %v7333_v33, %v14913_v55  ;;  %v6339_v24 = vmul.f32 %v14219_v10, %v13587_v19  ;;  %v6415_v63 = vmul.f32 %v14214_v44, %v13871_v62  ;;  %v6661_v45 = vmul.f32 %v14223_v60, %v13871_v62 }
 0xa64   : > { %v7997_v43 = vadd.f32 %v7927_v31, %v7752_v40  ;;  %v7179_v37 = vadd.f32 %v7090_v32, %v6934_v4  ;;  %v7893_v56 = vrot.slane %v7783_v23, 2  ;;  %v14916_v15 = vrot.slane %v14328_v48, 2 }
 0xa65   : > { %v7650_v7 = vsel %vm6491_vm11, %v7648_v57, %v14915_v42  ;;  %v6525_v51 = vrot.slane %v6415_v63, 1  ;;  %v6771_v33 = vrot.slane %v6661_v45, 2  ;;  %v6977_v19 = vmul.f32 %v14231_v52, %v14096_v53  ;;  %v15114_v63 = vld [vmem:[#allocation44_spill] sm:$0xff] }
 0xa66   : > { %v8083_v55 = vsel %vm2816_vm6, %v7997_v43, 0.0  ;;  %v7424_v13 = vadd.f32 %v7335_v8, %v7179_v37  ;;  %v6901_v62 = vmul.f32 %v14235_v47, %v13818_v1  ;;  %v7222_v31 = vmul.f32 %v14239_v9, %v14096_v53 }
 0xa67   : > { %8084 = vadd.xlane.f32.xlu1 %v8083_v55  ;;  %v15112_v32 = vrot.slane %v14036_v46, 1  ;;  %v15113_v57 = vrot.slane %v14042_v35, 2  ;;  %v7086_v4 = vrot.slane %v6977_v19, 1  ;;  %v7537_v45 = vmul.f32 %v14246_v20, %v15114_v63 }
 0xa68   : > { %v7494_v8 = vadd.f32 %v7462_v59, %v7424_v13  ;;  %v7331_v37 = vrot.slane %v7222_v31, 2  ;;  %v7782_v42 = vmul.f32 %v14250_v25, %v15114_v63  ;;  %v7895_v46 = vsel %vm6737_vm12, %v7893_v56, %v14916_v15 }
 0xa69   : > { %v6526_v23 = vsel %vm6491_vm11, %v15112_v32, %v6525_v51  ;;  %v6772_v40 = vsel %vm6737_vm12, %v15113_v57, %v6771_v33  ;;  %v15115_v55 = vrot.slane %v14053_v61, 1  ;;  %v7461_v51 = vmul.f32 %v14263_v38, %v15092_v34 }
 0xa6a   : > { %v6617_v43 = vadd.f32 %v6526_v23, %v6339_v24  ;;  %v6440_v33 = vmul.f32 %v14214_v44, %v13935_v18  ;;  %v7739_v13 = vadd.f32 %v7650_v7, %v7494_v8  ;;  %v7646_v24 = vrot.slane %v7537_v45, 1 }
 0xa6b   : > { %v7087_v35 = vsel %vm6491_vm11, %v15115_v55, %v7086_v4  ;;  %v6356_v19 = vmul.f32 %v14219_v10, %v13935_v18  ;;  %v15116_v31 = vrot.slane %v14062_v6, 2  ;;  %v14380_v61 = vmul.f32 %v14214_v44, %v13932_v26 }
 0xa6c   : > { %v6863_v59 = vadd.f32 %v6772_v40, %v6617_v43  ;;  %v6567_v32 = vrot.slane %v6440_v33, 1  ;;  %v6686_v23 = vmul.f32 %v14223_v60, %v13935_v18  ;;  %v7984_v57 = vadd.f32 %v7895_v46, %v7739_v13 }
 0xa6d   : > { %v7332_v56 = vsel %vm6737_vm12, %v15116_v31, %v7331_v37  ;;  %v7891_v7 = vrot.slane %v7782_v42, 2  ;;  %v14386_v40 = vmul.f32 %v14223_v60, %v13932_v26  ;;  %v14917_v45 = vrot.slane %v14380_v61, 1 }
 0xa6e   : > { %v6933_v4 = vadd.f32 %v6901_v62, %v6863_v59  ;;  %v6813_v6 = vrot.slane %v6686_v23, 2  ;;  %v6918_v8 = vmul.f32 %v14235_v47, %v14155_v14  ;;  %v7002_v43 = vmul.f32 %v14231_v52, %v14155_v14 }
 0xa6f   : > { %v8044_v37 = vsel %vm2816_vm6, %v7984_v57, 0.0  ;;  %v6814_v18 = vrot.slane %v14386_v40, 2  ;;  %v14397_v42 = vmul.f32 %v14231_v52, %v14159_v29  ;;  %v6569_v62 = vsel %vm6491_vm11, %v6567_v32, %v14917_v45  ;;  %v15117_v57 = vld [vmem:[#allocation43_spill] sm:$0xff] }
 0xa70   : > { %v7178_v55 = vadd.f32 %v7087_v35, %v6933_v4  ;;  %8045 = vadd.xlane.f32.xlu0 %v8044_v37  ;;  %v7128_v46 = vrot.slane %v7002_v43, 1  ;;  %v7247_v33 = vmul.f32 %v14239_v9, %v14155_v14  ;;  %v14406_v13 = vmul.f32 %v14239_v9, %v14159_v29  ;;  %v15119_v14 = vld [vmem:[#allocation34_spill] sm:$0xff] }
 0xa71   : > { %v6634_v59 = vadd.f32 %v6569_v62, %v6356_v19  ;;  %v6815_v31 = vsel %vm6737_vm12, %v6813_v6, %v6814_v18  ;;  %v14920_v23 = vrot.slane %v14397_v42, 1  ;;  %v15118_v4 = vrot.slane %v15117_v57, 1 }
 0xa72   : > { %v7423_v35 = vadd.f32 %v7332_v56, %v7178_v55  ;;  %v7373_v43 = vrot.slane %v7247_v33, 2  ;;  %v14919_v37 = vrot.slane %v14406_v13, 2  ;;  %v7562_v15 = vmul.f32 %v14246_v20, %v15119_v14  ;;  %v15120_v56 = vld [vmem:[#allocation33_spill] sm:$0xff]  ;;  %v15121_v55 = vld [vmem:[#allocation46_spill] sm:$0xff] }
 0xa73   : > { %v7647_v32 = vsel %vm6491_vm11, %v15118_v4, %v7646_v24  ;;  %v6880_v2 = vadd.f32 %v6815_v31, %v6634_v59  ;;  %v14420_v19 = vmul.f32 %v14246_v20, %v15120_v56  ;;  %v15122_v6 = vrot.slane %v15121_v55, 2 }
 0xa74   : > { %v7493_v45 = vadd.f32 %v7461_v51, %v7423_v35  ;;  %v7130_v24 = vsel %vm6491_vm11, %v7128_v46, %v14920_v23  ;;  %v7807_v33 = vmul.f32 %v14250_v25, %v15119_v14  ;;  %v14432_v57 = vmul.f32 %v14250_v25, %v15120_v56 }
 0xa75   : > { %v7892_v62 = vsel %vm6737_vm12, %v15122_v6, %v7891_v7  ;;  %v6950_v35 = vadd.f32 %v6918_v8, %v6880_v2  ;;  %v7375_v59 = vsel %vm6737_vm12, %v7373_v43, %v14919_v37  ;;  %v7478_v7 = vmul.f32 %v14263_v38, %v15119_v14 }
 0xa76   : > { %v7738_v51 = vadd.f32 %v7647_v32, %v7493_v45  ;;  %v7688_v31 = vrot.slane %v7562_v15, 1  ;;  %v7689_v4 = vrot.slane %v14420_v19, 1  ;;  %v14442_v46 = vsel %vm2682_vm8, %v14138_v28, 0.0  ;;  %v8010_v19 = vpop.xlane.xlu1 %8009 }
 0xa77   : > { %v6439_v55 = vmul.f32 %v14214_v44, %v13988_v50  ;;  %v7195_v45 = vadd.f32 %v7130_v24, %v6950_v35  ;;  %v6355_v2 = vmul.f32 %v14219_v10, %v13701_v49  ;;  %v6685_v8 = vmul.f32 %v14223_v60, %v13988_v50 }
 0xa78   : > { %v7983_v6 = vadd.f32 %v7892_v62, %v7738_v51  ;;  %v7933_v32 = vrot.slane %v7807_v33, 2  ;;  %v7934_v15 = vrot.slane %v14432_v57, 2  ;;  %v7001_v14 = vmul.f32 %v14231_v52, %v14212_v0 }
 0xa79   : > { %v6565_v43 = vrot.slane %v6439_v55, 1  ;;  %v7440_v37 = vadd.f32 %v7375_v59, %v7195_v45  ;;  %v6811_v23 = vrot.slane %v6685_v8, 2  ;;  %v7246_v62 = vmul.f32 %v14239_v9, %v14212_v0 }
 0xa7a   : > { %v8041_v28 = vsel %vm2816_vm6, %v7983_v6, 0.0  ;;  %v7690_v49 = vsel %vm6491_vm11, %v7688_v31, %v7689_v4  ;;  %v7126_v24 = vrot.slane %v7001_v14, 1  ;;  %v7561_v33 = vmul.f32 %v14246_v20, %v14442_v46 }
 0xa7b   : > { %8042 = vadd.xlane.f32.xlu1 %v8041_v28  ;;  %v6566_v50 = vsel %vm6491_vm11, %v6563_v11, %v6565_v43  ;;  %v7510_v51 = vadd.f32 %v7478_v7, %v7440_v37  ;;  %v6812_v59 = vsel %vm6737_vm12, %v6809_v16, %v6811_v23  ;;  %v6917_v55 = vmul.f32 %v14235_v47, %v13932_v26 }
 0xa7c   : > { %v6633_v35 = vadd.f32 %v6566_v50, %v6355_v2  ;;  %v7935_v31 = vsel %vm6737_vm12, %v7933_v32, %v7934_v15  ;;  %v7371_v58 = vrot.slane %v7246_v62, 2  ;;  %v7806_v11 = vmul.f32 %v14250_v25, %v14442_v46 }
 0xa7d   : > { %v7755_v6 = vadd.f32 %v7690_v49, %v7510_v51  ;;  %v7127_v37 = vsel %vm6491_vm11, %v7124_v36, %v7126_v24  ;;  %v6418_v3 = vmul.f32 %v14214_v44, %v14096_v53  ;;  %v7686_v16 = vrot.slane %v7561_v33, 1 }
 0xa7e   : > { %v6879_v45 = vadd.f32 %v6812_v59, %v6633_v35  ;;  %v7931_v23 = vrot.slane %v7806_v11, 2  ;;  %v6341_v7 = vmul.f32 %v14219_v10, %v13818_v1  ;;  %v6664_v2 = vmul.f32 %v14223_v60, %v14096_v53 }
 0xa7f   : > { %v8000_v8 = vadd.f32 %v7935_v31, %v7755_v6  ;;  %v6530_v43 = vrot.slane %v6418_v3, 1  ;;  %v6980_v14 = vmul.f32 %v14231_v52, %v15114_v63  ;;  %v15123_v5 = vrot.slane %v14182_v22, 2  ;;  %v15128_v6 = vld [vmem:[#allocation45_spill] sm:$0xff] }
 0xa80   : > { %v6949_v32 = vadd.f32 %v6917_v55, %v6879_v45  ;;  %v7477_v28 = vmul.f32 %v14263_v38, %v14159_v29  ;;  %v6776_v62 = vrot.slane %v6664_v2, 2  ;;  %v7225_v1 = vmul.f32 %v14239_v9, %v15114_v63 }
 0xa81   : > { %v7372_v36 = vsel %vm6737_vm12, %v15123_v5, %v7371_v58  ;;  %v8092_v49 = vsel %vm2816_vm6, %v8000_v8, 0.0  ;;  %v15124_v50 = vrot.slane %v14276_v27, 1  ;;  %v7091_v33 = vrot.slane %v6980_v14, 1 }
 0xa82   : > { %v7194_v53 = vadd.f32 %v7127_v37, %v6949_v32  ;;  %8093 = vadd.xlane.f32.xlu0 %v8092_v49  ;;  %v15125_v22 = vrot.slane %v14282_v21, 2  ;;  %v6903_v59 = vmul.f32 %v14235_v47, %v15092_v34  ;;  %v7336_v55 = vrot.slane %v7225_v1, 2 }
 0xa83   : > { %v6531_v24 = vsel %vm6491_vm11, %v15124_v50, %v6530_v43  ;;  %v15126_v63 = vrot.slane %v14193_v30, 1  ;;  %v15127_v27 = vrot.slane %v14202_v17, 2  ;;  %v7540_v45 = vmul.f32 %v14246_v20, %v15128_v6 }
 0xa84   : > { %v6619_v51 = vadd.f32 %v6531_v24, %v6341_v7  ;;  %v6777_v35 = vsel %vm6737_vm12, %v15125_v22, %v6776_v62  ;;  %v7439_v31 = vadd.f32 %v7372_v36, %v7194_v53  ;;  %v7463_v21 = vmul.f32 %v14263_v38, %v15111_v54  ;;  %v15132_v53 = vld [vmem:[#allocation35_spill] sm:$0xff] }
 0xa85   : > { %v7687_v58 = vsel %vm6491_vm11, %v15126_v63, %v7686_v16  ;;  %v7932_v11 = vsel %vm6737_vm12, %v15127_v27, %v7931_v23  ;;  %v7785_v34 = vmul.f32 %v14250_v25, %v15128_v6  ;;  %v6442_v3 = vmul.f32 %v14214_v44, %v14212_v0 }
 0xa86   : > { %v6865_v37 = vadd.f32 %v6777_v35, %v6619_v51  ;;  %v7509_v30 = vadd.f32 %v7477_v28, %v7439_v31  ;;  %v15129_v16 = vrot.slane %v14293_v41, 1  ;;  %v6357_v23 = vmul.f32 %v14219_v10, %v13932_v26 }
 0xa87   : > { %v6688_v7 = vmul.f32 %v14223_v60, %v14212_v0  ;;  %v15130_v54 = vrot.slane %v14302_v12, 2  ;;  %v6570_v32 = vrot.slane %v6442_v3, 1  ;;  %v7004_v44 = vmul.f32 %v14231_v52, %v14442_v46 }
 0xa88   : > { %v7092_v17 = vsel %vm6491_vm11, %v15129_v16, %v7091_v33  ;;  %v6935_v2 = vadd.f32 %v6903_v59, %v6865_v37  ;;  %v7754_v43 = vadd.f32 %v7687_v58, %v7509_v30  ;;  %v7651_v14 = vrot.slane %v7540_v45, 1  ;;  %v8717_v45 = vld [vmem:[#allocation3] ss:$0 sm:$0xff] }
 0xa89   : > { %v7337_v8 = vsel %vm6737_vm12, %v15130_v54, %v7336_v55  ;;  %v6816_v41 = vrot.slane %v6688_v7, 2  ;;  %v7249_v5 = vmul.f32 %v14239_v9, %v14442_v46  ;;  %v7896_v26 = vrot.slane %v7785_v34, 2 }
 0xa8a   : > { %v7180_v36 = vadd.f32 %v7092_v17, %v6935_v2  ;;  %v15131_v10 = vrot.slane %v14380_v61, 1  ;;  %v7131_v60 = vrot.slane %v7004_v44, 1  ;;  %v7999_v12 = vadd.f32 %v7932_v11, %v7754_v43 }
 0xa8b   : > { %v6817_v62 = vsel %vm6737_vm12, %v6814_v18, %v6816_v41  ;;  %v6919_v52 = vmul.f32 %v14235_v47, %v14159_v29  ;;  %v7376_v49 = vrot.slane %v7249_v5, 2  ;;  %v7564_v9 = vmul.f32 %v14246_v20, %v15132_v53 }
 0xa8c   : > { %v6571_v0 = vsel %vm6491_vm11, %v15131_v10, %v6570_v32  ;;  %v7425_v1 = vadd.f32 %v7337_v8, %v7180_v36  ;;  %v8089_v46 = vsel %vm2816_vm6, %v7999_v12, 0.0  ;;  %v15133_v61 = vrot.slane %v14319_v39, 1 }
 0xa8d   : > { %v6635_v28 = vadd.f32 %v6571_v0, %v6357_v23  ;;  %8090 = vadd.xlane.f32.xlu1 %v8089_v46  ;;  %v15134_v40 = vrot.slane %v14397_v42, 1  ;;  %v7809_v29 = vmul.f32 %v14250_v25, %v15132_v53  ;;  %v9357_v47 = vmov 0  }
 0xa8e   : > { %v7652_v50 = vsel %vm6491_vm11, %v15133_v61, %v7651_v14  ;;  %v7495_v33 = vadd.f32 %v7463_v21, %v7425_v1  ;;  %9045 = vset.pattern.permute.xlu0 %v9357_v47  ;;  %v15135_v20 = vrot.slane %v14328_v48, 2  ;;  %v15136_v35 = vrot.slane %v14406_v13, 2 }
 0xa8f   : > { %v6881_v24 = vadd.f32 %v6817_v62, %v6635_v28  ;;  %v7132_v18 = vsel %vm6491_vm11, %v15134_v40, %v7131_v60  ;;  %v7691_v55 = vrot.slane %v7564_v9, 1  ;;  %v7479_v42 = vmul.f32 %v14263_v38, %v15120_v56  ;;  %v8004_v56 = vpop.xlane.xlu0 %8003 }
 0xa90   : > { %v7897_v51 = vsel %vm6737_vm12, %v15135_v20, %v7896_v26  ;;  %v7740_v39 = vadd.f32 %v7652_v50, %v7495_v33  ;;  %v7377_v59 = vsel %vm6737_vm12, %v15136_v35, %v7376_v49  ;;  %v7936_v58 = vrot.slane %v7809_v29, 2 }
 0xa91   : > { %v6951_v22 = vadd.f32 %v6919_v52, %v6881_v24  ;;  %v7692_v48 = vsel %vm6491_vm11, %v7689_v4, %v7691_v55  ;;  %v8013_v4 = vpop.xlane.xlu1 %8012  ;;  %v8172_v60 = vlaneseq  ;;  %vm8183_vm13 = vcmask 130112  }
 0xa92   : > { %v7985_v63 = vadd.f32 %v7897_v51, %v7740_v39  ;;  %v7937_v13 = vsel %vm6737_vm12, %v7934_v15, %v7936_v58  ;;  %vm8320_vm14 = vcmask 1041409   ;;  %vm8322_vm15 = vcmask 1042434  }
 0xa93   : > { %v7196_v31 = vadd.f32 %v7132_v18, %v6951_v22  ;;  %v8007_v21 = vpop.xlane.xlu0 %8006  ;;  %v8173_v28 = vand.u32 127, %v8172_v60  ;;  %v8175_v52 = vshrl.u32 %v8172_v60, 7  ;;  %vm8324_vm0 = vcmask 1043459  }
 0xa94   : > { %v8047_v27 = vsel %vm2816_vm6, %v7985_v63, 0.0  ;;  %vm8326_vm1 = vcmask 1044484   ;;  %vm8328_vm2 = vcmask 1045509   ;;  %vm8330_vm3 = vcmask 1046534  }
 0xa95   : > { %v7441_v25 = vadd.f32 %v7377_v59, %v7196_v31  ;;  %8048 = vadd.xlane.f32.xlu1 %v8047_v27  ;;  %v8055_v17 = vpop.xlane.xlu1 %8054  ;;  %v8178_v1 = vadd.s32 4294967288, %v8173_v28  ;;  %v14568_v61 = vsub.s32 %v8173_v28, %v8175_v52  ;;  %vm8332_vm4 = vcmask 1047559  }
 0xa96   : > { %vm8343_vm5 = vcmask 130048  }
 0xa97   : > { %v7511_v11 = vadd.f32 %v7479_v42, %v7441_v25  ;;  %v8052_v34 = vpop.xlane.xlu0 %8051  ;;  %v14570_v50 = vsub.s32 %v8178_v1, %v8175_v52 }
 0xa98   : > { %8105 = vperm.xlu0 %9045, %v8717_v45  }
 0xa99   : > { %v7756_v6 = vadd.f32 %v7692_v48, %v7511_v11  ;;  %v8061_v57 = vpop.xlane.xlu1 %8060 }
 0xa9b   : > { %v8001_v37 = vadd.f32 %v7937_v13, %v7756_v6  ;;  %v8058_v3 = vpop.xlane.xlu0 %8057 }
 0xa9d   : > { %v8095_v38 = vsel %vm2816_vm6, %v8001_v37, 0.0  ;;  %v8019_v15 = vpop.xlane.xlu1 %8018 }
 0xa9e   : > { %8096 = vadd.xlane.f32.xlu1 %v8095_v38 }
 0xa9f   : > { %v8016_v30 = vpop.xlane.xlu0 %8015 }
 0xaa1   : > { %v8067_v54 = vpop.xlane.xlu1 %8066 }
 0xaa3   : > { %v8064_v16 = vpop.xlane.xlu0 %8063 }
 0xaa5   : > { %v8025_v32 = vpop.xlane.xlu1 %8024 }
 0xaa7   : > { %v8022_v23 = vpop.xlane.xlu0 %8021 }
 0xaa9   : > { %v8073_v43 = vpop.xlane.xlu1 %8072 }
 0xaab   : > { %v8070_v7 = vpop.xlane.xlu0 %8069 }
 0xaaf   : > { %v8028_v2 = vpop.xlane.xlu0 %8027 }
 0xab3   : > { %v8076_v8 = vpop.xlane.xlu0 %8075 }
 0xab7   : > { %v8034_v44 = vpop.xlane.xlu0 %8033  ;;  %v8031_v41 = vpop.xlane.xlu1 %8030 }
 0xac1   : > { %v8082_v14 = vpop.xlane.xlu0 %8081 }
 0xacb   : > { %v8079_v36 = vpop.xlane.xlu1 %8078 }
 0xad4   : > { %v8040_v5 = vpop.xlane.xlu0 %8039 }
 0xadf   : > { %v8037_v10 = vpop.xlane.xlu1 %8036 }
 0xae9   : > { %v8088_v26 = vpop.xlane.xlu0 %8087 }
 0xaf4   : > { %v8085_v12 = vpop.xlane.xlu1 %8084 }
 0xafd   : > { %v8046_v0 = vpop.xlane.xlu0 %8045 }
 0xb08   : > { %v8043_v49 = vpop.xlane.xlu1 %8042 }
 0xb0f   : > { %v8094_v62 = vpop.xlane.xlu0 %8093 }
 0xb17   : > { %v14564_v53 = vpop.permute.xlu0 %8105 }
 0xb18   : > { %v8108_v9 = vadd.f32 %v14564_v53, %v8004_v56  ;;  %v8109_v46 = vadd.f32 %v14564_v53, %v8007_v21  ;;  %v8110_v24 = vadd.f32 %v14564_v53, %v8010_v19  ;;  %v8111_v33 = vadd.f32 %v14564_v53, %v8013_v4 }
 0xb19   : > { %v8112_v40 = vadd.f32 %v14564_v53, %v8016_v30  ;;  %v8113_v18 = vadd.f32 %v14564_v53, %v8019_v15  ;;  %v8114_v29 = vadd.f32 %v14564_v53, %v8022_v23  ;;  %v8115_v47 = vadd.f32 %v14564_v53, %v8025_v32 }
 0xb1a   : > { %v8116_v20 = vadd.f32 %v14564_v53, %v8028_v2  ;;  %v8117_v51 = vadd.f32 %v14564_v53, %v8031_v41  ;;  %v8091_v22 = vpop.xlane.xlu1 %8090  ;;  %v14581_v39 = vadd.f32 %v14564_v53, %v8034_v44  ;;  %v14584_v35 = vadd.f32 %v14564_v53, %v8037_v10 }
 0xb1b   : > { %v14587_v59 = vadd.f32 %v14564_v53, %v8040_v5  ;;  %v14590_v55 = vadd.f32 %v14564_v53, %v8043_v49  ;;  %v14593_v31 = vadd.f32 %v14564_v53, %v8046_v0  ;;  %v8124_v42 = vadd.f32 %v14564_v53, %v8052_v34 }
 0xb1c   : > { %v8125_v63 = vadd.f32 %v14564_v53, %v8055_v17  ;;  %v8126_v58 = vadd.f32 %v14564_v53, %v8058_v3  ;;  %v8127_v25 = vadd.f32 %v14564_v53, %v8061_v57  ;;  %v8128_v27 = vadd.f32 %v14564_v53, %v8064_v16 }
 0xb1d   : > { %v8129_v48 = vadd.f32 %v14564_v53, %v8067_v54  ;;  %v14602_v11 = vadd.f32 %v14564_v53, %v8070_v7  ;;  %v14605_v13 = vadd.f32 %v14564_v53, %v8073_v43  ;;  %v14608_v6 = vadd.f32 %v14564_v53, %v8076_v8 }
 0xb1e   : > { %v8177_v45 = vrot.slane %v8108_v9, %v14568_v61  ;;  %v8182_v37 = vrot.slane %v8109_v46, %v14570_v50  ;;  %v8188_v38 = vrot.slane %v8110_v24, %v14568_v61  ;;  %v8192_v56 = vrot.slane %v8111_v33, %v14570_v50 }
 0xb1f   : > { %v8197_v21 = vrot.slane %v8112_v40, %v14568_v61  ;;  %v8201_v34 = vrot.slane %v8113_v18, %v14570_v50  ;;  %v8133_v3 = vadd.f32 %v14564_v53, %v8079_v36  ;;  %v8134_v19 = vadd.f32 %v14564_v53, %v8082_v14 }
 0xb20   : > { %v8206_v30 = vrot.slane %v8114_v29, %v14568_v61  ;;  %v8210_v4 = vrot.slane %v8115_v47, %v14570_v50  ;;  %v8135_v17 = vadd.f32 %v14564_v53, %v8085_v12  ;;  %v8136_v23 = vadd.f32 %v14564_v53, %v8088_v26 }
 0xb21   : > { %v8215_v57 = vrot.slane %v8116_v20, %v14568_v61  ;;  %v8219_v7 = vrot.slane %v8117_v51, %v14570_v50  ;;  %v8137_v2 = vadd.f32 %v14564_v53, %v8091_v22  ;;  %v8138_v54 = vadd.f32 %v14564_v53, %v8094_v62 }
 0xb22   : > { %v8049_v16 = vpop.xlane.xlu1 %8048  ;;  %v8184_v8 = vsel %vm8183_vm13, %v8182_v37, %v8177_v45  ;;  %v8193_v32 = vsel %vm8183_vm13, %v8192_v56, %v8188_v38  ;;  %v8202_v44 = vsel %vm8183_vm13, %v8201_v34, %v8197_v21  ;;  %v8211_v43 = vsel %vm8183_vm13, %v8210_v4, %v8206_v30 }
 0xb23   : > { %v8123_v15 = vadd.f32 %v14564_v53, %v8049_v16  ;;  %v8224_v14 = vrot.slane %v14581_v39, %v14568_v61  ;;  %v8228_v41 = vrot.slane %v14584_v35, %v14570_v50  ;;  %v8251_v5 = vrot.slane %v8124_v42, %v14568_v61 }
 0xb24   : > { %v8255_v36 = vrot.slane %v8125_v63, %v14570_v50  ;;  %v8260_v26 = vrot.slane %v8126_v58, %v14568_v61  ;;  %v8220_v10 = vsel %vm8183_vm13, %v8219_v7, %v8215_v57  ;;  %v8233_v0 = vrot.slane %v14587_v59, %v14568_v61 }
 0xb25   : > { %v8264_v60 = vrot.slane %v8127_v25, %v14570_v50  ;;  %v8269_v12 = vrot.slane %v8128_v27, %v14568_v61  ;;  %v8237_v28 = vrot.slane %v14590_v55, %v14570_v50  ;;  %v8242_v62 = vrot.slane %v14593_v31, %v14568_v61 }
 0xb26   : > { %v8246_v52 = vrot.slane %v8123_v15, %v14570_v50  ;;  %v8273_v1 = vrot.slane %v8129_v48, %v14570_v50  ;;  %v8256_v49 = vsel %vm8183_vm13, %v8255_v36, %v8251_v5  ;;  %v8278_v46 = vrot.slane %v14602_v11, %v14568_v61 }
 0xb27   : > { %v8265_v9 = vsel %vm8183_vm13, %v8264_v60, %v8260_v26  ;;  %v8282_v24 = vrot.slane %v14605_v13, %v14570_v50  ;;  %v8229_v40 = vsel %vm8183_vm13, %v8228_v41, %v8224_v14  ;;  %v8287_v29 = vrot.slane %v14608_v6, %v14568_v61 }
 0xb28   : > { %v8274_v18 = vsel %vm8183_vm13, %v8273_v1, %v8269_v12  ;;  %v8291_v47 = vrot.slane %v8133_v3, %v14570_v50  ;;  %v8296_v20 = vrot.slane %v8134_v19, %v14568_v61  ;;  %v8300_v51 = vrot.slane %v8135_v17, %v14570_v50 }
 0xb29   : > { %v8305_v22 = vrot.slane %v8136_v23, %v14568_v61  ;;  %v8321_v39 = vsel %vm8320_vm14, %v8193_v32, %v8184_v8  ;;  %v8309_v35 = vrot.slane %v8137_v2, %v14570_v50  ;;  %v8334_v55 = vsel %vm8320_vm14, %v8265_v9, %v8256_v49 }
 0xb2a   : > { %v8323_v59 = vsel %vm8322_vm15, %v8202_v44, %v8321_v39  ;;  %v8283_v42 = vsel %vm8183_vm13, %v8282_v24, %v8278_v46  ;;  %v8314_v63 = vrot.slane %v8138_v54, %v14568_v61  ;;  %v8335_v25 = vsel %vm8322_vm15, %v8274_v18, %v8334_v55 }
 0xb2b   : > { %v8097_v33 = vpop.xlane.xlu1 %8096  ;;  %v8325_v58 = vsel %vm8324_vm0, %v8211_v43, %v8323_v59  ;;  %v8292_v27 = vsel %vm8183_vm13, %v8291_v47, %v8287_v29  ;;  %v8336_v11 = vsel %vm8324_vm0, %v8283_v42, %v8335_v25  ;;  %v8301_v6 = vsel %vm8183_vm13, %v8300_v51, %v8296_v20 }
 0xb2c   : > { %v8139_v31 = vadd.f32 %v14564_v53, %v8097_v33  ;;  %v8327_v48 = vsel %vm8326_vm1, %v8220_v10, %v8325_v58  ;;  %v8238_v53 = vsel %vm8183_vm13, %v8237_v28, %v8233_v0  ;;  %v8337_v45 = vsel %vm8326_vm1, %v8292_v27, %v8336_v11 }
 0xb2d   : > { %v8329_v61 = vsel %vm8328_vm2, %v8229_v40, %v8327_v48  ;;  %v8247_v37 = vsel %vm8183_vm13, %v8246_v52, %v8242_v62  ;;  %v8310_v38 = vsel %vm8183_vm13, %v8309_v35, %v8305_v22  ;;  %v8338_v21 = vsel %vm8328_vm2, %v8301_v6, %v8337_v45 }
 0xb2e   : > { %v8318_v13 = vrot.slane %v8139_v31, %v14570_v50  ;;  %v8331_v56 = vsel %vm8330_vm3, %v8238_v53, %v8329_v61  ;;  %v8339_v50 = vsel %vm8330_vm3, %v8310_v38, %v8338_v21 }
 0xb2f   : > { %v8333_v34 = vsel %vm8332_vm4, %v8247_v37, %v8331_v56 }
 0xb30   : > { %v8319_v3 = vsel %vm8183_vm13, %v8318_v13, %v8314_v63  ;;  %8344 = vst.msk [vmem:[%s9741_s0] sm:$0xff] %vm8343_vm5, %v8333_v34 }
 0xb31   : > { %v8340_v19 = vsel %vm8332_vm4, %v8319_v3, %v8339_v50 }
 0xb32   : > { %8345 = vst.msk [vmem:[%s9741_s0 + $0x8] sm:$0xff] %vm8343_vm5, %v8340_v19 }
 0xb33 PF: > { %s15137_s26 = sld [smem:[#allocation21_spill]]  ;;  %s15138_s15 = sld [smem:[#allocation51_spill]] }
 0xb34   : > { %s8360_s19 = sshll.u32 %s9741_s0, 4  ;;  %s8347_s7 = scalar_lea.sflag [#allocation6], %s9708_s6  ;;  %s14699_s19 = int_to_ptr.vmem [resolvable:$true] %s8360_s19 }
 0xb35   : > { %s9208_s23 = scalar_lea.vmem %s14699_s19, 256  ;;  %s9358_s17 = smov [#allocation13]  }
 0xb36   : > { %p9209_p10 = scmp.ne.s32.totalorder %s14699_s19, %s9208_s23  ;;  %s9212_s16 = sshll.u32 %s9358_s17, 4  ;;  %s9213_s16 = int_to_ptr.vmem [resolvable:$false] %s9212_s16 }
 0xb37   : > { %s9214_s13 = scalar_lea.vmem %s9213_s16, 512  ;;  %p9215_p2 = scmp.lt.s32.totalorder %s14699_s19, %s9213_s16 }
 0xb38   : > { %p9210_p0 = pnand %p9209_p10, %p9581_p8  ;;  %p9216_p3 = scmp.lt.s32.totalorder %s9214_s13, %s9208_s23 }
 0xb39   : > { %s8724_s18 = sshll.u32 %s15137_s26, 8 }
 0xb3a   : > { %s14696_s20 = scalar_lea.hbm %s15138_s15, %s8724_s18  ;;  %p9211_p9 = pneg %p9210_p0 }
 0xb3b   : > { %p9217_p7 = por %p9216_p3, %p9215_p2 }
 0xb3d   : > { %p9218_p13 = pnand %p9217_p7, %p9211_p9 }
 0xb3f   : > { %9221 = shalt.err (!%p9218_p13)
}
 0xb40   : > { %s9222_s0 = scalar_lea.hbm %s14696_s20, 256  ;;  %s9226_s18 = scalar_lea.hbm %s15138_s15, 512 }
 0xb41   : > { %p9223_p12 = scmp.ne.s32.totalorder %s14696_s20, %s9222_s0  ;;  %p9227_p5 = scmp.lt.u32.totalorder %s14696_s20, %s15138_s15 }
 0xb42   : > { %p9228_p11 = scmp.lt.u32.totalorder %s9226_s18, %s9222_s0  ;;  %p9230_p10 = scmp.lt.u32.totalorder %s9222_s0, %s14696_s20 }
 0xb43   : > { %p9224_p4 = pnand %p9223_p12, %p9581_p8 }
 0xb44   : > { %p9229_p1 = por %p9228_p11, %p9227_p5 }
 0xb45   : > { %p9225_p6 = pneg %p9224_p4 }
 0xb46   : > { %p9231_p0 = por %p9230_p10, %p9229_p1 }
 0xb48   : > { %p9232_p9 = pnand %p9231_p0, %p9225_p6 }
 0xb4a   : > { %9235 = shalt.err (!%p9232_p9)
}
 0xb4b   : > { %s9359_s23 = smov 128   ;;  %s9360_s17 = smov 8  }
 0xb4c   : > { %8768 = dma.vmem_to_hbm [thread:$0]  (%p9581_p8), %s14699_s19, 256, %s14696_s20, %s8347_s7, %s9359_s23, %s9359_s23, %s9360_s17  }
 0xb4d PF: > { %s15139_s16 = sld [smem:[#allocation19_spill]]  ;;  %s15140_s13 = sld [smem:[#allocation23_spill]] }
 0xb4e   : > { %p8798_p2 = scmp.ge.s32.totalorder %s9342_s12, 2 }
 0xb53   : > { %s8375_s14 = sand.u32 1, %s15139_s16   ;;  %p15141_p3 = scmp.ne.s32.totalorder %s15140_s13, 0 }
 0xb54   : > { %s8376_s0 = scalar_lea.sflag [#allocation6], %s8375_s14 }
 0xb55   : > { %p8788_p7 = pnand %p8798_p2, %p15141_p3 }
 0xb57   : > { %9297 = dma.done.wait (!%p8788_p7), %s8376_s0, 256  }
 0xb58   : > { %9299 = vsyncadd (!%p8788_p7), %s8376_s0, 4294967040  ;;  %s29_s12 = sadd.s32 1, %s9342_s12   ;;  %s15142_s21 = smov %s9665_s29 }
 0xb59   : > { %p26_p13 = scmp.ge.s32.totalorder %s29_s12, 10   ;;  %s15143_s20 = smov %s15155_s9 }
 0xb5a   : > { %s15144_s26 = smov %s9306_s27  ;;  %s15145_s27 = smov %s9310_s28 }
 0xb5b   : > { %s15146_s28 = smov %s9651_s24  ;;  %s15147_s29 = smov %s9318_s30 }
 0xb5c   : > { %s15148_s30 = smov %s9322_s8  ;;  %s15149_s8 = smov %s15142_s21 }
 0xb5d   : > { %s15150_s6 = smov %s9334_s10  ;;  %s15151_s9 = smov %s9338_s11 }
 0xb5e   : > { %s15152_s10 = smov %s15143_s20  ;;  %s15153_s11 = smov %s15159_s4 }
 0xb5f   :  { %28 = sbr.rel (!%p26_p13) target bundleno = 16 (0x10), region = 135 }
 0xb66   :  { %8381 = vsyncpa [#allocation5], 1 }
 0xb67   :  { %8383 = vsyncpa [#allocation5 + $0x1], 1 }
 0xb68   :  { %8384 = vsyncpa [#allocation8], 1 }
 0xb69   :  { %8385 = vsyncpa [#allocation11], 1 }
 0xb6a   :  { %8387 = vsyncpa [#allocation11 + $0x1], 1 }
 0xb6b   :  { %8388 = vsyncpa [#allocation6], 1 }
 0xb6c   :  { %8390 = vsyncpa [#allocation6 + $0x1], 1 }

</bundles_post_ra>
